<compile_context>
chip_gen: v7x
topology: tpu7x:2x2x1
jax: 0.10.0
libtpu: 0.0.40
codegen_flags: <defaults>
</compile_context>

<pallas_src>
import math
import functools

import jax
import jax.numpy as jnp
from jax import lax
from jax.experimental import pallas as pl
from jax.experimental.pallas import tpu as pltpu


def _decoder_block_kernel(
    out_ref, enc_ref,
    # masked self-attention params
    wq1, bq1, wk1, bk1, wv1, bv1, wo1, bo1, g1, be1,
    # cross multi-head attention params (Q from decoder state, K/V from encoder)
    wq2, bq2, wk2, bk2, wv2, bv2, wo2, bo2, g2, be2,
    # position-wise feed-forward params
    wf1, bf1, wf2, bf2, g3, be3,
    y_ref,
    *, num_heads, head_dim,
):
    f32 = jnp.float32
    bf16 = jnp.bfloat16

    x = out_ref[0].astype(f32)      # (S, D) decoder input for this batch element
    enc = enc_ref[0].astype(f32)    # (S, D) encoder output for this batch element
    S, D = x.shape
    scale = 1.0 / math.sqrt(float(head_dim))

    # Causal additive bias, built ONCE (hoisted out of all attention/head work).
    row = lax.broadcasted_iota(jnp.int32, (S, S), 0)
    col = lax.broadcasted_iota(jnp.int32, (S, S), 1)
    causal_bias = jnp.where(col > row, f32(-1e30), f32(0.0))   # mask = triu(ones, 1)

    def layernorm(v, g_ref, b_ref):
        mu = jnp.mean(v, axis=-1, keepdims=True)
        var = jnp.mean((v - mu) * (v - mu), axis=-1, keepdims=True)
        return (v - mu) * lax.rsqrt(var + 1e-5) * g_ref[0] + b_ref[0]

    def split_heads(m):
        # (S, D) f32 -> (H, S, head_dim): lane slices stacked along a new
        # leading (batch) axis so the attention matmuls run as one batched
        # MXU contraction instead of H separate tiny matmuls.
        return jnp.stack(
            [m[:, h * head_dim:(h + 1) * head_dim] for h in range(num_heads)],
            axis=0)

    def mha(q_in, kv_in, wq, bq, wk, bk, wv, bv, wo, bo, bias):
        q_bf = q_in.astype(bf16)
        kv_bf = kv_in.astype(bf16)
        q = jnp.dot(q_bf, wq[...], preferred_element_type=f32) + bq[0]
        k = jnp.dot(kv_bf, wk[...], preferred_element_type=f32) + bk[0]
        v = jnp.dot(kv_bf, wv[...], preferred_element_type=f32) + bv[0]

        qh = split_heads(q * scale).astype(bf16)   # (H, S, dh), scale folded into Q
        kh = split_heads(k).astype(bf16)           # (H, S, dh)
        vh = split_heads(v).astype(bf16)           # (H, S, dh)

        # All heads in one batched contraction (leading batch axis).
        s = jnp.einsum('hqd,hkd->hqk', qh, kh, preferred_element_type=f32)  # (H,S,S)
        if bias is not None:
            s = s + bias                                      # (S,S) broadcasts over H
        s = s - jnp.max(s, axis=-1, keepdims=True)            # stable softmax, f32
        p = jnp.exp(s)
        denom = jnp.sum(p, axis=-1, keepdims=True)
        p = p * pl.reciprocal(denom, approx=True)             # EUP slot, off the VALU path

        ctx = jnp.einsum('hqk,hkd->hqd', p.astype(bf16), vh,
                         preferred_element_type=f32)          # (H, S, dh)
        concat = jnp.concatenate(
            [ctx[h] for h in range(num_heads)], axis=-1)      # (S, D)
        return jnp.dot(concat.astype(bf16), wo[...],
                       preferred_element_type=f32) + bo[0]

    # 1) masked self-attention + add & norm
    sa = mha(x, x, wq1, bq1, wk1, bk1, wv1, bv1, wo1, bo1, causal_bias)
    h1 = layernorm(x + sa, g1, be1)

    # 2) cross attention (K, V from encoder, Q from decoder state) + add & norm
    ca = mha(h1, enc, wq2, bq2, wk2, bk2, wv2, bv2, wo2, bo2, None)
    h2 = layernorm(h1 + ca, g2, be2)

    # 3) position-wise feed-forward + add & norm
    hid = jnp.maximum(
        jnp.dot(h2.astype(bf16), wf1[...], preferred_element_type=f32) + bf1[0], 0.0)
    ff = jnp.dot(hid.astype(bf16), wf2[...], preferred_element_type=f32) + bf2[0]
    h3 = layernorm(h2 + ff, g3, be3)

    y_ref[0] = h3.astype(y_ref.dtype)


PARAM_ORDER = [
    "wq1", "bq1", "wk1", "bk1", "wv1", "bv1", "wo1", "bo1", "g1", "be1",
    "wq2", "bq2", "wk2", "bk2", "wv2", "bv2", "wo2", "bo2", "g2", "be2",
    "wf1", "bf1", "wf2", "bf2", "g3", "be3",
]


def init_params(key, d_model, d_ff):
    """Deterministic synthetic parameter set (not a checkpoint load).

    Weights are stored in bf16 (MXU operand dtype); biases / LayerNorm params
    stay f32 (they are added to f32 accumulations).
    """
    ks = jax.random.split(key, 16)
    std = 0.02

    def lin(k, din, dout):
        w = (jax.random.normal(k, (din, dout), jnp.float32) * std).astype(jnp.bfloat16)
        b = jnp.zeros((1, dout), jnp.float32)
        return w, b

    p = {}
    # masked self-attention
    p["wq1"], p["bq1"] = lin(ks[0], d_model, d_model)
    p["wk1"], p["bk1"] = lin(ks[1], d_model, d_model)
    p["wv1"], p["bv1"] = lin(ks[2], d_model, d_model)
    p["wo1"], p["bo1"] = lin(ks[3], d_model, d_model)
    p["g1"] = jnp.ones((1, d_model), jnp.float32)
    p["be1"] = jnp.zeros((1, d_model), jnp.float32)
    # cross attention
    p["wq2"], p["bq2"] = lin(ks[4], d_model, d_model)
    p["wk2"], p["bk2"] = lin(ks[5], d_model, d_model)
    p["wv2"], p["bv2"] = lin(ks[6], d_model, d_model)
    p["wo2"], p["bo2"] = lin(ks[7], d_model, d_model)
    p["g2"] = jnp.ones((1, d_model), jnp.float32)
    p["be2"] = jnp.zeros((1, d_model), jnp.float32)
    # feed forward
    p["wf1"], p["bf1"] = lin(ks[8], d_model, d_ff)
    p["wf2"], p["bf2"] = lin(ks[9], d_ff, d_model)
    p["g3"] = jnp.ones((1, d_model), jnp.float32)
    p["be3"] = jnp.zeros((1, d_model), jnp.float32)
    return p


def decoder_block(outputs, encoded_inputs, params, *, num_heads,
                  single_buffer_weights=True):
    B, S, D = outputs.shape
    assert encoded_inputs.shape == outputs.shape
    assert D % num_heads == 0
    head_dim = D // num_heads

    param_list = [params[name] for name in PARAM_ORDER]

    def act_spec():
        # Lane-dense when D is a multiple of 128 (demo uses D=128).
        return pl.BlockSpec((1, S, D), lambda b: (b, 0, 0))

    def weight_spec(shape):
        zeros = (0,) * len(shape)
        index_map = lambda b, _z=zeros: _z
        if single_buffer_weights:
            # Grid-invariant operands never need a second in-flight buffer.
            return pl.BlockSpec(shape, index_map, pipeline_mode=pl.Buffered(1))
        return pl.BlockSpec(shape, index_map)

    in_specs = [act_spec(), act_spec()] + [weight_spec(p.shape) for p in param_list]
    out_specs = pl.BlockSpec((1, S, D), lambda b: (b, 0, 0))

    kernel = functools.partial(
        _decoder_block_kernel, num_heads=num_heads, head_dim=head_dim)

    return pl.pallas_call(
        kernel,
        out_shape=jax.ShapeDtypeStruct((B, S, D), jnp.float32),
        grid_spec=pltpu.PrefetchScalarGridSpec(
            num_scalar_prefetch=0,
            grid=(B,),
            in_specs=in_specs,
            out_specs=out_specs,
        ),
        compiler_params=pltpu.CompilerParams(
            dimension_semantics=("parallel",),
            vmem_limit_bytes=48 * 1024 * 1024,
        ),
    )(outputs, encoded_inputs, *param_list)


if __name__ == "__main__":
    B, S, D = 2, 8, 128          # batch, seq, token_vec_dim (D lane-dense: 128)
    NUM_HEADS = 4
    D_FF = 4 * D

    key = jax.random.PRNGKey(0)
    k_out, k_enc, k_par = jax.random.split(key, 3)
    outputs = jax.random.normal(k_out, (B, S, D), jnp.float32)
    encoded_inputs = jax.random.normal(k_enc, (B, S, D), jnp.float32)
    params = init_params(k_par, D, D_FF)

    try:
        y = decoder_block(outputs, encoded_inputs, params, num_heads=NUM_HEADS,
                          single_buffer_weights=True)
        jax.block_until_ready(y)
    except Exception:
        # Fallback only if this JAX build rejects pipeline_mode=pl.Buffered(1)
        # on the TPU pipeline; semantics are identical (just double-buffered).
        y = decoder_block(outputs, encoded_inputs, params, num_heads=NUM_HEADS,
                          single_buffer_weights=False)
        jax.block_until_ready(y)

    assert y.shape == (B, S, D)
    assert jnp.all(jnp.isfinite(y))
    print("KERNEL_OK")
</pallas_src>

<mosaic_0001>
module attributes {stable_mosaic.version = 11 : i64} {
  func.func @_decoder_block_kernel(%arg0: i32, %arg1: memref<1x8x128xf32, #tpu.memory_space<vmem>>, %arg2: memref<1x8x128xf32, #tpu.memory_space<vmem>>, %arg3: memref<128x128xbf16, #tpu.memory_space<vmem>>, %arg4: memref<1x128xf32, #tpu.memory_space<vmem>>, %arg5: memref<128x128xbf16, #tpu.memory_space<vmem>>, %arg6: memref<1x128xf32, #tpu.memory_space<vmem>>, %arg7: memref<128x128xbf16, #tpu.memory_space<vmem>>, %arg8: memref<1x128xf32, #tpu.memory_space<vmem>>, %arg9: memref<128x128xbf16, #tpu.memory_space<vmem>>, %arg10: memref<1x128xf32, #tpu.memory_space<vmem>>, %arg11: memref<1x128xf32, #tpu.memory_space<vmem>>, %arg12: memref<1x128xf32, #tpu.memory_space<vmem>>, %arg13: memref<128x128xbf16, #tpu.memory_space<vmem>>, %arg14: memref<1x128xf32, #tpu.memory_space<vmem>>, %arg15: memref<128x128xbf16, #tpu.memory_space<vmem>>, %arg16: memref<1x128xf32, #tpu.memory_space<vmem>>, %arg17: memref<128x128xbf16, #tpu.memory_space<vmem>>, %arg18: memref<1x128xf32, #tpu.memory_space<vmem>>, %arg19: memref<128x128xbf16, #tpu.memory_space<vmem>>, %arg20: memref<1x128xf32, #tpu.memory_space<vmem>>, %arg21: memref<1x128xf32, #tpu.memory_space<vmem>>, %arg22: memref<1x128xf32, #tpu.memory_space<vmem>>, %arg23: memref<128x512xbf16, #tpu.memory_space<vmem>>, %arg24: memref<1x512xf32, #tpu.memory_space<vmem>>, %arg25: memref<512x128xbf16, #tpu.memory_space<vmem>>, %arg26: memref<1x128xf32, #tpu.memory_space<vmem>>, %arg27: memref<1x128xf32, #tpu.memory_space<vmem>>, %arg28: memref<1x128xf32, #tpu.memory_space<vmem>>, %arg29: memref<1x8x128xf32, #tpu.memory_space<vmem>>) attributes {dimension_semantics = [#tpu.dimension_semantics<parallel>], iteration_bounds = array<i64: 2>, scalar_prefetch = 0 : i64, scratch_operands = 0 : i64, tpu.core_type = #tpu.core_type<tc>, window_params = [{transform_indices = @transform_0, window_bounds = array<i64: 1, 8, 128>}, {transform_indices = @transform_1, window_bounds = array<i64: 1, 8, 128>}, {pipeline_mode = #tpu.pipeline_mode<synchronous>, transform_indices = @transform_2, window_bounds = array<i64: 128, 128>}, {pipeline_mode = #tpu.pipeline_mode<synchronous>, transform_indices = @transform_3, window_bounds = array<i64: 1, 128>}, {pipeline_mode = #tpu.pipeline_mode<synchronous>, transform_indices = @transform_4, window_bounds = array<i64: 128, 128>}, {pipeline_mode = #tpu.pipeline_mode<synchronous>, transform_indices = @transform_5, window_bounds = array<i64: 1, 128>}, {pipeline_mode = #tpu.pipeline_mode<synchronous>, transform_indices = @transform_6, window_bounds = array<i64: 128, 128>}, {pipeline_mode = #tpu.pipeline_mode<synchronous>, transform_indices = @transform_7, window_bounds = array<i64: 1, 128>}, {pipeline_mode = #tpu.pipeline_mode<synchronous>, transform_indices = @transform_8, window_bounds = array<i64: 128, 128>}, {pipeline_mode = #tpu.pipeline_mode<synchronous>, transform_indices = @transform_9, window_bounds = array<i64: 1, 128>}, {pipeline_mode = #tpu.pipeline_mode<synchronous>, transform_indices = @transform_10, window_bounds = array<i64: 1, 128>}, {pipeline_mode = #tpu.pipeline_mode<synchronous>, transform_indices = @transform_11, window_bounds = array<i64: 1, 128>}, {pipeline_mode = #tpu.pipeline_mode<synchronous>, transform_indices = @transform_12, window_bounds = array<i64: 128, 128>}, {pipeline_mode = #tpu.pipeline_mode<synchronous>, transform_indices = @transform_13, window_bounds = array<i64: 1, 128>}, {pipeline_mode = #tpu.pipeline_mode<synchronous>, transform_indices = @transform_14, window_bounds = array<i64: 128, 128>}, {pipeline_mode = #tpu.pipeline_mode<synchronous>, transform_indices = @transform_15, window_bounds = array<i64: 1, 128>}, {pipeline_mode = #tpu.pipeline_mode<synchronous>, transform_indices = @transform_16, window_bounds = array<i64: 128, 128>}, {pipeline_mode = #tpu.pipeline_mode<synchronous>, transform_indices = @transform_17, window_bounds = array<i64: 1, 128>}, {pipeline_mode = #tpu.pipeline_mode<synchronous>, transform_indices = @transform_18, window_bounds = array<i64: 128, 128>}, {pipeline_mode = #tpu.pipeline_mode<synchronous>, transform_indices = @transform_19, window_bounds = array<i64: 1, 128>}, {pipeline_mode = #tpu.pipeline_mode<synchronous>, transform_indices = @transform_20, window_bounds = array<i64: 1, 128>}, {pipeline_mode = #tpu.pipeline_mode<synchronous>, transform_indices = @transform_21, window_bounds = array<i64: 1, 128>}, {pipeline_mode = #tpu.pipeline_mode<synchronous>, transform_indices = @transform_22, window_bounds = array<i64: 128, 512>}, {pipeline_mode = #tpu.pipeline_mode<synchronous>, transform_indices = @transform_23, window_bounds = array<i64: 1, 512>}, {pipeline_mode = #tpu.pipeline_mode<synchronous>, transform_indices = @transform_24, window_bounds = array<i64: 512, 128>}, {pipeline_mode = #tpu.pipeline_mode<synchronous>, transform_indices = @transform_25, window_bounds = array<i64: 1, 128>}, {pipeline_mode = #tpu.pipeline_mode<synchronous>, transform_indices = @transform_26, window_bounds = array<i64: 1, 128>}, {pipeline_mode = #tpu.pipeline_mode<synchronous>, transform_indices = @transform_27, window_bounds = array<i64: 1, 128>}, {transform_indices = @transform_28, window_bounds = array<i64: 1, 8, 128>}]} {
    %c0 = arith.constant 0 : index
    %c0_0 = arith.constant 0 : index
    %c0_1 = arith.constant 0 : index
    %0 = vector.load %arg1[%c0, %c0_0, %c0_1] : memref<1x8x128xf32, #tpu.memory_space<vmem>>, vector<1x8x128xf32>
    %1 = vector.shape_cast %0 : vector<1x8x128xf32> to vector<8x128xf32>
    %c0_2 = arith.constant 0 : index
    %c0_3 = arith.constant 0 : index
    %c0_4 = arith.constant 0 : index
    %2 = vector.load %arg2[%c0_2, %c0_3, %c0_4] : memref<1x8x128xf32, #tpu.memory_space<vmem>>, vector<1x8x128xf32>
    %3 = vector.shape_cast %2 : vector<1x8x128xf32> to vector<8x128xf32>
    %4 = tpu.iota {dimensions = array<i32: 0>} : vector<8x8xi32>
    %5 = tpu.iota {dimensions = array<i32: 1>} : vector<8x8xi32>
    %6 = arith.cmpi sgt, %5, %4 : vector<8x8xi32>
    %cst = arith.constant -1.000000e+30 : f32
    %cst_5 = arith.constant 0.000000e+00 : f32
    %7 = vector.broadcast %cst : f32 to vector<8x8xf32>
    %8 = vector.broadcast %cst_5 : f32 to vector<8x8xf32>
    %9 = arith.select %6, %7, %8 : vector<8x8xi1>, vector<8x8xf32>
    %10 = arith.truncf %1 : vector<8x128xf32> to vector<8x128xbf16>
    %11 = arith.truncf %1 : vector<8x128xf32> to vector<8x128xbf16>
    %c0_6 = arith.constant 0 : index
    %c0_7 = arith.constant 0 : index
    %12 = vector.load %arg3[%c0_6, %c0_7] : memref<128x128xbf16, #tpu.memory_space<vmem>>, vector<128x128xbf16>
    %cst_8 = arith.constant dense<0.000000e+00> : vector<8x128xf32>
    %13 = tpu.matmul %10, %12, %cst_8 {dimension_numbers = #tpu.dot_dimension_numbers<[1], [0], [0], [1], [0, 0, 1, 1], [], []>} : vector<8x128xbf16>, vector<128x128xbf16>, vector<8x128xf32> -> vector<8x128xf32>
    %c0_9 = arith.constant 0 : index
    %c0_10 = arith.constant 0 : index
    %14 = vector.load %arg4[%c0_9, %c0_10] : memref<1x128xf32, #tpu.memory_space<vmem>>, vector<1x128xf32>
    %15 = vector.shape_cast %14 : vector<1x128xf32> to vector<128xf32>
    %16 = vector.shape_cast %15 : vector<128xf32> to vector<1x128xf32>
    %17 = vector.broadcast %16 : vector<1x128xf32> to vector<8x128xf32>
    %18 = arith.addf %13, %17 : vector<8x128xf32>
    %c0_11 = arith.constant 0 : index
    %c0_12 = arith.constant 0 : index
    %19 = vector.load %arg5[%c0_11, %c0_12] : memref<128x128xbf16, #tpu.memory_space<vmem>>, vector<128x128xbf16>
    %cst_13 = arith.constant dense<0.000000e+00> : vector<8x128xf32>
    %20 = tpu.matmul %11, %19, %cst_13 {dimension_numbers = #tpu.dot_dimension_numbers<[1], [0], [0], [1], [0, 0, 1, 1], [], []>} : vector<8x128xbf16>, vector<128x128xbf16>, vector<8x128xf32> -> vector<8x128xf32>
    %c0_14 = arith.constant 0 : index
    %c0_15 = arith.constant 0 : index
    %21 = vector.load %arg6[%c0_14, %c0_15] : memref<1x128xf32, #tpu.memory_space<vmem>>, vector<1x128xf32>
    %22 = vector.shape_cast %21 : vector<1x128xf32> to vector<128xf32>
    %23 = vector.shape_cast %22 : vector<128xf32> to vector<1x128xf32>
    %24 = vector.broadcast %23 : vector<1x128xf32> to vector<8x128xf32>
    %25 = arith.addf %20, %24 : vector<8x128xf32>
    %c0_16 = arith.constant 0 : index
    %c0_17 = arith.constant 0 : index
    %26 = vector.load %arg7[%c0_16, %c0_17] : memref<128x128xbf16, #tpu.memory_space<vmem>>, vector<128x128xbf16>
    %cst_18 = arith.constant dense<0.000000e+00> : vector<8x128xf32>
    %27 = tpu.matmul %11, %26, %cst_18 {dimension_numbers = #tpu.dot_dimension_numbers<[1], [0], [0], [1], [0, 0, 1, 1], [], []>} : vector<8x128xbf16>, vector<128x128xbf16>, vector<8x128xf32> -> vector<8x128xf32>
    %c0_19 = arith.constant 0 : index
    %c0_20 = arith.constant 0 : index
    %28 = vector.load %arg8[%c0_19, %c0_20] : memref<1x128xf32, #tpu.memory_space<vmem>>, vector<1x128xf32>
    %29 = vector.shape_cast %28 : vector<1x128xf32> to vector<128xf32>
    %30 = vector.shape_cast %29 : vector<128xf32> to vector<1x128xf32>
    %31 = vector.broadcast %30 : vector<1x128xf32> to vector<8x128xf32>
    %32 = arith.addf %27, %31 : vector<8x128xf32>
    %cst_21 = arith.constant 0.176776692 : f32
    %33 = vector.broadcast %cst_21 : f32 to vector<8x128xf32>
    %34 = arith.mulf %18, %33 : vector<8x128xf32>
    %35 = vector.extract_strided_slice %34 {offsets = [0, 0], sizes = [8, 32], strides = [1, 1]} : vector<8x128xf32> to vector<8x32xf32>
    %36 = vector.extract_strided_slice %34 {offsets = [0, 32], sizes = [8, 32], strides = [1, 1]} : vector<8x128xf32> to vector<8x32xf32>
    %37 = vector.extract_strided_slice %34 {offsets = [0, 64], sizes = [8, 32], strides = [1, 1]} : vector<8x128xf32> to vector<8x32xf32>
    %38 = vector.extract_strided_slice %34 {offsets = [0, 96], sizes = [8, 32], strides = [1, 1]} : vector<8x128xf32> to vector<8x32xf32>
    %39 = vector.shape_cast %35 : vector<8x32xf32> to vector<1x8x32xf32>
    %40 = vector.shape_cast %36 : vector<8x32xf32> to vector<1x8x32xf32>
    %41 = vector.shape_cast %37 : vector<8x32xf32> to vector<1x8x32xf32>
    %42 = vector.shape_cast %38 : vector<8x32xf32> to vector<1x8x32xf32>
    %43 = tpu.concatenate %39, %40, %41, %42 in 0 : vector<1x8x32xf32>, vector<1x8x32xf32>, vector<1x8x32xf32>, vector<1x8x32xf32> -> vector<4x8x32xf32>
    %44 = arith.truncf %43 : vector<4x8x32xf32> to vector<4x8x32xbf16>
    %45 = vector.extract_strided_slice %25 {offsets = [0, 0], sizes = [8, 32], strides = [1, 1]} : vector<8x128xf32> to vector<8x32xf32>
    %46 = vector.extract_strided_slice %25 {offsets = [0, 32], sizes = [8, 32], strides = [1, 1]} : vector<8x128xf32> to vector<8x32xf32>
    %47 = vector.extract_strided_slice %25 {offsets = [0, 64], sizes = [8, 32], strides = [1, 1]} : vector<8x128xf32> to vector<8x32xf32>
    %48 = vector.extract_strided_slice %25 {offsets = [0, 96], sizes = [8, 32], strides = [1, 1]} : vector<8x128xf32> to vector<8x32xf32>
    %49 = vector.shape_cast %45 : vector<8x32xf32> to vector<1x8x32xf32>
    %50 = vector.shape_cast %46 : vector<8x32xf32> to vector<1x8x32xf32>
    %51 = vector.shape_cast %47 : vector<8x32xf32> to vector<1x8x32xf32>
    %52 = vector.shape_cast %48 : vector<8x32xf32> to vector<1x8x32xf32>
    %53 = tpu.concatenate %49, %50, %51, %52 in 0 : vector<1x8x32xf32>, vector<1x8x32xf32>, vector<1x8x32xf32>, vector<1x8x32xf32> -> vector<4x8x32xf32>
    %54 = arith.truncf %53 : vector<4x8x32xf32> to vector<4x8x32xbf16>
    %55 = vector.extract_strided_slice %32 {offsets = [0, 0], sizes = [8, 32], strides = [1, 1]} : vector<8x128xf32> to vector<8x32xf32>
    %56 = vector.extract_strided_slice %32 {offsets = [0, 32], sizes = [8, 32], strides = [1, 1]} : vector<8x128xf32> to vector<8x32xf32>
    %57 = vector.extract_strided_slice %32 {offsets = [0, 64], sizes = [8, 32], strides = [1, 1]} : vector<8x128xf32> to vector<8x32xf32>
    %58 = vector.extract_strided_slice %32 {offsets = [0, 96], sizes = [8, 32], strides = [1, 1]} : vector<8x128xf32> to vector<8x32xf32>
    %59 = vector.shape_cast %55 : vector<8x32xf32> to vector<1x8x32xf32>
    %60 = vector.shape_cast %56 : vector<8x32xf32> to vector<1x8x32xf32>
    %61 = vector.shape_cast %57 : vector<8x32xf32> to vector<1x8x32xf32>
    %62 = vector.shape_cast %58 : vector<8x32xf32> to vector<1x8x32xf32>
    %63 = tpu.concatenate %59, %60, %61, %62 in 0 : vector<1x8x32xf32>, vector<1x8x32xf32>, vector<1x8x32xf32>, vector<1x8x32xf32> -> vector<4x8x32xf32>
    %64 = arith.truncf %63 : vector<4x8x32xf32> to vector<4x8x32xbf16>
    "tpu.trace_start"() <{level = 10 : i32, message = "hqd,hkd->hqk"}> : () -> ()
    %cst_22 = arith.constant dense<0.000000e+00> : vector<4x8x8xf32>
    %65 = tpu.matmul %44, %54, %cst_22 {dimension_numbers = #tpu.dot_dimension_numbers<[2], [2], [1], [1], [0, 0, 0, 1, 1, 1], [0], [0]>} : vector<4x8x32xbf16>, vector<4x8x32xbf16>, vector<4x8x8xf32> -> vector<4x8x8xf32>
    "tpu.trace_stop"() : () -> ()
    %66 = vector.shape_cast %9 : vector<8x8xf32> to vector<1x8x8xf32>
    %67 = vector.broadcast %66 : vector<1x8x8xf32> to vector<4x8x8xf32>
    %68 = arith.addf %65, %67 : vector<4x8x8xf32>
    %cst_23 = arith.constant dense<0xFF800000> : vector<4x8xf32>
    %69 = vector.multi_reduction <maximumf>, %68, %cst_23 [2] : vector<4x8x8xf32> to vector<4x8xf32>
    %70 = vector.shape_cast %69 : vector<4x8xf32> to vector<4x8x1xf32>
    %71 = vector.broadcast %70 : vector<4x8x1xf32> to vector<4x8x8xf32>
    %72 = arith.subf %68, %71 : vector<4x8x8xf32>
    %73 = math.exp %72 : vector<4x8x8xf32>
    %cst_24 = arith.constant dense<0.000000e+00> : vector<4x8xf32>
    %74 = vector.multi_reduction <add>, %73, %cst_24 [2] : vector<4x8x8xf32> to vector<4x8xf32>
    %75 = vector.shape_cast %74 : vector<4x8xf32> to vector<4x8x1xf32>
    %76 = tpu.reciprocal %75 {approx = true} : vector<4x8x1xf32> -> vector<4x8x1xf32>
    %77 = vector.broadcast %76 : vector<4x8x1xf32> to vector<4x8x8xf32>
    %78 = arith.mulf %73, %77 : vector<4x8x8xf32>
    %79 = arith.truncf %78 : vector<4x8x8xf32> to vector<4x8x8xbf16>
    "tpu.trace_start"() <{level = 10 : i32, message = "hqk,hkd->hqd"}> : () -> ()
    %cst_25 = arith.constant dense<0.000000e+00> : vector<4x8x32xf32>
    %80 = tpu.matmul %79, %64, %cst_25 {dimension_numbers = #tpu.dot_dimension_numbers<[2], [1], [1], [2], [0, 0, 0, 1, 1, 2], [0], [0]>} : vector<4x8x8xbf16>, vector<4x8x32xbf16>, vector<4x8x32xf32> -> vector<4x8x32xf32>
    "tpu.trace_stop"() : () -> ()
    %81 = vector.extract_strided_slice %80 {offsets = [0, 0, 0], sizes = [1, 8, 32], strides = [1, 1, 1]} : vector<4x8x32xf32> to vector<1x8x32xf32>
    %82 = vector.shape_cast %81 : vector<1x8x32xf32> to vector<8x32xf32>
    %83 = vector.extract_strided_slice %80 {offsets = [1, 0, 0], sizes = [1, 8, 32], strides = [1, 1, 1]} : vector<4x8x32xf32> to vector<1x8x32xf32>
    %84 = vector.shape_cast %83 : vector<1x8x32xf32> to vector<8x32xf32>
    %85 = vector.extract_strided_slice %80 {offsets = [2, 0, 0], sizes = [1, 8, 32], strides = [1, 1, 1]} : vector<4x8x32xf32> to vector<1x8x32xf32>
    %86 = vector.shape_cast %85 : vector<1x8x32xf32> to vector<8x32xf32>
    %87 = vector.extract_strided_slice %80 {offsets = [3, 0, 0], sizes = [1, 8, 32], strides = [1, 1, 1]} : vector<4x8x32xf32> to vector<1x8x32xf32>
    %88 = vector.shape_cast %87 : vector<1x8x32xf32> to vector<8x32xf32>
    %89 = tpu.concatenate %82, %84, %86, %88 in 1 : vector<8x32xf32>, vector<8x32xf32>, vector<8x32xf32>, vector<8x32xf32> -> vector<8x128xf32>
    %90 = arith.truncf %89 : vector<8x128xf32> to vector<8x128xbf16>
    %c0_26 = arith.constant 0 : index
    %c0_27 = arith.constant 0 : index
    %91 = vector.load %arg9[%c0_26, %c0_27] : memref<128x128xbf16, #tpu.memory_space<vmem>>, vector<128x128xbf16>
    %cst_28 = arith.constant dense<0.000000e+00> : vector<8x128xf32>
    %92 = tpu.matmul %90, %91, %cst_28 {dimension_numbers = #tpu.dot_dimension_numbers<[1], [0], [0], [1], [0, 0, 1, 1], [], []>} : vector<8x128xbf16>, vector<128x128xbf16>, vector<8x128xf32> -> vector<8x128xf32>
    %c0_29 = arith.constant 0 : index
    %c0_30 = arith.constant 0 : index
    %93 = vector.load %arg10[%c0_29, %c0_30] : memref<1x128xf32, #tpu.memory_space<vmem>>, vector<1x128xf32>
    %94 = vector.shape_cast %93 : vector<1x128xf32> to vector<128xf32>
    %95 = vector.shape_cast %94 : vector<128xf32> to vector<1x128xf32>
    %96 = vector.broadcast %95 : vector<1x128xf32> to vector<8x128xf32>
    %97 = arith.addf %92, %96 : vector<8x128xf32>
    %98 = arith.addf %1, %97 : vector<8x128xf32>
    %cst_31 = arith.constant dense<0.000000e+00> : vector<8xf32>
    %99 = vector.multi_reduction <add>, %98, %cst_31 [1] : vector<8x128xf32> to vector<8xf32>
    %100 = vector.shape_cast %99 : vector<8xf32> to vector<8x1xf32>
    %cst_32 = arith.constant 1.280000e+02 : f32
    %101 = vector.broadcast %cst_32 : f32 to vector<8x1xf32>
    %102 = arith.divf %100, %101 : vector<8x1xf32>
    %103 = vector.broadcast %102 : vector<8x1xf32> to vector<8x128xf32>
    %104 = arith.subf %98, %103 : vector<8x128xf32>
    %105 = vector.broadcast %102 : vector<8x1xf32> to vector<8x128xf32>
    %106 = arith.subf %98, %105 : vector<8x128xf32>
    %107 = arith.mulf %104, %106 : vector<8x128xf32>
    %cst_33 = arith.constant dense<0.000000e+00> : vector<8xf32>
    %108 = vector.multi_reduction <add>, %107, %cst_33 [1] : vector<8x128xf32> to vector<8xf32>
    %109 = vector.shape_cast %108 : vector<8xf32> to vector<8x1xf32>
    %cst_34 = arith.constant 1.280000e+02 : f32
    %110 = vector.broadcast %cst_34 : f32 to vector<8x1xf32>
    %111 = arith.divf %109, %110 : vector<8x1xf32>
    %112 = vector.broadcast %102 : vector<8x1xf32> to vector<8x128xf32>
    %113 = arith.subf %98, %112 : vector<8x128xf32>
    %cst_35 = arith.constant 9.99999974E-6 : f32
    %114 = vector.broadcast %cst_35 : f32 to vector<8x1xf32>
    %115 = arith.addf %111, %114 : vector<8x1xf32>
    %116 = math.rsqrt %115 : vector<8x1xf32>
    %117 = vector.broadcast %116 : vector<8x1xf32> to vector<8x128xf32>
    %118 = arith.mulf %113, %117 : vector<8x128xf32>
    %c0_36 = arith.constant 0 : index
    %c0_37 = arith.constant 0 : index
    %119 = vector.load %arg11[%c0_36, %c0_37] : memref<1x128xf32, #tpu.memory_space<vmem>>, vector<1x128xf32>
    %120 = vector.shape_cast %119 : vector<1x128xf32> to vector<128xf32>
    %121 = vector.shape_cast %120 : vector<128xf32> to vector<1x128xf32>
    %122 = vector.broadcast %121 : vector<1x128xf32> to vector<8x128xf32>
    %123 = arith.mulf %118, %122 : vector<8x128xf32>
    %c0_38 = arith.constant 0 : index
    %c0_39 = arith.constant 0 : index
    %124 = vector.load %arg12[%c0_38, %c0_39] : memref<1x128xf32, #tpu.memory_space<vmem>>, vector<1x128xf32>
    %125 = vector.shape_cast %124 : vector<1x128xf32> to vector<128xf32>
    %126 = vector.shape_cast %125 : vector<128xf32> to vector<1x128xf32>
    %127 = vector.broadcast %126 : vector<1x128xf32> to vector<8x128xf32>
    %128 = arith.addf %123, %127 : vector<8x128xf32>
    %129 = arith.truncf %128 : vector<8x128xf32> to vector<8x128xbf16>
    %130 = arith.truncf %3 : vector<8x128xf32> to vector<8x128xbf16>
    %c0_40 = arith.constant 0 : index
    %c0_41 = arith.constant 0 : index
    %131 = vector.load %arg13[%c0_40, %c0_41] : memref<128x128xbf16, #tpu.memory_space<vmem>>, vector<128x128xbf16>
    %cst_42 = arith.constant dense<0.000000e+00> : vector<8x128xf32>
    %132 = tpu.matmul %129, %131, %cst_42 {dimension_numbers = #tpu.dot_dimension_numbers<[1], [0], [0], [1], [0, 0, 1, 1], [], []>} : vector<8x128xbf16>, vector<128x128xbf16>, vector<8x128xf32> -> vector<8x128xf32>
    %c0_43 = arith.constant 0 : index
    %c0_44 = arith.constant 0 : index
    %133 = vector.load %arg14[%c0_43, %c0_44] : memref<1x128xf32, #tpu.memory_space<vmem>>, vector<1x128xf32>
    %134 = vector.shape_cast %133 : vector<1x128xf32> to vector<128xf32>
    %135 = vector.shape_cast %134 : vector<128xf32> to vector<1x128xf32>
    %136 = vector.broadcast %135 : vector<1x128xf32> to vector<8x128xf32>
    %137 = arith.addf %132, %136 : vector<8x128xf32>
    %c0_45 = arith.constant 0 : index
    %c0_46 = arith.constant 0 : index
    %138 = vector.load %arg15[%c0_45, %c0_46] : memref<128x128xbf16, #tpu.memory_space<vmem>>, vector<128x128xbf16>
    %cst_47 = arith.constant dense<0.000000e+00> : vector<8x128xf32>
    %139 = tpu.matmul %130, %138, %cst_47 {dimension_numbers = #tpu.dot_dimension_numbers<[1], [0], [0], [1], [0, 0, 1, 1], [], []>} : vector<8x128xbf16>, vector<128x128xbf16>, vector<8x128xf32> -> vector<8x128xf32>
    %c0_48 = arith.constant 0 : index
    %c0_49 = arith.constant 0 : index
    %140 = vector.load %arg16[%c0_48, %c0_49] : memref<1x128xf32, #tpu.memory_space<vmem>>, vector<1x128xf32>
    %141 = vector.shape_cast %140 : vector<1x128xf32> to vector<128xf32>
    %142 = vector.shape_cast %141 : vector<128xf32> to vector<1x128xf32>
    %143 = vector.broadcast %142 : vector<1x128xf32> to vector<8x128xf32>
    %144 = arith.addf %139, %143 : vector<8x128xf32>
    %c0_50 = arith.constant 0 : index
    %c0_51 = arith.constant 0 : index
    %145 = vector.load %arg17[%c0_50, %c0_51] : memref<128x128xbf16, #tpu.memory_space<vmem>>, vector<128x128xbf16>
    %cst_52 = arith.constant dense<0.000000e+00> : vector<8x128xf32>
    %146 = tpu.matmul %130, %145, %cst_52 {dimension_numbers = #tpu.dot_dimension_numbers<[1], [0], [0], [1], [0, 0, 1, 1], [], []>} : vector<8x128xbf16>, vector<128x128xbf16>, vector<8x128xf32> -> vector<8x128xf32>
    %c0_53 = arith.constant 0 : index
    %c0_54 = arith.constant 0 : index
    %147 = vector.load %arg18[%c0_53, %c0_54] : memref<1x128xf32, #tpu.memory_space<vmem>>, vector<1x128xf32>
    %148 = vector.shape_cast %147 : vector<1x128xf32> to vector<128xf32>
    %149 = vector.shape_cast %148 : vector<128xf32> to vector<1x128xf32>
    %150 = vector.broadcast %149 : vector<1x128xf32> to vector<8x128xf32>
    %151 = arith.addf %146, %150 : vector<8x128xf32>
    %cst_55 = arith.constant 0.176776692 : f32
    %152 = vector.broadcast %cst_55 : f32 to vector<8x128xf32>
    %153 = arith.mulf %137, %152 : vector<8x128xf32>
    %154 = vector.extract_strided_slice %153 {offsets = [0, 0], sizes = [8, 32], strides = [1, 1]} : vector<8x128xf32> to vector<8x32xf32>
    %155 = vector.extract_strided_slice %153 {offsets = [0, 32], sizes = [8, 32], strides = [1, 1]} : vector<8x128xf32> to vector<8x32xf32>
    %156 = vector.extract_strided_slice %153 {offsets = [0, 64], sizes = [8, 32], strides = [1, 1]} : vector<8x128xf32> to vector<8x32xf32>
    %157 = vector.extract_strided_slice %153 {offsets = [0, 96], sizes = [8, 32], strides = [1, 1]} : vector<8x128xf32> to vector<8x32xf32>
    %158 = vector.shape_cast %154 : vector<8x32xf32> to vector<1x8x32xf32>
    %159 = vector.shape_cast %155 : vector<8x32xf32> to vector<1x8x32xf32>
    %160 = vector.shape_cast %156 : vector<8x32xf32> to vector<1x8x32xf32>
    %161 = vector.shape_cast %157 : vector<8x32xf32> to vector<1x8x32xf32>
    %162 = tpu.concatenate %158, %159, %160, %161 in 0 : vector<1x8x32xf32>, vector<1x8x32xf32>, vector<1x8x32xf32>, vector<1x8x32xf32> -> vector<4x8x32xf32>
    %163 = arith.truncf %162 : vector<4x8x32xf32> to vector<4x8x32xbf16>
    %164 = vector.extract_strided_slice %144 {offsets = [0, 0], sizes = [8, 32], strides = [1, 1]} : vector<8x128xf32> to vector<8x32xf32>
    %165 = vector.extract_strided_slice %144 {offsets = [0, 32], sizes = [8, 32], strides = [1, 1]} : vector<8x128xf32> to vector<8x32xf32>
    %166 = vector.extract_strided_slice %144 {offsets = [0, 64], sizes = [8, 32], strides = [1, 1]} : vector<8x128xf32> to vector<8x32xf32>
    %167 = vector.extract_strided_slice %144 {offsets = [0, 96], sizes = [8, 32], strides = [1, 1]} : vector<8x128xf32> to vector<8x32xf32>
    %168 = vector.shape_cast %164 : vector<8x32xf32> to vector<1x8x32xf32>
    %169 = vector.shape_cast %165 : vector<8x32xf32> to vector<1x8x32xf32>
    %170 = vector.shape_cast %166 : vector<8x32xf32> to vector<1x8x32xf32>
    %171 = vector.shape_cast %167 : vector<8x32xf32> to vector<1x8x32xf32>
    %172 = tpu.concatenate %168, %169, %170, %171 in 0 : vector<1x8x32xf32>, vector<1x8x32xf32>, vector<1x8x32xf32>, vector<1x8x32xf32> -> vector<4x8x32xf32>
    %173 = arith.truncf %172 : vector<4x8x32xf32> to vector<4x8x32xbf16>
    %174 = vector.extract_strided_slice %151 {offsets = [0, 0], sizes = [8, 32], strides = [1, 1]} : vector<8x128xf32> to vector<8x32xf32>
    %175 = vector.extract_strided_slice %151 {offsets = [0, 32], sizes = [8, 32], strides = [1, 1]} : vector<8x128xf32> to vector<8x32xf32>
    %176 = vector.extract_strided_slice %151 {offsets = [0, 64], sizes = [8, 32], strides = [1, 1]} : vector<8x128xf32> to vector<8x32xf32>
    %177 = vector.extract_strided_slice %151 {offsets = [0, 96], sizes = [8, 32], strides = [1, 1]} : vector<8x128xf32> to vector<8x32xf32>
    %178 = vector.shape_cast %174 : vector<8x32xf32> to vector<1x8x32xf32>
    %179 = vector.shape_cast %175 : vector<8x32xf32> to vector<1x8x32xf32>
    %180 = vector.shape_cast %176 : vector<8x32xf32> to vector<1x8x32xf32>
    %181 = vector.shape_cast %177 : vector<8x32xf32> to vector<1x8x32xf32>
    %182 = tpu.concatenate %178, %179, %180, %181 in 0 : vector<1x8x32xf32>, vector<1x8x32xf32>, vector<1x8x32xf32>, vector<1x8x32xf32> -> vector<4x8x32xf32>
    %183 = arith.truncf %182 : vector<4x8x32xf32> to vector<4x8x32xbf16>
    "tpu.trace_start"() <{level = 10 : i32, message = "hqd,hkd->hqk"}> : () -> ()
    %cst_56 = arith.constant dense<0.000000e+00> : vector<4x8x8xf32>
    %184 = tpu.matmul %163, %173, %cst_56 {dimension_numbers = #tpu.dot_dimension_numbers<[2], [2], [1], [1], [0, 0, 0, 1, 1, 1], [0], [0]>} : vector<4x8x32xbf16>, vector<4x8x32xbf16>, vector<4x8x8xf32> -> vector<4x8x8xf32>
    "tpu.trace_stop"() : () -> ()
    %cst_57 = arith.constant dense<0xFF800000> : vector<4x8xf32>
    %185 = vector.multi_reduction <maximumf>, %184, %cst_57 [2] : vector<4x8x8xf32> to vector<4x8xf32>
    %186 = vector.shape_cast %185 : vector<4x8xf32> to vector<4x8x1xf32>
    %187 = vector.broadcast %186 : vector<4x8x1xf32> to vector<4x8x8xf32>
    %188 = arith.subf %184, %187 : vector<4x8x8xf32>
    %189 = math.exp %188 : vector<4x8x8xf32>
    %cst_58 = arith.constant dense<0.000000e+00> : vector<4x8xf32>
    %190 = vector.multi_reduction <add>, %189, %cst_58 [2] : vector<4x8x8xf32> to vector<4x8xf32>
    %191 = vector.shape_cast %190 : vector<4x8xf32> to vector<4x8x1xf32>
    %192 = tpu.reciprocal %191 {approx = true} : vector<4x8x1xf32> -> vector<4x8x1xf32>
    %193 = vector.broadcast %192 : vector<4x8x1xf32> to vector<4x8x8xf32>
    %194 = arith.mulf %189, %193 : vector<4x8x8xf32>
    %195 = arith.truncf %194 : vector<4x8x8xf32> to vector<4x8x8xbf16>
    "tpu.trace_start"() <{level = 10 : i32, message = "hqk,hkd->hqd"}> : () -> ()
    %cst_59 = arith.constant dense<0.000000e+00> : vector<4x8x32xf32>
    %196 = tpu.matmul %195, %183, %cst_59 {dimension_numbers = #tpu.dot_dimension_numbers<[2], [1], [1], [2], [0, 0, 0, 1, 1, 2], [0], [0]>} : vector<4x8x8xbf16>, vector<4x8x32xbf16>, vector<4x8x32xf32> -> vector<4x8x32xf32>
    "tpu.trace_stop"() : () -> ()
    %197 = vector.extract_strided_slice %196 {offsets = [0, 0, 0], sizes = [1, 8, 32], strides = [1, 1, 1]} : vector<4x8x32xf32> to vector<1x8x32xf32>
    %198 = vector.shape_cast %197 : vector<1x8x32xf32> to vector<8x32xf32>
    %199 = vector.extract_strided_slice %196 {offsets = [1, 0, 0], sizes = [1, 8, 32], strides = [1, 1, 1]} : vector<4x8x32xf32> to vector<1x8x32xf32>
    %200 = vector.shape_cast %199 : vector<1x8x32xf32> to vector<8x32xf32>
    %201 = vector.extract_strided_slice %196 {offsets = [2, 0, 0], sizes = [1, 8, 32], strides = [1, 1, 1]} : vector<4x8x32xf32> to vector<1x8x32xf32>
    %202 = vector.shape_cast %201 : vector<1x8x32xf32> to vector<8x32xf32>
    %203 = vector.extract_strided_slice %196 {offsets = [3, 0, 0], sizes = [1, 8, 32], strides = [1, 1, 1]} : vector<4x8x32xf32> to vector<1x8x32xf32>
    %204 = vector.shape_cast %203 : vector<1x8x32xf32> to vector<8x32xf32>
    %205 = tpu.concatenate %198, %200, %202, %204 in 1 : vector<8x32xf32>, vector<8x32xf32>, vector<8x32xf32>, vector<8x32xf32> -> vector<8x128xf32>
    %206 = arith.truncf %205 : vector<8x128xf32> to vector<8x128xbf16>
    %c0_60 = arith.constant 0 : index
    %c0_61 = arith.constant 0 : index
    %207 = vector.load %arg19[%c0_60, %c0_61] : memref<128x128xbf16, #tpu.memory_space<vmem>>, vector<128x128xbf16>
    %cst_62 = arith.constant dense<0.000000e+00> : vector<8x128xf32>
    %208 = tpu.matmul %206, %207, %cst_62 {dimension_numbers = #tpu.dot_dimension_numbers<[1], [0], [0], [1], [0, 0, 1, 1], [], []>} : vector<8x128xbf16>, vector<128x128xbf16>, vector<8x128xf32> -> vector<8x128xf32>
    %c0_63 = arith.constant 0 : index
    %c0_64 = arith.constant 0 : index
    %209 = vector.load %arg20[%c0_63, %c0_64] : memref<1x128xf32, #tpu.memory_space<vmem>>, vector<1x128xf32>
    %210 = vector.shape_cast %209 : vector<1x128xf32> to vector<128xf32>
    %211 = vector.shape_cast %210 : vector<128xf32> to vector<1x128xf32>
    %212 = vector.broadcast %211 : vector<1x128xf32> to vector<8x128xf32>
    %213 = arith.addf %208, %212 : vector<8x128xf32>
    %214 = arith.addf %128, %213 : vector<8x128xf32>
    %cst_65 = arith.constant dense<0.000000e+00> : vector<8xf32>
    %215 = vector.multi_reduction <add>, %214, %cst_65 [1] : vector<8x128xf32> to vector<8xf32>
    %216 = vector.shape_cast %215 : vector<8xf32> to vector<8x1xf32>
    %cst_66 = arith.constant 1.280000e+02 : f32
    %217 = vector.broadcast %cst_66 : f32 to vector<8x1xf32>
    %218 = arith.divf %216, %217 : vector<8x1xf32>
    %219 = vector.broadcast %218 : vector<8x1xf32> to vector<8x128xf32>
    %220 = arith.subf %214, %219 : vector<8x128xf32>
    %221 = vector.broadcast %218 : vector<8x1xf32> to vector<8x128xf32>
    %222 = arith.subf %214, %221 : vector<8x128xf32>
    %223 = arith.mulf %220, %222 : vector<8x128xf32>
    %cst_67 = arith.constant dense<0.000000e+00> : vector<8xf32>
    %224 = vector.multi_reduction <add>, %223, %cst_67 [1] : vector<8x128xf32> to vector<8xf32>
    %225 = vector.shape_cast %224 : vector<8xf32> to vector<8x1xf32>
    %cst_68 = arith.constant 1.280000e+02 : f32
    %226 = vector.broadcast %cst_68 : f32 to vector<8x1xf32>
    %227 = arith.divf %225, %226 : vector<8x1xf32>
    %228 = vector.broadcast %218 : vector<8x1xf32> to vector<8x128xf32>
    %229 = arith.subf %214, %228 : vector<8x128xf32>
    %cst_69 = arith.constant 9.99999974E-6 : f32
    %230 = vector.broadcast %cst_69 : f32 to vector<8x1xf32>
    %231 = arith.addf %227, %230 : vector<8x1xf32>
    %232 = math.rsqrt %231 : vector<8x1xf32>
    %233 = vector.broadcast %232 : vector<8x1xf32> to vector<8x128xf32>
    %234 = arith.mulf %229, %233 : vector<8x128xf32>
    %c0_70 = arith.constant 0 : index
    %c0_71 = arith.constant 0 : index
    %235 = vector.load %arg21[%c0_70, %c0_71] : memref<1x128xf32, #tpu.memory_space<vmem>>, vector<1x128xf32>
    %236 = vector.shape_cast %235 : vector<1x128xf32> to vector<128xf32>
    %237 = vector.shape_cast %236 : vector<128xf32> to vector<1x128xf32>
    %238 = vector.broadcast %237 : vector<1x128xf32> to vector<8x128xf32>
    %239 = arith.mulf %234, %238 : vector<8x128xf32>
    %c0_72 = arith.constant 0 : index
    %c0_73 = arith.constant 0 : index
    %240 = vector.load %arg22[%c0_72, %c0_73] : memref<1x128xf32, #tpu.memory_space<vmem>>, vector<1x128xf32>
    %241 = vector.shape_cast %240 : vector<1x128xf32> to vector<128xf32>
    %242 = vector.shape_cast %241 : vector<128xf32> to vector<1x128xf32>
    %243 = vector.broadcast %242 : vector<1x128xf32> to vector<8x128xf32>
    %244 = arith.addf %239, %243 : vector<8x128xf32>
    %245 = arith.truncf %244 : vector<8x128xf32> to vector<8x128xbf16>
    %c0_74 = arith.constant 0 : index
    %c0_75 = arith.constant 0 : index
    %246 = vector.load %arg23[%c0_74, %c0_75] : memref<128x512xbf16, #tpu.memory_space<vmem>>, vector<128x512xbf16>
    %cst_76 = arith.constant dense<0.000000e+00> : vector<8x512xf32>
    %247 = tpu.matmul %245, %246, %cst_76 {dimension_numbers = #tpu.dot_dimension_numbers<[1], [0], [0], [1], [0, 0, 1, 1], [], []>} : vector<8x128xbf16>, vector<128x512xbf16>, vector<8x512xf32> -> vector<8x512xf32>
    %c0_77 = arith.constant 0 : index
    %c0_78 = arith.constant 0 : index
    %248 = vector.load %arg24[%c0_77, %c0_78] : memref<1x512xf32, #tpu.memory_space<vmem>>, vector<1x512xf32>
    %249 = vector.shape_cast %248 : vector<1x512xf32> to vector<512xf32>
    %250 = vector.shape_cast %249 : vector<512xf32> to vector<1x512xf32>
    %251 = vector.broadcast %250 : vector<1x512xf32> to vector<8x512xf32>
    %252 = arith.addf %247, %251 : vector<8x512xf32>
    %cst_79 = arith.constant 0.000000e+00 : f32
    %253 = vector.broadcast %cst_79 : f32 to vector<8x512xf32>
    %254 = arith.maximumf %252, %253 : vector<8x512xf32>
    %255 = arith.truncf %254 : vector<8x512xf32> to vector<8x512xbf16>
    %c0_80 = arith.constant 0 : index
    %c0_81 = arith.constant 0 : index
    %256 = vector.load %arg25[%c0_80, %c0_81] : memref<512x128xbf16, #tpu.memory_space<vmem>>, vector<512x128xbf16>
    %cst_82 = arith.constant dense<0.000000e+00> : vector<8x128xf32>
    %257 = tpu.matmul %255, %256, %cst_82 {dimension_numbers = #tpu.dot_dimension_numbers<[1], [0], [0], [1], [0, 0, 1, 1], [], []>} : vector<8x512xbf16>, vector<512x128xbf16>, vector<8x128xf32> -> vector<8x128xf32>
    %c0_83 = arith.constant 0 : index
    %c0_84 = arith.constant 0 : index
    %258 = vector.load %arg26[%c0_83, %c0_84] : memref<1x128xf32, #tpu.memory_space<vmem>>, vector<1x128xf32>
    %259 = vector.shape_cast %258 : vector<1x128xf32> to vector<128xf32>
    %260 = vector.shape_cast %259 : vector<128xf32> to vector<1x128xf32>
    %261 = vector.broadcast %260 : vector<1x128xf32> to vector<8x128xf32>
    %262 = arith.addf %257, %261 : vector<8x128xf32>
    %263 = arith.addf %244, %262 : vector<8x128xf32>
    %cst_85 = arith.constant dense<0.000000e+00> : vector<8xf32>
    %264 = vector.multi_reduction <add>, %263, %cst_85 [1] : vector<8x128xf32> to vector<8xf32>
    %265 = vector.shape_cast %264 : vector<8xf32> to vector<8x1xf32>
    %cst_86 = arith.constant 1.280000e+02 : f32
    %266 = vector.broadcast %cst_86 : f32 to vector<8x1xf32>
    %267 = arith.divf %265, %266 : vector<8x1xf32>
    %268 = vector.broadcast %267 : vector<8x1xf32> to vector<8x128xf32>
    %269 = arith.subf %263, %268 : vector<8x128xf32>
    %270 = vector.broadcast %267 : vector<8x1xf32> to vector<8x128xf32>
    %271 = arith.subf %263, %270 : vector<8x128xf32>
    %272 = arith.mulf %269, %271 : vector<8x128xf32>
    %cst_87 = arith.constant dense<0.000000e+00> : vector<8xf32>
    %273 = vector.multi_reduction <add>, %272, %cst_87 [1] : vector<8x128xf32> to vector<8xf32>
    %274 = vector.shape_cast %273 : vector<8xf32> to vector<8x1xf32>
    %cst_88 = arith.constant 1.280000e+02 : f32
    %275 = vector.broadcast %cst_88 : f32 to vector<8x1xf32>
    %276 = arith.divf %274, %275 : vector<8x1xf32>
    %277 = vector.broadcast %267 : vector<8x1xf32> to vector<8x128xf32>
    %278 = arith.subf %263, %277 : vector<8x128xf32>
    %cst_89 = arith.constant 9.99999974E-6 : f32
    %279 = vector.broadcast %cst_89 : f32 to vector<8x1xf32>
    %280 = arith.addf %276, %279 : vector<8x1xf32>
    %281 = math.rsqrt %280 : vector<8x1xf32>
    %282 = vector.broadcast %281 : vector<8x1xf32> to vector<8x128xf32>
    %283 = arith.mulf %278, %282 : vector<8x128xf32>
    %c0_90 = arith.constant 0 : index
    %c0_91 = arith.constant 0 : index
    %284 = vector.load %arg27[%c0_90, %c0_91] : memref<1x128xf32, #tpu.memory_space<vmem>>, vector<1x128xf32>
    %285 = vector.shape_cast %284 : vector<1x128xf32> to vector<128xf32>
    %286 = vector.shape_cast %285 : vector<128xf32> to vector<1x128xf32>
    %287 = vector.broadcast %286 : vector<1x128xf32> to vector<8x128xf32>
    %288 = arith.mulf %283, %287 : vector<8x128xf32>
    %c0_92 = arith.constant 0 : index
    %c0_93 = arith.constant 0 : index
    %289 = vector.load %arg28[%c0_92, %c0_93] : memref<1x128xf32, #tpu.memory_space<vmem>>, vector<1x128xf32>
    %290 = vector.shape_cast %289 : vector<1x128xf32> to vector<128xf32>
    %291 = vector.shape_cast %290 : vector<128xf32> to vector<1x128xf32>
    %292 = vector.broadcast %291 : vector<1x128xf32> to vector<8x128xf32>
    %293 = arith.addf %288, %292 : vector<8x128xf32>
    %c0_94 = arith.constant 0 : index
    %c0_95 = arith.constant 0 : index
    %c0_96 = arith.constant 0 : index
    %294 = vector.load %arg29[%c0_94, %c0_95, %c0_96] : memref<1x8x128xf32, #tpu.memory_space<vmem>>, vector<1x8x128xf32>
    %295 = vector.shape_cast %294 : vector<1x8x128xf32> to vector<8x128xf32>
    %296 = vector.shape_cast %293 : vector<8x128xf32> to vector<1x8x128xf32>
    tpu.vector_store %arg29[%c0_94, %c0_95, %c0_96], %296 {strides = array<i32>} : memref<1x8x128xf32, #tpu.memory_space<vmem>>, vector<1x8x128xf32>,
    return
  }
  func.func @transform_0(%arg0: i32) -> (i32, i32, i32) {
    %c0_i32 = arith.constant 0 : i32
    %c0_i32_0 = arith.constant 0 : i32
    %c0_i32_1 = arith.constant 0 : i32
    return %arg0, %c0_i32, %c0_i32_0 : i32, i32, i32
  }
  func.func @transform_1(%arg0: i32) -> (i32, i32, i32) {
    %c0_i32 = arith.constant 0 : i32
    %c0_i32_0 = arith.constant 0 : i32
    %c0_i32_1 = arith.constant 0 : i32
    return %arg0, %c0_i32, %c0_i32_0 : i32, i32, i32
  }
  func.func @transform_2(%arg0: i32) -> (i32, i32) {
    %c0_i32 = arith.constant 0 : i32
    %c0_i32_0 = arith.constant 0 : i32
    %c0_i32_1 = arith.constant 0 : i32
    return %c0_i32, %c0_i32_0 : i32, i32
  }
  func.func @transform_3(%arg0: i32) -> (i32, i32) {
    %c0_i32 = arith.constant 0 : i32
    %c0_i32_0 = arith.constant 0 : i32
    %c0_i32_1 = arith.constant 0 : i32
    return %c0_i32, %c0_i32_0 : i32, i32
  }
  func.func @transform_4(%arg0: i32) -> (i32, i32) {
    %c0_i32 = arith.constant 0 : i32
    %c0_i32_0 = arith.constant 0 : i32
    %c0_i32_1 = arith.constant 0 : i32
    return %c0_i32, %c0_i32_0 : i32, i32
  }
  func.func @transform_5(%arg0: i32) -> (i32, i32) {
    %c0_i32 = arith.constant 0 : i32
    %c0_i32_0 = arith.constant 0 : i32
    %c0_i32_1 = arith.constant 0 : i32
    return %c0_i32, %c0_i32_0 : i32, i32
  }
  func.func @transform_6(%arg0: i32) -> (i32, i32) {
    %c0_i32 = arith.constant 0 : i32
    %c0_i32_0 = arith.constant 0 : i32
    %c0_i32_1 = arith.constant 0 : i32
    return %c0_i32, %c0_i32_0 : i32, i32
  }
  func.func @transform_7(%arg0: i32) -> (i32, i32) {
    %c0_i32 = arith.constant 0 : i32
    %c0_i32_0 = arith.constant 0 : i32
    %c0_i32_1 = arith.constant 0 : i32
    return %c0_i32, %c0_i32_0 : i32, i32
  }
  func.func @transform_8(%arg0: i32) -> (i32, i32) {
    %c0_i32 = arith.constant 0 : i32
    %c0_i32_0 = arith.constant 0 : i32
    %c0_i32_1 = arith.constant 0 : i32
    return %c0_i32, %c0_i32_0 : i32, i32
  }
  func.func @transform_9(%arg0: i32) -> (i32, i32) {
    %c0_i32 = arith.constant 0 : i32
    %c0_i32_0 = arith.constant 0 : i32
    %c0_i32_1 = arith.constant 0 : i32
    return %c0_i32, %c0_i32_0 : i32, i32
  }
  func.func @transform_10(%arg0: i32) -> (i32, i32) {
    %c0_i32 = arith.constant 0 : i32
    %c0_i32_0 = arith.constant 0 : i32
    %c0_i32_1 = arith.constant 0 : i32
    return %c0_i32, %c0_i32_0 : i32, i32
  }
  func.func @transform_11(%arg0: i32) -> (i32, i32) {
    %c0_i32 = arith.constant 0 : i32
    %c0_i32_0 = arith.constant 0 : i32
    %c0_i32_1 = arith.constant 0 : i32
    return %c0_i32, %c0_i32_0 : i32, i32
  }
  func.func @transform_12(%arg0: i32) -> (i32, i32) {
    %c0_i32 = arith.constant 0 : i32
    %c0_i32_0 = arith.constant 0 : i32
    %c0_i32_1 = arith.constant 0 : i32
    return %c0_i32, %c0_i32_0 : i32, i32
  }
  func.func @transform_13(%arg0: i32) -> (i32, i32) {
    %c0_i32 = arith.constant 0 : i32
    %c0_i32_0 = arith.constant 0 : i32
    %c0_i32_1 = arith.constant 0 : i32
    return %c0_i32, %c0_i32_0 : i32, i32
  }
  func.func @transform_14(%arg0: i32) -> (i32, i32) {
    %c0_i32 = arith.constant 0 : i32
    %c0_i32_0 = arith.constant 0 : i32
    %c0_i32_1 = arith.constant 0 : i32
    return %c0_i32, %c0_i32_0 : i32, i32
  }
  func.func @transform_15(%arg0: i32) -> (i32, i32) {
    %c0_i32 = arith.constant 0 : i32
    %c0_i32_0 = arith.constant 0 : i32
    %c0_i32_1 = arith.constant 0 : i32
    return %c0_i32, %c0_i32_0 : i32, i32
  }
  func.func @transform_16(%arg0: i32) -> (i32, i32) {
    %c0_i32 = arith.constant 0 : i32
    %c0_i32_0 = arith.constant 0 : i32
    %c0_i32_1 = arith.constant 0 : i32
    return %c0_i32, %c0_i32_0 : i32, i32
  }
  func.func @transform_17(%arg0: i32) -> (i32, i32) {
    %c0_i32 = arith.constant 0 : i32
    %c0_i32_0 = arith.constant 0 : i32
    %c0_i32_1 = arith.constant 0 : i32
    return %c0_i32, %c0_i32_0 : i32, i32
  }
  func.func @transform_18(%arg0: i32) -> (i32, i32) {
    %c0_i32 = arith.constant 0 : i32
    %c0_i32_0 = arith.constant 0 : i32
    %c0_i32_1 = arith.constant 0 : i32
    return %c0_i32, %c0_i32_0 : i32, i32
  }
  func.func @transform_19(%arg0: i32) -> (i32, i32) {
    %c0_i32 = arith.constant 0 : i32
    %c0_i32_0 = arith.constant 0 : i32
    %c0_i32_1 = arith.constant 0 : i32
    return %c0_i32, %c0_i32_0 : i32, i32
  }
  func.func @transform_20(%arg0: i32) -> (i32, i32) {
    %c0_i32 = arith.constant 0 : i32
    %c0_i32_0 = arith.constant 0 : i32
    %c0_i32_1 = arith.constant 0 : i32
    return %c0_i32, %c0_i32_0 : i32, i32
  }
  func.func @transform_21(%arg0: i32) -> (i32, i32) {
    %c0_i32 = arith.constant 0 : i32
    %c0_i32_0 = arith.constant 0 : i32
    %c0_i32_1 = arith.constant 0 : i32
    return %c0_i32, %c0_i32_0 : i32, i32
  }
  func.func @transform_22(%arg0: i32) -> (i32, i32) {
    %c0_i32 = arith.constant 0 : i32
    %c0_i32_0 = arith.constant 0 : i32
    %c0_i32_1 = arith.constant 0 : i32
    return %c0_i32, %c0_i32_0 : i32, i32
  }
  func.func @transform_23(%arg0: i32) -> (i32, i32) {
    %c0_i32 = arith.constant 0 : i32
    %c0_i32_0 = arith.constant 0 : i32
    %c0_i32_1 = arith.constant 0 : i32
    return %c0_i32, %c0_i32_0 : i32, i32
  }
  func.func @transform_24(%arg0: i32) -> (i32, i32) {
    %c0_i32 = arith.constant 0 : i32
    %c0_i32_0 = arith.constant 0 : i32
    %c0_i32_1 = arith.constant 0 : i32
    return %c0_i32, %c0_i32_0 : i32, i32
  }
  func.func @transform_25(%arg0: i32) -> (i32, i32) {
    %c0_i32 = arith.constant 0 : i32
    %c0_i32_0 = arith.constant 0 : i32
    %c0_i32_1 = arith.constant 0 : i32
    return %c0_i32, %c0_i32_0 : i32, i32
  }
  func.func @transform_26(%arg0: i32) -> (i32, i32) {
    %c0_i32 = arith.constant 0 : i32
    %c0_i32_0 = arith.constant 0 : i32
    %c0_i32_1 = arith.constant 0 : i32
    return %c0_i32, %c0_i32_0 : i32, i32
  }
  func.func @transform_27(%arg0: i32) -> (i32, i32) {
    %c0_i32 = arith.constant 0 : i32
    %c0_i32_0 = arith.constant 0 : i32
    %c0_i32_1 = arith.constant 0 : i32
    return %c0_i32, %c0_i32_0 : i32, i32
  }
  func.func @transform_28(%arg0: i32) -> (i32, i32, i32) {
    %c0_i32 = arith.constant 0 : i32
    %c0_i32_0 = arith.constant 0 : i32
    %c0_i32_1 = arith.constant 0 : i32
    return %arg0, %c0_i32, %c0_i32_0 : i32, i32, i32
  }
}

module attributes {stable_mosaic.version = 11 : i64} {
  func.func @_decoder_block_kernel(%arg0: i32, %arg1: memref<1x8x128xf32, #tpu.memory_space<vmem>>, %arg2: memref<1x8x128xf32, #tpu.memory_space<vmem>>, %arg3: memref<128x128xbf16, #tpu.memory_space<vmem>>, %arg4: memref<1x128xf32, #tpu.memory_space<vmem>>, %arg5: memref<128x128xbf16, #tpu.memory_space<vmem>>, %arg6: memref<1x128xf32, #tpu.memory_space<vmem>>, %arg7: memref<128x128xbf16, #tpu.memory_space<vmem>>, %arg8: memref<1x128xf32, #tpu.memory_space<vmem>>, %arg9: memref<128x128xbf16, #tpu.memory_space<vmem>>, %arg10: memref<1x128xf32, #tpu.memory_space<vmem>>, %arg11: memref<1x128xf32, #tpu.memory_space<vmem>>, %arg12: memref<1x128xf32, #tpu.memory_space<vmem>>, %arg13: memref<128x128xbf16, #tpu.memory_space<vmem>>, %arg14: memref<1x128xf32, #tpu.memory_space<vmem>>, %arg15: memref<128x128xbf16, #tpu.memory_space<vmem>>, %arg16: memref<1x128xf32, #tpu.memory_space<vmem>>, %arg17: memref<128x128xbf16, #tpu.memory_space<vmem>>, %arg18: memref<1x128xf32, #tpu.memory_space<vmem>>, %arg19: memref<128x128xbf16, #tpu.memory_space<vmem>>, %arg20: memref<1x128xf32, #tpu.memory_space<vmem>>, %arg21: memref<1x128xf32, #tpu.memory_space<vmem>>, %arg22: memref<1x128xf32, #tpu.memory_space<vmem>>, %arg23: memref<128x512xbf16, #tpu.memory_space<vmem>>, %arg24: memref<1x512xf32, #tpu.memory_space<vmem>>, %arg25: memref<512x128xbf16, #tpu.memory_space<vmem>>, %arg26: memref<1x128xf32, #tpu.memory_space<vmem>>, %arg27: memref<1x128xf32, #tpu.memory_space<vmem>>, %arg28: memref<1x128xf32, #tpu.memory_space<vmem>>, %arg29: memref<1x8x128xf32, #tpu.memory_space<vmem>>) attributes {dimension_semantics = [#tpu.dimension_semantics<parallel>], iteration_bounds = array<i64: 2>, scalar_prefetch = 0 : i64, scratch_operands = 0 : i64, tpu.core_type = #tpu.core_type<tc>, window_params = [{transform_indices = @transform_0, window_bounds = array<i64: 1, 8, 128>}, {transform_indices = @transform_1, window_bounds = array<i64: 1, 8, 128>}, {pipeline_mode = #tpu.pipeline_mode<synchronous>, transform_indices = @transform_2, window_bounds = array<i64: 128, 128>}, {pipeline_mode = #tpu.pipeline_mode<synchronous>, transform_indices = @transform_3, window_bounds = array<i64: 1, 128>}, {pipeline_mode = #tpu.pipeline_mode<synchronous>, transform_indices = @transform_4, window_bounds = array<i64: 128, 128>}, {pipeline_mode = #tpu.pipeline_mode<synchronous>, transform_indices = @transform_5, window_bounds = array<i64: 1, 128>}, {pipeline_mode = #tpu.pipeline_mode<synchronous>, transform_indices = @transform_6, window_bounds = array<i64: 128, 128>}, {pipeline_mode = #tpu.pipeline_mode<synchronous>, transform_indices = @transform_7, window_bounds = array<i64: 1, 128>}, {pipeline_mode = #tpu.pipeline_mode<synchronous>, transform_indices = @transform_8, window_bounds = array<i64: 128, 128>}, {pipeline_mode = #tpu.pipeline_mode<synchronous>, transform_indices = @transform_9, window_bounds = array<i64: 1, 128>}, {pipeline_mode = #tpu.pipeline_mode<synchronous>, transform_indices = @transform_10, window_bounds = array<i64: 1, 128>}, {pipeline_mode = #tpu.pipeline_mode<synchronous>, transform_indices = @transform_11, window_bounds = array<i64: 1, 128>}, {pipeline_mode = #tpu.pipeline_mode<synchronous>, transform_indices = @transform_12, window_bounds = array<i64: 128, 128>}, {pipeline_mode = #tpu.pipeline_mode<synchronous>, transform_indices = @transform_13, window_bounds = array<i64: 1, 128>}, {pipeline_mode = #tpu.pipeline_mode<synchronous>, transform_indices = @transform_14, window_bounds = array<i64: 128, 128>}, {pipeline_mode = #tpu.pipeline_mode<synchronous>, transform_indices = @transform_15, window_bounds = array<i64: 1, 128>}, {pipeline_mode = #tpu.pipeline_mode<synchronous>, transform_indices = @transform_16, window_bounds = array<i64: 128, 128>}, {pipeline_mode = #tpu.pipeline_mode<synchronous>, transform_indices = @transform_17, window_bounds = array<i64: 1, 128>}, {pipeline_mode = #tpu.pipeline_mode<synchronous>, transform_indices = @transform_18, window_bounds = array<i64: 128, 128>}, {pipeline_mode = #tpu.pipeline_mode<synchronous>, transform_indices = @transform_19, window_bounds = array<i64: 1, 128>}, {pipeline_mode = #tpu.pipeline_mode<synchronous>, transform_indices = @transform_20, window_bounds = array<i64: 1, 128>}, {pipeline_mode = #tpu.pipeline_mode<synchronous>, transform_indices = @transform_21, window_bounds = array<i64: 1, 128>}, {pipeline_mode = #tpu.pipeline_mode<synchronous>, transform_indices = @transform_22, window_bounds = array<i64: 128, 512>}, {pipeline_mode = #tpu.pipeline_mode<synchronous>, transform_indices = @transform_23, window_bounds = array<i64: 1, 512>}, {pipeline_mode = #tpu.pipeline_mode<synchronous>, transform_indices = @transform_24, window_bounds = array<i64: 512, 128>}, {pipeline_mode = #tpu.pipeline_mode<synchronous>, transform_indices = @transform_25, window_bounds = array<i64: 1, 128>}, {pipeline_mode = #tpu.pipeline_mode<synchronous>, transform_indices = @transform_26, window_bounds = array<i64: 1, 128>}, {pipeline_mode = #tpu.pipeline_mode<synchronous>, transform_indices = @transform_27, window_bounds = array<i64: 1, 128>}, {transform_indices = @transform_28, window_bounds = array<i64: 1, 8, 128>}]} {
    %c0 = arith.constant 0 : index
    %c0_0 = arith.constant 0 : index
    %c0_1 = arith.constant 0 : index
    %0 = vector.load %arg1[%c0, %c0_0, %c0_1] : memref<1x8x128xf32, #tpu.memory_space<vmem>>, vector<1x8x128xf32>
    %1 = vector.shape_cast %0 : vector<1x8x128xf32> to vector<8x128xf32>
    %c0_2 = arith.constant 0 : index
    %c0_3 = arith.constant 0 : index
    %c0_4 = arith.constant 0 : index
    %2 = vector.load %arg2[%c0_2, %c0_3, %c0_4] : memref<1x8x128xf32, #tpu.memory_space<vmem>>, vector<1x8x128xf32>
    %3 = vector.shape_cast %2 : vector<1x8x128xf32> to vector<8x128xf32>
    %4 = tpu.iota {dimensions = array<i32: 0>} : vector<8x8xi32>
    %5 = tpu.iota {dimensions = array<i32: 1>} : vector<8x8xi32>
    %6 = arith.cmpi sgt, %5, %4 : vector<8x8xi32>
    %cst = arith.constant -1.000000e+30 : f32
    %cst_5 = arith.constant 0.000000e+00 : f32
    %7 = vector.broadcast %cst : f32 to vector<8x8xf32>
    %8 = vector.broadcast %cst_5 : f32 to vector<8x8xf32>
    %9 = arith.select %6, %7, %8 : vector<8x8xi1>, vector<8x8xf32>
    %10 = arith.truncf %1 : vector<8x128xf32> to vector<8x128xbf16>
    %11 = arith.truncf %1 : vector<8x128xf32> to vector<8x128xbf16>
    %c0_6 = arith.constant 0 : index
    %c0_7 = arith.constant 0 : index
    %12 = vector.load %arg3[%c0_6, %c0_7] : memref<128x128xbf16, #tpu.memory_space<vmem>>, vector<128x128xbf16>
    %cst_8 = arith.constant dense<0.000000e+00> : vector<8x128xf32>
    %13 = tpu.matmul %10, %12, %cst_8 {dimension_numbers = #tpu.dot_dimension_numbers<[1], [0], [0], [1], [0, 0, 1, 1], [], []>} : vector<8x128xbf16>, vector<128x128xbf16>, vector<8x128xf32> -> vector<8x128xf32>
    %c0_9 = arith.constant 0 : index
    %c0_10 = arith.constant 0 : index
    %14 = vector.load %arg4[%c0_9, %c0_10] : memref<1x128xf32, #tpu.memory_space<vmem>>, vector<1x128xf32>
    %15 = vector.shape_cast %14 : vector<1x128xf32> to vector<128xf32>
    %16 = vector.shape_cast %15 : vector<128xf32> to vector<1x128xf32>
    %17 = vector.broadcast %16 : vector<1x128xf32> to vector<8x128xf32>
    %18 = arith.addf %13, %17 : vector<8x128xf32>
    %c0_11 = arith.constant 0 : index
    %c0_12 = arith.constant 0 : index
    %19 = vector.load %arg5[%c0_11, %c0_12] : memref<128x128xbf16, #tpu.memory_space<vmem>>, vector<128x128xbf16>
    %cst_13 = arith.constant dense<0.000000e+00> : vector<8x128xf32>
    %20 = tpu.matmul %11, %19, %cst_13 {dimension_numbers = #tpu.dot_dimension_numbers<[1], [0], [0], [1], [0, 0, 1, 1], [], []>} : vector<8x128xbf16>, vector<128x128xbf16>, vector<8x128xf32> -> vector<8x128xf32>
    %c0_14 = arith.constant 0 : index
    %c0_15 = arith.constant 0 : index
    %21 = vector.load %arg6[%c0_14, %c0_15] : memref<1x128xf32, #tpu.memory_space<vmem>>, vector<1x128xf32>
    %22 = vector.shape_cast %21 : vector<1x128xf32> to vector<128xf32>
    %23 = vector.shape_cast %22 : vector<128xf32> to vector<1x128xf32>
    %24 = vector.broadcast %23 : vector<1x128xf32> to vector<8x128xf32>
    %25 = arith.addf %20, %24 : vector<8x128xf32>
    %c0_16 = arith.constant 0 : index
    %c0_17 = arith.constant 0 : index
    %26 = vector.load %arg7[%c0_16, %c0_17] : memref<128x128xbf16, #tpu.memory_space<vmem>>, vector<128x128xbf16>
    %cst_18 = arith.constant dense<0.000000e+00> : vector<8x128xf32>
    %27 = tpu.matmul %11, %26, %cst_18 {dimension_numbers = #tpu.dot_dimension_numbers<[1], [0], [0], [1], [0, 0, 1, 1], [], []>} : vector<8x128xbf16>, vector<128x128xbf16>, vector<8x128xf32> -> vector<8x128xf32>
    %c0_19 = arith.constant 0 : index
    %c0_20 = arith.constant 0 : index
    %28 = vector.load %arg8[%c0_19, %c0_20] : memref<1x128xf32, #tpu.memory_space<vmem>>, vector<1x128xf32>
    %29 = vector.shape_cast %28 : vector<1x128xf32> to vector<128xf32>
    %30 = vector.shape_cast %29 : vector<128xf32> to vector<1x128xf32>
    %31 = vector.broadcast %30 : vector<1x128xf32> to vector<8x128xf32>
    %32 = arith.addf %27, %31 : vector<8x128xf32>
    %cst_21 = arith.constant 0.176776692 : f32
    %33 = vector.broadcast %cst_21 : f32 to vector<8x128xf32>
    %34 = arith.mulf %18, %33 : vector<8x128xf32>
    %35 = vector.extract_strided_slice %34 {offsets = [0, 0], sizes = [8, 32], strides = [1, 1]} : vector<8x128xf32> to vector<8x32xf32>
    %36 = vector.extract_strided_slice %34 {offsets = [0, 32], sizes = [8, 32], strides = [1, 1]} : vector<8x128xf32> to vector<8x32xf32>
    %37 = vector.extract_strided_slice %34 {offsets = [0, 64], sizes = [8, 32], strides = [1, 1]} : vector<8x128xf32> to vector<8x32xf32>
    %38 = vector.extract_strided_slice %34 {offsets = [0, 96], sizes = [8, 32], strides = [1, 1]} : vector<8x128xf32> to vector<8x32xf32>
    %39 = vector.shape_cast %35 : vector<8x32xf32> to vector<1x8x32xf32>
    %40 = vector.shape_cast %36 : vector<8x32xf32> to vector<1x8x32xf32>
    %41 = vector.shape_cast %37 : vector<8x32xf32> to vector<1x8x32xf32>
    %42 = vector.shape_cast %38 : vector<8x32xf32> to vector<1x8x32xf32>
    %43 = tpu.concatenate %39, %40, %41, %42 in 0 : vector<1x8x32xf32>, vector<1x8x32xf32>, vector<1x8x32xf32>, vector<1x8x32xf32> -> vector<4x8x32xf32>
    %44 = arith.truncf %43 : vector<4x8x32xf32> to vector<4x8x32xbf16>
    %45 = vector.extract_strided_slice %25 {offsets = [0, 0], sizes = [8, 32], strides = [1, 1]} : vector<8x128xf32> to vector<8x32xf32>
    %46 = vector.extract_strided_slice %25 {offsets = [0, 32], sizes = [8, 32], strides = [1, 1]} : vector<8x128xf32> to vector<8x32xf32>
    %47 = vector.extract_strided_slice %25 {offsets = [0, 64], sizes = [8, 32], strides = [1, 1]} : vector<8x128xf32> to vector<8x32xf32>
    %48 = vector.extract_strided_slice %25 {offsets = [0, 96], sizes = [8, 32], strides = [1, 1]} : vector<8x128xf32> to vector<8x32xf32>
    %49 = vector.shape_cast %45 : vector<8x32xf32> to vector<1x8x32xf32>
    %50 = vector.shape_cast %46 : vector<8x32xf32> to vector<1x8x32xf32>
    %51 = vector.shape_cast %47 : vector<8x32xf32> to vector<1x8x32xf32>
    %52 = vector.shape_cast %48 : vector<8x32xf32> to vector<1x8x32xf32>
    %53 = tpu.concatenate %49, %50, %51, %52 in 0 : vector<1x8x32xf32>, vector<1x8x32xf32>, vector<1x8x32xf32>, vector<1x8x32xf32> -> vector<4x8x32xf32>
    %54 = arith.truncf %53 : vector<4x8x32xf32> to vector<4x8x32xbf16>
    %55 = vector.extract_strided_slice %32 {offsets = [0, 0], sizes = [8, 32], strides = [1, 1]} : vector<8x128xf32> to vector<8x32xf32>
    %56 = vector.extract_strided_slice %32 {offsets = [0, 32], sizes = [8, 32], strides = [1, 1]} : vector<8x128xf32> to vector<8x32xf32>
    %57 = vector.extract_strided_slice %32 {offsets = [0, 64], sizes = [8, 32], strides = [1, 1]} : vector<8x128xf32> to vector<8x32xf32>
    %58 = vector.extract_strided_slice %32 {offsets = [0, 96], sizes = [8, 32], strides = [1, 1]} : vector<8x128xf32> to vector<8x32xf32>
    %59 = vector.shape_cast %55 : vector<8x32xf32> to vector<1x8x32xf32>
    %60 = vector.shape_cast %56 : vector<8x32xf32> to vector<1x8x32xf32>
    %61 = vector.shape_cast %57 : vector<8x32xf32> to vector<1x8x32xf32>
    %62 = vector.shape_cast %58 : vector<8x32xf32> to vector<1x8x32xf32>
    %63 = tpu.concatenate %59, %60, %61, %62 in 0 : vector<1x8x32xf32>, vector<1x8x32xf32>, vector<1x8x32xf32>, vector<1x8x32xf32> -> vector<4x8x32xf32>
    %64 = arith.truncf %63 : vector<4x8x32xf32> to vector<4x8x32xbf16>
    "tpu.trace_start"() <{level = 10 : i32, message = "hqd,hkd->hqk"}> : () -> ()
    %cst_22 = arith.constant dense<0.000000e+00> : vector<4x8x8xf32>
    %65 = tpu.matmul %44, %54, %cst_22 {dimension_numbers = #tpu.dot_dimension_numbers<[2], [2], [1], [1], [0, 0, 0, 1, 1, 1], [0], [0]>} : vector<4x8x32xbf16>, vector<4x8x32xbf16>, vector<4x8x8xf32> -> vector<4x8x8xf32>
    "tpu.trace_stop"() : () -> ()
    %66 = vector.shape_cast %9 : vector<8x8xf32> to vector<1x8x8xf32>
    %67 = vector.broadcast %66 : vector<1x8x8xf32> to vector<4x8x8xf32>
    %68 = arith.addf %65, %67 : vector<4x8x8xf32>
    %cst_23 = arith.constant dense<0xFF800000> : vector<4x8xf32>
    %69 = vector.multi_reduction <maximumf>, %68, %cst_23 [2] : vector<4x8x8xf32> to vector<4x8xf32>
    %70 = vector.shape_cast %69 : vector<4x8xf32> to vector<4x8x1xf32>
    %71 = vector.broadcast %70 : vector<4x8x1xf32> to vector<4x8x8xf32>
    %72 = arith.subf %68, %71 : vector<4x8x8xf32>
    %73 = math.exp %72 : vector<4x8x8xf32>
    %cst_24 = arith.constant dense<0.000000e+00> : vector<4x8xf32>
    %74 = vector.multi_reduction <add>, %73, %cst_24 [2] : vector<4x8x8xf32> to vector<4x8xf32>
    %75 = vector.shape_cast %74 : vector<4x8xf32> to vector<4x8x1xf32>
    %76 = tpu.reciprocal %75 {approx = true} : vector<4x8x1xf32> -> vector<4x8x1xf32>
    %77 = vector.broadcast %76 : vector<4x8x1xf32> to vector<4x8x8xf32>
    %78 = arith.mulf %73, %77 : vector<4x8x8xf32>
    %79 = arith.truncf %78 : vector<4x8x8xf32> to vector<4x8x8xbf16>
    "tpu.trace_start"() <{level = 10 : i32, message = "hqk,hkd->hqd"}> : () -> ()
    %cst_25 = arith.constant dense<0.000000e+00> : vector<4x8x32xf32>
    %80 = tpu.matmul %79, %64, %cst_25 {dimension_numbers = #tpu.dot_dimension_numbers<[2], [1], [1], [2], [0, 0, 0, 1, 1, 2], [0], [0]>} : vector<4x8x8xbf16>, vector<4x8x32xbf16>, vector<4x8x32xf32> -> vector<4x8x32xf32>
    "tpu.trace_stop"() : () -> ()
    %81 = vector.extract_strided_slice %80 {offsets = [0, 0, 0], sizes = [1, 8, 32], strides = [1, 1, 1]} : vector<4x8x32xf32> to vector<1x8x32xf32>
    %82 = vector.shape_cast %81 : vector<1x8x32xf32> to vector<8x32xf32>
    %83 = vector.extract_strided_slice %80 {offsets = [1, 0, 0], sizes = [1, 8, 32], strides = [1, 1, 1]} : vector<4x8x32xf32> to vector<1x8x32xf32>
    %84 = vector.shape_cast %83 : vector<1x8x32xf32> to vector<8x32xf32>
    %85 = vector.extract_strided_slice %80 {offsets = [2, 0, 0], sizes = [1, 8, 32], strides = [1, 1, 1]} : vector<4x8x32xf32> to vector<1x8x32xf32>
    %86 = vector.shape_cast %85 : vector<1x8x32xf32> to vector<8x32xf32>
    %87 = vector.extract_strided_slice %80 {offsets = [3, 0, 0], sizes = [1, 8, 32], strides = [1, 1, 1]} : vector<4x8x32xf32> to vector<1x8x32xf32>
    %88 = vector.shape_cast %87 : vector<1x8x32xf32> to vector<8x32xf32>
    %89 = tpu.concatenate %82, %84, %86, %88 in 1 : vector<8x32xf32>, vector<8x32xf32>, vector<8x32xf32>, vector<8x32xf32> -> vector<8x128xf32>
    %90 = arith.truncf %89 : vector<8x128xf32> to vector<8x128xbf16>
    %c0_26 = arith.constant 0 : index
    %c0_27 = arith.constant 0 : index
    %91 = vector.load %arg9[%c0_26, %c0_27] : memref<128x128xbf16, #tpu.memory_space<vmem>>, vector<128x128xbf16>
    %cst_28 = arith.constant dense<0.000000e+00> : vector<8x128xf32>
    %92 = tpu.matmul %90, %91, %cst_28 {dimension_numbers = #tpu.dot_dimension_numbers<[1], [0], [0], [1], [0, 0, 1, 1], [], []>} : vector<8x128xbf16>, vector<128x128xbf16>, vector<8x128xf32> -> vector<8x128xf32>
    %c0_29 = arith.constant 0 : index
    %c0_30 = arith.constant 0 : index
    %93 = vector.load %arg10[%c0_29, %c0_30] : memref<1x128xf32, #tpu.memory_space<vmem>>, vector<1x128xf32>
    %94 = vector.shape_cast %93 : vector<1x128xf32> to vector<128xf32>
    %95 = vector.shape_cast %94 : vector<128xf32> to vector<1x128xf32>
    %96 = vector.broadcast %95 : vector<1x128xf32> to vector<8x128xf32>
    %97 = arith.addf %92, %96 : vector<8x128xf32>
    %98 = arith.addf %1, %97 : vector<8x128xf32>
    %cst_31 = arith.constant dense<0.000000e+00> : vector<8xf32>
    %99 = vector.multi_reduction <add>, %98, %cst_31 [1] : vector<8x128xf32> to vector<8xf32>
    %100 = vector.shape_cast %99 : vector<8xf32> to vector<8x1xf32>
    %cst_32 = arith.constant 1.280000e+02 : f32
    %101 = vector.broadcast %cst_32 : f32 to vector<8x1xf32>
    %102 = arith.divf %100, %101 : vector<8x1xf32>
    %103 = vector.broadcast %102 : vector<8x1xf32> to vector<8x128xf32>
    %104 = arith.subf %98, %103 : vector<8x128xf32>
    %105 = vector.broadcast %102 : vector<8x1xf32> to vector<8x128xf32>
    %106 = arith.subf %98, %105 : vector<8x128xf32>
    %107 = arith.mulf %104, %106 : vector<8x128xf32>
    %cst_33 = arith.constant dense<0.000000e+00> : vector<8xf32>
    %108 = vector.multi_reduction <add>, %107, %cst_33 [1] : vector<8x128xf32> to vector<8xf32>
    %109 = vector.shape_cast %108 : vector<8xf32> to vector<8x1xf32>
    %cst_34 = arith.constant 1.280000e+02 : f32
    %110 = vector.broadcast %cst_34 : f32 to vector<8x1xf32>
    %111 = arith.divf %109, %110 : vector<8x1xf32>
    %112 = vector.broadcast %102 : vector<8x1xf32> to vector<8x128xf32>
    %113 = arith.subf %98, %112 : vector<8x128xf32>
    %cst_35 = arith.constant 9.99999974E-6 : f32
    %114 = vector.broadcast %cst_35 : f32 to vector<8x1xf32>
    %115 = arith.addf %111, %114 : vector<8x1xf32>
    %116 = math.rsqrt %115 : vector<8x1xf32>
    %117 = vector.broadcast %116 : vector<8x1xf32> to vector<8x128xf32>
    %118 = arith.mulf %113, %117 : vector<8x128xf32>
    %c0_36 = arith.constant 0 : index
    %c0_37 = arith.constant 0 : index
    %119 = vector.load %arg11[%c0_36, %c0_37] : memref<1x128xf32, #tpu.memory_space<vmem>>, vector<1x128xf32>
    %120 = vector.shape_cast %119 : vector<1x128xf32> to vector<128xf32>
    %121 = vector.shape_cast %120 : vector<128xf32> to vector<1x128xf32>
    %122 = vector.broadcast %121 : vector<1x128xf32> to vector<8x128xf32>
    %123 = arith.mulf %118, %122 : vector<8x128xf32>
    %c0_38 = arith.constant 0 : index
    %c0_39 = arith.constant 0 : index
    %124 = vector.load %arg12[%c0_38, %c0_39] : memref<1x128xf32, #tpu.memory_space<vmem>>, vector<1x128xf32>
    %125 = vector.shape_cast %124 : vector<1x128xf32> to vector<128xf32>
    %126 = vector.shape_cast %125 : vector<128xf32> to vector<1x128xf32>
    %127 = vector.broadcast %126 : vector<1x128xf32> to vector<8x128xf32>
    %128 = arith.addf %123, %127 : vector<8x128xf32>
    %129 = arith.truncf %128 : vector<8x128xf32> to vector<8x128xbf16>
    %130 = arith.truncf %3 : vector<8x128xf32> to vector<8x128xbf16>
    %c0_40 = arith.constant 0 : index
    %c0_41 = arith.constant 0 : index
    %131 = vector.load %arg13[%c0_40, %c0_41] : memref<128x128xbf16, #tpu.memory_space<vmem>>, vector<128x128xbf16>
    %cst_42 = arith.constant dense<0.000000e+00> : vector<8x128xf32>
    %132 = tpu.matmul %129, %131, %cst_42 {dimension_numbers = #tpu.dot_dimension_numbers<[1], [0], [0], [1], [0, 0, 1, 1], [], []>} : vector<8x128xbf16>, vector<128x128xbf16>, vector<8x128xf32> -> vector<8x128xf32>
    %c0_43 = arith.constant 0 : index
    %c0_44 = arith.constant 0 : index
    %133 = vector.load %arg14[%c0_43, %c0_44] : memref<1x128xf32, #tpu.memory_space<vmem>>, vector<1x128xf32>
    %134 = vector.shape_cast %133 : vector<1x128xf32> to vector<128xf32>
    %135 = vector.shape_cast %134 : vector<128xf32> to vector<1x128xf32>
    %136 = vector.broadcast %135 : vector<1x128xf32> to vector<8x128xf32>
    %137 = arith.addf %132, %136 : vector<8x128xf32>
    %c0_45 = arith.constant 0 : index
    %c0_46 = arith.constant 0 : index
    %138 = vector.load %arg15[%c0_45, %c0_46] : memref<128x128xbf16, #tpu.memory_space<vmem>>, vector<128x128xbf16>
    %cst_47 = arith.constant dense<0.000000e+00> : vector<8x128xf32>
    %139 = tpu.matmul %130, %138, %cst_47 {dimension_numbers = #tpu.dot_dimension_numbers<[1], [0], [0], [1], [0, 0, 1, 1], [], []>} : vector<8x128xbf16>, vector<128x128xbf16>, vector<8x128xf32> -> vector<8x128xf32>
    %c0_48 = arith.constant 0 : index
    %c0_49 = arith.constant 0 : index
    %140 = vector.load %arg16[%c0_48, %c0_49] : memref<1x128xf32, #tpu.memory_space<vmem>>, vector<1x128xf32>
    %141 = vector.shape_cast %140 : vector<1x128xf32> to vector<128xf32>
    %142 = vector.shape_cast %141 : vector<128xf32> to vector<1x128xf32>
    %143 = vector.broadcast %142 : vector<1x128xf32> to vector<8x128xf32>
    %144 = arith.addf %139, %143 : vector<8x128xf32>
    %c0_50 = arith.constant 0 : index
    %c0_51 = arith.constant 0 : index
    %145 = vector.load %arg17[%c0_50, %c0_51] : memref<128x128xbf16, #tpu.memory_space<vmem>>, vector<128x128xbf16>
    %cst_52 = arith.constant dense<0.000000e+00> : vector<8x128xf32>
    %146 = tpu.matmul %130, %145, %cst_52 {dimension_numbers = #tpu.dot_dimension_numbers<[1], [0], [0], [1], [0, 0, 1, 1], [], []>} : vector<8x128xbf16>, vector<128x128xbf16>, vector<8x128xf32> -> vector<8x128xf32>
    %c0_53 = arith.constant 0 : index
    %c0_54 = arith.constant 0 : index
    %147 = vector.load %arg18[%c0_53, %c0_54] : memref<1x128xf32, #tpu.memory_space<vmem>>, vector<1x128xf32>
    %148 = vector.shape_cast %147 : vector<1x128xf32> to vector<128xf32>
    %149 = vector.shape_cast %148 : vector<128xf32> to vector<1x128xf32>
    %150 = vector.broadcast %149 : vector<1x128xf32> to vector<8x128xf32>
    %151 = arith.addf %146, %150 : vector<8x128xf32>
    %cst_55 = arith.constant 0.176776692 : f32
    %152 = vector.broadcast %cst_55 : f32 to vector<8x128xf32>
    %153 = arith.mulf %137, %152 : vector<8x128xf32>
    %154 = vector.extract_strided_slice %153 {offsets = [0, 0], sizes = [8, 32], strides = [1, 1]} : vector<8x128xf32> to vector<8x32xf32>
    %155 = vector.extract_strided_slice %153 {offsets = [0, 32], sizes = [8, 32], strides = [1, 1]} : vector<8x128xf32> to vector<8x32xf32>
    %156 = vector.extract_strided_slice %153 {offsets = [0, 64], sizes = [8, 32], strides = [1, 1]} : vector<8x128xf32> to vector<8x32xf32>
    %157 = vector.extract_strided_slice %153 {offsets = [0, 96], sizes = [8, 32], strides = [1, 1]} : vector<8x128xf32> to vector<8x32xf32>
    %158 = vector.shape_cast %154 : vector<8x32xf32> to vector<1x8x32xf32>
    %159 = vector.shape_cast %155 : vector<8x32xf32> to vector<1x8x32xf32>
    %160 = vector.shape_cast %156 : vector<8x32xf32> to vector<1x8x32xf32>
    %161 = vector.shape_cast %157 : vector<8x32xf32> to vector<1x8x32xf32>
    %162 = tpu.concatenate %158, %159, %160, %161 in 0 : vector<1x8x32xf32>, vector<1x8x32xf32>, vector<1x8x32xf32>, vector<1x8x32xf32> -> vector<4x8x32xf32>
    %163 = arith.truncf %162 : vector<4x8x32xf32> to vector<4x8x32xbf16>
    %164 = vector.extract_strided_slice %144 {offsets = [0, 0], sizes = [8, 32], strides = [1, 1]} : vector<8x128xf32> to vector<8x32xf32>
    %165 = vector.extract_strided_slice %144 {offsets = [0, 32], sizes = [8, 32], strides = [1, 1]} : vector<8x128xf32> to vector<8x32xf32>
    %166 = vector.extract_strided_slice %144 {offsets = [0, 64], sizes = [8, 32], strides = [1, 1]} : vector<8x128xf32> to vector<8x32xf32>
    %167 = vector.extract_strided_slice %144 {offsets = [0, 96], sizes = [8, 32], strides = [1, 1]} : vector<8x128xf32> to vector<8x32xf32>
    %168 = vector.shape_cast %164 : vector<8x32xf32> to vector<1x8x32xf32>
    %169 = vector.shape_cast %165 : vector<8x32xf32> to vector<1x8x32xf32>
    %170 = vector.shape_cast %166 : vector<8x32xf32> to vector<1x8x32xf32>
    %171 = vector.shape_cast %167 : vector<8x32xf32> to vector<1x8x32xf32>
    %172 = tpu.concatenate %168, %169, %170, %171 in 0 : vector<1x8x32xf32>, vector<1x8x32xf32>, vector<1x8x32xf32>, vector<1x8x32xf32> -> vector<4x8x32xf32>
    %173 = arith.truncf %172 : vector<4x8x32xf32> to vector<4x8x32xbf16>
    %174 = vector.extract_strided_slice %151 {offsets = [0, 0], sizes = [8, 32], strides = [1, 1]} : vector<8x128xf32> to vector<8x32xf32>
    %175 = vector.extract_strided_slice %151 {offsets = [0, 32], sizes = [8, 32], strides = [1, 1]} : vector<8x128xf32> to vector<8x32xf32>
    %176 = vector.extract_strided_slice %151 {offsets = [0, 64], sizes = [8, 32], strides = [1, 1]} : vector<8x128xf32> to vector<8x32xf32>
    %177 = vector.extract_strided_slice %151 {offsets = [0, 96], sizes = [8, 32], strides = [1, 1]} : vector<8x128xf32> to vector<8x32xf32>
    %178 = vector.shape_cast %174 : vector<8x32xf32> to vector<1x8x32xf32>
    %179 = vector.shape_cast %175 : vector<8x32xf32> to vector<1x8x32xf32>
    %180 = vector.shape_cast %176 : vector<8x32xf32> to vector<1x8x32xf32>
    %181 = vector.shape_cast %177 : vector<8x32xf32> to vector<1x8x32xf32>
    %182 = tpu.concatenate %178, %179, %180, %181 in 0 : vector<1x8x32xf32>, vector<1x8x32xf32>, vector<1x8x32xf32>, vector<1x8x32xf32> -> vector<4x8x32xf32>
    %183 = arith.truncf %182 : vector<4x8x32xf32> to vector<4x8x32xbf16>
    "tpu.trace_start"() <{level = 10 : i32, message = "hqd,hkd->hqk"}> : () -> ()
    %cst_56 = arith.constant dense<0.000000e+00> : vector<4x8x8xf32>
    %184 = tpu.matmul %163, %173, %cst_56 {dimension_numbers = #tpu.dot_dimension_numbers<[2], [2], [1], [1], [0, 0, 0, 1, 1, 1], [0], [0]>} : vector<4x8x32xbf16>, vector<4x8x32xbf16>, vector<4x8x8xf32> -> vector<4x8x8xf32>
    "tpu.trace_stop"() : () -> ()
    %cst_57 = arith.constant dense<0xFF800000> : vector<4x8xf32>
    %185 = vector.multi_reduction <maximumf>, %184, %cst_57 [2] : vector<4x8x8xf32> to vector<4x8xf32>
    %186 = vector.shape_cast %185 : vector<4x8xf32> to vector<4x8x1xf32>
    %187 = vector.broadcast %186 : vector<4x8x1xf32> to vector<4x8x8xf32>
    %188 = arith.subf %184, %187 : vector<4x8x8xf32>
    %189 = math.exp %188 : vector<4x8x8xf32>
    %cst_58 = arith.constant dense<0.000000e+00> : vector<4x8xf32>
    %190 = vector.multi_reduction <add>, %189, %cst_58 [2] : vector<4x8x8xf32> to vector<4x8xf32>
    %191 = vector.shape_cast %190 : vector<4x8xf32> to vector<4x8x1xf32>
    %192 = tpu.reciprocal %191 {approx = true} : vector<4x8x1xf32> -> vector<4x8x1xf32>
    %193 = vector.broadcast %192 : vector<4x8x1xf32> to vector<4x8x8xf32>
    %194 = arith.mulf %189, %193 : vector<4x8x8xf32>
    %195 = arith.truncf %194 : vector<4x8x8xf32> to vector<4x8x8xbf16>
    "tpu.trace_start"() <{level = 10 : i32, message = "hqk,hkd->hqd"}> : () -> ()
    %cst_59 = arith.constant dense<0.000000e+00> : vector<4x8x32xf32>
    %196 = tpu.matmul %195, %183, %cst_59 {dimension_numbers = #tpu.dot_dimension_numbers<[2], [1], [1], [2], [0, 0, 0, 1, 1, 2], [0], [0]>} : vector<4x8x8xbf16>, vector<4x8x32xbf16>, vector<4x8x32xf32> -> vector<4x8x32xf32>
    "tpu.trace_stop"() : () -> ()
    %197 = vector.extract_strided_slice %196 {offsets = [0, 0, 0], sizes = [1, 8, 32], strides = [1, 1, 1]} : vector<4x8x32xf32> to vector<1x8x32xf32>
    %198 = vector.shape_cast %197 : vector<1x8x32xf32> to vector<8x32xf32>
    %199 = vector.extract_strided_slice %196 {offsets = [1, 0, 0], sizes = [1, 8, 32], strides = [1, 1, 1]} : vector<4x8x32xf32> to vector<1x8x32xf32>
    %200 = vector.shape_cast %199 : vector<1x8x32xf32> to vector<8x32xf32>
    %201 = vector.extract_strided_slice %196 {offsets = [2, 0, 0], sizes = [1, 8, 32], strides = [1, 1, 1]} : vector<4x8x32xf32> to vector<1x8x32xf32>
    %202 = vector.shape_cast %201 : vector<1x8x32xf32> to vector<8x32xf32>
    %203 = vector.extract_strided_slice %196 {offsets = [3, 0, 0], sizes = [1, 8, 32], strides = [1, 1, 1]} : vector<4x8x32xf32> to vector<1x8x32xf32>
    %204 = vector.shape_cast %203 : vector<1x8x32xf32> to vector<8x32xf32>
    %205 = tpu.concatenate %198, %200, %202, %204 in 1 : vector<8x32xf32>, vector<8x32xf32>, vector<8x32xf32>, vector<8x32xf32> -> vector<8x128xf32>
    %206 = arith.truncf %205 : vector<8x128xf32> to vector<8x128xbf16>
    %c0_60 = arith.constant 0 : index
    %c0_61 = arith.constant 0 : index
    %207 = vector.load %arg19[%c0_60, %c0_61] : memref<128x128xbf16, #tpu.memory_space<vmem>>, vector<128x128xbf16>
    %cst_62 = arith.constant dense<0.000000e+00> : vector<8x128xf32>
    %208 = tpu.matmul %206, %207, %cst_62 {dimension_numbers = #tpu.dot_dimension_numbers<[1], [0], [0], [1], [0, 0, 1, 1], [], []>} : vector<8x128xbf16>, vector<128x128xbf16>, vector<8x128xf32> -> vector<8x128xf32>
    %c0_63 = arith.constant 0 : index
    %c0_64 = arith.constant 0 : index
    %209 = vector.load %arg20[%c0_63, %c0_64] : memref<1x128xf32, #tpu.memory_space<vmem>>, vector<1x128xf32>
    %210 = vector.shape_cast %209 : vector<1x128xf32> to vector<128xf32>
    %211 = vector.shape_cast %210 : vector<128xf32> to vector<1x128xf32>
    %212 = vector.broadcast %211 : vector<1x128xf32> to vector<8x128xf32>
    %213 = arith.addf %208, %212 : vector<8x128xf32>
    %214 = arith.addf %128, %213 : vector<8x128xf32>
    %cst_65 = arith.constant dense<0.000000e+00> : vector<8xf32>
    %215 = vector.multi_reduction <add>, %214, %cst_65 [1] : vector<8x128xf32> to vector<8xf32>
    %216 = vector.shape_cast %215 : vector<8xf32> to vector<8x1xf32>
    %cst_66 = arith.constant 1.280000e+02 : f32
    %217 = vector.broadcast %cst_66 : f32 to vector<8x1xf32>
    %218 = arith.divf %216, %217 : vector<8x1xf32>
    %219 = vector.broadcast %218 : vector<8x1xf32> to vector<8x128xf32>
    %220 = arith.subf %214, %219 : vector<8x128xf32>
    %221 = vector.broadcast %218 : vector<8x1xf32> to vector<8x128xf32>
    %222 = arith.subf %214, %221 : vector<8x128xf32>
    %223 = arith.mulf %220, %222 : vector<8x128xf32>
    %cst_67 = arith.constant dense<0.000000e+00> : vector<8xf32>
    %224 = vector.multi_reduction <add>, %223, %cst_67 [1] : vector<8x128xf32> to vector<8xf32>
    %225 = vector.shape_cast %224 : vector<8xf32> to vector<8x1xf32>
    %cst_68 = arith.constant 1.280000e+02 : f32
    %226 = vector.broadcast %cst_68 : f32 to vector<8x1xf32>
    %227 = arith.divf %225, %226 : vector<8x1xf32>
    %228 = vector.broadcast %218 : vector<8x1xf32> to vector<8x128xf32>
    %229 = arith.subf %214, %228 : vector<8x128xf32>
    %cst_69 = arith.constant 9.99999974E-6 : f32
    %230 = vector.broadcast %cst_69 : f32 to vector<8x1xf32>
    %231 = arith.addf %227, %230 : vector<8x1xf32>
    %232 = math.rsqrt %231 : vector<8x1xf32>
    %233 = vector.broadcast %232 : vector<8x1xf32> to vector<8x128xf32>
    %234 = arith.mulf %229, %233 : vector<8x128xf32>
    %c0_70 = arith.constant 0 : index
    %c0_71 = arith.constant 0 : index
    %235 = vector.load %arg21[%c0_70, %c0_71] : memref<1x128xf32, #tpu.memory_space<vmem>>, vector<1x128xf32>
    %236 = vector.shape_cast %235 : vector<1x128xf32> to vector<128xf32>
    %237 = vector.shape_cast %236 : vector<128xf32> to vector<1x128xf32>
    %238 = vector.broadcast %237 : vector<1x128xf32> to vector<8x128xf32>
    %239 = arith.mulf %234, %238 : vector<8x128xf32>
    %c0_72 = arith.constant 0 : index
    %c0_73 = arith.constant 0 : index
    %240 = vector.load %arg22[%c0_72, %c0_73] : memref<1x128xf32, #tpu.memory_space<vmem>>, vector<1x128xf32>
    %241 = vector.shape_cast %240 : vector<1x128xf32> to vector<128xf32>
    %242 = vector.shape_cast %241 : vector<128xf32> to vector<1x128xf32>
    %243 = vector.broadcast %242 : vector<1x128xf32> to vector<8x128xf32>
    %244 = arith.addf %239, %243 : vector<8x128xf32>
    %245 = arith.truncf %244 : vector<8x128xf32> to vector<8x128xbf16>
    %c0_74 = arith.constant 0 : index
    %c0_75 = arith.constant 0 : index
    %246 = vector.load %arg23[%c0_74, %c0_75] : memref<128x512xbf16, #tpu.memory_space<vmem>>, vector<128x512xbf16>
    %cst_76 = arith.constant dense<0.000000e+00> : vector<8x512xf32>
    %247 = tpu.matmul %245, %246, %cst_76 {dimension_numbers = #tpu.dot_dimension_numbers<[1], [0], [0], [1], [0, 0, 1, 1], [], []>} : vector<8x128xbf16>, vector<128x512xbf16>, vector<8x512xf32> -> vector<8x512xf32>
    %c0_77 = arith.constant 0 : index
    %c0_78 = arith.constant 0 : index
    %248 = vector.load %arg24[%c0_77, %c0_78] : memref<1x512xf32, #tpu.memory_space<vmem>>, vector<1x512xf32>
    %249 = vector.shape_cast %248 : vector<1x512xf32> to vector<512xf32>
    %250 = vector.shape_cast %249 : vector<512xf32> to vector<1x512xf32>
    %251 = vector.broadcast %250 : vector<1x512xf32> to vector<8x512xf32>
    %252 = arith.addf %247, %251 : vector<8x512xf32>
    %cst_79 = arith.constant 0.000000e+00 : f32
    %253 = vector.broadcast %cst_79 : f32 to vector<8x512xf32>
    %254 = arith.maximumf %252, %253 : vector<8x512xf32>
    %255 = arith.truncf %254 : vector<8x512xf32> to vector<8x512xbf16>
    %c0_80 = arith.constant 0 : index
    %c0_81 = arith.constant 0 : index
    %256 = vector.load %arg25[%c0_80, %c0_81] : memref<512x128xbf16, #tpu.memory_space<vmem>>, vector<512x128xbf16>
    %cst_82 = arith.constant dense<0.000000e+00> : vector<8x128xf32>
    %257 = tpu.matmul %255, %256, %cst_82 {dimension_numbers = #tpu.dot_dimension_numbers<[1], [0], [0], [1], [0, 0, 1, 1], [], []>} : vector<8x512xbf16>, vector<512x128xbf16>, vector<8x128xf32> -> vector<8x128xf32>
    %c0_83 = arith.constant 0 : index
    %c0_84 = arith.constant 0 : index
    %258 = vector.load %arg26[%c0_83, %c0_84] : memref<1x128xf32, #tpu.memory_space<vmem>>, vector<1x128xf32>
    %259 = vector.shape_cast %258 : vector<1x128xf32> to vector<128xf32>
    %260 = vector.shape_cast %259 : vector<128xf32> to vector<1x128xf32>
    %261 = vector.broadcast %260 : vector<1x128xf32> to vector<8x128xf32>
    %262 = arith.addf %257, %261 : vector<8x128xf32>
    %263 = arith.addf %244, %262 : vector<8x128xf32>
    %cst_85 = arith.constant dense<0.000000e+00> : vector<8xf32>
    %264 = vector.multi_reduction <add>, %263, %cst_85 [1] : vector<8x128xf32> to vector<8xf32>
    %265 = vector.shape_cast %264 : vector<8xf32> to vector<8x1xf32>
    %cst_86 = arith.constant 1.280000e+02 : f32
    %266 = vector.broadcast %cst_86 : f32 to vector<8x1xf32>
    %267 = arith.divf %265, %266 : vector<8x1xf32>
    %268 = vector.broadcast %267 : vector<8x1xf32> to vector<8x128xf32>
    %269 = arith.subf %263, %268 : vector<8x128xf32>
    %270 = vector.broadcast %267 : vector<8x1xf32> to vector<8x128xf32>
    %271 = arith.subf %263, %270 : vector<8x128xf32>
    %272 = arith.mulf %269, %271 : vector<8x128xf32>
    %cst_87 = arith.constant dense<0.000000e+00> : vector<8xf32>
    %273 = vector.multi_reduction <add>, %272, %cst_87 [1] : vector<8x128xf32> to vector<8xf32>
    %274 = vector.shape_cast %273 : vector<8xf32> to vector<8x1xf32>
    %cst_88 = arith.constant 1.280000e+02 : f32
    %275 = vector.broadcast %cst_88 : f32 to vector<8x1xf32>
    %276 = arith.divf %274, %275 : vector<8x1xf32>
    %277 = vector.broadcast %267 : vector<8x1xf32> to vector<8x128xf32>
    %278 = arith.subf %263, %277 : vector<8x128xf32>
    %cst_89 = arith.constant 9.99999974E-6 : f32
    %279 = vector.broadcast %cst_89 : f32 to vector<8x1xf32>
    %280 = arith.addf %276, %279 : vector<8x1xf32>
    %281 = math.rsqrt %280 : vector<8x1xf32>
    %282 = vector.broadcast %281 : vector<8x1xf32> to vector<8x128xf32>
    %283 = arith.mulf %278, %282 : vector<8x128xf32>
    %c0_90 = arith.constant 0 : index
    %c0_91 = arith.constant 0 : index
    %284 = vector.load %arg27[%c0_90, %c0_91] : memref<1x128xf32, #tpu.memory_space<vmem>>, vector<1x128xf32>
    %285 = vector.shape_cast %284 : vector<1x128xf32> to vector<128xf32>
    %286 = vector.shape_cast %285 : vector<128xf32> to vector<1x128xf32>
    %287 = vector.broadcast %286 : vector<1x128xf32> to vector<8x128xf32>
    %288 = arith.mulf %283, %287 : vector<8x128xf32>
    %c0_92 = arith.constant 0 : index
    %c0_93 = arith.constant 0 : index
    %289 = vector.load %arg28[%c0_92, %c0_93] : memref<1x128xf32, #tpu.memory_space<vmem>>, vector<1x128xf32>
    %290 = vector.shape_cast %289 : vector<1x128xf32> to vector<128xf32>
    %291 = vector.shape_cast %290 : vector<128xf32> to vector<1x128xf32>
    %292 = vector.broadcast %291 : vector<1x128xf32> to vector<8x128xf32>
    %293 = arith.addf %288, %292 : vector<8x128xf32>
    %c0_94 = arith.constant 0 : index
    %c0_95 = arith.constant 0 : index
    %c0_96 = arith.constant 0 : index
    %294 = vector.load %arg29[%c0_94, %c0_95, %c0_96] : memref<1x8x128xf32, #tpu.memory_space<vmem>>, vector<1x8x128xf32>
    %295 = vector.shape_cast %294 : vector<1x8x128xf32> to vector<8x128xf32>
    %296 = vector.shape_cast %293 : vector<8x128xf32> to vector<1x8x128xf32>
    tpu.vector_store %arg29[%c0_94, %c0_95, %c0_96], %296 {strides = array<i32>} : memref<1x8x128xf32, #tpu.memory_space<vmem>>, vector<1x8x128xf32>,
    return
  }
  func.func @transform_0(%arg0: i32) -> (i32, i32, i32) {
    %c0_i32 = arith.constant 0 : i32
    %c0_i32_0 = arith.constant 0 : i32
    %c0_i32_1 = arith.constant 0 : i32
    return %arg0, %c0_i32, %c0_i32_0 : i32, i32, i32
  }
  func.func @transform_1(%arg0: i32) -> (i32, i32, i32) {
    %c0_i32 = arith.constant 0 : i32
    %c0_i32_0 = arith.constant 0 : i32
    %c0_i32_1 = arith.constant 0 : i32
    return %arg0, %c0_i32, %c0_i32_0 : i32, i32, i32
  }
  func.func @transform_2(%arg0: i32) -> (i32, i32) {
    %c0_i32 = arith.constant 0 : i32
    %c0_i32_0 = arith.constant 0 : i32
    %c0_i32_1 = arith.constant 0 : i32
    return %c0_i32, %c0_i32_0 : i32, i32
  }
  func.func @transform_3(%arg0: i32) -> (i32, i32) {
    %c0_i32 = arith.constant 0 : i32
    %c0_i32_0 = arith.constant 0 : i32
    %c0_i32_1 = arith.constant 0 : i32
    return %c0_i32, %c0_i32_0 : i32, i32
  }
  func.func @transform_4(%arg0: i32) -> (i32, i32) {
    %c0_i32 = arith.constant 0 : i32
    %c0_i32_0 = arith.constant 0 : i32
    %c0_i32_1 = arith.constant 0 : i32
    return %c0_i32, %c0_i32_0 : i32, i32
  }
  func.func @transform_5(%arg0: i32) -> (i32, i32) {
    %c0_i32 = arith.constant 0 : i32
    %c0_i32_0 = arith.constant 0 : i32
    %c0_i32_1 = arith.constant 0 : i32
    return %c0_i32, %c0_i32_0 : i32, i32
  }
  func.func @transform_6(%arg0: i32) -> (i32, i32) {
    %c0_i32 = arith.constant 0 : i32
    %c0_i32_0 = arith.constant 0 : i32
    %c0_i32_1 = arith.constant 0 : i32
    return %c0_i32, %c0_i32_0 : i32, i32
  }
  func.func @transform_7(%arg0: i32) -> (i32, i32) {
    %c0_i32 = arith.constant 0 : i32
    %c0_i32_0 = arith.constant 0 : i32
    %c0_i32_1 = arith.constant 0 : i32
    return %c0_i32, %c0_i32_0 : i32, i32
  }
  func.func @transform_8(%arg0: i32) -> (i32, i32) {
    %c0_i32 = arith.constant 0 : i32
    %c0_i32_0 = arith.constant 0 : i32
    %c0_i32_1 = arith.constant 0 : i32
    return %c0_i32, %c0_i32_0 : i32, i32
  }
  func.func @transform_9(%arg0: i32) -> (i32, i32) {
    %c0_i32 = arith.constant 0 : i32
    %c0_i32_0 = arith.constant 0 : i32
    %c0_i32_1 = arith.constant 0 : i32
    return %c0_i32, %c0_i32_0 : i32, i32
  }
  func.func @transform_10(%arg0: i32) -> (i32, i32) {
    %c0_i32 = arith.constant 0 : i32
    %c0_i32_0 = arith.constant 0 : i32
    %c0_i32_1 = arith.constant 0 : i32
    return %c0_i32, %c0_i32_0 : i32, i32
  }
  func.func @transform_11(%arg0: i32) -> (i32, i32) {
    %c0_i32 = arith.constant 0 : i32
    %c0_i32_0 = arith.constant 0 : i32
    %c0_i32_1 = arith.constant 0 : i32
    return %c0_i32, %c0_i32_0 : i32, i32
  }
  func.func @transform_12(%arg0: i32) -> (i32, i32) {
    %c0_i32 = arith.constant 0 : i32
    %c0_i32_0 = arith.constant 0 : i32
    %c0_i32_1 = arith.constant 0 : i32
    return %c0_i32, %c0_i32_0 : i32, i32
  }
  func.func @transform_13(%arg0: i32) -> (i32, i32) {
    %c0_i32 = arith.constant 0 : i32
    %c0_i32_0 = arith.constant 0 : i32
    %c0_i32_1 = arith.constant 0 : i32
    return %c0_i32, %c0_i32_0 : i32, i32
  }
  func.func @transform_14(%arg0: i32) -> (i32, i32) {
    %c0_i32 = arith.constant 0 : i32
    %c0_i32_0 = arith.constant 0 : i32
    %c0_i32_1 = arith.constant 0 : i32
    return %c0_i32, %c0_i32_0 : i32, i32
  }
  func.func @transform_15(%arg0: i32) -> (i32, i32) {
    %c0_i32 = arith.constant 0 : i32
    %c0_i32_0 = arith.constant 0 : i32
    %c0_i32_1 = arith.constant 0 : i32
    return %c0_i32, %c0_i32_0 : i32, i32
  }
  func.func @transform_16(%arg0: i32) -> (i32, i32) {
    %c0_i32 = arith.constant 0 : i32
    %c0_i32_0 = arith.constant 0 : i32
    %c0_i32_1 = arith.constant 0 : i32
    return %c0_i32, %c0_i32_0 : i32, i32
  }
  func.func @transform_17(%arg0: i32) -> (i32, i32) {
    %c0_i32 = arith.constant 0 : i32
    %c0_i32_0 = arith.constant 0 : i32
    %c0_i32_1 = arith.constant 0 : i32
    return %c0_i32, %c0_i32_0 : i32, i32
  }
  func.func @transform_18(%arg0: i32) -> (i32, i32) {
    %c0_i32 = arith.constant 0 : i32
    %c0_i32_0 = arith.constant 0 : i32
    %c0_i32_1 = arith.constant 0 : i32
    return %c0_i32, %c0_i32_0 : i32, i32
  }
  func.func @transform_19(%arg0: i32) -> (i32, i32) {
    %c0_i32 = arith.constant 0 : i32
    %c0_i32_0 = arith.constant 0 : i32
    %c0_i32_1 = arith.constant 0 : i32
    return %c0_i32, %c0_i32_0 : i32, i32
  }
  func.func @transform_20(%arg0: i32) -> (i32, i32) {
    %c0_i32 = arith.constant 0 : i32
    %c0_i32_0 = arith.constant 0 : i32
    %c0_i32_1 = arith.constant 0 : i32
    return %c0_i32, %c0_i32_0 : i32, i32
  }
  func.func @transform_21(%arg0: i32) -> (i32, i32) {
    %c0_i32 = arith.constant 0 : i32
    %c0_i32_0 = arith.constant 0 : i32
    %c0_i32_1 = arith.constant 0 : i32
    return %c0_i32, %c0_i32_0 : i32, i32
  }
  func.func @transform_22(%arg0: i32) -> (i32, i32) {
    %c0_i32 = arith.constant 0 : i32
    %c0_i32_0 = arith.constant 0 : i32
    %c0_i32_1 = arith.constant 0 : i32
    return %c0_i32, %c0_i32_0 : i32, i32
  }
  func.func @transform_23(%arg0: i32) -> (i32, i32) {
    %c0_i32 = arith.constant 0 : i32
    %c0_i32_0 = arith.constant 0 : i32
    %c0_i32_1 = arith.constant 0 : i32
    return %c0_i32, %c0_i32_0 : i32, i32
  }
  func.func @transform_24(%arg0: i32) -> (i32, i32) {
    %c0_i32 = arith.constant 0 : i32
    %c0_i32_0 = arith.constant 0 : i32
    %c0_i32_1 = arith.constant 0 : i32
    return %c0_i32, %c0_i32_0 : i32, i32
  }
  func.func @transform_25(%arg0: i32) -> (i32, i32) {
    %c0_i32 = arith.constant 0 : i32
    %c0_i32_0 = arith.constant 0 : i32
    %c0_i32_1 = arith.constant 0 : i32
    return %c0_i32, %c0_i32_0 : i32, i32
  }
  func.func @transform_26(%arg0: i32) -> (i32, i32) {
    %c0_i32 = arith.constant 0 : i32
    %c0_i32_0 = arith.constant 0 : i32
    %c0_i32_1 = arith.constant 0 : i32
    return %c0_i32, %c0_i32_0 : i32, i32
  }
  func.func @transform_27(%arg0: i32) -> (i32, i32) {
    %c0_i32 = arith.constant 0 : i32
    %c0_i32_0 = arith.constant 0 : i32
    %c0_i32_1 = arith.constant 0 : i32
    return %c0_i32, %c0_i32_0 : i32, i32
  }
  func.func @transform_28(%arg0: i32) -> (i32, i32, i32) {
    %c0_i32 = arith.constant 0 : i32
    %c0_i32_0 = arith.constant 0 : i32
    %c0_i32_1 = arith.constant 0 : i32
    return %arg0, %c0_i32, %c0_i32_0 : i32, i32, i32
  }
}

</mosaic_0001>

<bundles_post_ra>
// kernel: tpu_custom_call.1
= control target key start
LH: loop header
LB: loop body
LE: loop exit
PB: predicated region body
PF: predicated region fallthrough
CT: control target
= control target key end

     0   :  { %s6819_s0 = inlined_call_operand.hbm [shape: f32[2,8,128], index: 0, kind: input, shape index: {}]   ;;  %s6820_s1 = inlined_call_operand.hbm [shape: f32[2,8,128], index: 1, kind: input, shape index: {}]   ;;  %s6821_s2 = inlined_call_operand.hbm [shape: bf16[128,128], index: 2, kind: input, shape index: {}]   ;;  %s6822_s3 = inlined_call_operand.hbm [shape: f32[1,128], index: 3, kind: input, shape index: {}]   ;;  %s6823_s4 = inlined_call_operand.hbm [shape: bf16[128,128], index: 4, kind: input, shape index: {}]   ;;  %s6824_s5 = inlined_call_operand.hbm [shape: f32[1,128], index: 5, kind: input, shape index: {}]   ;;  %s6825_s6 = inlined_call_operand.hbm [shape: bf16[128,128], index: 6, kind: input, shape index: {}]   ;;  %s6826_s7 = inlined_call_operand.hbm [shape: f32[1,128], index: 7, kind: input, shape index: {}]   ;;  %s6827_s8 = inlined_call_operand.hbm [shape: bf16[128,128], index: 8, kind: input, shape index: {}]   ;;  %s6828_s9 = inlined_call_operand.hbm [shape: f32[1,128], index: 9, kind: input, shape index: {}]   ;;  %s6829_s10 = inlined_call_operand.hbm [shape: f32[1,128], index: 10, kind: input, shape index: {}]   ;;  %s6830_s11 = inlined_call_operand.hbm [shape: f32[1,128], index: 11, kind: input, shape index: {}]   ;;  %s6831_s12 = inlined_call_operand.hbm [shape: bf16[128,128], index: 12, kind: input, shape index: {}]   ;;  %s6832_s13 = inlined_call_operand.hbm [shape: f32[1,128], index: 13, kind: input, shape index: {}]   ;;  %s6833_s14 = inlined_call_operand.hbm [shape: bf16[128,128], index: 14, kind: input, shape index: {}]   ;;  %s6834_s15 = inlined_call_operand.hbm [shape: f32[1,128], index: 15, kind: input, shape index: {}]   ;;  %s6835_s16 = inlined_call_operand.hbm [shape: bf16[128,128], index: 16, kind: input, shape index: {}]   ;;  %s6836_s17 = inlined_call_operand.hbm [shape: f32[1,128], index: 17, kind: input, shape index: {}]   ;;  %s6837_s18 = inlined_call_operand.vmem [shape: bf16[128,128], index: 18, kind: input, shape index: {}]   ;;  %s6838_s19 = inlined_call_operand.vmem [shape: f32[1,128], index: 19, kind: input, shape index: {}]   ;;  %s6839_s20 = inlined_call_operand.vmem [shape: f32[1,128], index: 20, kind: input, shape index: {}]   ;;  %s6840_s21 = inlined_call_operand.vmem [shape: f32[1,128], index: 21, kind: input, shape index: {}]   ;;  %s6841_s22 = inlined_call_operand.hbm [shape: bf16[128,512], index: 22, kind: input, shape index: {}]   ;;  %s6842_s23 = inlined_call_operand.vmem [shape: f32[1,512], index: 23, kind: input, shape index: {}]   ;;  %s6843_s24 = inlined_call_operand.hbm [shape: bf16[512,128], index: 24, kind: input, shape index: {}]   ;;  %s6844_s25 = inlined_call_operand.vmem [shape: f32[1,128], index: 25, kind: input, shape index: {}]   ;;  %s6845_s26 = inlined_call_operand.vmem [shape: f32[1,128], index: 26, kind: input, shape index: {}]   ;;  %s6846_s27 = inlined_call_operand.vmem [shape: f32[1,128], index: 27, kind: input, shape index: {}]   ;;  %s6847_s28 = inlined_call_operand.hbm [shape: f32[2,8,128], index: 28, kind: output, shape index: {}]  }
   0x1   :  { %6880 = sst [smem:[#allocation48_spill]] %s6819_s0 }
   0x2   :  { %6881 = sst [smem:[#allocation49_spill]] %s6820_s1 }
   0x3   :  { %6882 = sst [smem:[#allocation50_spill]] %s6821_s2 }
   0x4   :  { %6883 = sst [smem:[#allocation51_spill]] %s6822_s3 }
   0x5   :  { %6884 = sst [smem:[#allocation52_spill]] %s6823_s4 }
   0x6   :  { %6885 = sst [smem:[#allocation53_spill]] %s6824_s5 }
   0x7   :  { %6886 = sst [smem:[#allocation54_spill]] %s6825_s6 }
   0x8   :  { %6887 = sst [smem:[#allocation55_spill]] %s6826_s7 }
   0x9   :  { %6888 = sst [smem:[#allocation56_spill]] %s6827_s8 }
   0xa   :  { %6889 = sst [smem:[#allocation57_spill]] %s6828_s9 }
   0xb   :  { %6890 = sst [smem:[#allocation58_spill]] %s6829_s10 }
   0xc   :  { %6891 = sst [smem:[#allocation59_spill]] %s6830_s11 }
   0xd   :  { %6892 = sst [smem:[#allocation60_spill]] %s6831_s12 }
   0xe   :  { %6893 = sst [smem:[#allocation61_spill]] %s6832_s13 }
   0xf   :  { %6894 = sst [smem:[#allocation62_spill]] %s6833_s14 }
  0x10   :  { %6895 = sst [smem:[#allocation63_spill]] %s6834_s15 }
  0x11   :  { %6896 = sst [smem:[#allocation64_spill]] %s6835_s16 }
  0x12   :  { %6897 = sst [smem:[#allocation65_spill]] %s6836_s17 }
  0x13   :  { %6898 = sst [smem:[#allocation66_spill]] %s6837_s18 }
  0x14   :  { %6899 = sst [smem:[#allocation67_spill]] %s6838_s19 }
  0x15   :  { %6900 = sst [smem:[#allocation68_spill]] %s6839_s20 }
  0x16   :  { %6901 = sst [smem:[#allocation69_spill]] %s6840_s21 }
  0x17   :  { %6902 = sst [smem:[#allocation70_spill]] %s6841_s22 }
  0x18   :  { %6903 = sst [smem:[#allocation71_spill]] %s6842_s23 }
  0x19   :  { %6904 = sst [smem:[#allocation72_spill]] %s6843_s24 }
  0x1a   :  { %6905 = sst [smem:[#allocation73_spill]] %s6844_s25 }
  0x1b   :  { %6906 = sst [smem:[#allocation74_spill]] %s6845_s26 }
  0x1c   :  { %6907 = sst [smem:[#allocation75_spill]] %s6846_s27 }
  0x1d   :  { %6908 = sst [smem:[#allocation76_spill]] %s6847_s28 }
  0x1e   :  { %33 = vsyncpa [#allocation3], 0 }
  0x1f   :  { %35 = vsyncpa [#allocation3 + $0x1], 0 }
  0x20   :  { %36 = vsyncpa [#allocation6], 0 }
  0x21   :  { %38 = vsyncpa [#allocation6 + $0x1], 0 }
  0x22   :  { %39 = vsyncpa [#allocation9], 0 }
  0x23   :  { %40 = vsyncpa [#allocation12], 0 }
  0x24   :  { %41 = vsyncpa [#allocation15], 0 }
  0x25   :  { %42 = vsyncpa [#allocation18], 0 }
  0x26   :  { %43 = vsyncpa [#allocation21], 0 }
  0x27   :  { %44 = vsyncpa [#allocation24], 0 }
  0x28   :  { %45 = vsyncpa [#allocation27], 0 }
  0x29   :  { %46 = vsyncpa [#allocation30], 0 }
  0x2a   :  { %47 = vsyncpa [#allocation33], 0 }
  0x2b   :  { %48 = vsyncpa [#allocation4], 0 }
  0x2c   :  { %50 = vsyncpa [#allocation4 + $0x1], 0  ;;  %s5898_s8 = smov 0   ;;  %s5900_s5 = smov 0  }
  0x2d   :  { %s5902_s9 = smov 0   ;;  %s5904_s30 = smov 0  }
  0x2e LB: > { %s5722_s3 = smov [#allocation7]   ;;  %s5919_s10 = sadd.s32 4294967295, %s5720_s30   ;;  %s5720_s30 = sphi %s5904_s30, %s6977_s30   ;;  %s5716_s9 = sphi %s5902_s9, %s6976_s9   ;;  %s5712_s5 = sphi %s5900_s5, %s6975_s5   ;;  %s5708_s8 = sphi %s5898_s8, %s6974_s8  }
  0x2f   : > { %s697_s6 = sshll.u32 %s5722_s3, 4  ;;  %p4009_p0 = scmp.ge.s32.totalorder %s5720_s30, 1  ;;  %s5924_s6 = int_to_ptr.vmem [resolvable:$true] %s697_s6 }
  0x30   : > { %p6868_p1 = scmp.eq.s32.totalorder %s5919_s10, 0  ;;  %p685_p2 = scmp.lt.s32.totalorder %s5720_s30, 3 }
  0x31   : > { %s5723_s11 = smov [#allocation8]   ;;  %s5724_s7 = smov [#allocation11]  }
  0x32   : > { %p5926_p3 = pnand %p4009_p0, %p685_p2  ;;  %s711_s29 = sshll.u32 %s5723_s11, 4  ;;  %s5939_s29 = int_to_ptr.vmem [resolvable:$true] %s711_s29 }
  0x33   : > { %s735_s12 = sshll.u32 %s5724_s7, 4  ;;  %s6911_s3 = sld [smem:[#allocation50_spill]]  ;;  %s5941_s12 = int_to_ptr.vmem [resolvable:$true] %s735_s12 }
  0x34   : > { %s6909_s0 = scalar_select %p5926_p3, 1, 0 }
  0x35   : > { %p4700_p5 = pneg %p5926_p3 }
  0x37   : > { %p5935_p6 = pnand %p4700_p5, %p6868_p1 }
  0x39   : > { %s5046_s28 = scalar_lea.hbm %s6911_s3, 1024  ;;  %p5951_p8 = pneg %p5935_p6 }
  0x3a   : > { %p5047_p7 = scmp.ne.s32.totalorder %s6911_s3, %s5046_s28  ;;  %p5053_p11 = scmp.lt.u32.totalorder %s5046_s28, %s6911_s3 }
  0x3c   : > { %p5049_p9 = pnand %p5951_p8, %p5047_p7 }
  0x3e   : > { %p5050_p10 = pneg %p5049_p9 }
  0x40   : > { %p5055_p12 = pnand %p5053_p11, %p5050_p10 }
  0x42   : > { %5058 = shalt.err (!%p5055_p12)
}
  0x43   : > { %s5059_s26 = scalar_lea.vmem %s5924_s6, 1024  ;;  %p5067_p5 = scmp.lt.s32.totalorder %s5924_s6, %s5924_s6 }
  0x44   : > { %p5060_p13 = scmp.ne.s32.totalorder %s5924_s6, %s5059_s26  ;;  %p5068_p4 = scmp.lt.s32.totalorder %s5059_s26, %s5059_s26 }
  0x46   : > { %p5062_p0 = pnand %p5060_p13, %p5951_p8  ;;  %p5069_p7 = por %p5068_p4, %p5067_p5 }
  0x48   : > { %p5063_p2 = pneg %p5062_p0 }
  0x4a   : > { %p5070_p9 = pnand %p5069_p7, %p5063_p2 }
  0x4c   : > { %5073 = shalt.err (!%p5070_p9)
}
  0x4d   : > { %s6863_s27 = smov 64   ;;  %s6865_s25 = smov 4  }
  0x4e   : > { %4703 = dma.hbm_to_vmem [thread:$0]  (!%p5935_p6), %s6911_s3, 1024, %s5924_s6, [#allocation6], %s6863_s27, %s6863_s27, %s6865_s25  }
  0x4f   : > { %s6913_s23 = sld [smem:[#allocation51_spill]] }
  0x55   : > { %s5074_s26 = scalar_lea.hbm %s6913_s23, 16 }
  0x56   : > { %p5075_p4 = scmp.ne.s32.totalorder %s6913_s23, %s5074_s26  ;;  %p5081_p12 = scmp.lt.u32.totalorder %s5074_s26, %s6913_s23 }
  0x58   : > { %p5077_p10 = pnand %p5075_p4, %p5951_p8 }
  0x5a   : > { %p5078_p11 = pneg %p5077_p10 }
  0x5c   : > { %p5083_p13 = pnand %p5081_p12, %p5078_p11 }
  0x5e   : > { %5086 = shalt.err (!%p5083_p13)
}
  0x5f   : > { %s5087_s6 = scalar_lea.vmem %s5939_s29, 16  ;;  %s5094_s20 = scalar_lea.vmem %s5939_s29, 32 }
  0x60   : > { %p5088_p0 = scmp.ne.s32.totalorder %s5939_s29, %s5087_s6  ;;  %p5095_p7 = scmp.lt.s32.totalorder %s5939_s29, %s5939_s29 }
  0x61   : > { %p5096_p9 = scmp.lt.s32.totalorder %s5094_s20, %s5087_s6 }
  0x62   : > { %p5090_p2 = pnand %p5088_p0, %p5951_p8 }
  0x63   : > { %p5097_p4 = por %p5096_p9, %p5095_p7 }
  0x64   : > { %p5091_p5 = pneg %p5090_p2 }
  0x66   : > { %p5098_p10 = pnand %p5097_p4, %p5091_p5 }
  0x68   : > { %5101 = shalt.err (!%p5098_p10)
}
  0x69   : > { %4706 = dma.hbm_to_vmem [thread:$0]  (!%p5935_p6), %s6913_s23, 16, %s5939_s29, [#allocation9]  }
  0x6a   : > { %s6914_s1 = sld [smem:[#allocation53_spill]] }
  0x70   : > { %s5102_s4 = scalar_lea.hbm %s6914_s1, 16 }
  0x71   : > { %p5103_p11 = scmp.ne.s32.totalorder %s6914_s1, %s5102_s4  ;;  %p5109_p0 = scmp.lt.u32.totalorder %s5102_s4, %s6914_s1 }
  0x73   : > { %p5105_p12 = pnand %p5103_p11, %p5951_p8 }
  0x75   : > { %p5106_p13 = pneg %p5105_p12 }
  0x77   : > { %p5111_p2 = pnand %p5109_p0, %p5106_p13 }
  0x79   : > { %5114 = shalt.err (!%p5111_p2)
}
  0x7a   : > { %s5115_s29 = scalar_lea.vmem %s5941_s12, 16  ;;  %s5122_s18 = scalar_lea.vmem %s5941_s12, 32 }
  0x7b   : > { %p5116_p5 = scmp.ne.s32.totalorder %s5941_s12, %s5115_s29  ;;  %p5123_p4 = scmp.lt.s32.totalorder %s5941_s12, %s5941_s12 }
  0x7c   : > { %p5124_p10 = scmp.lt.s32.totalorder %s5122_s18, %s5115_s29 }
  0x7d   : > { %p5118_p7 = pnand %p5116_p5, %p5951_p8 }
  0x7e   : > { %p5125_p11 = por %p5124_p10, %p5123_p4 }
  0x7f   : > { %p5119_p9 = pneg %p5118_p7 }
  0x81   : > { %p5126_p12 = pnand %p5125_p11, %p5119_p9 }
  0x83   : > { %5129 = shalt.err (!%p5126_p12)
}
  0x84   : > { %4712 = dma.hbm_to_vmem [thread:$0]  (!%p5935_p6), %s6914_s1, 16, %s5941_s12, [#allocation12]  }
  0x85   : > { %s5727_s28 = smov [#allocation14]   ;;  %s5728_s7 = smov [#allocation17]  }
  0x86   : > { %s759_s4 = sshll.u32 %s5727_s28, 4  ;;  %s783_s26 = sshll.u32 %s5728_s7, 4  ;;  %s760_s4 = int_to_ptr.vmem [resolvable:$true] %s759_s4  ;;  %s784_s26 = int_to_ptr.vmem [resolvable:$true] %s783_s26 }
  0x87   : > { %s6915_s27 = sld [smem:[#allocation55_spill]] }
  0x8d   : > { %s5130_s29 = scalar_lea.hbm %s6915_s27, 16 }
  0x8e   : > { %p5131_p13 = scmp.ne.s32.totalorder %s6915_s27, %s5130_s29  ;;  %p5137_p5 = scmp.lt.u32.totalorder %s5130_s29, %s6915_s27 }
  0x90   : > { %p5133_p0 = pnand %p5131_p13, %p5951_p8 }
  0x92   : > { %p5134_p2 = pneg %p5133_p0 }
  0x94   : > { %p5139_p7 = pnand %p5137_p5, %p5134_p2 }
  0x96   : > { %5142 = shalt.err (!%p5139_p7)
}
  0x97   : > { %s5143_s12 = scalar_lea.vmem %s760_s4, 16  ;;  %s5150_s21 = scalar_lea.vmem %s760_s4, 32 }
  0x98   : > { %p5144_p9 = scmp.ne.s32.totalorder %s760_s4, %s5143_s12  ;;  %p5151_p11 = scmp.lt.s32.totalorder %s760_s4, %s760_s4 }
  0x99   : > { %p5152_p12 = scmp.lt.s32.totalorder %s5150_s21, %s5143_s12 }
  0x9a   : > { %p5146_p4 = pnand %p5144_p9, %p5951_p8 }
  0x9b   : > { %p5153_p1 = por %p5152_p12, %p5151_p11 }
  0x9c   : > { %p5147_p10 = pneg %p5146_p4 }
  0x9e   : > { %p5154_p3 = pnand %p5153_p1, %p5147_p10 }
  0xa0   : > { %5157 = shalt.err (!%p5154_p3)
}
  0xa1   : > { %4718 = dma.hbm_to_vmem [thread:$0]  (!%p5935_p6), %s6915_s27, 16, %s760_s4, [#allocation15]  }
  0xa2   : > { %s6916_s6 = sld [smem:[#allocation57_spill]] }
  0xa8   : > { %s5158_s20 = scalar_lea.hbm %s6916_s6, 16 }
  0xa9   : > { %p5159_p13 = scmp.ne.s32.totalorder %s6916_s6, %s5158_s20  ;;  %p5165_p3 = scmp.lt.u32.totalorder %s5158_s20, %s6916_s6 }
  0xab   : > { %p5161_p0 = pnand %p5159_p13, %p5951_p8 }
  0xad   : > { %p5162_p1 = pneg %p5161_p0 }
  0xaf   : > { %p5167_p2 = pnand %p5165_p3, %p5162_p1 }
  0xb1   : > { %5170 = shalt.err (!%p5167_p2)
}
  0xb2   : > { %s5171_s21 = scalar_lea.vmem %s784_s26, 16  ;;  %s5178_s4 = scalar_lea.vmem %s784_s26, 32 }
  0xb3   : > { %p5172_p5 = scmp.ne.s32.totalorder %s784_s26, %s5171_s21  ;;  %p5179_p4 = scmp.lt.s32.totalorder %s784_s26, %s784_s26 }
  0xb4   : > { %p5180_p10 = scmp.lt.s32.totalorder %s5178_s4, %s5171_s21 }
  0xb5   : > { %p5174_p7 = pnand %p5172_p5, %p5951_p8 }
  0xb6   : > { %p5181_p11 = por %p5180_p10, %p5179_p4 }
  0xb7   : > { %p5175_p9 = pneg %p5174_p7 }
  0xb9   : > { %p5182_p12 = pnand %p5181_p11, %p5175_p9 }
  0xbb   : > { %5185 = shalt.err (!%p5182_p12)
}
  0xbc   : > { %4724 = dma.hbm_to_vmem [thread:$0]  (!%p5935_p6), %s6916_s6, 16, %s784_s26, [#allocation18]  }
  0xbd   : > { %s5729_s3 = smov [#allocation20]   ;;  %s5730_s20 = smov [#allocation23]  }
  0xbe   : > { %s805_s7 = sshll.u32 %s5729_s3, 4  ;;  %s829_s29 = sshll.u32 %s5730_s20, 4  ;;  %s806_s7 = int_to_ptr.vmem [resolvable:$true] %s805_s7  ;;  %s830_s29 = int_to_ptr.vmem [resolvable:$true] %s829_s29 }
  0xbf   : > { %s6917_s12 = sld [smem:[#allocation59_spill]] }
  0xc5   : > { %s5186_s1 = scalar_lea.hbm %s6917_s12, 16 }
  0xc6   : > { %p5187_p13 = scmp.ne.s32.totalorder %s6917_s12, %s5186_s1  ;;  %p5193_p3 = scmp.lt.u32.totalorder %s5186_s1, %s6917_s12 }
  0xc8   : > { %p5189_p0 = pnand %p5187_p13, %p5951_p8 }
  0xca   : > { %p5190_p1 = pneg %p5189_p0 }
  0xcc   : > { %p5195_p2 = pnand %p5193_p3, %p5190_p1 }
  0xce   : > { %5198 = shalt.err (!%p5195_p2)
}
  0xcf   : > { %s5199_s26 = scalar_lea.vmem %s806_s7, 16  ;;  %s5206_s28 = scalar_lea.vmem %s806_s7, 32 }
  0xd0   : > { %p5200_p5 = scmp.ne.s32.totalorder %s806_s7, %s5199_s26  ;;  %p5207_p4 = scmp.lt.s32.totalorder %s806_s7, %s806_s7 }
  0xd1   : > { %p5208_p10 = scmp.lt.s32.totalorder %s5206_s28, %s5199_s26 }
  0xd2   : > { %p5202_p7 = pnand %p5200_p5, %p5951_p8 }
  0xd3   : > { %p5209_p11 = por %p5208_p10, %p5207_p4 }
  0xd4   : > { %p5203_p9 = pneg %p5202_p7 }
  0xd6   : > { %p5210_p12 = pnand %p5209_p11, %p5203_p9 }
  0xd8   : > { %5213 = shalt.err (!%p5210_p12)
}
  0xd9   : > { %4730 = dma.hbm_to_vmem [thread:$0]  (!%p5935_p6), %s6917_s12, 16, %s806_s7, [#allocation21]  }
  0xda   : > { %s6918_s13 = sld [smem:[#allocation61_spill]] }
  0xe0   : > { %s5214_s18 = scalar_lea.hbm %s6918_s13, 16 }
  0xe1   : > { %p5215_p13 = scmp.ne.s32.totalorder %s6918_s13, %s5214_s18  ;;  %p5221_p3 = scmp.lt.u32.totalorder %s5214_s18, %s6918_s13 }
  0xe3   : > { %p5217_p0 = pnand %p5215_p13, %p5951_p8 }
  0xe5   : > { %p5218_p1 = pneg %p5217_p0 }
  0xe7   : > { %p5223_p2 = pnand %p5221_p3, %p5218_p1 }
  0xe9   : > { %5226 = shalt.err (!%p5223_p2)
}
  0xea   : > { %s5227_s26 = scalar_lea.vmem %s830_s29, 16  ;;  %s5234_s7 = scalar_lea.vmem %s830_s29, 32 }
  0xeb   : > { %p5228_p5 = scmp.ne.s32.totalorder %s830_s29, %s5227_s26  ;;  %p5235_p4 = scmp.lt.s32.totalorder %s830_s29, %s830_s29 }
  0xec   : > { %p5236_p10 = scmp.lt.s32.totalorder %s5234_s7, %s5227_s26 }
  0xed   : > { %p5230_p7 = pnand %p5228_p5, %p5951_p8 }
  0xee   : > { %p5237_p11 = por %p5236_p10, %p5235_p4 }
  0xef   : > { %p5231_p9 = pneg %p5230_p7 }
  0xf1   : > { %p5238_p12 = pnand %p5237_p11, %p5231_p9 }
  0xf3   : > { %5241 = shalt.err (!%p5238_p12)
}
  0xf4   : > { %4736 = dma.hbm_to_vmem [thread:$0]  (!%p5935_p6), %s6918_s13, 16, %s830_s29, [#allocation24]  }
  0xf5   : > { %s5731_s20 = smov [#allocation26]   ;;  %s5732_s1 = smov [#allocation29]  }
  0xf6   : > { %s853_s23 = sshll.u32 %s5731_s20, 4  ;;  %s877_s18 = sshll.u32 %s5732_s1, 4  ;;  %s854_s23 = int_to_ptr.vmem [resolvable:$true] %s853_s23  ;;  %s878_s18 = int_to_ptr.vmem [resolvable:$true] %s877_s18 }
  0xf7   : > { %s6919_s15 = sld [smem:[#allocation63_spill]] }
  0xfd   : > { %s5242_s4 = scalar_lea.hbm %s6919_s15, 16 }
  0xfe   : > { %p5243_p13 = scmp.ne.s32.totalorder %s6919_s15, %s5242_s4  ;;  %p5249_p3 = scmp.lt.u32.totalorder %s5242_s4, %s6919_s15 }
 0x100   : > { %p5245_p0 = pnand %p5243_p13, %p5951_p8 }
 0x102   : > { %p5246_p1 = pneg %p5245_p0 }
 0x104   : > { %p5251_p2 = pnand %p5249_p3, %p5246_p1 }
 0x106   : > { %5254 = shalt.err (!%p5251_p2)
}
 0x107   : > { %s5255_s29 = scalar_lea.vmem %s854_s23, 16  ;;  %s5262_s3 = scalar_lea.vmem %s854_s23, 32 }
 0x108   : > { %p5256_p5 = scmp.ne.s32.totalorder %s854_s23, %s5255_s29  ;;  %p5263_p4 = scmp.lt.s32.totalorder %s854_s23, %s854_s23 }
 0x109   : > { %p5264_p10 = scmp.lt.s32.totalorder %s5262_s3, %s5255_s29 }
 0x10a   : > { %p5258_p7 = pnand %p5256_p5, %p5951_p8 }
 0x10b   : > { %p5265_p11 = por %p5264_p10, %p5263_p4 }
 0x10c   : > { %p5259_p9 = pneg %p5258_p7 }
 0x10e   : > { %p5266_p12 = pnand %p5265_p11, %p5259_p9 }
 0x110   : > { %5269 = shalt.err (!%p5266_p12)
}
 0x111   : > { %4742 = dma.hbm_to_vmem [thread:$0]  (!%p5935_p6), %s6919_s15, 16, %s854_s23, [#allocation27]  }
 0x112   : > { %s6920_s17 = sld [smem:[#allocation65_spill]] }
 0x118   : > { %s5270_s4 = scalar_lea.hbm %s6920_s17, 16 }
 0x119   : > { %p5271_p13 = scmp.ne.s32.totalorder %s6920_s17, %s5270_s4  ;;  %p5277_p3 = scmp.lt.u32.totalorder %s5270_s4, %s6920_s17 }
 0x11b   : > { %p5273_p0 = pnand %p5271_p13, %p5951_p8 }
 0x11d   : > { %p5274_p1 = pneg %p5273_p0 }
 0x11f   : > { %p5279_p2 = pnand %p5277_p3, %p5274_p1 }
 0x121   : > { %5282 = shalt.err (!%p5279_p2)
}
 0x122   : > { %s5283_s29 = scalar_lea.vmem %s878_s18, 16  ;;  %s5290_s23 = scalar_lea.vmem %s878_s18, 32 }
 0x123   : > { %p5284_p5 = scmp.ne.s32.totalorder %s878_s18, %s5283_s29  ;;  %p5291_p4 = scmp.lt.s32.totalorder %s878_s18, %s878_s18 }
 0x124   : > { %p5292_p10 = scmp.lt.s32.totalorder %s5290_s23, %s5283_s29 }
 0x125   : > { %p5286_p7 = pnand %p5284_p5, %p5951_p8 }
 0x126   : > { %p5293_p11 = por %p5292_p10, %p5291_p4 }
 0x127   : > { %p5287_p9 = pneg %p5286_p7 }
 0x129   : > { %p5294_p12 = pnand %p5293_p11, %p5287_p9 }
 0x12b   : > { %5297 = shalt.err (!%p5294_p12)
}
 0x12c   : > { %4748 = dma.hbm_to_vmem [thread:$0]  (!%p5935_p6), %s6920_s17, 16, %s878_s18, [#allocation30]  }
 0x12d   : > { %s5733_s1 = smov [#allocation10]   ;;  %s5734_s21 = smov [#allocation13]  }
 0x12e   : > { %s721_s19 = sshll.u32 %s5733_s1, 4  ;;  %s745_s4 = sshll.u32 %s5734_s21, 4  ;;  %s722_s19 = int_to_ptr.vmem [resolvable:$true] %s721_s19  ;;  %s746_s4 = int_to_ptr.vmem [resolvable:$true] %s745_s4 }
 0x12f   : > { %s6921_s7 = sld [smem:[#allocation52_spill]] }
 0x135   : > { %s5298_s28 = scalar_lea.hbm %s6921_s7, 1024 }
 0x136   : > { %p5299_p13 = scmp.ne.s32.totalorder %s6921_s7, %s5298_s28  ;;  %p5305_p3 = scmp.lt.u32.totalorder %s5298_s28, %s6921_s7 }
 0x138   : > { %p5301_p0 = pnand %p5299_p13, %p5951_p8 }
 0x13a   : > { %p5302_p1 = pneg %p5301_p0 }
 0x13c   : > { %p5307_p2 = pnand %p5305_p3, %p5302_p1 }
 0x13e   : > { %5310 = shalt.err (!%p5307_p2)
}
 0x13f   : > { %s5311_s18 = scalar_lea.vmem %s722_s19, 1024  ;;  %p5319_p4 = scmp.lt.s32.totalorder %s722_s19, %s722_s19 }
 0x140   : > { %p5312_p5 = scmp.ne.s32.totalorder %s722_s19, %s5311_s18  ;;  %p5320_p10 = scmp.lt.s32.totalorder %s5311_s18, %s5311_s18 }
 0x142   : > { %p5314_p7 = pnand %p5312_p5, %p5951_p8  ;;  %p5321_p11 = por %p5320_p10, %p5319_p4 }
 0x144   : > { %p5315_p9 = pneg %p5314_p7 }
 0x146   : > { %p5322_p12 = pnand %p5321_p11, %p5315_p9 }
 0x148   : > { %5325 = shalt.err (!%p5322_p12)
}
 0x149   : > { %s6922_s20 = smov 4   ;;  %s6923_s1 = smov 64  }
 0x14a   : > { %4709 = dma.hbm_to_vmem [thread:$0]  (!%p5935_p6), %s6921_s7, 1024, %s722_s19, [#allocation9], %s6923_s1, %s6923_s1, %s6922_s20  }
 0x14b   : > { %s6924_s28 = sld [smem:[#allocation54_spill]] }
 0x151   : > { %s5326_s29 = scalar_lea.hbm %s6924_s28, 1024 }
 0x152   : > { %p5327_p13 = scmp.ne.s32.totalorder %s6924_s28, %s5326_s29  ;;  %p5333_p3 = scmp.lt.u32.totalorder %s5326_s29, %s6924_s28 }
 0x154   : > { %p5329_p0 = pnand %p5327_p13, %p5951_p8 }
 0x156   : > { %p5330_p1 = pneg %p5329_p0 }
 0x158   : > { %p5335_p2 = pnand %p5333_p3, %p5330_p1 }
 0x15a   : > { %5338 = shalt.err (!%p5335_p2)
}
 0x15b   : > { %s5339_s6 = scalar_lea.vmem %s746_s4, 1024  ;;  %p5347_p4 = scmp.lt.s32.totalorder %s746_s4, %s746_s4 }
 0x15c   : > { %p5340_p5 = scmp.ne.s32.totalorder %s746_s4, %s5339_s6  ;;  %p5348_p10 = scmp.lt.s32.totalorder %s5339_s6, %s5339_s6 }
 0x15e   : > { %p5342_p7 = pnand %p5340_p5, %p5951_p8  ;;  %p5349_p11 = por %p5348_p10, %p5347_p4 }
 0x160   : > { %p5343_p9 = pneg %p5342_p7 }
 0x162   : > { %p5350_p12 = pnand %p5349_p11, %p5343_p9 }
 0x164   : > { %5353 = shalt.err (!%p5350_p12)
}
 0x165   : > { %4715 = dma.hbm_to_vmem [thread:$0]  (!%p5935_p6), %s6924_s28, 1024, %s746_s4, [#allocation12], %s6923_s1, %s6923_s1, %s6922_s20  }
 0x166   : > { %s5735_s21 = smov [#allocation16]   ;;  %s5736_s26 = smov [#allocation19]  }
 0x167   : > { %s769_s25 = sshll.u32 %s5735_s21, 4  ;;  %s794_s29 = sshll.u32 %s5736_s26, 4  ;;  %s770_s25 = int_to_ptr.vmem [resolvable:$true] %s769_s25  ;;  %s795_s29 = int_to_ptr.vmem [resolvable:$true] %s794_s29 }
 0x168   : > { %s6925_s18 = sld [smem:[#allocation56_spill]] }
 0x16e   : > { %s5354_s6 = scalar_lea.hbm %s6925_s18, 1024 }
 0x16f   : > { %p5355_p13 = scmp.ne.s32.totalorder %s6925_s18, %s5354_s6  ;;  %p5361_p3 = scmp.lt.u32.totalorder %s5354_s6, %s6925_s18 }
 0x171   : > { %p5357_p0 = pnand %p5355_p13, %p5951_p8 }
 0x173   : > { %p5358_p1 = pneg %p5357_p0 }
 0x175   : > { %p5363_p2 = pnand %p5361_p3, %p5358_p1 }
 0x177   : > { %5366 = shalt.err (!%p5363_p2)
}
 0x178   : > { %s5367_s4 = scalar_lea.vmem %s770_s25, 1024  ;;  %p5375_p4 = scmp.lt.s32.totalorder %s770_s25, %s770_s25 }
 0x179   : > { %p5368_p5 = scmp.ne.s32.totalorder %s770_s25, %s5367_s4  ;;  %p5376_p10 = scmp.lt.s32.totalorder %s5367_s4, %s5367_s4 }
 0x17b   : > { %p5370_p7 = pnand %p5368_p5, %p5951_p8  ;;  %p5377_p11 = por %p5376_p10, %p5375_p4 }
 0x17d   : > { %p5371_p9 = pneg %p5370_p7 }
 0x17f   : > { %p5378_p12 = pnand %p5377_p11, %p5371_p9 }
 0x181   : > { %5381 = shalt.err (!%p5378_p12)
}
 0x182   : > { %4721 = dma.hbm_to_vmem [thread:$0]  (!%p5935_p6), %s6925_s18, 1024, %s770_s25, [#allocation15], %s6923_s1, %s6923_s1, %s6922_s20  }
 0x183   : > { %s6926_s21 = sld [smem:[#allocation58_spill]] }
 0x189   : > { %s5382_s26 = scalar_lea.hbm %s6926_s21, 16 }
 0x18a   : > { %p5383_p13 = scmp.ne.s32.totalorder %s6926_s21, %s5382_s26  ;;  %p5389_p3 = scmp.lt.u32.totalorder %s5382_s26, %s6926_s21 }
 0x18c   : > { %p5385_p0 = pnand %p5383_p13, %p5951_p8 }
 0x18e   : > { %p5386_p1 = pneg %p5385_p0 }
 0x190   : > { %p5391_p2 = pnand %p5389_p3, %p5386_p1 }
 0x192   : > { %5394 = shalt.err (!%p5391_p2)
}
 0x193   : > { %s5395_s4 = scalar_lea.vmem %s795_s29, 16  ;;  %s5402_s25 = scalar_lea.vmem %s795_s29, 32 }
 0x194   : > { %p5396_p5 = scmp.ne.s32.totalorder %s795_s29, %s5395_s4  ;;  %p5403_p4 = scmp.lt.s32.totalorder %s795_s29, %s795_s29 }
 0x195   : > { %p5404_p10 = scmp.lt.s32.totalorder %s5402_s25, %s5395_s4 }
 0x196   : > { %p5398_p7 = pnand %p5396_p5, %p5951_p8 }
 0x197   : > { %p5405_p11 = por %p5404_p10, %p5403_p4 }
 0x198   : > { %p5399_p9 = pneg %p5398_p7 }
 0x19a   : > { %p5406_p12 = pnand %p5405_p11, %p5399_p9 }
 0x19c   : > { %5409 = shalt.err (!%p5406_p12)
}
 0x19d   : > { %4727 = dma.hbm_to_vmem [thread:$0]  (!%p5935_p6), %s6926_s21, 16, %s795_s29, [#allocation18]  }
 0x19e   : > { %s5737_s7 = smov [#allocation22]   ;;  %s5738_s26 = smov [#allocation25]  }
 0x19f   : > { %s815_s19 = sshll.u32 %s5737_s7, 4  ;;  %s839_s23 = sshll.u32 %s5738_s26, 4  ;;  %s816_s19 = int_to_ptr.vmem [resolvable:$true] %s815_s19  ;;  %s840_s23 = int_to_ptr.vmem [resolvable:$true] %s839_s23 }
 0x1a0   : > { %s6927_s12 = sld [smem:[#allocation60_spill]] }
 0x1a6   : > { %s5410_s17 = scalar_lea.hbm %s6927_s12, 1024 }
 0x1a7   : > { %p5411_p13 = scmp.ne.s32.totalorder %s6927_s12, %s5410_s17  ;;  %p5417_p3 = scmp.lt.u32.totalorder %s5410_s17, %s6927_s12 }
 0x1a9   : > { %p5413_p0 = pnand %p5411_p13, %p5951_p8 }
 0x1ab   : > { %p5414_p1 = pneg %p5413_p0 }
 0x1ad   : > { %p5419_p2 = pnand %p5417_p3, %p5414_p1 }
 0x1af   : > { %5422 = shalt.err (!%p5419_p2)
}
 0x1b0   : > { %s5423_s29 = scalar_lea.vmem %s816_s19, 1024  ;;  %p5431_p4 = scmp.lt.s32.totalorder %s816_s19, %s816_s19 }
 0x1b1   : > { %p5424_p5 = scmp.ne.s32.totalorder %s816_s19, %s5423_s29  ;;  %p5432_p10 = scmp.lt.s32.totalorder %s5423_s29, %s5423_s29 }
 0x1b3   : > { %p5426_p7 = pnand %p5424_p5, %p5951_p8  ;;  %p5433_p11 = por %p5432_p10, %p5431_p4 }
 0x1b5   : > { %p5427_p9 = pneg %p5426_p7 }
 0x1b7   : > { %p5434_p12 = pnand %p5433_p11, %p5427_p9 }
 0x1b9   : > { %5437 = shalt.err (!%p5434_p12)
}
 0x1ba   : > { %4733 = dma.hbm_to_vmem [thread:$0]  (!%p5935_p6), %s6927_s12, 1024, %s816_s19, [#allocation21], %s6923_s1, %s6923_s1, %s6922_s20  }
 0x1bb   : > { %s6928_s14 = sld [smem:[#allocation62_spill]] }
 0x1c1   : > { %s5438_s26 = scalar_lea.hbm %s6928_s14, 1024 }
 0x1c2   : > { %p5439_p13 = scmp.ne.s32.totalorder %s6928_s14, %s5438_s26  ;;  %p5445_p3 = scmp.lt.u32.totalorder %s5438_s26, %s6928_s14 }
 0x1c4   : > { %p5441_p0 = pnand %p5439_p13, %p5951_p8 }
 0x1c6   : > { %p5442_p1 = pneg %p5441_p0 }
 0x1c8   : > { %p5447_p2 = pnand %p5445_p3, %p5442_p1 }
 0x1ca   : > { %5450 = shalt.err (!%p5447_p2)
}
 0x1cb   : > { %s5451_s13 = scalar_lea.vmem %s840_s23, 1024  ;;  %p5459_p4 = scmp.lt.s32.totalorder %s840_s23, %s840_s23 }
 0x1cc   : > { %p5452_p5 = scmp.ne.s32.totalorder %s840_s23, %s5451_s13  ;;  %p5460_p10 = scmp.lt.s32.totalorder %s5451_s13, %s5451_s13 }
 0x1ce   : > { %p5454_p7 = pnand %p5452_p5, %p5951_p8  ;;  %p5461_p11 = por %p5460_p10, %p5459_p4 }
 0x1d0   : > { %p5455_p9 = pneg %p5454_p7 }
 0x1d2   : > { %p5462_p12 = pnand %p5461_p11, %p5455_p9 }
 0x1d4   : > { %5465 = shalt.err (!%p5462_p12)
}
 0x1d5   : > { %4739 = dma.hbm_to_vmem [thread:$0]  (!%p5935_p6), %s6928_s14, 1024, %s840_s23, [#allocation24], %s6923_s1, %s6923_s1, %s6922_s20  }
 0x1d6   : > { %s5739_s18 = smov [#allocation28]   ;;  %s5740_s15 = smov [#allocation31]  }
 0x1d7   : > { %s863_s17 = sshll.u32 %s5739_s18, 4  ;;  %s899_s7 = sshll.u32 %s5740_s15, 4  ;;  %s864_s17 = int_to_ptr.vmem [resolvable:$true] %s863_s17  ;;  %s900_s7 = int_to_ptr.vmem [resolvable:$true] %s899_s7 }
 0x1d8   : > { %s6929_s16 = sld [smem:[#allocation64_spill]] }
 0x1de   : > { %s5466_s6 = scalar_lea.hbm %s6929_s16, 1024 }
 0x1df   : > { %p5467_p13 = scmp.ne.s32.totalorder %s6929_s16, %s5466_s6  ;;  %p5473_p3 = scmp.lt.u32.totalorder %s5466_s6, %s6929_s16 }
 0x1e1   : > { %p5469_p0 = pnand %p5467_p13, %p5951_p8 }
 0x1e3   : > { %p5470_p1 = pneg %p5469_p0 }
 0x1e5   : > { %p5475_p2 = pnand %p5473_p3, %p5470_p1 }
 0x1e7   : > { %5478 = shalt.err (!%p5475_p2)
}
 0x1e8   : > { %s5479_s23 = scalar_lea.vmem %s864_s17, 1024  ;;  %p5487_p4 = scmp.lt.s32.totalorder %s864_s17, %s864_s17 }
 0x1e9   : > { %p5480_p5 = scmp.ne.s32.totalorder %s864_s17, %s5479_s23  ;;  %p5488_p10 = scmp.lt.s32.totalorder %s5479_s23, %s5479_s23 }
 0x1eb   : > { %p5482_p7 = pnand %p5480_p5, %p5951_p8  ;;  %p5489_p11 = por %p5488_p10, %p5487_p4 }
 0x1ed   : > { %p5483_p9 = pneg %p5482_p7 }
 0x1ef   : > { %p5490_p12 = pnand %p5489_p11, %p5483_p9 }
 0x1f1   : > { %5493 = shalt.err (!%p5490_p12)
}
 0x1f2   : > { %4745 = dma.hbm_to_vmem [thread:$0]  (!%p5935_p6), %s6929_s16, 1024, %s864_s17, [#allocation27], %s6923_s1, %s6923_s1, %s6922_s20  }
 0x1f3   : > { %s6930_s22 = sld [smem:[#allocation70_spill]] }
 0x1f9   : > { %s5494_s3 = scalar_lea.hbm %s6930_s22, 4096 }
 0x1fa   : > { %p5495_p13 = scmp.ne.s32.totalorder %s6930_s22, %s5494_s3  ;;  %p5501_p3 = scmp.lt.u32.totalorder %s5494_s3, %s6930_s22 }
 0x1fc   : > { %p5497_p0 = pnand %p5495_p13, %p5951_p8 }
 0x1fe   : > { %p5498_p1 = pneg %p5497_p0 }
 0x200   : > { %p5503_p2 = pnand %p5501_p3, %p5498_p1 }
 0x202   : > { %5506 = shalt.err (!%p5503_p2)
}
 0x203   : > { %s5507_s19 = scalar_lea.vmem %s900_s7, 4096  ;;  %p5515_p4 = scmp.lt.s32.totalorder %s900_s7, %s900_s7 }
 0x204   : > { %p5508_p5 = scmp.ne.s32.totalorder %s900_s7, %s5507_s19  ;;  %p5516_p10 = scmp.lt.s32.totalorder %s5507_s19, %s5507_s19 }
 0x206   : > { %p5510_p7 = pnand %p5508_p5, %p5951_p8  ;;  %p5517_p11 = por %p5516_p10, %p5515_p4 }
 0x208   : > { %p5511_p9 = pneg %p5510_p7 }
 0x20a   : > { %p5518_p12 = pnand %p5517_p11, %p5511_p9 }
 0x20c   : > { %5521 = shalt.err (!%p5518_p12)
}
 0x20d   : > { %s5741_s17 = smov 256   ;;  %s5742_s23 = smov 16  }
 0x20e   : > { %4751 = dma.hbm_to_vmem [thread:$0]  (!%p5935_p6), %s6930_s22, 4096, %s900_s7, [#allocation30], %s5741_s17, %s5741_s17, %s5742_s23  }
 0x20f   : > { %s5743_s15 = smov [#allocation32]   ;;  %s6931_s24 = sld [smem:[#allocation72_spill]] }
 0x210   : > { %s915_s26 = sshll.u32 %s5743_s15, 4  ;;  %s916_s26 = int_to_ptr.vmem [resolvable:$true] %s915_s26 }
 0x215   : > { %s5522_s4 = scalar_lea.hbm %s6931_s24, 4096 }
 0x216   : > { %p5523_p13 = scmp.ne.s32.totalorder %s6931_s24, %s5522_s4  ;;  %p5529_p3 = scmp.lt.u32.totalorder %s5522_s4, %s6931_s24 }
 0x218   : > { %p5525_p0 = pnand %p5523_p13, %p5951_p8 }
 0x21a   : > { %p5526_p1 = pneg %p5525_p0 }
 0x21c   : > { %p5531_p2 = pnand %p5529_p3, %p5526_p1 }
 0x21e   : > { %5534 = shalt.err (!%p5531_p2)
}
 0x21f   : > { %s5535_s7 = scalar_lea.vmem %s916_s26, 4096  ;;  %p5543_p4 = scmp.lt.s32.totalorder %s916_s26, %s916_s26 }
 0x220   : > { %p5536_p5 = scmp.ne.s32.totalorder %s916_s26, %s5535_s7  ;;  %p5544_p10 = scmp.lt.s32.totalorder %s5535_s7, %s5535_s7 }
 0x222   : > { %p5538_p7 = pnand %p5536_p5, %p5951_p8  ;;  %p5545_p11 = por %p5544_p10, %p5543_p4 }
 0x224   : > { %p5539_p9 = pneg %p5538_p7 }
 0x226   : > { %p5546_p12 = pnand %p5545_p11, %p5539_p9 }
 0x228   : > { %5549 = shalt.err (!%p5546_p12)
}
 0x229   : > { %4754 = dma.hbm_to_vmem [thread:$0]  (!%p5935_p6), %s6931_s24, 4096, %s916_s26, [#allocation33], %s6923_s1, %s6923_s1, %s6922_s20  }
 0x22a   : > { %s4008_s2 = sadd.s32 4294967294, %s5720_s30   ;;  %s6316_s11 = sadd.s32 1, %s5720_s30  }
 0x22b   : > { %s60_s23 = ssub.s32 %s5720_s30, %s6316_s11  ;;  %s63_s29 = sadd.s32 1, %s5716_s9 }
 0x22c   : > { %p61_p8 = scmp.eq.s32.totalorder %s60_s23, 0  ;;  %p70_p13 = scmp.ne.s32.totalorder %s5716_s9, %s5712_s5 }
 0x22d   : > { %p71_p0 = scmp.eq.s32.totalorder %s5720_s30, 0  ;;  %p76_p1 = scmp.ne.s32.totalorder %s5712_s5, %s5708_s8 }
 0x22e   : > { %s6327_s18 = scalar_select %p61_p8, %s5716_s9, %s63_s29  }
 0x22f   : > { %p6329_p3 = por %p71_p0, %p70_p13  ;;  %p6933_p2 = scmp.eq.s32.totalorder %s5919_s10, 0 }
 0x230   : > { %p672_p5 = scmp.eq.s32.totalorder %s5919_s10, 1  ;;  %p678_p7 = scmp.eq.s32.totalorder %s4008_s2, 1 }
 0x231   : > { %p6335_p6 = por %p6933_p2, %p76_p1  ;;  %p4784_p9 = scmp.lt.s32.totalorder %s5720_s30, 2 }
 0x232   : > { %s938_s1 = sand.u32 1, %s5716_s9   ;;  %p6342_p4 = por %p672_p5, %p70_p13 }
 0x233   : > { %s6934_s20 = scalar_select %p6335_p6, 1, 0 }
 0x234   : > { %s6935_s26 = scalar_select %p6342_p4, 1, 0 }
 0x235   : > { %p6346_p10 = por %p678_p7, %p76_p1  ;;  %s6350_s6 = sshll.u32 %s938_s1, 3 }
 0x236   : > { %s4030_s4 = sshll.u32 %s5720_s30, 7  ;;  %s6937_s19 = sld [smem:[#allocation48_spill]] }
 0x237   : > { %s6936_s3 = scalar_select %p6346_p10, 1, 0 }
 0x238   : > { %s942_s12 = scalar_lea.vmem [#allocation2], %s6350_s6  ;;  %p6363_p11 = pnand %p4784_p9, %p6329_p3 }
 0x239   : > { %s949_s17 = sshll.u32 %s942_s12, 4  ;;  %s6939_s14 = sld [smem:[#allocation49_spill]]  ;;  %s6359_s17 = int_to_ptr.vmem [resolvable:$true] %s949_s17 }
 0x23a   : > { %s956_s13 = sand.u32 1, %s5720_s30   ;;  %s939_s16 = scalar_lea.sflag [#allocation3], %s938_s1 }
 0x23b   : > { %p5552_p8 = pneg %p6363_p11 }
 0x23c   : > { %s6356_s7 = scalar_lea.hbm %s6937_s19, %s4030_s4  ;;  %s5555_s22 = scalar_lea.hbm %s6937_s19, 256 }
 0x23d   : > { %s5550_s21 = scalar_lea.hbm %s6356_s7, 128  ;;  %p5556_p1 = scmp.lt.u32.totalorder %s6356_s7, %s6937_s19 }
 0x23e   : > { %p5551_p12 = scmp.ne.s32.totalorder %s6356_s7, %s5550_s21  ;;  %p5557_p3 = scmp.lt.u32.totalorder %s5555_s22, %s5550_s21 }
 0x23f   : > { %s6370_s25 = scalar_lea.hbm %s6939_s14, %s4030_s4  ;;  %p5559_p5 = scmp.lt.u32.totalorder %s5550_s21, %s6356_s7 }
 0x240   : > { %p5553_p13 = pnand %p5552_p8, %p5551_p12  ;;  %p5558_p2 = por %p5557_p3, %p5556_p1 }
 0x242   : > { %p5554_p0 = pneg %p5553_p13  ;;  %p5560_p7 = por %p5559_p5, %p5558_p2 }
 0x244   : > { %p5561_p9 = pnand %p5560_p7, %p5554_p0 }
 0x246   : > { %5564 = shalt.err (!%p5561_p9)
}
 0x247   : > { %s5565_s1 = scalar_lea.vmem %s6359_s17, 128  ;;  %s5744_s4 = smov [#allocation2]  }
 0x248   : > { %p5566_p12 = scmp.ne.s32.totalorder %s6359_s17, %s5565_s1  ;;  %s5570_s29 = sshll.u32 %s5744_s4, 4  ;;  %s5571_s29 = int_to_ptr.vmem [resolvable:$false] %s5570_s29 }
 0x249   : > { %s5572_s24 = scalar_lea.vmem %s5571_s29, 256  ;;  %p5573_p4 = scmp.lt.s32.totalorder %s6359_s17, %s5571_s29 }
 0x24a   : > { %p5568_p13 = pnand %p5566_p12, %p5552_p8  ;;  %p5574_p1 = scmp.lt.s32.totalorder %s5572_s24, %s5565_s1 }
 0x24c   : > { %p5569_p10 = pneg %p5568_p13  ;;  %p5575_p3 = por %p5574_p1, %p5573_p4 }
 0x24e   : > { %p5576_p2 = pnand %p5575_p3, %p5569_p10 }
 0x250   : > { %5579 = shalt.err (!%p5576_p2)
}
 0x251   : > { %4758 = dma.hbm_to_vmem [thread:$0]  (!%p6363_p11), %s6356_s7, 128, %s6359_s17, %s939_s16  }
 0x252   : > { %s960_s22 = scalar_lea.vmem [#allocation5], %s6350_s6  ;;  %s957_s15 = scalar_lea.sflag [#allocation6], %s956_s13 }
 0x253   : > { %s967_s21 = sshll.u32 %s960_s22, 4  ;;  %s5580_s12 = scalar_lea.hbm %s6370_s25, 128  ;;  %s968_s21 = int_to_ptr.vmem [resolvable:$true] %s967_s21 }
 0x254   : > { %p5581_p4 = scmp.ne.s32.totalorder %s6370_s25, %s5580_s12  ;;  %s5585_s4 = scalar_lea.hbm %s6939_s14, 256 }
 0x255   : > { %p5586_p5 = scmp.lt.u32.totalorder %s6370_s25, %s6939_s14  ;;  %p5587_p7 = scmp.lt.u32.totalorder %s5585_s4, %s5580_s12 }
 0x256   : > { %p5583_p10 = pnand %p5581_p4, %p5552_p8  ;;  %p5589_p12 = scmp.lt.u32.totalorder %s5580_s12, %s6370_s25 }
 0x257   : > { %p5588_p9 = por %p5587_p7, %p5586_p5 }
 0x258   : > { %p5584_p0 = pneg %p5583_p10 }
 0x259   : > { %p5590_p13 = por %p5589_p12, %p5588_p9 }
 0x25b   : > { %p5591_p1 = pnand %p5590_p13, %p5584_p0 }
 0x25d   : > { %5594 = shalt.err (!%p5591_p1)
}
 0x25e   : > { %s5595_s16 = scalar_lea.vmem %s968_s21, 128  ;;  %s5745_s6 = smov [#allocation5]  }
 0x25f   : > { %p5596_p3 = scmp.ne.s32.totalorder %s968_s21, %s5595_s16  ;;  %s5600_s7 = sshll.u32 %s5745_s6, 4  ;;  %s5601_s7 = int_to_ptr.vmem [resolvable:$false] %s5600_s7 }
 0x260   : > { %s5602_s17 = scalar_lea.vmem %s5601_s7, 256  ;;  %p5603_p10 = scmp.lt.s32.totalorder %s968_s21, %s5601_s7 }
 0x261   : > { %p5598_p2 = pnand %p5596_p3, %p5552_p8  ;;  %p5604_p6 = scmp.lt.s32.totalorder %s5602_s17, %s5595_s16 }
 0x263   : > { %p5599_p4 = pneg %p5598_p2  ;;  %p5605_p5 = por %p5604_p6, %p5603_p10 }
 0x265   : > { %p5606_p7 = pnand %p5605_p5, %p5599_p4 }
 0x267   : > { %5609 = shalt.err (!%p5606_p7)
}
 0x268   : > { %4761 = dma.hbm_to_vmem [thread:$0]  (!%p6363_p11), %s6370_s25, 128, %s968_s21, %s957_s15  }
 0x269   : > { %p6940_p0 = scmp.ne.s32.totalorder %s6909_s0, 0 }
 0x26a   : > { %s6423_s13 = sand.u32 (!%p6940_p0), 1, %s5712_s5   ;;  %p6941_p6 = scmp.ne.s32.totalorder (!%p6940_p0), %s6934_s20, 0 }
 0x26b   : > { %976 = sbr.rel (%p6940_p0) target bundleno = 4936 (0x1348), region = 132  ;;  %s6426_s22 = sshll.u32 (!%p6940_p0), %s6423_s13, 3 }
 0x26c   : > { %s979_s12 = scalar_lea.sflag (!%p6940_p0), [#allocation3], %s6423_s13  ;;  %s982_s23 = scalar_lea.vmem (!%p6940_p0), [#allocation2], %s6426_s22 }
 0x272   : > { %5655 = dma.done.wait (%p6941_p6), %s979_s12, 128  }
 0x273   : > { %5657 = vsyncadd (%p6941_p6), %s979_s12, 4294967168  ;;  %s987_s0 = sand.u32 1, %s5919_s10   ;;  %s991_s25 = scalar_lea.vmem [#allocation5], %s6426_s22 }
 0x274   : > { %s988_s2 = scalar_lea.sflag [#allocation6], %s987_s0 }
 0x275   : > { %5659 = dma.done.wait (%p6941_p6), %s988_s2, 128  }
 0x276   : > { %5661 = vsyncadd (%p6941_p6), %s988_s2, 4294967168  ;;  %p6942_p11 = scmp.eq.s32.totalorder %s5919_s10, 0 }
 0x278   : > { %5663 = dma.done.wait (%p6942_p11), [#allocation6], 1024   ;;  %p6943_p8 = pmov %p6942_p11 }
 0x27a   : > { %5665 = vsyncadd (%p6943_p8), [#allocation6], 4294966272  ;;  %p6944_p9 = pmov %p6943_p8 }
 0x27b   : > { %p6945_p12 = pmov %p6943_p8 }
 0x27c   : > { %5667 = dma.done.wait (%p6944_p9), [#allocation9], 1040  }
 0x27d   : > { %5669 = vsyncadd (%p6945_p12), [#allocation9], 4294966256  ;;  %p6946_p13 = pmov %p6943_p8 }
 0x27e   : > { %p6947_p1 = pmov %p6943_p8 }
 0x27f   : > { %5671 = dma.done.wait (%p6946_p13), [#allocation12], 1040  }
 0x280   : > { %5673 = vsyncadd (%p6947_p1), [#allocation12], 4294966256  ;;  %p6948_p3 = pmov %p6947_p1 }
 0x281   : > { %p6949_p2 = pmov %p6947_p1 }
 0x282   : > { %5675 = dma.done.wait (%p6948_p3), [#allocation15], 1040  }
 0x283   : > { %5677 = vsyncadd (%p6949_p2), [#allocation15], 4294966256  ;;  %p6950_p4 = pmov %p6947_p1 }
 0x284   : > { %p6951_p10 = pmov %p6947_p1 }
 0x285   : > { %5679 = dma.done.wait (%p6950_p4), [#allocation18], 32  }
 0x286   : > { %5681 = vsyncadd (%p6951_p10), [#allocation18], 4294967264  ;;  %p6952_p5 = pmov %p6947_p1 }
 0x287   : > { %p6953_p7 = pmov %p6947_p1 }
 0x288   : > { %5683 = dma.done.wait (%p6952_p5), [#allocation21], 1040  }
 0x289   : > { %5685 = vsyncadd (%p6953_p7), [#allocation21], 4294966256  ;;  %p6954_p0 = pmov %p6947_p1 }
 0x28b   : > { %5687 = dma.done.wait (%p6954_p0), [#allocation24], 1040   ;;  %p6955_p6 = pmov %p6954_p0 }
 0x28c   : > { %p6956_p11 = pmov %p6954_p0 }
 0x28d   : > { %5689 = vsyncadd (%p6955_p6), [#allocation24], 4294966256 }
 0x28e   : > { %5691 = dma.done.wait (%p6956_p11), [#allocation27], 1040   ;;  %p6957_p8 = pmov %p6954_p0 }
 0x28f   : > { %p6958_p9 = pmov %p6954_p0 }
 0x290   : > { %5693 = vsyncadd (%p6957_p8), [#allocation27], 4294966256 }
 0x291   : > { %5695 = dma.done.wait (%p6958_p9), [#allocation30], 4112   ;;  %p6959_p12 = pmov %p6954_p0 }
 0x292   : > { %p6960_p13 = pmov %p6954_p0 }
 0x293   : > { %5697 = vsyncadd (%p6959_p12), [#allocation30], 4294963184 }
 0x294   : > { %5699 = dma.done.wait (%p6960_p13), [#allocation33], 4096   ;;  %p6961_p1 = pmov %p6954_p0 }
 0x295   : > { %v5746_v0 = vmov 0.0   ;;  %vm5747_vm0 = vmmov 0   ;;  %v4864_v1 = vld [vmem:[#allocation10] sm:$0xff]   ;;  %v4866_v3 = vld [vmem:[#allocation10 + $0x8] sm:$0xff]   ;;  %v4868_v5 = vld [vmem:[#allocation10 + $0x10] sm:$0xff]   ;;  %vm1527_vm1 = vcmask 261120   ;;  %v1144_v58 = vlaneseq }
 0x296   : > { %5701 = vsyncadd (%p6961_p1), [#allocation33], 4294963200  ;;  %4386 = vmatprep.subr.bf16.mxu1 %v5746_v0  ;;  %4366 = vmatprep.subr.bf16.mxu0 %v5746_v0  ;;  %v4865_v2 = vld [vmem:[#allocation7] sm:$0xff]   ;;  %v4867_v4 = vld [vmem:[#allocation7 + $0x8] sm:$0xff]   ;;  %s5748_s20 = smov 64   ;;  %s5749_s21 = smov 96  }
 0x297   : > { %4402 = vmatprep.mubr.msk.bf16.mxu1 %vm5747_vm0, %v5746_v0  ;;  %4382 = vmatprep.mubr.msk.bf16.mxu0 %vm5747_vm0, %v5746_v0  ;;  %v4869_v6 = vld [vmem:[#allocation7 + $0x10] sm:$0xff]   ;;  %v4870_v7 = vld [vmem:[#allocation10 + $0x18] sm:$0xff]   ;;  %v4872_v9 = vld [vmem:[#allocation10 + $0x20] sm:$0xff]   ;;  %s5750_s15 = smov 32   ;;  %v6553_v59 = vshrl.u32 %v1144_v58, 7  ;;  %v1147_v60 = vand.u32 127, %v1144_v58 }
 0x298   : > { %4387 = vmatpush3.bf16.msra.mxu1 %v4864_v1  ;;  %4367 = vmatpush3.bf16.msra.mxu0 %v4865_v2  ;;  %v4871_v8 = vld [vmem:[#allocation7 + $0x18] sm:$0xff]   ;;  %v4873_v10 = vld [vmem:[#allocation7 + $0x20] sm:$0xff]   ;;  %v4874_v11 = vld [vmem:[#allocation10 + $0x28] sm:$0xff]   ;;  %vm1712_vm3 = vcmask 64512   ;;  %vm1764_vm4 = vcmask 1043456   ;;  %vm1959_vm5 = vcmask 523264  }
 0x299   : > { %4388 = vmatprep.subr.bf16.mxu1 %v5746_v0  ;;  %4368 = vmatprep.subr.bf16.mxu0 %v5746_v0  ;;  %v4875_v12 = vld [vmem:[#allocation7 + $0x28] sm:$0xff]   ;;  %v4876_v13 = vld [vmem:[#allocation10 + $0x30] sm:$0xff]   ;;  %v4878_v15 = vld [vmem:[#allocation10 + $0x38] sm:$0xff]   ;;  %vm1148_vm2 = vcmp.gt.s32.totalorder %v1147_v60, %v6553_v59  ;;  %vm1961_vm6 = vcmask 785408   ;;  %s6962_s29 = sld [smem:[#allocation66_spill]]  ;;  %s6963_s6 = sld [smem:[#allocation67_spill]] }
 0x29a   : > { %v4877_v14 = vld [vmem:[#allocation7 + $0x30] sm:$0xff]   ;;  %v6500_v16 = vld [vmem:[%s982_s23] sm:$0xff]  ;;  %v4879_v17 = vld [vmem:[#allocation7 + $0x38] sm:$0xff]   ;;  %v1149_v61 = vsel %vm1148_vm2, -1e+30, %v5746_v0  ;;  %s6964_s17 = sld [smem:[#allocation68_spill]] }
 0x29b   : > { %v6506_v18 = vpack.c.bf16 %v6500_v16, %v6500_v16  ;;  %v4064_v19 = vld [vmem:[#allocation11] ss:$0 sm:$0xff]  ;;  %v4055_v20 = vld [vmem:[#allocation8] ss:$0 sm:$0xff]  ;;  %v4880_v35 = vld [vmem:[#allocation13] sm:$0xff]   ;;  %s6965_s0 = sld [smem:[#allocation69_spill]] }
 0x29c   : > { %4389 = vmatpush3.bf16.msra.mxu1 %v4866_v3  ;;  %4369 = vmatpush3.bf16.msra.mxu0 %v4867_v4  ;;  %v4881_v36 = vld [vmem:[#allocation13 + $0x8] sm:$0xff]   ;;  %v4882_v37 = vld [vmem:[#allocation13 + $0x10] sm:$0xff]   ;;  %v4883_v38 = vld [vmem:[#allocation13 + $0x18] sm:$0xff]   ;;  %s6966_s1 = sld [smem:[#allocation71_spill]]  ;;  %s6967_s16 = sld [smem:[#allocation73_spill]] }
 0x29d   : > { %4390 = vmatprep.subr.bf16.mxu1 %v5746_v0  ;;  %4370 = vmatprep.subr.bf16.mxu0 %v5746_v0  ;;  %v4884_v39 = vld [vmem:[#allocation13 + $0x20] sm:$0xff]   ;;  %v4885_v40 = vld [vmem:[#allocation13 + $0x28] sm:$0xff]   ;;  %v4886_v44 = vld [vmem:[#allocation13 + $0x30] sm:$0xff]   ;;  %s4215_s12 = sshll.u32 %s5919_s10, 7  ;;  %s1140_s23 = scalar_lea.vmem [#allocation34], %s6426_s22 }
 0x29e   : > { %v4887_v49 = vld [vmem:[#allocation13 + $0x38] sm:$0xff]   ;;  %s3731_s24 = scalar_lea.sflag [#allocation4], %s6423_s13  ;;  %p6971_p2 = scmp.ne.s32.totalorder %s6935_s26, 0 }
 0x29f   : > { %s5752_s10 = smov [#allocation34]  }
 0x2a0   : > { %4391 = vmatpush3.bf16.msra.mxu1 %v4868_v5  ;;  %4371 = vmatpush3.bf16.msra.mxu0 %v4869_v6  ;;  %s5614_s22 = sshll.u32 %s5752_s10, 4  ;;  %s5615_s22 = int_to_ptr.vmem [resolvable:$false] %s5614_s22 }
 0x2a1   : > { %4392 = vmatprep.subr.bf16.mxu1 %v5746_v0  ;;  %4372 = vmatprep.subr.bf16.mxu0 %v5746_v0 }
 0x2a4   : > { %4393 = vmatpush3.bf16.msra.mxu1 %v4870_v7  ;;  %4373 = vmatpush3.bf16.msra.mxu0 %v4871_v8  ;;  %v4073_v8 = vld [vmem:[#allocation14] ss:$0 sm:$0xff] }
 0x2a5   : > { %4394 = vmatprep.subr.bf16.mxu1 %v5746_v0  ;;  %4374 = vmatprep.subr.bf16.mxu0 %v5746_v0 }
 0x2a8   : > { %4395 = vmatpush3.bf16.msra.mxu1 %v4872_v9  ;;  %4375 = vmatpush3.bf16.msra.mxu0 %v4873_v10 }
 0x2a9   : > { %4396 = vmatprep.subr.bf16.mxu1 %v5746_v0  ;;  %4376 = vmatprep.subr.bf16.mxu0 %v5746_v0 }
 0x2ac   : > { %4397 = vmatpush3.bf16.msra.mxu1 %v4874_v11  ;;  %4377 = vmatpush3.bf16.msra.mxu0 %v4875_v12 }
 0x2ad   : > { %4398 = vmatprep.subr.bf16.mxu1 %v5746_v0  ;;  %4378 = vmatprep.subr.bf16.mxu0 %v5746_v0 }
 0x2b0   : > { %4399 = vmatpush3.bf16.msra.mxu1 %v4876_v13  ;;  %4379 = vmatpush3.bf16.msra.mxu0 %v4877_v14 }
 0x2b1   : > { %4400 = vmatprep.subr.bf16.mxu1 %v5746_v0  ;;  %4380 = vmatprep.subr.bf16.mxu0 %v5746_v0 }
 0x2b4   : > { %4401 = vmatpush3.bf16.msra.mxu1 %v4878_v15  ;;  %4381 = vmatpush3.bf16.msra.mxu0 %v4879_v17 }
 0x2b5   : > { %4426 = vmatprep.subr.bf16.mxu1 %v5746_v0  ;;  %4406 = vmatprep.subr.bf16.mxu0 %v5746_v0 }
 0x2b7   : > { %4403 = vmatmul.mubr.bf16.vlgmr.msra.gmra.mrb[0].mxu1 %v6506_v18  ;;  %4383 = vmatmul.mubr.bf16.vlgmr.msra.gmra.mrb[0].mxu0 %v6506_v18 }
 0x2b8   : > { %4428 = vmatprep.mubr.msk.bf16.mxu1 %vm5747_vm0, %v5746_v0  ;;  %4422 = vmatprep.mubr.msk.bf16.mxu0 %vm5747_vm0, %v5746_v0 }
 0x2b9   : > { %4407 = vmatpush3.bf16.msra.mxu0 %v4880_v35 }
 0x2ba   : > { %4408 = vmatprep.subr.bf16.mxu0 %v5746_v0 }
 0x2bd   : > { %4409 = vmatpush3.bf16.msra.mxu0 %v4881_v36 }
 0x2be   : > { %4410 = vmatprep.subr.bf16.mxu0 %v5746_v0 }
 0x2c1   : > { %4411 = vmatpush3.bf16.msra.mxu0 %v4882_v37 }
 0x2c2   : > { %4412 = vmatprep.subr.bf16.mxu0 %v5746_v0 }
 0x2c5   : > { %4413 = vmatpush3.bf16.msra.mxu0 %v4883_v38 }
 0x2c6   : > { %4414 = vmatprep.subr.bf16.mxu0 %v5746_v0 }
 0x2c9   : > { %4415 = vmatpush3.bf16.msra.mxu0 %v4884_v39 }
 0x2ca   : > { %4416 = vmatprep.subr.bf16.mxu0 %v5746_v0 }
 0x2cd   : > { %4417 = vmatpush3.bf16.msra.mxu0 %v4885_v40 }
 0x2ce   : > { %4418 = vmatprep.subr.bf16.mxu0 %v5746_v0 }
 0x2d1   : > { %4419 = vmatpush3.bf16.msra.mxu0 %v4886_v44 }
 0x2d2   : > { %4420 = vmatprep.subr.bf16.mxu0 %v5746_v0 }
 0x2d5   : > { %4421 = vmatpush3.bf16.msra.mxu0 %v4887_v49 }
 0x2d6   : > { %4474 = vmatprep.subr.bf16.mxu0 %v5746_v0 }
 0x2d8   : > { %4423 = vmatmul.mubr.bf16.vlgmr.msra.gmra.mrb[4].mxu0 %v6506_v18 }
 0x2d9   : > { %4490 = vmatprep.mubr.msk.bf16.mxu0 %vm5747_vm0, %v5746_v0 }
 0x38a   : > { %v1367_v21 = vpop.f32.mrb[0].mxu1  ;;  %v1256_v24 = vpop.f32.mrb[0].mxu0 }
 0x38b   : > { %v1368_v22 = vadd.f32 %v4064_v19, %v1367_v21  ;;  %v4404_v23 = vpop.f32.mrb[1].mxu1  ;;  %v1257_v25 = vadd.f32 %v4055_v20, %v1256_v24  ;;  %v4384_v27 = vpop.f32.mrb[1].mxu0 }
 0x38c   : > { %v1370_v26 = vpop.f32.mrb[2].mxu1  ;;  %v1259_v29 = vpop.f32.mrb[2].mxu0 }
 0x38d   : > { %1503 = vrot.lane.b32.xlu1 %v1368_v22, %s5748_s20  ;;  %1500 = vrot.lane.b32.xlu0 %v1368_v22, %s5749_s21  ;;  %v4405_v28 = vpop.f32.mrb[3].mxu1  ;;  %v1509_v30 = vpack.c.bf16 %v1368_v22, %v1368_v22  ;;  %v1484_v31 = vmul.f32 0.17677669, %v1257_v25  ;;  %v4385_v32 = vpop.f32.mrb[3].mxu0 }
 0x38f   : > { %v1532_v33 = vsel %vm1527_vm1, %v1509_v30, 0  ;;  %v1495_v34 = vpack.c.bf16 %v1484_v31, %v1484_v31 }
 0x390   : > { %4427 = vmatpush3.bf16.xpose.msra.mxu1 %v1532_v33 }
 0x391   : > { %1489 = vrot.lane.b32.xlu1 %v1484_v31, %s5748_s20  ;;  %1486 = vrot.lane.b32.xlu0 %v1484_v31, %s5749_s21 }
 0x392   : > { %4432 = vmatprep.subr.bf16.mxu1 %v5746_v0 }
 0x395   : > { %1492 = vrot.lane.b32.xlu1 %v1484_v31, %s5750_s15  ;;  %1506 = vrot.lane.b32.xlu0 %v1368_v22, %s5750_s15 }
 0x397   : > { %4429 = vmatmul.mubr.msk.bf16.vlgmr.msra.gmra.mrb[4].mxu1 %vm1527_vm1, %v1495_v34 }
 0x398   : > { %4434 = vmatprep.mubr.msk.bf16.mxu1 %vm5747_vm0, %v5746_v0 }
 0x3ab   : > { %v1478_v12 = vpop.f32.mrb[4].mxu0 }
 0x3ac   : > { %v1479_v13 = vadd.f32 %v4073_v8, %v1478_v12  ;;  %v4424_v14 = vpop.f32.mrb[5].mxu0 }
 0x3ad   : > { %v1481_v15 = vpop.f32.mrb[6].mxu0 }
 0x3ae   : > { %v4425_v17 = vpop.f32.mrb[7].mxu0  ;;  %v1523_v18 = vpack.c.bf16 %v1479_v13, %v1479_v13 }
 0x3b0   : > { %v1766_v20 = vsel %vm1764_vm4, %v1523_v18, 0 }
 0x3ff   : > { %v1501_v41 = vpop.permute.xlu0 %1500  ;;  %v1504_v45 = vpop.permute.xlu1 %1503 }
 0x400   : > { %v1510_v42 = vpack.c.bf16 %v1501_v41, %v1501_v41  ;;  %v1511_v47 = vpack.c.bf16 %v1504_v45, %v1504_v45 }
 0x402   : > { %v1578_v43 = vsel %vm1527_vm1, %v1510_v42, 0  ;;  %v1624_v50 = vsel %vm1527_vm1, %v1511_v47, 0 }
 0x403   : > { %4433 = vmatpush3.bf16.xpose.msra.mxu1 %v1578_v43  ;;  %v1487_v46 = vpop.permute.xlu0 %1486  ;;  %v1490_v53 = vpop.permute.xlu1 %1489 }
 0x404   : > { %4438 = vmatprep.subr.bf16.mxu1 %v5746_v0  ;;  %v1496_v48 = vpack.c.bf16 %v1487_v46, %v1487_v46  ;;  %v1497_v54 = vpack.c.bf16 %v1490_v53, %v1490_v53 }
 0x407   : > { %v1507_v51 = vpop.permute.xlu0 %1506  ;;  %v1493_v56 = vpop.permute.xlu1 %1492 }
 0x408   : > { %v1512_v52 = vpack.c.bf16 %v1507_v51, %v1507_v51  ;;  %v1498_v57 = vpack.c.bf16 %v1493_v56, %v1493_v56 }
 0x40a   : > { %4435 = vmatmul.mubr.msk.bf16.vlgmr.msra.gmra.mrb[8].mxu1 %vm1527_vm1, %v1496_v48  ;;  %v1670_v55 = vsel %vm1527_vm1, %v1512_v52, 0 }
 0x40b   : > { %4439 = vmatpush3.bf16.xpose.msra.mxu1 %v1624_v50  ;;  %4440 = vmatprep.mubr.msk.bf16.mxu1 %vm5747_vm0, %v5746_v0 }
 0x40c   : > { %4444 = vmatprep.subr.bf16.mxu1 %v5746_v0 }
 0x412   : > { %4441 = vmatmul.mubr.msk.bf16.vlgmr.msra.gmra.mrb[12].mxu1 %vm1527_vm1, %v1497_v54 }
 0x413   : > { %4445 = vmatpush3.bf16.xpose.msra.mxu1 %v1670_v55  ;;  %4446 = vmatprep.mubr.msk.bf16.mxu1 %vm5747_vm0, %v5746_v0 }
 0x414   : > { %4450 = vmatprep.subr.bf16.mxu1 %v5746_v0 }
 0x41a   : > { %4447 = vmatmul.mubr.msk.bf16.vlgmr.msra.gmra.mrb[16].mxu1 %vm1527_vm1, %v1498_v57 }
 0x41b   : > { %4452 = vmatprep.mubr.msk.bf16.mxu1 %vm5747_vm0, %v5746_v0  ;;  %4451 = vmatpush3.bf16.msra.mxu1 %v1766_v20  ;;  %v4888_v20 = vld [vmem:[#allocation16] sm:$0xff]  }
 0x41c   : > { %4456 = vmatprep.subr.bf16.mxu1 %v5746_v0  ;;  %4475 = vmatpush3.bf16.msra.mxu0 %v4888_v20  ;;  %v4100_v20 = vld [vmem:[#allocation20] ss:$0 sm:$0xff] }
 0x41d   : > { %4476 = vmatprep.subr.bf16.mxu0 %v5746_v0 }
 0x46a   : > { %v1568_v62 = vpop.f32.mrb[4].mxu1 }
 0x46b   : > { %v1569_v63 = vadd.f32 %v1568_v62, %v1149_v61  ;;  %v4430_v1 = vpop.f32.mrb[5].mxu1 }
 0x46c   : > { %v1571_v2 = vpop.f32.mrb[6].mxu1 }
 0x46d   : > { %v4431_v3 = vpop.f32.mrb[7].mxu1  ;;  %v1713_v4 = vsel %vm1712_vm3, %v1569_v63, -inf }
 0x46e   : > { %1714 = vmax.xlane.f32.xlu0 %v1713_v4 }
 0x4dd   : > { %v1614_v5 = vpop.f32.mrb[8].mxu1 }
 0x4de   : > { %v1615_v6 = vadd.f32 %v1614_v5, %v1149_v61  ;;  %v4436_v7 = vpop.f32.mrb[9].mxu1 }
 0x4df   : > { %v1617_v9 = vpop.f32.mrb[10].mxu1 }
 0x4e0   : > { %v4437_v10 = vpop.f32.mrb[11].mxu1  ;;  %v1716_v11 = vsel %vm1712_vm3, %v1615_v6, -inf }
 0x4e1   : > { %1717 = vmax.xlane.f32.xlu1 %v1716_v11 }
 0x4e5   : > { %v1660_v19 = vpop.f32.mrb[12].mxu1 }
 0x4e6   : > { %v1661_v21 = vadd.f32 %v1660_v19, %v1149_v61  ;;  %v4442_v22 = vpop.f32.mrb[13].mxu1 }
 0x4e7   : > { %v1663_v23 = vpop.f32.mrb[14].mxu1  ;;  %v4890_v22 = vld [vmem:[#allocation16 + $0x10] sm:$0xff]  }
 0x4e8   : > { %v4443_v24 = vpop.f32.mrb[15].mxu1  ;;  %v1719_v25 = vsel %vm1712_vm3, %v1661_v21, -inf  ;;  %v4891_v23 = vld [vmem:[#allocation16 + $0x18] sm:$0xff]  }
 0x4e9   : > { %1720 = vmax.xlane.f32.xlu0 %v1719_v25  ;;  %v4892_v24 = vld [vmem:[#allocation16 + $0x20] sm:$0xff]   ;;  %v4893_v25 = vld [vmem:[#allocation16 + $0x28] sm:$0xff]  }
 0x4ed   : > { %v1706_v26 = vpop.f32.mrb[16].mxu1 }
 0x4ee   : > { %v1707_v27 = vadd.f32 %v1706_v26, %v1149_v61  ;;  %v4448_v28 = vpop.f32.mrb[17].mxu1  ;;  %v4894_v26 = vld [vmem:[#allocation16 + $0x30] sm:$0xff]  }
 0x4ef   : > { %v1709_v29 = vpop.f32.mrb[18].mxu1 }
 0x4f0   : > { %v4449_v30 = vpop.f32.mrb[19].mxu1  ;;  %v1722_v31 = vsel %vm1712_vm3, %v1707_v27, -inf }
 0x4f1   : > { %1723 = vmax.xlane.f32.xlu0 %v1722_v31  ;;  %v4895_v31 = vld [vmem:[#allocation16 + $0x38] sm:$0xff]  }
 0x4fb   : > { %v1715_v32 = vpop.xlane.xlu0 %1714 }
 0x4fc   : > { %v1725_v33 = vsub.f32 %v1569_v63, %v1715_v32 }
 0x4fe   : > { %v1729_v34 = vmul.f32 1.442695, %v1725_v33 }
 0x500   : > { %5008 = vpow2.f32 %v1729_v34 }
 0x50a   : > { %v5009_v35 = vpop.eup %5008 }
 0x50b   : > { %v1737_v36 = vsel %vm1712_vm3, %v5009_v35, 0.0 }
 0x50c   : > { %1738 = vadd.xlane.f32.xlu1 %v1737_v36 }
 0x51d   : > { %1514 = vrot.lane.b32.xlu1 %v1479_v13, %s5749_s21 }
 0x56e   : > { %v1718_v37 = vpop.xlane.xlu1 %1717 }
 0x56f   : > { %v1726_v38 = vsub.f32 %v1615_v6, %v1718_v37 }
 0x571   : > { %v1731_v39 = vmul.f32 1.442695, %v1726_v38 }
 0x573   : > { %5010 = vpow2.f32 %v1731_v39 }
 0x576   : > { %v1721_v40 = vpop.xlane.xlu0 %1720 }
 0x577   : > { %v1727_v41 = vsub.f32 %v1661_v21, %v1721_v40  ;;  %v4889_v21 = vld [vmem:[#allocation16 + $0x8] sm:$0xff]  }
 0x578   : > { %4477 = vmatpush3.bf16.msra.mxu0 %v4889_v21 }
 0x579   : > { %v1733_v42 = vmul.f32 1.442695, %v1727_v41  ;;  %4478 = vmatprep.subr.bf16.mxu0 %v5746_v0 }
 0x57b   : > { %5012 = vpow2.f32 %v1733_v42 }
 0x57c   : > { %4479 = vmatpush3.bf16.msra.mxu0 %v4890_v22 }
 0x57d   : > { %v5011_v43 = vpop.eup %5010  ;;  %4480 = vmatprep.subr.bf16.mxu0 %v5746_v0 }
 0x57e   : > { %v1724_v44 = vpop.xlane.xlu0 %1723  ;;  %v1740_v45 = vsel %vm1712_vm3, %v5011_v43, 0.0 }
 0x57f   : > { %v1728_v46 = vsub.f32 %v1707_v27, %v1724_v44  ;;  %1741 = vadd.xlane.f32.xlu0 %v1740_v45 }
 0x580   : > { %4481 = vmatpush3.bf16.msra.mxu0 %v4891_v23 }
 0x581   : > { %v1735_v47 = vmul.f32 1.442695, %v1728_v46  ;;  %4482 = vmatprep.subr.bf16.mxu0 %v5746_v0 }
 0x583   : > { %5014 = vpow2.f32 %v1735_v47  ;;  %v4090_v47 = vld [vmem:[#allocation17] ss:$0 sm:$0xff] }
 0x584   : > { %4483 = vmatpush3.bf16.msra.mxu0 %v4892_v24  ;;  %v4110_v24 = vld [vmem:[#allocation26] ss:$0 sm:$0xff] }
 0x585   : > { %v5013_v48 = vpop.eup %5012  ;;  %4484 = vmatprep.subr.bf16.mxu0 %v5746_v0 }
 0x586   : > { %v1743_v49 = vsel %vm1712_vm3, %v5013_v48, 0.0 }
 0x587   : > { %1744 = vadd.xlane.f32.xlu1 %v1743_v49 }
 0x588   : > { %4485 = vmatpush3.bf16.msra.mxu0 %v4893_v25 }
 0x589   : > { %4486 = vmatprep.subr.bf16.mxu0 %v5746_v0 }
 0x58c   : > { %4487 = vmatpush3.bf16.msra.mxu0 %v4894_v26 }
 0x58d   : > { %v5015_v50 = vpop.eup %5014  ;;  %4488 = vmatprep.subr.bf16.mxu0 %v5746_v0 }
 0x58e   : > { %v1746_v51 = vsel %vm1712_vm3, %v5015_v50, 0.0 }
 0x58f   : > { %1747 = vadd.xlane.f32.xlu0 %v1746_v51 }
 0x590   : > { %4489 = vmatpush3.bf16.msra.mxu0 %v4895_v31 }
 0x591   : > { %4514 = vmatprep.subr.bf16.mxu0 %v5746_v0 }
 0x598   : > { %1520 = vrot.lane.b32.xlu1 %v1479_v13, %s5750_s15 }
 0x599   : > { %v1739_v52 = vpop.xlane.xlu1 %1738 }
 0x59a   : > { %5016 = vrcp.f32 %v1739_v52 }
 0x59d   : > { %v1515_v53 = vpop.permute.xlu1 %1514 }
 0x59e   : > { %v1524_v54 = vpack.c.bf16 %v1515_v53, %v1515_v53 }
 0x5a0   : > { %v1812_v58 = vsel %vm1764_vm4, %v1524_v54, 0  ;;  %v4896_v54 = vld [vmem:[#allocation25] sm:$0xff]  }
 0x5a4   : > { %v5017_v55 = vpop.eup %5016 }
 0x5a5   : > { %v1753_v56 = vmul.f32 %v5017_v55, %v5009_v35  ;;  %1517 = vrot.lane.b32.xlu0 %v1479_v13, %s5748_s20  ;;  %v4898_v55 = vld [vmem:[#allocation22] sm:$0xff]  }
 0x5a7   : > { %v1757_v57 = vpack.c.bf16 %v1753_v56, %v1753_v56  ;;  %v4897_v56 = vld [vmem:[#allocation25 + $0x8] sm:$0xff]  }
 0x5a9   : > { %4453 = vmatmul.mubr.msk.bf16.vlgmr.msra.gmra.mrb[20].mxu1 %vm1712_vm3, %v1757_v57  ;;  %v4900_v57 = vld [vmem:[#allocation22 + $0x8] sm:$0xff]  }
 0x5aa   : > { %4457 = vmatpush3.bf16.msra.mxu1 %v1812_v58  ;;  %4458 = vmatprep.mubr.msk.bf16.mxu1 %vm5747_vm0, %v5746_v0  ;;  %v4899_v58 = vld [vmem:[#allocation25 + $0x10] sm:$0xff]  }
 0x5ab   : > { %4462 = vmatprep.subr.bf16.mxu1 %v5746_v0 }
 0x60c   : > { %v1742_v60 = vpop.xlane.xlu0 %1741 }
 0x60d   : > { %5018 = vrcp.f32 %v1742_v60 }
 0x614   : > { %v1745_v61 = vpop.xlane.xlu1 %1744 }
 0x615   : > { %5020 = vrcp.f32 %v1745_v61 }
 0x617   : > { %v5019_v62 = vpop.eup %5018 }
 0x618   : > { %v1754_v63 = vmul.f32 %v5019_v62, %v5011_v43  ;;  %v1521_v4 = vpop.permute.xlu1 %1520 }
 0x619   : > { %v1526_v8 = vpack.c.bf16 %v1521_v4, %v1521_v4  ;;  %v4904_v4 = vld [vmem:[#allocation22 + $0x18] sm:$0xff]  }
 0x61a   : > { %v1758_v1 = vpack.c.bf16 %v1754_v63, %v1754_v63 }
 0x61b   : > { %v1904_v12 = vsel %vm1764_vm4, %v1526_v8, 0  ;;  %v4908_v8 = vld [vmem:[#allocation22 + $0x28] sm:$0xff]  }
 0x61c   : > { %v1748_v2 = vpop.xlane.xlu0 %1747  ;;  %4459 = vmatmul.mubr.msk.bf16.vlgmr.msra.gmra.mrb[24].mxu1 %vm1712_vm3, %v1758_v1  ;;  %v4903_v1 = vld [vmem:[#allocation25 + $0x20] sm:$0xff]  }
 0x61d   : > { %5022 = vrcp.f32 %v1748_v2  ;;  %4464 = vmatprep.mubr.msk.bf16.mxu1 %vm5747_vm0, %v5746_v0  ;;  %v4902_v2 = vld [vmem:[#allocation22 + $0x10] sm:$0xff]  }
 0x61f   : > { %v5021_v3 = vpop.eup %5020 }
 0x620   : > { %v1518_v5 = vpop.permute.xlu0 %1517  ;;  %v1755_v6 = vmul.f32 %v5021_v3, %v5013_v48  ;;  %v4905_v3 = vld [vmem:[#allocation25 + $0x28] sm:$0xff]  }
 0x621   : > { %v1525_v7 = vpack.c.bf16 %v1518_v5, %v1518_v5  ;;  %v4907_v5 = vld [vmem:[#allocation25 + $0x30] sm:$0xff]  }
 0x622   : > { %v1759_v10 = vpack.c.bf16 %v1755_v6, %v1755_v6  ;;  %v4906_v6 = vld [vmem:[#allocation22 + $0x20] sm:$0xff]  }
 0x623   : > { %v1858_v9 = vsel %vm1764_vm4, %v1525_v7, 0  ;;  %v4909_v7 = vld [vmem:[#allocation25 + $0x38] sm:$0xff]  }
 0x624   : > { %4463 = vmatpush3.bf16.msra.mxu1 %v1858_v9  ;;  %v1143_v9 = vld [vmem:[%s991_s25] sm:$0xff] }
 0x625   : > { %4468 = vmatprep.subr.bf16.mxu1 %v5746_v0 }
 0x627   : > { %v5023_v11 = vpop.eup %5022  ;;  %4465 = vmatmul.mubr.msk.bf16.vlgmr.msra.gmra.mrb[28].mxu1 %vm1712_vm3, %v1759_v10  ;;  %v2105_v10 = vpack.c.bf16 %v1143_v9, %v1143_v9 }
 0x628   : > { %4469 = vmatpush3.bf16.msra.mxu1 %v1904_v12  ;;  %4470 = vmatprep.mubr.msk.bf16.mxu1 %vm5747_vm0, %v5746_v0  ;;  %v1756_v13 = vmul.f32 %v5023_v11, %v5015_v50  ;;  %v4910_v11 = vld [vmem:[#allocation22 + $0x30] sm:$0xff]   ;;  %v4911_v12 = vld [vmem:[#allocation22 + $0x38] sm:$0xff]  }
 0x629   : > { %4494 = vmatprep.subr.bf16.mxu1 %v5746_v0 }
 0x62a   : > { %v1760_v14 = vpack.c.bf16 %v1756_v13, %v1756_v13 }
 0x62f   : > { %4471 = vmatmul.mubr.msk.bf16.vlgmr.msra.gmra.mrb[32].mxu1 %vm1712_vm3, %v1760_v14 }
 0x630   : > { %4510 = vmatprep.mubr.msk.bf16.mxu1 %vm5747_vm0, %v5746_v0  ;;  %4495 = vmatpush3.bf16.msra.mxu1 %v4898_v55 }
 0x631   : > { %4496 = vmatprep.subr.bf16.mxu1 %v5746_v0 }
 0x634   : > { %4497 = vmatpush3.bf16.msra.mxu1 %v4900_v57 }
 0x635   : > { %4498 = vmatprep.subr.bf16.mxu1 %v5746_v0 }
 0x638   : > { %4499 = vmatpush3.bf16.msra.mxu1 %v4902_v2 }
 0x639   : > { %4500 = vmatprep.subr.bf16.mxu1 %v5746_v0 }
 0x63c   : > { %4501 = vmatpush3.bf16.msra.mxu1 %v4904_v4  ;;  %v4119_v4 = vld [vmem:[#allocation29] ss:$0 sm:$0xff] }
 0x63d   : > { %4502 = vmatprep.subr.bf16.mxu1 %v5746_v0 }
 0x640   : > { %4503 = vmatpush3.bf16.msra.mxu1 %v4906_v6 }
 0x641   : > { %4504 = vmatprep.subr.bf16.mxu1 %v5746_v0 }
 0x644   : > { %4505 = vmatpush3.bf16.msra.mxu1 %v4908_v8 }
 0x645   : > { %4506 = vmatprep.subr.bf16.mxu1 %v5746_v0 }
 0x648   : > { %4507 = vmatpush3.bf16.msra.mxu1 %v4910_v11 }
 0x649   : > { %4508 = vmatprep.subr.bf16.mxu1 %v5746_v0 }
 0x64c   : > { %4509 = vmatpush3.bf16.msra.mxu1 %v4911_v12 }
 0x64d   : > { %4534 = vmatprep.subr.bf16.mxu1 %v5746_v0 }
 0x67c   : > { %v1802_v15 = vpop.f32.mrb[20].mxu1 }
 0x67d   : > { %v4454_v17 = vpop.f32.mrb[21].mxu1 }
 0x67e   : > { %v1805_v18 = vpop.f32.mrb[22].mxu1 }
 0x67f   : > { %v4455_v19 = vpop.f32.mrb[23].mxu1  ;;  %v4099_v18 = vld [vmem:[#allocation19] ss:$0 sm:$0xff] }
 0x6ef   : > { %v1848_v27 = vpop.f32.mrb[24].mxu1 }
 0x6f0   : > { %1947 = vrot.lane.b32.xlu1 %v1848_v27, %s5750_s15  ;;  %v4460_v28 = vpop.f32.mrb[25].mxu1 }
 0x6f1   : > { %v1851_v29 = vpop.f32.mrb[26].mxu1 }
 0x6f2   : > { %v4461_v30 = vpop.f32.mrb[27].mxu1 }
 0x6fa   : > { %v1894_v32 = vpop.f32.mrb[28].mxu1 }
 0x6fb   : > { %1951 = vrot.lane.b32.xlu0 %v1894_v32, %s5748_s20  ;;  %v4466_v33 = vpop.f32.mrb[29].mxu1  ;;  %v4912_v32 = vld [vmem:[#allocation28] sm:$0xff]  }
 0x6fc   : > { %v1897_v34 = vpop.f32.mrb[30].mxu1  ;;  %v4913_v33 = vld [vmem:[#allocation28 + $0x8] sm:$0xff]  }
 0x6fd   : > { %v4467_v35 = vpop.f32.mrb[31].mxu1  ;;  %v4914_v34 = vld [vmem:[#allocation28 + $0x10] sm:$0xff]  }
 0x6fe   : > { %v4915_v35 = vld [vmem:[#allocation28 + $0x18] sm:$0xff]  }
 0x702   : > { %v1940_v36 = vpop.f32.mrb[32].mxu1 }
 0x703   : > { %1955 = vrot.lane.b32.xlu1 %v1940_v36, %s5749_s21  ;;  %v4472_v37 = vpop.f32.mrb[33].mxu1  ;;  %v4916_v36 = vld [vmem:[#allocation28 + $0x20] sm:$0xff]  }
 0x704   : > { %v1943_v38 = vpop.f32.mrb[34].mxu1  ;;  %v4917_v37 = vld [vmem:[#allocation28 + $0x28] sm:$0xff]  }
 0x705   : > { %v4473_v39 = vpop.f32.mrb[35].mxu1  ;;  %v4918_v38 = vld [vmem:[#allocation28 + $0x30] sm:$0xff]  }
 0x706   : > { %v4919_v39 = vld [vmem:[#allocation28 + $0x38] sm:$0xff]  }
 0x762   : > { %v1948_v40 = vpop.permute.xlu1 %1947 }
 0x763   : > { %v1958_v42 = vsel %vm1527_vm1, %v1802_v15, %v1948_v40 }
 0x76d   : > { %v1952_v41 = vpop.permute.xlu0 %1951 }
 0x76e   : > { %v1960_v43 = vsel %vm1959_vm5, %v1958_v42, %v1952_v41 }
 0x775   : > { %v1956_v44 = vpop.permute.xlu1 %1955 }
 0x776   : > { %v1962_v45 = vsel %vm1961_vm6, %v1960_v43, %v1956_v44  ;;  %v4101_v43 = vld [vmem:[#allocation23] ss:$0 sm:$0xff] }
 0x777   : > { %v1963_v46 = vpack.c.bf16 %v1962_v45, %v1962_v45 }
 0x779   : > { %4491 = vmatmul.mubr.bf16.vlgmr.msra.gmra.mrb[8].mxu0 %v1963_v46 }
 0x77a   : > { %4530 = vmatprep.mubr.msk.bf16.mxu0 %vm5747_vm0, %v5746_v0  ;;  %4515 = vmatpush3.bf16.msra.mxu0 %v4896_v54 }
 0x77b   : > { %4516 = vmatprep.subr.bf16.mxu0 %v5746_v0 }
 0x77e   : > { %4517 = vmatpush3.bf16.msra.mxu0 %v4897_v56 }
 0x77f   : > { %4518 = vmatprep.subr.bf16.mxu0 %v5746_v0 }
 0x782   : > { %4519 = vmatpush3.bf16.msra.mxu0 %v4899_v58 }
 0x783   : > { %4520 = vmatprep.subr.bf16.mxu0 %v5746_v0 }
 0x84c   : > { %v2069_v48 = vpop.f32.mrb[8].mxu0 }
 0x84d   : > { %v2070_v49 = vadd.f32 %v4090_v47, %v2069_v48  ;;  %v4492_v50 = vpop.f32.mrb[9].mxu0 }
 0x84e   : > { %v2072_v51 = vpop.f32.mrb[10].mxu0 }
 0x84f   : > { %v4493_v52 = vpop.f32.mrb[11].mxu0  ;;  %v2075_v53 = vadd.f32 %v2070_v49, %v6500_v16  ;;  %v4901_v16 = vld [vmem:[#allocation25 + $0x18] sm:$0xff]  }
 0x850   : > { %4521 = vmatpush3.bf16.msra.mxu0 %v4901_v16 }
 0x851   : > { %2076 = vadd.xlane.f32.xlu0 %v2075_v53  ;;  %4522 = vmatprep.subr.bf16.mxu0 %v5746_v0 }
 0x854   : > { %4523 = vmatpush3.bf16.msra.mxu0 %v4903_v1 }
 0x855   : > { %4524 = vmatprep.subr.bf16.mxu0 %v5746_v0 }
 0x858   : > { %4525 = vmatpush3.bf16.msra.mxu0 %v4905_v3 }
 0x859   : > { %4526 = vmatprep.subr.bf16.mxu0 %v5746_v0 }
 0x85c   : > { %4527 = vmatpush3.bf16.msra.mxu0 %v4907_v5 }
 0x85d   : > { %4528 = vmatprep.subr.bf16.mxu0 %v5746_v0 }
 0x860   : > { %4529 = vmatpush3.bf16.msra.mxu0 %v4909_v7 }
 0x861   : > { %4554 = vmatprep.subr.bf16.mxu0 %v5746_v0 }
 0x863   : > { %4531 = vmatmul.mubr.bf16.vlgmr.msra.gmra.mrb[12].mxu0 %v2105_v10 }
 0x864   : > { %4556 = vmatprep.mubr.msk.bf16.mxu0 %vm5747_vm0, %v5746_v0 }
 0x8de   : > { %v2077_v60 = vpop.xlane.xlu0 %2076 }
 0x8df   : > { %v2079_v61 = vmul.f32 0.0078125, %v2077_v60 }
 0x8e1   : > { %v2080_v62 = vsub.f32 %v2075_v53, %v2079_v61 }
 0x8e3   : > { %v2081_v63 = vmul.f32 %v2080_v62, %v2080_v62 }
 0x8e5   : > { %2082 = vadd.xlane.f32.xlu1 %v2081_v63 }
 0x936   : > { %v2322_v25 = vpop.f32.mrb[12].mxu0 }
 0x937   : > { %v2323_v26 = vadd.f32 %v4110_v24, %v2322_v25  ;;  %v4532_v27 = vpop.f32.mrb[13].mxu0 }
 0x938   : > { %v2325_v28 = vpop.f32.mrb[14].mxu0 }
 0x939   : > { %2455 = vrot.lane.b32.xlu0 %v2323_v26, %s5749_s21  ;;  %2458 = vrot.lane.b32.xlu1 %v2323_v26, %s5748_s20  ;;  %v4533_v29 = vpop.f32.mrb[15].mxu0  ;;  %v2464_v30 = vpack.c.bf16 %v2323_v26, %v2323_v26 }
 0x93b   : > { %v2486_v31 = vsel %vm1527_vm1, %v2464_v30, 0 }
 0x93c   : > { %4555 = vmatpush3.bf16.xpose.msra.mxu0 %v2486_v31 }
 0x93d   : > { %2461 = vrot.lane.b32.xlu1 %v2323_v26, %s5750_s15  ;;  %4566 = vmatprep.subr.bf16.mxu0 %v5746_v0 }
 0x972   : > { %v2083_v13 = vpop.xlane.xlu1 %2082 }
 0x973   : > { %v2084_v14 = vmul.f32 0.0078125, %v2083_v13 }
 0x975   : > { %v2085_v15 = vadd.f32 1e-05, %v2084_v14 }
 0x977   : > { %5024 = vrsqrt.f32 %v2085_v15 }
 0x981   : > { %v5025_v17 = vpop.eup %5024 }
 0x982   : > { %v2087_v19 = vmul.f32 %v5025_v17, %v2080_v62 }
 0x984   : > { %v2095_v21 = vmul.f32 %v4099_v18, %v2087_v19 }
 0x986   : > { %v6625_v22 = vadd.f32 %v4100_v20, %v2095_v21 }
 0x988   : > { %v2104_v23 = vpack.c.bf16 %v6625_v22, %v6625_v22 }
 0x98a   : > { %4511 = vmatmul.mubr.bf16.vlgmr.msra.gmra.mrb[36].mxu1 %v2104_v23 }
 0x98b   : > { %4550 = vmatprep.mubr.msk.bf16.mxu1 %vm5747_vm0, %v5746_v0  ;;  %4535 = vmatpush3.bf16.msra.mxu1 %v4912_v32 }
 0x98c   : > { %4536 = vmatprep.subr.bf16.mxu1 %v5746_v0 }
 0x98f   : > { %4537 = vmatpush3.bf16.msra.mxu1 %v4913_v33 }
 0x990   : > { %4538 = vmatprep.subr.bf16.mxu1 %v5746_v0 }
 0x993   : > { %4539 = vmatpush3.bf16.msra.mxu1 %v4914_v34 }
 0x994   : > { %4540 = vmatprep.subr.bf16.mxu1 %v5746_v0 }
 0x997   : > { %4541 = vmatpush3.bf16.msra.mxu1 %v4915_v35 }
 0x998   : > { %4542 = vmatprep.subr.bf16.mxu1 %v5746_v0 }
 0x99b   : > { %4543 = vmatpush3.bf16.msra.mxu1 %v4916_v36 }
 0x99c   : > { %4544 = vmatprep.subr.bf16.mxu1 %v5746_v0 }
 0x99f   : > { %4545 = vmatpush3.bf16.msra.mxu1 %v4917_v37 }
 0x9a0   : > { %4546 = vmatprep.subr.bf16.mxu1 %v5746_v0 }
 0x9a3   : > { %4547 = vmatpush3.bf16.msra.mxu1 %v4918_v38 }
 0x9a4   : > { %4548 = vmatprep.subr.bf16.mxu1 %v5746_v0 }
 0x9a7   : > { %4549 = vmatpush3.bf16.msra.mxu1 %v4919_v39 }
 0x9a8   : > { %4560 = vmatprep.subr.bf16.mxu1 %v5746_v0 }
 0x9aa   : > { %4551 = vmatmul.mubr.bf16.vlgmr.msra.gmra.mrb[40].mxu1 %v2105_v10 }
 0x9ab   : > { %4562 = vmatprep.mubr.msk.bf16.mxu1 %vm5747_vm0, %v5746_v0  ;;  %v2456_v40 = vpop.permute.xlu0 %2455  ;;  %v2459_v45 = vpop.permute.xlu1 %2458 }
 0x9ac   : > { %v2465_v41 = vpack.c.bf16 %v2456_v40, %v2456_v40  ;;  %v2466_v48 = vpack.c.bf16 %v2459_v45, %v2459_v45 }
 0x9ae   : > { %v2532_v42 = vsel %vm1527_vm1, %v2465_v41, 0  ;;  %v2578_v53 = vsel %vm1527_vm1, %v2466_v48, 0 }
 0x9af   : > { %v2462_v54 = vpop.permute.xlu1 %2461 }
 0x9b0   : > { %4561 = vmatpush3.bf16.xpose.msra.mxu1 %v2532_v42  ;;  %v2467_v55 = vpack.c.bf16 %v2462_v54, %v2462_v54 }
 0x9b1   : > { %4572 = vmatprep.subr.bf16.mxu1 %v5746_v0 }
 0x9b2   : > { %v2624_v58 = vsel %vm1527_vm1, %v2467_v55, 0 }
 0xa5d   : > { %v2211_v44 = vpop.f32.mrb[36].mxu1 }
 0xa5e   : > { %v2212_v46 = vadd.f32 %v4101_v43, %v2211_v44  ;;  %v4512_v47 = vpop.f32.mrb[37].mxu1 }
 0xa5f   : > { %v2214_v49 = vpop.f32.mrb[38].mxu1 }
 0xa60   : > { %v2439_v50 = vmul.f32 0.17677669, %v2212_v46  ;;  %v4513_v51 = vpop.f32.mrb[39].mxu1 }
 0xa62   : > { %v2450_v52 = vpack.c.bf16 %v2439_v50, %v2439_v50  ;;  %2447 = vrot.lane.b32.xlu1 %v2439_v50, %s5750_s15  ;;  %2441 = vrot.lane.b32.xlu0 %v2439_v50, %s5749_s21 }
 0xa64   : > { %4557 = vmatmul.mubr.msk.bf16.vlgmr.msra.gmra.mrb[16].mxu0 %vm1527_vm1, %v2450_v52 }
 0xa65   : > { %4567 = vmatpush3.bf16.xpose.msra.mxu0 %v2578_v53  ;;  %4568 = vmatprep.mubr.msk.bf16.mxu0 %vm5747_vm0, %v5746_v0 }
 0xa66   : > { %2444 = vrot.lane.b32.xlu0 %v2439_v50, %s5748_s20  ;;  %4578 = vmatprep.subr.bf16.mxu0 %v5746_v0 }
 0xa7d   : > { %v2433_v62 = vpop.f32.mrb[40].mxu1 }
 0xa7e   : > { %v4552_v63 = vpop.f32.mrb[41].mxu1  ;;  %v6667_v5 = vadd.f32 %v4119_v4, %v2433_v62 }
 0xa7f   : > { %v2436_v1 = vpop.f32.mrb[42].mxu1 }
 0xa80   : > { %v4553_v3 = vpop.f32.mrb[43].mxu1  ;;  %v2478_v6 = vpack.c.bf16 %v6667_v5, %v6667_v5 }
 0xa82   : > { %v2718_v7 = vsel %vm1764_vm4, %v2478_v6, 0 }
 0xad4   : > { %v2442_v56 = vpop.permute.xlu0 %2441  ;;  %v2448_v61 = vpop.permute.xlu1 %2447 }
 0xad5   : > { %v2451_v57 = vpack.c.bf16 %v2442_v56, %v2442_v56  ;;  %v2453_v2 = vpack.c.bf16 %v2448_v61, %v2448_v61 }
 0xad7   : > { %4563 = vmatmul.mubr.msk.bf16.vlgmr.msra.gmra.mrb[44].mxu1 %vm1527_vm1, %v2451_v57 }
 0xad8   : > { %4573 = vmatpush3.bf16.xpose.msra.mxu1 %v2624_v58  ;;  %v2445_v16 = vpop.permute.xlu0 %2444  ;;  %4574 = vmatprep.mubr.msk.bf16.mxu1 %vm5747_vm0, %v5746_v0 }
 0xad9   : > { %v2452_v60 = vpack.c.bf16 %v2445_v16, %v2445_v16  ;;  %4584 = vmatprep.subr.bf16.mxu1 %v5746_v0 }
 0xadb   : > { %4569 = vmatmul.mubr.msk.bf16.vlgmr.msra.gmra.mrb[20].mxu0 %vm1527_vm1, %v2452_v60 }
 0xadc   : > { %4580 = vmatprep.mubr.msk.bf16.mxu0 %vm5747_vm0, %v5746_v0  ;;  %4579 = vmatpush3.bf16.msra.mxu0 %v2718_v7 }
 0xadd   : > { %4590 = vmatprep.subr.bf16.mxu0 %v5746_v0 }
 0xadf   : > { %4575 = vmatmul.mubr.msk.bf16.vlgmr.msra.gmra.mrb[48].mxu1 %vm1527_vm1, %v2453_v2 }
 0xae0   : > { %4586 = vmatprep.mubr.msk.bf16.mxu1 %vm5747_vm0, %v5746_v0 }
 0xb37   : > { %v2522_v8 = vpop.f32.mrb[16].mxu0 }
 0xb38   : > { %v4558_v9 = vpop.f32.mrb[17].mxu0  ;;  %v2666_v10 = vsel %vm1712_vm3, %v2522_v8, -inf }
 0xb39   : > { %2667 = vmax.xlane.f32.xlu0 %v2666_v10  ;;  %v2525_v11 = vpop.f32.mrb[18].mxu0 }
 0xb3a   : > { %v4559_v12 = vpop.f32.mrb[19].mxu0 }
 0xb3b   : > { %v4920_v12 = vld [vmem:[%s6962_s29] sm:$0xff]  }
 0xbaa   : > { %v2568_v13 = vpop.f32.mrb[44].mxu1 }
 0xbab   : > { %v4564_v14 = vpop.f32.mrb[45].mxu1  ;;  %v2669_v15 = vsel %vm1712_vm3, %v2568_v13, -inf }
 0xbac   : > { %2670 = vmax.xlane.f32.xlu1 %v2669_v15  ;;  %v2571_v17 = vpop.f32.mrb[46].mxu1  ;;  %v4922_v14 = vld [vmem:[%s6962_s29 + $0x10] sm:$0xff]   ;;  %v4923_v15 = vld [vmem:[%s6962_s29 + $0x18] sm:$0xff]  }
 0xbad   : > { %v4565_v18 = vpop.f32.mrb[47].mxu1 }
 0xbae   : > { %v2614_v19 = vpop.f32.mrb[20].mxu0 }
 0xbaf   : > { %v4570_v20 = vpop.f32.mrb[21].mxu0  ;;  %v2672_v21 = vsel %vm1712_vm3, %v2614_v19, -inf }
 0xbb0   : > { %2673 = vmax.xlane.f32.xlu0 %v2672_v21  ;;  %v2617_v23 = vpop.f32.mrb[22].mxu0  ;;  %v4924_v20 = vld [vmem:[%s6962_s29 + $0x20] sm:$0xff]  }
 0xbb1   : > { %v4571_v24 = vpop.f32.mrb[23].mxu0  ;;  %v4925_v23 = vld [vmem:[%s6962_s29 + $0x28] sm:$0xff]  }
 0xbb2   : > { %v2660_v25 = vpop.f32.mrb[48].mxu1  ;;  %v4926_v24 = vld [vmem:[%s6962_s29 + $0x30] sm:$0xff]  }
 0xbb3   : > { %v4576_v26 = vpop.f32.mrb[49].mxu1  ;;  %v2675_v27 = vsel %vm1712_vm3, %v2660_v25, -inf }
 0xbb4   : > { %v2663_v28 = vpop.f32.mrb[50].mxu1  ;;  %2676 = vmax.xlane.f32.xlu0 %v2675_v27 }
 0xbb5   : > { %v4577_v29 = vpop.f32.mrb[51].mxu1 }
 0xbbd   : > { %2469 = vrot.lane.b32.xlu1 %v6667_v5, %s5749_s21 }
 0xbc6   : > { %v2668_v30 = vpop.xlane.xlu0 %2667 }
 0xbc7   : > { %v2678_v31 = vsub.f32 %v2522_v8, %v2668_v30 }
 0xbc9   : > { %v2682_v32 = vmul.f32 1.442695, %v2678_v31 }
 0xbcb   : > { %5026 = vpow2.f32 %v2682_v32 }
 0xbd5   : > { %v5027_v33 = vpop.eup %5026 }
 0xbd6   : > { %v2690_v34 = vsel %vm1712_vm3, %v5027_v33, 0.0 }
 0xbe1   : > { %2691 = vadd.xlane.f32.xlu1 %v2690_v34 }
 0xc39   : > { %v2671_v35 = vpop.xlane.xlu1 %2670 }
 0xc3a   : > { %v2679_v36 = vsub.f32 %v2568_v13, %v2671_v35  ;;  %v4921_v13 = vld [vmem:[%s6962_s29 + $0x8] sm:$0xff]  }
 0xc3c   : > { %v2684_v37 = vmul.f32 1.442695, %v2679_v36 }
 0xc3d   : > { %v2470_v38 = vpop.permute.xlu1 %2469  ;;  %v2674_v39 = vpop.xlane.xlu0 %2673 }
 0xc3e   : > { %5028 = vpow2.f32 %v2684_v37  ;;  %v2479_v40 = vpack.c.bf16 %v2470_v38, %v2470_v38  ;;  %v2680_v41 = vsub.f32 %v2614_v19, %v2674_v39 }
 0xc40   : > { %v2764_v42 = vsel %vm1764_vm4, %v2479_v40, 0  ;;  %v2686_v43 = vmul.f32 1.442695, %v2680_v41 }
 0xc41   : > { %4585 = vmatpush3.bf16.msra.mxu1 %v2764_v42  ;;  %v2677_v44 = vpop.xlane.xlu0 %2676 }
 0xc42   : > { %5030 = vpow2.f32 %v2686_v43  ;;  %v2681_v45 = vsub.f32 %v2660_v25, %v2677_v44  ;;  %4596 = vmatprep.subr.bf16.mxu1 %v5746_v0  ;;  %v4927_v25 = vld [vmem:[%s6962_s29 + $0x38] sm:$0xff]   ;;  %v4136_v44 = vld [vmem:[%s6963_s6] ss:$0 sm:$0xff]  ;;  %s6968_s6 = sld [smem:[#allocation74_spill]] }
 0xc44   : > { %v2688_v46 = vmul.f32 1.442695, %v2681_v45 }
 0xc46   : > { %5032 = vpow2.f32 %v2688_v46 }
 0xc48   : > { %v5029_v47 = vpop.eup %5028 }
 0xc49   : > { %v2693_v48 = vsel %vm1712_vm3, %v5029_v47, 0.0 }
 0xc4a   : > { %2694 = vadd.xlane.f32.xlu0 %v2693_v48 }
 0xc4c   : > { %v5031_v49 = vpop.eup %5030 }
 0xc4d   : > { %v2696_v50 = vsel %vm1712_vm3, %v5031_v49, 0.0 }
 0xc4e   : > { %2697 = vadd.xlane.f32.xlu1 %v2696_v50 }
 0xc50   : > { %v5033_v51 = vpop.eup %5032 }
 0xc51   : > { %v2699_v52 = vsel %vm1712_vm3, %v5033_v51, 0.0 }
 0xc52   : > { %2700 = vadd.xlane.f32.xlu0 %v2699_v52  ;;  %v4930_v52 = vld [vmem:[#allocation31 + $0x4] ss:$16 sps:$4 sm:$0xff]  }
 0xc5f   : > { %2475 = vrot.lane.b32.xlu1 %v6667_v5, %s5750_s15 }
 0xc68   : > { %2472 = vrot.lane.b32.xlu0 %v6667_v5, %s5748_s20 }
 0xc6e   : > { %v2692_v53 = vpop.xlane.xlu1 %2691 }
 0xc6f   : > { %5034 = vrcp.f32 %v2692_v53  ;;  %v4931_v53 = vld [vmem:[#allocation31 + $0x8] ss:$16 sps:$4 sm:$0xff]  }
 0xc79   : > { %v5035_v54 = vpop.eup %5034 }
 0xc7a   : > { %v2706_v55 = vmul.f32 %v5035_v54, %v5027_v33  ;;  %v4933_v54 = vld [vmem:[#allocation31 + $0xc] ss:$16 sps:$4 sm:$0xff]  }
 0xc7c   : > { %v2710_v56 = vpack.c.bf16 %v2706_v55, %v2706_v55  ;;  %v4936_v55 = vld [vmem:[#allocation31 + $0x24] ss:$16 sps:$4 sm:$0xff]  }
 0xc7e   : > { %4581 = vmatmul.mubr.msk.bf16.vlgmr.msra.gmra.mrb[24].mxu0 %vm1712_vm3, %v2710_v56  ;;  %v4939_v56 = vld [vmem:[#allocation31 + $0x2c] ss:$16 sps:$4 sm:$0xff]  }
 0xc7f   : > { %4592 = vmatprep.mubr.msk.bf16.mxu0 %vm5747_vm0, %v5746_v0 }
 0xcd7   : > { %v2695_v57 = vpop.xlane.xlu0 %2694 }
 0xcd8   : > { %5036 = vrcp.f32 %v2695_v57  ;;  %v4934_v57 = vld [vmem:[#allocation31 + $0x20] ss:$16 sps:$4 sm:$0xff]  }
 0xcdb   : > { %v2698_v58 = vpop.xlane.xlu1 %2697 }
 0xcdc   : > { %5038 = vrcp.f32 %v2698_v58  ;;  %v4937_v58 = vld [vmem:[#allocation31 + $0x28] ss:$16 sps:$4 sm:$0xff]  }
 0xcdf   : > { %v2701_v16 = vpop.xlane.xlu0 %2700  ;;  %v2476_v60 = vpop.permute.xlu1 %2475 }
 0xce0   : > { %5040 = vrcp.f32 %v2701_v16  ;;  %v2481_v63 = vpack.c.bf16 %v2476_v60, %v2476_v60  ;;  %v4942_v16 = vld [vmem:[#allocation31 + $0x44] ss:$16 sps:$4 sm:$0xff]   ;;  %v4945_v60 = vld [vmem:[#allocation31 + $0x4c] ss:$16 sps:$4 sm:$0xff]  }
 0xce2   : > { %v5037_v61 = vpop.eup %5036  ;;  %v2856_v7 = vsel %vm1764_vm4, %v2481_v63, 0 }
 0xce3   : > { %v2707_v62 = vmul.f32 %v5037_v61, %v5029_v47  ;;  %v2473_v1 = vpop.permute.xlu0 %2472  ;;  %v4940_v61 = vld [vmem:[#allocation31 + $0x40] ss:$16 sps:$4 sm:$0xff]  }
 0xce4   : > { %v2480_v2 = vpack.c.bf16 %v2473_v1, %v2473_v1 }
 0xce5   : > { %v2711_v3 = vpack.c.bf16 %v2707_v62, %v2707_v62 }
 0xce6   : > { %v5039_v4 = vpop.eup %5038  ;;  %v2810_v5 = vsel %vm1764_vm4, %v2480_v2, 0 }
 0xce7   : > { %v2708_v6 = vmul.f32 %v5039_v4, %v5031_v49  ;;  %4587 = vmatmul.mubr.msk.bf16.vlgmr.msra.gmra.mrb[52].mxu1 %vm1712_vm3, %v2711_v3  ;;  %4591 = vmatpush3.bf16.msra.mxu0 %v2810_v5  ;;  %v4948_v3 = vld [vmem:[#allocation31 + $0x64] ss:$16 sps:$4 sm:$0xff]   ;;  %v4951_v4 = vld [vmem:[#allocation31 + $0x6c] ss:$16 sps:$4 sm:$0xff]   ;;  %v4946_v5 = vld [vmem:[#allocation31 + $0x60] ss:$16 sps:$4 sm:$0xff]  }
 0xce8   : > { %4597 = vmatpush3.bf16.msra.mxu1 %v2856_v7  ;;  %4598 = vmatprep.mubr.msk.bf16.mxu1 %vm5747_vm0, %v5746_v0  ;;  %v4954_v7 = vld [vmem:[#allocation31 + $0x84] ss:$16 sps:$4 sm:$0xff]  }
 0xce9   : > { %v2712_v8 = vpack.c.bf16 %v2708_v6, %v2708_v6  ;;  %4602 = vmatprep.subr.bf16.mxu0 %v5746_v0  ;;  %3268 = vmatprep.subr.bf16.mxu1 %v4930_v52  ;;  %v4949_v6 = vld [vmem:[#allocation31 + $0x68] ss:$16 sps:$4 sm:$0xff]   ;;  %v4993_v52 = vld [vmem:[#allocation32 + $0xe0] sm:$0xff]  }
 0xcea   : > { %v5041_v9 = vpop.eup %5040 }
 0xceb   : > { %v2709_v10 = vmul.f32 %v5041_v9, %v5033_v51  ;;  %4593 = vmatmul.mubr.msk.bf16.vlgmr.msra.gmra.mrb[28].mxu0 %vm1712_vm3, %v2712_v8  ;;  %v4928_v51 = vld [vmem:[#allocation31] ss:$16 sps:$4 sm:$0xff]   ;;  %v4957_v8 = vld [vmem:[#allocation31 + $0x8c] ss:$16 sps:$4 sm:$0xff]  }
 0xcec   : > { %4618 = vmatprep.mubr.msk.bf16.mxu0 %vm5747_vm0, %v5746_v0  ;;  %4603 = vmatpush3.bf16.msra.mxu0 %v4920_v12  ;;  %v4952_v9 = vld [vmem:[#allocation31 + $0x80] ss:$16 sps:$4 sm:$0xff]   ;;  %v4963_v12 = vld [vmem:[#allocation31 + $0xac] ss:$16 sps:$4 sm:$0xff]  }
 0xced   : > { %v2713_v11 = vpack.c.bf16 %v2709_v10, %v2709_v10  ;;  %4604 = vmatprep.subr.bf16.mxu0 %v5746_v0  ;;  %v4955_v10 = vld [vmem:[#allocation31 + $0x88] ss:$16 sps:$4 sm:$0xff]  }
 0xcef   : > { %4599 = vmatmul.mubr.msk.bf16.vlgmr.msra.gmra.mrb[56].mxu1 %vm1712_vm3, %v2713_v11  ;;  %v4960_v11 = vld [vmem:[#allocation31 + $0xa4] ss:$16 sps:$4 sm:$0xff]  }
 0xcf0   : > { %4605 = vmatpush3.bf16.msra.mxu0 %v4921_v13  ;;  %3269 = vmatpush1.bf16.msra.mxu1 %v4928_v51  ;;  %v4958_v13 = vld [vmem:[#allocation31 + $0xa0] ss:$16 sps:$4 sm:$0xff]  }
 0xcf1   : > { %4606 = vmatprep.subr.bf16.mxu0 %v5746_v0  ;;  %3270 = vmatprep.subr.bf16.mxu1 %v4936_v55  ;;  %v4992_v51 = vld [vmem:[#allocation32 + $0x60] sm:$0xff]   ;;  %v4996_v55 = vld [vmem:[#allocation32 + $0x68] sm:$0xff]  }
 0xcf4   : > { %4607 = vmatpush3.bf16.msra.mxu0 %v4922_v14  ;;  %3271 = vmatpush1.bf16.msra.mxu1 %v4934_v57  ;;  %v4961_v14 = vld [vmem:[#allocation31 + $0xa8] ss:$16 sps:$4 sm:$0xff]  }
 0xcf5   : > { %4608 = vmatprep.subr.bf16.mxu0 %v5746_v0  ;;  %3272 = vmatprep.subr.bf16.mxu1 %v4942_v16  ;;  %v4998_v57 = vld [vmem:[#allocation32 + $0x28] sm:$0xff]   ;;  %v5000_v16 = vld [vmem:[#allocation32 + $0x70] sm:$0xff]  }
 0xcf8   : > { %4609 = vmatpush3.bf16.msra.mxu0 %v4923_v15  ;;  %3273 = vmatpush1.bf16.msra.mxu1 %v4940_v61  ;;  %v4966_v15 = vld [vmem:[#allocation31 + $0xc4] ss:$16 sps:$4 sm:$0xff]  }
 0xcf9   : > { %4610 = vmatprep.subr.bf16.mxu0 %v5746_v0  ;;  %3274 = vmatprep.subr.bf16.mxu1 %v4948_v3  ;;  %v5002_v61 = vld [vmem:[#allocation32 + $0x30] sm:$0xff]   ;;  %v3090_v3 = vsub.s32 0, %v6553_v59 }
 0xcfc   : > { %4611 = vmatpush3.bf16.msra.mxu0 %v4924_v20  ;;  %3275 = vmatpush1.bf16.msra.mxu1 %v4946_v5  ;;  %v4972_v20 = vld [vmem:[#allocation31 + $0xe4] ss:$16 sps:$4 sm:$0xff]   ;;  %v3086_v5 = vld [vmem:[%s6966_s1] sm:$0xf]  ;;  %s6970_s1 = sld [smem:[#allocation76_spill]] }
 0xcfd   : > { %4612 = vmatprep.subr.bf16.mxu0 %v5746_v0  ;;  %3276 = vmatprep.subr.bf16.mxu1 %v4954_v7  ;;  %v3102_v7 = vsub.s32 3, %v6553_v59 }
 0xd00   : > { %4613 = vmatpush3.bf16.msra.mxu0 %v4925_v23  ;;  %3277 = vmatpush1.bf16.msra.mxu1 %v4952_v9  ;;  %v4970_v23 = vld [vmem:[#allocation31 + $0xe0] ss:$16 sps:$4 sm:$0xff]  }
 0xd01   : > { %4614 = vmatprep.subr.bf16.mxu0 %v5746_v0  ;;  %3278 = vmatprep.subr.bf16.mxu1 %v4960_v11  ;;  %v3103_v11 = vrot.slane %v3086_v5, %v3102_v7 }
 0xd02   : > { %s6775_s4 = scalar_lea.hbm %s6970_s1, %s4215_s12 }
 0xd04   : > { %4615 = vmatpush3.bf16.msra.mxu0 %v4926_v24  ;;  %3279 = vmatpush1.bf16.msra.mxu1 %v4958_v13  ;;  %v4973_v24 = vld [vmem:[#allocation31 + $0xe8] ss:$16 sps:$4 sm:$0xff]  }
 0xd05   : > { %4616 = vmatprep.subr.bf16.mxu0 %v5746_v0  ;;  %3280 = vmatprep.subr.bf16.mxu1 %v4966_v15 }
 0xd08   : > { %4617 = vmatpush3.bf16.msra.mxu0 %v4927_v25  ;;  %v5751_v25 = vmov 0  }
 0xd09   : > { %3309 = vmatprep.subr.bf16.mxu0 %v4933_v54  ;;  %3300 = vmatprep.mubr.bf16.mxu1 %v5751_v25  ;;  %v4995_v54 = vld [vmem:[#allocation32 + $0xa0] sm:$0xff]  }
 0xd51   : > { %v2754_v17 = vpop.f32.mrb[24].mxu0 }
 0xd52   : > { %v4582_v18 = vpop.f32.mrb[25].mxu0 }
 0xd53   : > { %v2757_v19 = vpop.f32.mrb[26].mxu0  ;;  %v4964_v18 = vld [vmem:[#allocation31 + $0xc0] ss:$16 sps:$4 sm:$0xff]  }
 0xd54   : > { %v4583_v21 = vpop.f32.mrb[27].mxu0  ;;  %v4967_v19 = vld [vmem:[#allocation31 + $0xc8] ss:$16 sps:$4 sm:$0xff]   ;;  %3281 = vmatpush1.bf16.msra.mxu1 %v4964_v18 }
 0xd55   : > { %v4975_v21 = vld [vmem:[#allocation31 + $0xec] ss:$16 sps:$4 sm:$0xff]   ;;  %3282 = vmatprep.subr.bf16.mxu1 %v4972_v20 }
 0xd58   : > { %3283 = vmatpush1.bf16.msra.mxu1 %v4970_v23 }
 0xdba   : > { %v2800_v26 = vpop.f32.mrb[52].mxu1 }
 0xdbb   : > { %2899 = vrot.lane.b32.xlu1 %v2800_v26, %s5750_s15  ;;  %v4588_v27 = vpop.f32.mrb[53].mxu1  ;;  %v4976_v26 = vld [vmem:[#allocation32 + $0x40] sm:$0xff]  }
 0xdbc   : > { %v2803_v28 = vpop.f32.mrb[54].mxu1  ;;  %v4977_v27 = vld [vmem:[#allocation32 + $0xc0] sm:$0xff]   ;;  %4322 = vmatprep.subr.bf16.mxu1 %v4976_v26 }
 0xdbd   : > { %v4589_v29 = vpop.f32.mrb[55].mxu1 }
 0xdbe   : > { %v2846_v30 = vpop.f32.mrb[28].mxu0 }
 0xdbf   : > { %2903 = vrot.lane.b32.xlu0 %v2846_v30, %s5748_s20  ;;  %v4594_v31 = vpop.f32.mrb[29].mxu0  ;;  %s5616_s20 = scalar_lea.vmem %s5615_s22, 256 }
 0xdc0   : > { %v2849_v32 = vpop.f32.mrb[30].mxu0 }
 0xdc1   : > { %v4595_v33 = vpop.f32.mrb[31].mxu0  ;;  %v4145_v32 = vld [vmem:[%s6964_s17] ss:$0 sm:$0xff]  ;;  %s6969_s17 = sld [smem:[#allocation75_spill]] }
 0xdc2   : > { %v2892_v34 = vpop.f32.mrb[56].mxu1 }
 0xdc3   : > { %2907 = vrot.lane.b32.xlu1 %v2892_v34, %s5749_s21  ;;  %v4600_v0 = vpop.f32.mrb[57].mxu1  ;;  %v4146_v34 = vld [vmem:[%s6965_s0] ss:$0 sm:$0xff]  ;;  %s3744_s0 = sshll.u32 %s1140_s23, 4  ;;  %s6777_s0 = int_to_ptr.vmem [resolvable:$true] %s3744_s0 }
 0xdc4   : > { %v2895_v35 = vpop.f32.mrb[58].mxu1  ;;  %p5617_p5 = scmp.lt.s32.totalorder %s6777_s0, %s5615_s22 }
 0xdc5   : > { %v4601_v36 = vpop.f32.mrb[59].mxu1 }
 0xdc6   : > { %v4978_v36 = vld [vmem:[#allocation32] sm:$0xff]  }
 0xe2d   : > { %v2900_v37 = vpop.permute.xlu1 %2899 }
 0xe2e   : > { %v2910_v39 = vsel %vm1527_vm1, %v2754_v17, %v2900_v37  ;;  %v4969_v17 = vld [vmem:[#allocation31 + $0xcc] ss:$16 sps:$4 sm:$0xff]   ;;  %v4979_v37 = vld [vmem:[#allocation32 + $0x80] sm:$0xff]  }
 0xe31   : > { %v2904_v38 = vpop.permute.xlu0 %2903 }
 0xe32   : > { %v2911_v40 = vsel %vm1959_vm5, %v2910_v39, %v2904_v38  ;;  %v4980_v39 = vld [vmem:[#allocation32 + $0x48] sm:$0xff]  }
 0xe35   : > { %v2908_v41 = vpop.permute.xlu1 %2907 }
 0xe36   : > { %v2912_v42 = vsel %vm1961_vm6, %v2911_v40, %v2908_v41  ;;  %v4981_v40 = vld [vmem:[#allocation32 + $0xc8] sm:$0xff]  }
 0xe37   : > { %v2913_v43 = vpack.c.bf16 %v2912_v42, %v2912_v42  ;;  %v4982_v41 = vld [vmem:[#allocation32 + $0x8] sm:$0xff]  }
 0xe38   : > { %v4983_v42 = vld [vmem:[#allocation32 + $0x88] sm:$0xff]  }
 0xe39   : > { %4619 = vmatmul.mubr.bf16.vlgmr.msra.gmra.mrb[32].mxu0 %v2913_v43  ;;  %v4984_v43 = vld [vmem:[#allocation32 + $0x50] sm:$0xff]  }
 0xe3a   : > { %3310 = vmatpush1.bf16.msra.mxu0 %v4931_v53  ;;  %3341 = vmatprep.mubr.bf16.mxu0 %v5751_v25  ;;  %v4994_v53 = vld [vmem:[#allocation32 + $0x20] sm:$0xff]  }
 0xe3b   : > { %3311 = vmatprep.subr.bf16.mxu0 %v4939_v56  ;;  %v4997_v56 = vld [vmem:[#allocation32 + $0xe8] sm:$0xff]  }
 0xe3e   : > { %3312 = vmatpush1.bf16.msra.mxu0 %v4937_v58  ;;  %v4999_v58 = vld [vmem:[#allocation32 + $0xa8] sm:$0xff]  }
 0xe3f   : > { %3313 = vmatprep.subr.bf16.mxu0 %v4945_v60  ;;  %v5001_v60 = vld [vmem:[#allocation32 + $0xf0] sm:$0xff]  }
 0xf0c   : > { %v3019_v45 = vpop.f32.mrb[32].mxu0 }
 0xf0d   : > { %v3020_v46 = vadd.f32 %v4136_v44, %v3019_v45  ;;  %v4620_v47 = vpop.f32.mrb[33].mxu0  ;;  %v4985_v44 = vld [vmem:[#allocation32 + $0xd0] sm:$0xff]  }
 0xf0e   : > { %v3022_v48 = vpop.f32.mrb[34].mxu0  ;;  %v4986_v45 = vld [vmem:[#allocation32 + $0x10] sm:$0xff]   ;;  %v4988_v47 = vld [vmem:[#allocation32 + $0x58] sm:$0xff]  }
 0xf0f   : > { %v4621_v49 = vpop.f32.mrb[35].mxu0  ;;  %v3025_v50 = vadd.f32 %v3020_v46, %v6625_v22  ;;  %v4943_v22 = vld [vmem:[#allocation31 + $0x48] ss:$16 sps:$4 sm:$0xff]   ;;  %v4987_v46 = vld [vmem:[#allocation32 + $0x90] sm:$0xff]  }
 0xf10   : > { %3314 = vmatpush1.bf16.msra.mxu0 %v4943_v22  ;;  %v4989_v48 = vld [vmem:[#allocation32 + $0xd8] sm:$0xff]   ;;  %v5003_v22 = vld [vmem:[#allocation32 + $0xb0] sm:$0xff]  }
 0xf11   : > { %3026 = vadd.xlane.f32.xlu0 %v3025_v50  ;;  %3315 = vmatprep.subr.bf16.mxu0 %v4951_v4  ;;  %v4990_v49 = vld [vmem:[#allocation32 + $0x18] sm:$0xff]   ;;  %v3098_v4 = vsub.s32 2, %v6553_v59 }
 0xf13   : > { %v3099_v9 = vrot.slane %v3086_v5, %v3098_v4 }
 0xf14   : > { %3316 = vmatpush1.bf16.msra.mxu0 %v4949_v6  ;;  %v3094_v6 = vsub.s32 1, %v6553_v59 }
 0xf15   : > { %3317 = vmatprep.subr.bf16.mxu0 %v4957_v8  ;;  %v3091_v8 = vrot.slane %v3086_v5, %v3090_v3 }
 0xf18   : > { %3318 = vmatpush1.bf16.msra.mxu0 %v4955_v10  ;;  %v3095_v10 = vrot.slane %v3086_v5, %v3094_v6 }
 0xf19   : > { %3319 = vmatprep.subr.bf16.mxu0 %v4963_v12 }
 0xf1c   : > { %3320 = vmatpush1.bf16.msra.mxu0 %v4961_v14 }
 0xf1d   : > { %3321 = vmatprep.subr.bf16.mxu0 %v4969_v17 }
 0xf20   : > { %3322 = vmatpush1.bf16.msra.mxu0 %v4967_v19 }
 0xf21   : > { %3323 = vmatprep.subr.bf16.mxu0 %v4975_v21 }
 0xf24   : > { %3324 = vmatpush1.bf16.msra.mxu0 %v4973_v24 }
 0xf25   : > { %4344 = vmatprep.subr.bf16.mxu0 %v4977_v27 }
 0xf9e   : > { %v3027_v62 = vpop.xlane.xlu0 %3026 }
 0xf9f   : > { %v3028_v63 = vmul.f32 0.0078125, %v3027_v62  ;;  %v5004_v62 = vld [vmem:[#allocation32 + $0x78] sm:$0xff]  }
 0xfa1   : > { %v3029_v1 = vsub.f32 %v3025_v50, %v3028_v63  ;;  %v4991_v50 = vld [vmem:[#allocation32 + $0x98] sm:$0xff]  }
 0xfa2   : > { %v5005_v63 = vld [vmem:[#allocation32 + $0xf8] sm:$0xff]  }
 0xfa3   : > { %v3030_v2 = vmul.f32 %v3029_v1, %v3029_v1 }
 0xfa5   : > { %3031 = vadd.xlane.f32.xlu1 %v3030_v2  ;;  %v5007_v2 = vld [vmem:[#allocation32 + $0xb8] sm:$0xff]  }
0x1032   : > { %v3032_v28 = vpop.xlane.xlu1 %3031 }
0x1033   : > { %v3033_v29 = vmul.f32 0.0078125, %v3032_v28 }
0x1035   : > { %v3034_v30 = vadd.f32 1e-05, %v3033_v29 }
0x1037   : > { %5042 = vrsqrt.f32 %v3034_v30 }
0x1041   : > { %v5043_v31 = vpop.eup %5042 }
0x1042   : > { %v3036_v33 = vmul.f32 %v5043_v31, %v3029_v1  ;;  %v5006_v1 = vld [vmem:[#allocation32 + $0x38] sm:$0xff]  }
0x1044   : > { %v3044_v0 = vmul.f32 %v4145_v32, %v3036_v33 }
0x1046   : > { %v6749_v35 = vadd.f32 %v4146_v34, %v3044_v0  ;;  %v4179_v0 = vld [vmem:[%s6967_s16] ss:$0 sm:$0xff]  ;;  %s5610_s16 = scalar_lea.vmem %s6777_s0, 128 }
0x1047   : > { %p5611_p3 = scmp.ne.s32.totalorder %s6777_s0, %s5610_s16  ;;  %p5618_p7 = scmp.lt.s32.totalorder %s5616_s20, %s5610_s16 }
0x1048   : > { %v3053_v38 = vpack.c.bf16 %v6749_v35, %v6749_v35 }
0x1049   : > { %p5612_p4 = pnand %p5611_p3, %p6971_p2  ;;  %p5619_p0 = por %p5618_p7, %p5617_p5 }
0x104a   : > { %3301 = vmatmul.mubr.bf16.vlgmr.msra.gmra.mrb[60].mxu1 %v3053_v38  ;;  %3342 = vmatmul.mubr.bf16.vlgmr.msra.gmra.mrb[36].mxu0 %v3053_v38 }
0x104b   : > { %4323 = vmatpush3.bf16.msra.mxu1 %v4978_v36  ;;  %4345 = vmatpush3.bf16.msra.mxu0 %v4979_v37  ;;  %p5613_p10 = pneg %p5612_p4 }
0x104c   : > { %4324 = vmatprep.subr.bf16.mxu1 %v4980_v39  ;;  %4346 = vmatprep.subr.bf16.mxu0 %v4981_v40 }
0x104d   : > { %p5620_p6 = pnand %p5619_p0, %p5613_p10 }
0x104f   : > { %4325 = vmatpush3.bf16.msra.mxu1 %v4982_v41  ;;  %4347 = vmatpush3.bf16.msra.mxu0 %v4983_v42 }
0x1050   : > { %4326 = vmatprep.subr.bf16.mxu1 %v4984_v43  ;;  %4348 = vmatprep.subr.bf16.mxu0 %v4985_v44 }
0x1053   : > { %4327 = vmatpush3.bf16.msra.mxu1 %v4986_v45  ;;  %4349 = vmatpush3.bf16.msra.mxu0 %v4987_v46 }
0x1054   : > { %4328 = vmatprep.subr.bf16.mxu1 %v4988_v47  ;;  %4350 = vmatprep.subr.bf16.mxu0 %v4989_v48 }
0x1057   : > { %4329 = vmatpush3.bf16.msra.mxu1 %v4990_v49  ;;  %4351 = vmatpush3.bf16.msra.mxu0 %v4991_v50 }
0x1058   : > { %4330 = vmatprep.subr.bf16.mxu1 %v4992_v51  ;;  %4352 = vmatprep.subr.bf16.mxu0 %v4993_v52 }
0x105b   : > { %4331 = vmatpush3.bf16.msra.mxu1 %v4994_v53  ;;  %4353 = vmatpush3.bf16.msra.mxu0 %v4995_v54 }
0x105c   : > { %4332 = vmatprep.subr.bf16.mxu1 %v4996_v55  ;;  %4354 = vmatprep.subr.bf16.mxu0 %v4997_v56  ;;  %v4212_v55 = vld [vmem:[%s6968_s6] ss:$0 sm:$0xff] }
0x105f   : > { %4333 = vmatpush3.bf16.msra.mxu1 %v4998_v57  ;;  %4355 = vmatpush3.bf16.msra.mxu0 %v4999_v58 }
0x1060   : > { %4334 = vmatprep.subr.bf16.mxu1 %v5000_v16  ;;  %4356 = vmatprep.subr.bf16.mxu0 %v5001_v60 }
0x1063   : > { %4335 = vmatpush3.bf16.msra.mxu1 %v5002_v61  ;;  %4357 = vmatpush3.bf16.msra.mxu0 %v5003_v22 }
0x1064   : > { %4336 = vmatprep.subr.bf16.mxu1 %v5004_v62  ;;  %4358 = vmatprep.subr.bf16.mxu0 %v5005_v63 }
0x1067   : > { %4337 = vmatpush3.bf16.msra.mxu1 %v5006_v1  ;;  %4359 = vmatpush3.bf16.msra.mxu0 %v5007_v2 }
0x111d   : > { %v3302_v12 = vpop.f32.mrb[60].mxu1  ;;  %v3343_v13 = vpop.f32.mrb[36].mxu0 }
0x111e   : > { %v3303_v14 = vadd.f32 %v3302_v12, %v3091_v8  ;;  %v3344_v15 = vadd.f32 %v3343_v13, %v3099_v9  ;;  %v3304_v17 = vpop.f32.mrb[61].mxu1  ;;  %v3345_v18 = vpop.f32.mrb[37].mxu0 }
0x111f   : > { %v3305_v19 = vadd.f32 %v3304_v17, %v3095_v10  ;;  %v3346_v20 = vadd.f32 %v3345_v18, %v3103_v11  ;;  %v3306_v21 = vpop.f32.mrb[62].mxu1  ;;  %v3347_v23 = vpop.f32.mrb[38].mxu0 }
0x1120   : > { %v3350_v24 = vmax.f32 %v3303_v14, 0.0  ;;  %v3352_v25 = vmax.f32 %v3344_v15, 0.0  ;;  %v3307_v26 = vpop.f32.mrb[63].mxu1  ;;  %v3348_v27 = vpop.f32.mrb[39].mxu0 }
0x1121   : > { %v3351_v28 = vmax.f32 %v3305_v19, 0.0  ;;  %v3353_v59 = vmax.f32 %v3346_v20, 0.0 }
0x1122   : > { %v3354_v31 = vpack.c.bf16 %v3350_v24, %v3350_v24  ;;  %v3356_v32 = vpack.c.bf16 %v3352_v25, %v3352_v25 }
0x1123   : > { %v3355_v29 = vpack.c.bf16 %v3351_v28, %v3351_v28  ;;  %v3357_v30 = vpack.c.bf16 %v3353_v59, %v3353_v59 }
0x1125   : > { %3653 = vmatprep.mubr.bf16.mxu1 %v3355_v29  ;;  %3693 = vmatprep.mubr.bf16.mxu0 %v3357_v30 }
0x1126   : > { %3654 = vmatmul.mubr.bf16.vlgmr.msra.gmra.mrb[64].mxu1 %v3354_v31  ;;  %3694 = vmatmul.mubr.bf16.vlgmr.msra.gmra.mrb[40].mxu0 %v3356_v32 }
0x11f9   : > { %v4338_v33 = vpop.f32.mrb[64].mxu1  ;;  %v4360_v34 = vpop.f32.mrb[40].mxu0 }
0x11fa   : > { %v4339_v36 = vpop.f32.mrb[65].mxu1  ;;  %v4361_v37 = vpop.f32.mrb[41].mxu0 }
0x11fb   : > { %v4340_v38 = vadd.f32 %v4339_v36, %v4338_v33  ;;  %v4362_v39 = vadd.f32 %v4361_v37, %v4360_v34  ;;  %v4341_v40 = vpop.f32.mrb[66].mxu1  ;;  %v4363_v41 = vpop.f32.mrb[42].mxu0 }
0x11fc   : > { %v4342_v42 = vpop.f32.mrb[67].mxu1  ;;  %v4364_v43 = vpop.f32.mrb[43].mxu0 }
0x11fd   : > { %v3656_v44 = vadd.f32 %v4340_v38, %v4179_v0 }
0x11ff   : > { %v3696_v45 = vadd.f32 %v4362_v39, %v3656_v44 }
0x1201   : > { %v3701_v46 = vadd.f32 %v3696_v45, %v6749_v35  ;;  %v4213_v35 = vld [vmem:[%s6969_s17] ss:$0 sm:$0xff] }
0x1203   : > { %3702 = vadd.xlane.f32.xlu0 %v3701_v46 }
0x1290   : > { %v3703_v47 = vpop.xlane.xlu0 %3702 }
0x1291   : > { %v3704_v48 = vmul.f32 0.0078125, %v3703_v47 }
0x1293   : > { %v3705_v49 = vsub.f32 %v3701_v46, %v3704_v48 }
0x1295   : > { %v3706_v50 = vmul.f32 %v3705_v49, %v3705_v49 }
0x1297   : > { %3707 = vadd.xlane.f32.xlu0 %v3706_v50 }
0x1324   : > { %v3708_v51 = vpop.xlane.xlu0 %3707 }
0x1325   : > { %v3709_v52 = vmul.f32 0.0078125, %v3708_v51 }
0x1327   : > { %v3710_v53 = vadd.f32 1e-05, %v3709_v52 }
0x1329   : > { %5044 = vrsqrt.f32 %v3710_v53 }
0x1333   : > { %v5045_v54 = vpop.eup %5044 }
0x1334   : > { %v3712_v56 = vmul.f32 %v5045_v54, %v3705_v49 }
0x1336   : > { %v3720_v57 = vmul.f32 %v4212_v55, %v3712_v56 }
0x1338   : > { %v3728_v58 = vadd.f32 %v4213_v35, %v3720_v57 }
0x133a   : > { %3729 = vst [vmem:[%s1140_s23] sm:$0xff] %v3728_v58 }
0x133b   : > { %5623 = shalt.err (!%p5620_p6)
}
0x133c   : > { %s5624_s13 = scalar_lea.hbm %s6775_s4, 128  ;;  %s5628_s21 = scalar_lea.hbm %s6970_s1, 256 }
0x133d   : > { %p5625_p11 = scmp.ne.s32.totalorder %s6775_s4, %s5624_s13  ;;  %p5629_p12 = scmp.lt.u32.totalorder %s6775_s4, %s6970_s1 }
0x133e   : > { %p5630_p13 = scmp.lt.u32.totalorder %s5628_s21, %s5624_s13  ;;  %p5632_p3 = scmp.lt.u32.totalorder %s5624_s13, %s6775_s4 }
0x133f   : > { %p5626_p8 = pnand %p5625_p11, %p6971_p2 }
0x1340   : > { %p5631_p1 = por %p5630_p13, %p5629_p12 }
0x1341   : > { %p5627_p9 = pneg %p5626_p8 }
0x1342   : > { %p5633_p4 = por %p5632_p3, %p5631_p1 }
0x1344   : > { %p5634_p10 = pnand %p5633_p4, %p5627_p9 }
0x1346   : > { %5637 = shalt.err (!%p5634_p10)
}
0x1347   : > { %4698 = dma.vmem_to_hbm [thread:$0]  (%p6971_p2), %s6777_s0, 128, %s6775_s4, %s3731_s24  }
0x1348 PF: > { %s3756_s12 = sand.u32 1, %s5708_s8   ;;  %p6972_p5 = scmp.ne.s32.totalorder %s6936_s3, 0 }
0x1349   : > { %p6973_p7 = scmp.ge.s32.totalorder %s5720_s30, 2  ;;  %s3757_s23 = scalar_lea.sflag [#allocation4], %s3756_s12 }
0x134b   : > { %p4763_p0 = pnand %p6973_p7, %p6972_p5 }
0x134d   : > { %5703 = dma.done.wait (!%p4763_p0), %s3757_s23, 128  }
0x134e   : > { %5705 = vsyncadd (!%p4763_p0), %s3757_s23, 4294967168  ;;  %p53_p6 = scmp.ge.s32.totalorder %s6316_s11, 4   ;;  %s6974_s8 = smov %s5712_s5 }
0x134f   : > { %s6975_s5 = smov %s5716_s9  ;;  %s6976_s9 = smov %s6327_s18 }
0x1350   : > { %s6977_s30 = smov %s6316_s11  ;;  %55 = sbr.rel (!%p53_p6) target bundleno = 46 (0x2e), region = 262 }
0x1357   :  { %3762 = vsyncpa [#allocation3], 1 }
0x1358   :  { %3764 = vsyncpa [#allocation3 + $0x1], 1 }
0x1359   :  { %3765 = vsyncpa [#allocation6], 1 }
0x135a   :  { %3767 = vsyncpa [#allocation6 + $0x1], 1 }
0x135b   :  { %3768 = vsyncpa [#allocation9], 1 }
0x135c   :  { %3769 = vsyncpa [#allocation12], 1 }
0x135d   :  { %3770 = vsyncpa [#allocation15], 1 }
0x135e   :  { %3771 = vsyncpa [#allocation18], 1 }
0x135f   :  { %3772 = vsyncpa [#allocation21], 1 }
0x1360   :  { %3773 = vsyncpa [#allocation24], 1 }
0x1361   :  { %3774 = vsyncpa [#allocation27], 1 }
0x1362   :  { %3775 = vsyncpa [#allocation30], 1 }
0x1363   :  { %3776 = vsyncpa [#allocation33], 1 }
0x1364   :  { %3777 = vsyncpa [#allocation4], 1 }
0x1365   :  { %3779 = vsyncpa [#allocation4 + $0x1], 1 }

// kernel: tpu_custom_call.1
= control target key start
LH: loop header
LB: loop body
LE: loop exit
PB: predicated region body
PF: predicated region fallthrough
CT: control target
= control target key end

     0   :  { %s6819_s0 = inlined_call_operand.hbm [shape: f32[2,8,128], index: 0, kind: input, shape index: {}]   ;;  %s6820_s1 = inlined_call_operand.hbm [shape: f32[2,8,128], index: 1, kind: input, shape index: {}]   ;;  %s6821_s2 = inlined_call_operand.hbm [shape: bf16[128,128], index: 2, kind: input, shape index: {}]   ;;  %s6822_s3 = inlined_call_operand.hbm [shape: f32[1,128], index: 3, kind: input, shape index: {}]   ;;  %s6823_s4 = inlined_call_operand.hbm [shape: bf16[128,128], index: 4, kind: input, shape index: {}]   ;;  %s6824_s5 = inlined_call_operand.hbm [shape: f32[1,128], index: 5, kind: input, shape index: {}]   ;;  %s6825_s6 = inlined_call_operand.hbm [shape: bf16[128,128], index: 6, kind: input, shape index: {}]   ;;  %s6826_s7 = inlined_call_operand.hbm [shape: f32[1,128], index: 7, kind: input, shape index: {}]   ;;  %s6827_s8 = inlined_call_operand.hbm [shape: bf16[128,128], index: 8, kind: input, shape index: {}]   ;;  %s6828_s9 = inlined_call_operand.hbm [shape: f32[1,128], index: 9, kind: input, shape index: {}]   ;;  %s6829_s10 = inlined_call_operand.hbm [shape: f32[1,128], index: 10, kind: input, shape index: {}]   ;;  %s6830_s11 = inlined_call_operand.hbm [shape: f32[1,128], index: 11, kind: input, shape index: {}]   ;;  %s6831_s12 = inlined_call_operand.hbm [shape: bf16[128,128], index: 12, kind: input, shape index: {}]   ;;  %s6832_s13 = inlined_call_operand.hbm [shape: f32[1,128], index: 13, kind: input, shape index: {}]   ;;  %s6833_s14 = inlined_call_operand.hbm [shape: bf16[128,128], index: 14, kind: input, shape index: {}]   ;;  %s6834_s15 = inlined_call_operand.hbm [shape: f32[1,128], index: 15, kind: input, shape index: {}]   ;;  %s6835_s16 = inlined_call_operand.hbm [shape: bf16[128,128], index: 16, kind: input, shape index: {}]   ;;  %s6836_s17 = inlined_call_operand.hbm [shape: f32[1,128], index: 17, kind: input, shape index: {}]   ;;  %s6837_s18 = inlined_call_operand.vmem [shape: bf16[128,128], index: 18, kind: input, shape index: {}]   ;;  %s6838_s19 = inlined_call_operand.vmem [shape: f32[1,128], index: 19, kind: input, shape index: {}]   ;;  %s6839_s20 = inlined_call_operand.vmem [shape: f32[1,128], index: 20, kind: input, shape index: {}]   ;;  %s6840_s21 = inlined_call_operand.vmem [shape: f32[1,128], index: 21, kind: input, shape index: {}]   ;;  %s6841_s22 = inlined_call_operand.hbm [shape: bf16[128,512], index: 22, kind: input, shape index: {}]   ;;  %s6842_s23 = inlined_call_operand.vmem [shape: f32[1,512], index: 23, kind: input, shape index: {}]   ;;  %s6843_s24 = inlined_call_operand.hbm [shape: bf16[512,128], index: 24, kind: input, shape index: {}]   ;;  %s6844_s25 = inlined_call_operand.vmem [shape: f32[1,128], index: 25, kind: input, shape index: {}]   ;;  %s6845_s26 = inlined_call_operand.vmem [shape: f32[1,128], index: 26, kind: input, shape index: {}]   ;;  %s6846_s27 = inlined_call_operand.vmem [shape: f32[1,128], index: 27, kind: input, shape index: {}]   ;;  %s6847_s28 = inlined_call_operand.hbm [shape: f32[2,8,128], index: 28, kind: output, shape index: {}]  }
   0x1   :  { %6880 = sst [smem:[#allocation48_spill]] %s6819_s0 }
   0x2   :  { %6881 = sst [smem:[#allocation49_spill]] %s6820_s1 }
   0x3   :  { %6882 = sst [smem:[#allocation50_spill]] %s6821_s2 }
   0x4   :  { %6883 = sst [smem:[#allocation51_spill]] %s6822_s3 }
   0x5   :  { %6884 = sst [smem:[#allocation52_spill]] %s6823_s4 }
   0x6   :  { %6885 = sst [smem:[#allocation53_spill]] %s6824_s5 }
   0x7   :  { %6886 = sst [smem:[#allocation54_spill]] %s6825_s6 }
   0x8   :  { %6887 = sst [smem:[#allocation55_spill]] %s6826_s7 }
   0x9   :  { %6888 = sst [smem:[#allocation56_spill]] %s6827_s8 }
   0xa   :  { %6889 = sst [smem:[#allocation57_spill]] %s6828_s9 }
   0xb   :  { %6890 = sst [smem:[#allocation58_spill]] %s6829_s10 }
   0xc   :  { %6891 = sst [smem:[#allocation59_spill]] %s6830_s11 }
   0xd   :  { %6892 = sst [smem:[#allocation60_spill]] %s6831_s12 }
   0xe   :  { %6893 = sst [smem:[#allocation61_spill]] %s6832_s13 }
   0xf   :  { %6894 = sst [smem:[#allocation62_spill]] %s6833_s14 }
  0x10   :  { %6895 = sst [smem:[#allocation63_spill]] %s6834_s15 }
  0x11   :  { %6896 = sst [smem:[#allocation64_spill]] %s6835_s16 }
  0x12   :  { %6897 = sst [smem:[#allocation65_spill]] %s6836_s17 }
  0x13   :  { %6898 = sst [smem:[#allocation66_spill]] %s6837_s18 }
  0x14   :  { %6899 = sst [smem:[#allocation67_spill]] %s6838_s19 }
  0x15   :  { %6900 = sst [smem:[#allocation68_spill]] %s6839_s20 }
  0x16   :  { %6901 = sst [smem:[#allocation69_spill]] %s6840_s21 }
  0x17   :  { %6902 = sst [smem:[#allocation70_spill]] %s6841_s22 }
  0x18   :  { %6903 = sst [smem:[#allocation71_spill]] %s6842_s23 }
  0x19   :  { %6904 = sst [smem:[#allocation72_spill]] %s6843_s24 }
  0x1a   :  { %6905 = sst [smem:[#allocation73_spill]] %s6844_s25 }
  0x1b   :  { %6906 = sst [smem:[#allocation74_spill]] %s6845_s26 }
  0x1c   :  { %6907 = sst [smem:[#allocation75_spill]] %s6846_s27 }
  0x1d   :  { %6908 = sst [smem:[#allocation76_spill]] %s6847_s28 }
  0x1e   :  { %33 = vsyncpa [#allocation3], 0 }
  0x1f   :  { %35 = vsyncpa [#allocation3 + $0x1], 0 }
  0x20   :  { %36 = vsyncpa [#allocation6], 0 }
  0x21   :  { %38 = vsyncpa [#allocation6 + $0x1], 0 }
  0x22   :  { %39 = vsyncpa [#allocation9], 0 }
  0x23   :  { %40 = vsyncpa [#allocation12], 0 }
  0x24   :  { %41 = vsyncpa [#allocation15], 0 }
  0x25   :  { %42 = vsyncpa [#allocation18], 0 }
  0x26   :  { %43 = vsyncpa [#allocation21], 0 }
  0x27   :  { %44 = vsyncpa [#allocation24], 0 }
  0x28   :  { %45 = vsyncpa [#allocation27], 0 }
  0x29   :  { %46 = vsyncpa [#allocation30], 0 }
  0x2a   :  { %47 = vsyncpa [#allocation33], 0 }
  0x2b   :  { %48 = vsyncpa [#allocation4], 0 }
  0x2c   :  { %50 = vsyncpa [#allocation4 + $0x1], 0  ;;  %s5898_s8 = smov 0   ;;  %s5900_s5 = smov 0  }
  0x2d   :  { %s5902_s9 = smov 0   ;;  %s5904_s30 = smov 0  }
  0x2e LB: > { %s5722_s3 = smov [#allocation7]   ;;  %s5919_s10 = sadd.s32 4294967295, %s5720_s30   ;;  %s5720_s30 = sphi %s5904_s30, %s6977_s30   ;;  %s5716_s9 = sphi %s5902_s9, %s6976_s9   ;;  %s5712_s5 = sphi %s5900_s5, %s6975_s5   ;;  %s5708_s8 = sphi %s5898_s8, %s6974_s8  }
  0x2f   : > { %s697_s6 = sshll.u32 %s5722_s3, 4  ;;  %p4009_p0 = scmp.ge.s32.totalorder %s5720_s30, 1  ;;  %s5924_s6 = int_to_ptr.vmem [resolvable:$true] %s697_s6 }
  0x30   : > { %p6868_p1 = scmp.eq.s32.totalorder %s5919_s10, 0  ;;  %p685_p2 = scmp.lt.s32.totalorder %s5720_s30, 3 }
  0x31   : > { %s5723_s11 = smov [#allocation8]   ;;  %s5724_s7 = smov [#allocation11]  }
  0x32   : > { %p5926_p3 = pnand %p4009_p0, %p685_p2  ;;  %s711_s29 = sshll.u32 %s5723_s11, 4  ;;  %s5939_s29 = int_to_ptr.vmem [resolvable:$true] %s711_s29 }
  0x33   : > { %s735_s12 = sshll.u32 %s5724_s7, 4  ;;  %s6911_s3 = sld [smem:[#allocation50_spill]]  ;;  %s5941_s12 = int_to_ptr.vmem [resolvable:$true] %s735_s12 }
  0x34   : > { %s6909_s0 = scalar_select %p5926_p3, 1, 0 }
  0x35   : > { %p4700_p5 = pneg %p5926_p3 }
  0x37   : > { %p5935_p6 = pnand %p4700_p5, %p6868_p1 }
  0x39   : > { %s5046_s28 = scalar_lea.hbm %s6911_s3, 1024  ;;  %p5951_p8 = pneg %p5935_p6 }
  0x3a   : > { %p5047_p7 = scmp.ne.s32.totalorder %s6911_s3, %s5046_s28  ;;  %p5053_p11 = scmp.lt.u32.totalorder %s5046_s28, %s6911_s3 }
  0x3c   : > { %p5049_p9 = pnand %p5951_p8, %p5047_p7 }
  0x3e   : > { %p5050_p10 = pneg %p5049_p9 }
  0x40   : > { %p5055_p12 = pnand %p5053_p11, %p5050_p10 }
  0x42   : > { %5058 = shalt.err (!%p5055_p12)
}
  0x43   : > { %s5059_s26 = scalar_lea.vmem %s5924_s6, 1024  ;;  %p5067_p5 = scmp.lt.s32.totalorder %s5924_s6, %s5924_s6 }
  0x44   : > { %p5060_p13 = scmp.ne.s32.totalorder %s5924_s6, %s5059_s26  ;;  %p5068_p4 = scmp.lt.s32.totalorder %s5059_s26, %s5059_s26 }
  0x46   : > { %p5062_p0 = pnand %p5060_p13, %p5951_p8  ;;  %p5069_p7 = por %p5068_p4, %p5067_p5 }
  0x48   : > { %p5063_p2 = pneg %p5062_p0 }
  0x4a   : > { %p5070_p9 = pnand %p5069_p7, %p5063_p2 }
  0x4c   : > { %5073 = shalt.err (!%p5070_p9)
}
  0x4d   : > { %s6863_s27 = smov 64   ;;  %s6865_s25 = smov 4  }
  0x4e   : > { %4703 = dma.hbm_to_vmem [thread:$0]  (!%p5935_p6), %s6911_s3, 1024, %s5924_s6, [#allocation6], %s6863_s27, %s6863_s27, %s6865_s25  }
  0x4f   : > { %s6913_s23 = sld [smem:[#allocation51_spill]] }
  0x55   : > { %s5074_s26 = scalar_lea.hbm %s6913_s23, 16 }
  0x56   : > { %p5075_p4 = scmp.ne.s32.totalorder %s6913_s23, %s5074_s26  ;;  %p5081_p12 = scmp.lt.u32.totalorder %s5074_s26, %s6913_s23 }
  0x58   : > { %p5077_p10 = pnand %p5075_p4, %p5951_p8 }
  0x5a   : > { %p5078_p11 = pneg %p5077_p10 }
  0x5c   : > { %p5083_p13 = pnand %p5081_p12, %p5078_p11 }
  0x5e   : > { %5086 = shalt.err (!%p5083_p13)
}
  0x5f   : > { %s5087_s6 = scalar_lea.vmem %s5939_s29, 16  ;;  %s5094_s20 = scalar_lea.vmem %s5939_s29, 32 }
  0x60   : > { %p5088_p0 = scmp.ne.s32.totalorder %s5939_s29, %s5087_s6  ;;  %p5095_p7 = scmp.lt.s32.totalorder %s5939_s29, %s5939_s29 }
  0x61   : > { %p5096_p9 = scmp.lt.s32.totalorder %s5094_s20, %s5087_s6 }
  0x62   : > { %p5090_p2 = pnand %p5088_p0, %p5951_p8 }
  0x63   : > { %p5097_p4 = por %p5096_p9, %p5095_p7 }
  0x64   : > { %p5091_p5 = pneg %p5090_p2 }
  0x66   : > { %p5098_p10 = pnand %p5097_p4, %p5091_p5 }
  0x68   : > { %5101 = shalt.err (!%p5098_p10)
}
  0x69   : > { %4706 = dma.hbm_to_vmem [thread:$0]  (!%p5935_p6), %s6913_s23, 16, %s5939_s29, [#allocation9]  }
  0x6a   : > { %s6914_s1 = sld [smem:[#allocation53_spill]] }
  0x70   : > { %s5102_s4 = scalar_lea.hbm %s6914_s1, 16 }
  0x71   : > { %p5103_p11 = scmp.ne.s32.totalorder %s6914_s1, %s5102_s4  ;;  %p5109_p0 = scmp.lt.u32.totalorder %s5102_s4, %s6914_s1 }
  0x73   : > { %p5105_p12 = pnand %p5103_p11, %p5951_p8 }
  0x75   : > { %p5106_p13 = pneg %p5105_p12 }
  0x77   : > { %p5111_p2 = pnand %p5109_p0, %p5106_p13 }
  0x79   : > { %5114 = shalt.err (!%p5111_p2)
}
  0x7a   : > { %s5115_s29 = scalar_lea.vmem %s5941_s12, 16  ;;  %s5122_s18 = scalar_lea.vmem %s5941_s12, 32 }
  0x7b   : > { %p5116_p5 = scmp.ne.s32.totalorder %s5941_s12, %s5115_s29  ;;  %p5123_p4 = scmp.lt.s32.totalorder %s5941_s12, %s5941_s12 }
  0x7c   : > { %p5124_p10 = scmp.lt.s32.totalorder %s5122_s18, %s5115_s29 }
  0x7d   : > { %p5118_p7 = pnand %p5116_p5, %p5951_p8 }
  0x7e   : > { %p5125_p11 = por %p5124_p10, %p5123_p4 }
  0x7f   : > { %p5119_p9 = pneg %p5118_p7 }
  0x81   : > { %p5126_p12 = pnand %p5125_p11, %p5119_p9 }
  0x83   : > { %5129 = shalt.err (!%p5126_p12)
}
  0x84   : > { %4712 = dma.hbm_to_vmem [thread:$0]  (!%p5935_p6), %s6914_s1, 16, %s5941_s12, [#allocation12]  }
  0x85   : > { %s5727_s28 = smov [#allocation14]   ;;  %s5728_s7 = smov [#allocation17]  }
  0x86   : > { %s759_s4 = sshll.u32 %s5727_s28, 4  ;;  %s783_s26 = sshll.u32 %s5728_s7, 4  ;;  %s760_s4 = int_to_ptr.vmem [resolvable:$true] %s759_s4  ;;  %s784_s26 = int_to_ptr.vmem [resolvable:$true] %s783_s26 }
  0x87   : > { %s6915_s27 = sld [smem:[#allocation55_spill]] }
  0x8d   : > { %s5130_s29 = scalar_lea.hbm %s6915_s27, 16 }
  0x8e   : > { %p5131_p13 = scmp.ne.s32.totalorder %s6915_s27, %s5130_s29  ;;  %p5137_p5 = scmp.lt.u32.totalorder %s5130_s29, %s6915_s27 }
  0x90   : > { %p5133_p0 = pnand %p5131_p13, %p5951_p8 }
  0x92   : > { %p5134_p2 = pneg %p5133_p0 }
  0x94   : > { %p5139_p7 = pnand %p5137_p5, %p5134_p2 }
  0x96   : > { %5142 = shalt.err (!%p5139_p7)
}
  0x97   : > { %s5143_s12 = scalar_lea.vmem %s760_s4, 16  ;;  %s5150_s21 = scalar_lea.vmem %s760_s4, 32 }
  0x98   : > { %p5144_p9 = scmp.ne.s32.totalorder %s760_s4, %s5143_s12  ;;  %p5151_p11 = scmp.lt.s32.totalorder %s760_s4, %s760_s4 }
  0x99   : > { %p5152_p12 = scmp.lt.s32.totalorder %s5150_s21, %s5143_s12 }
  0x9a   : > { %p5146_p4 = pnand %p5144_p9, %p5951_p8 }
  0x9b   : > { %p5153_p1 = por %p5152_p12, %p5151_p11 }
  0x9c   : > { %p5147_p10 = pneg %p5146_p4 }
  0x9e   : > { %p5154_p3 = pnand %p5153_p1, %p5147_p10 }
  0xa0   : > { %5157 = shalt.err (!%p5154_p3)
}
  0xa1   : > { %4718 = dma.hbm_to_vmem [thread:$0]  (!%p5935_p6), %s6915_s27, 16, %s760_s4, [#allocation15]  }
  0xa2   : > { %s6916_s6 = sld [smem:[#allocation57_spill]] }
  0xa8   : > { %s5158_s20 = scalar_lea.hbm %s6916_s6, 16 }
  0xa9   : > { %p5159_p13 = scmp.ne.s32.totalorder %s6916_s6, %s5158_s20  ;;  %p5165_p3 = scmp.lt.u32.totalorder %s5158_s20, %s6916_s6 }
  0xab   : > { %p5161_p0 = pnand %p5159_p13, %p5951_p8 }
  0xad   : > { %p5162_p1 = pneg %p5161_p0 }
  0xaf   : > { %p5167_p2 = pnand %p5165_p3, %p5162_p1 }
  0xb1   : > { %5170 = shalt.err (!%p5167_p2)
}
  0xb2   : > { %s5171_s21 = scalar_lea.vmem %s784_s26, 16  ;;  %s5178_s4 = scalar_lea.vmem %s784_s26, 32 }
  0xb3   : > { %p5172_p5 = scmp.ne.s32.totalorder %s784_s26, %s5171_s21  ;;  %p5179_p4 = scmp.lt.s32.totalorder %s784_s26, %s784_s26 }
  0xb4   : > { %p5180_p10 = scmp.lt.s32.totalorder %s5178_s4, %s5171_s21 }
  0xb5   : > { %p5174_p7 = pnand %p5172_p5, %p5951_p8 }
  0xb6   : > { %p5181_p11 = por %p5180_p10, %p5179_p4 }
  0xb7   : > { %p5175_p9 = pneg %p5174_p7 }
  0xb9   : > { %p5182_p12 = pnand %p5181_p11, %p5175_p9 }
  0xbb   : > { %5185 = shalt.err (!%p5182_p12)
}
  0xbc   : > { %4724 = dma.hbm_to_vmem [thread:$0]  (!%p5935_p6), %s6916_s6, 16, %s784_s26, [#allocation18]  }
  0xbd   : > { %s5729_s3 = smov [#allocation20]   ;;  %s5730_s20 = smov [#allocation23]  }
  0xbe   : > { %s805_s7 = sshll.u32 %s5729_s3, 4  ;;  %s829_s29 = sshll.u32 %s5730_s20, 4  ;;  %s806_s7 = int_to_ptr.vmem [resolvable:$true] %s805_s7  ;;  %s830_s29 = int_to_ptr.vmem [resolvable:$true] %s829_s29 }
  0xbf   : > { %s6917_s12 = sld [smem:[#allocation59_spill]] }
  0xc5   : > { %s5186_s1 = scalar_lea.hbm %s6917_s12, 16 }
  0xc6   : > { %p5187_p13 = scmp.ne.s32.totalorder %s6917_s12, %s5186_s1  ;;  %p5193_p3 = scmp.lt.u32.totalorder %s5186_s1, %s6917_s12 }
  0xc8   : > { %p5189_p0 = pnand %p5187_p13, %p5951_p8 }
  0xca   : > { %p5190_p1 = pneg %p5189_p0 }
  0xcc   : > { %p5195_p2 = pnand %p5193_p3, %p5190_p1 }
  0xce   : > { %5198 = shalt.err (!%p5195_p2)
}
  0xcf   : > { %s5199_s26 = scalar_lea.vmem %s806_s7, 16  ;;  %s5206_s28 = scalar_lea.vmem %s806_s7, 32 }
  0xd0   : > { %p5200_p5 = scmp.ne.s32.totalorder %s806_s7, %s5199_s26  ;;  %p5207_p4 = scmp.lt.s32.totalorder %s806_s7, %s806_s7 }
  0xd1   : > { %p5208_p10 = scmp.lt.s32.totalorder %s5206_s28, %s5199_s26 }
  0xd2   : > { %p5202_p7 = pnand %p5200_p5, %p5951_p8 }
  0xd3   : > { %p5209_p11 = por %p5208_p10, %p5207_p4 }
  0xd4   : > { %p5203_p9 = pneg %p5202_p7 }
  0xd6   : > { %p5210_p12 = pnand %p5209_p11, %p5203_p9 }
  0xd8   : > { %5213 = shalt.err (!%p5210_p12)
}
  0xd9   : > { %4730 = dma.hbm_to_vmem [thread:$0]  (!%p5935_p6), %s6917_s12, 16, %s806_s7, [#allocation21]  }
  0xda   : > { %s6918_s13 = sld [smem:[#allocation61_spill]] }
  0xe0   : > { %s5214_s18 = scalar_lea.hbm %s6918_s13, 16 }
  0xe1   : > { %p5215_p13 = scmp.ne.s32.totalorder %s6918_s13, %s5214_s18  ;;  %p5221_p3 = scmp.lt.u32.totalorder %s5214_s18, %s6918_s13 }
  0xe3   : > { %p5217_p0 = pnand %p5215_p13, %p5951_p8 }
  0xe5   : > { %p5218_p1 = pneg %p5217_p0 }
  0xe7   : > { %p5223_p2 = pnand %p5221_p3, %p5218_p1 }
  0xe9   : > { %5226 = shalt.err (!%p5223_p2)
}
  0xea   : > { %s5227_s26 = scalar_lea.vmem %s830_s29, 16  ;;  %s5234_s7 = scalar_lea.vmem %s830_s29, 32 }
  0xeb   : > { %p5228_p5 = scmp.ne.s32.totalorder %s830_s29, %s5227_s26  ;;  %p5235_p4 = scmp.lt.s32.totalorder %s830_s29, %s830_s29 }
  0xec   : > { %p5236_p10 = scmp.lt.s32.totalorder %s5234_s7, %s5227_s26 }
  0xed   : > { %p5230_p7 = pnand %p5228_p5, %p5951_p8 }
  0xee   : > { %p5237_p11 = por %p5236_p10, %p5235_p4 }
  0xef   : > { %p5231_p9 = pneg %p5230_p7 }
  0xf1   : > { %p5238_p12 = pnand %p5237_p11, %p5231_p9 }
  0xf3   : > { %5241 = shalt.err (!%p5238_p12)
}
  0xf4   : > { %4736 = dma.hbm_to_vmem [thread:$0]  (!%p5935_p6), %s6918_s13, 16, %s830_s29, [#allocation24]  }
  0xf5   : > { %s5731_s20 = smov [#allocation26]   ;;  %s5732_s1 = smov [#allocation29]  }
  0xf6   : > { %s853_s23 = sshll.u32 %s5731_s20, 4  ;;  %s877_s18 = sshll.u32 %s5732_s1, 4  ;;  %s854_s23 = int_to_ptr.vmem [resolvable:$true] %s853_s23  ;;  %s878_s18 = int_to_ptr.vmem [resolvable:$true] %s877_s18 }
  0xf7   : > { %s6919_s15 = sld [smem:[#allocation63_spill]] }
  0xfd   : > { %s5242_s4 = scalar_lea.hbm %s6919_s15, 16 }
  0xfe   : > { %p5243_p13 = scmp.ne.s32.totalorder %s6919_s15, %s5242_s4  ;;  %p5249_p3 = scmp.lt.u32.totalorder %s5242_s4, %s6919_s15 }
 0x100   : > { %p5245_p0 = pnand %p5243_p13, %p5951_p8 }
 0x102   : > { %p5246_p1 = pneg %p5245_p0 }
 0x104   : > { %p5251_p2 = pnand %p5249_p3, %p5246_p1 }
 0x106   : > { %5254 = shalt.err (!%p5251_p2)
}
 0x107   : > { %s5255_s29 = scalar_lea.vmem %s854_s23, 16  ;;  %s5262_s3 = scalar_lea.vmem %s854_s23, 32 }
 0x108   : > { %p5256_p5 = scmp.ne.s32.totalorder %s854_s23, %s5255_s29  ;;  %p5263_p4 = scmp.lt.s32.totalorder %s854_s23, %s854_s23 }
 0x109   : > { %p5264_p10 = scmp.lt.s32.totalorder %s5262_s3, %s5255_s29 }
 0x10a   : > { %p5258_p7 = pnand %p5256_p5, %p5951_p8 }
 0x10b   : > { %p5265_p11 = por %p5264_p10, %p5263_p4 }
 0x10c   : > { %p5259_p9 = pneg %p5258_p7 }
 0x10e   : > { %p5266_p12 = pnand %p5265_p11, %p5259_p9 }
 0x110   : > { %5269 = shalt.err (!%p5266_p12)
}
 0x111   : > { %4742 = dma.hbm_to_vmem [thread:$0]  (!%p5935_p6), %s6919_s15, 16, %s854_s23, [#allocation27]  }
 0x112   : > { %s6920_s17 = sld [smem:[#allocation65_spill]] }
 0x118   : > { %s5270_s4 = scalar_lea.hbm %s6920_s17, 16 }
 0x119   : > { %p5271_p13 = scmp.ne.s32.totalorder %s6920_s17, %s5270_s4  ;;  %p5277_p3 = scmp.lt.u32.totalorder %s5270_s4, %s6920_s17 }
 0x11b   : > { %p5273_p0 = pnand %p5271_p13, %p5951_p8 }
 0x11d   : > { %p5274_p1 = pneg %p5273_p0 }
 0x11f   : > { %p5279_p2 = pnand %p5277_p3, %p5274_p1 }
 0x121   : > { %5282 = shalt.err (!%p5279_p2)
}
 0x122   : > { %s5283_s29 = scalar_lea.vmem %s878_s18, 16  ;;  %s5290_s23 = scalar_lea.vmem %s878_s18, 32 }
 0x123   : > { %p5284_p5 = scmp.ne.s32.totalorder %s878_s18, %s5283_s29  ;;  %p5291_p4 = scmp.lt.s32.totalorder %s878_s18, %s878_s18 }
 0x124   : > { %p5292_p10 = scmp.lt.s32.totalorder %s5290_s23, %s5283_s29 }
 0x125   : > { %p5286_p7 = pnand %p5284_p5, %p5951_p8 }
 0x126   : > { %p5293_p11 = por %p5292_p10, %p5291_p4 }
 0x127   : > { %p5287_p9 = pneg %p5286_p7 }
 0x129   : > { %p5294_p12 = pnand %p5293_p11, %p5287_p9 }
 0x12b   : > { %5297 = shalt.err (!%p5294_p12)
}
 0x12c   : > { %4748 = dma.hbm_to_vmem [thread:$0]  (!%p5935_p6), %s6920_s17, 16, %s878_s18, [#allocation30]  }
 0x12d   : > { %s5733_s1 = smov [#allocation10]   ;;  %s5734_s21 = smov [#allocation13]  }
 0x12e   : > { %s721_s19 = sshll.u32 %s5733_s1, 4  ;;  %s745_s4 = sshll.u32 %s5734_s21, 4  ;;  %s722_s19 = int_to_ptr.vmem [resolvable:$true] %s721_s19  ;;  %s746_s4 = int_to_ptr.vmem [resolvable:$true] %s745_s4 }
 0x12f   : > { %s6921_s7 = sld [smem:[#allocation52_spill]] }
 0x135   : > { %s5298_s28 = scalar_lea.hbm %s6921_s7, 1024 }
 0x136   : > { %p5299_p13 = scmp.ne.s32.totalorder %s6921_s7, %s5298_s28  ;;  %p5305_p3 = scmp.lt.u32.totalorder %s5298_s28, %s6921_s7 }
 0x138   : > { %p5301_p0 = pnand %p5299_p13, %p5951_p8 }
 0x13a   : > { %p5302_p1 = pneg %p5301_p0 }
 0x13c   : > { %p5307_p2 = pnand %p5305_p3, %p5302_p1 }
 0x13e   : > { %5310 = shalt.err (!%p5307_p2)
}
 0x13f   : > { %s5311_s18 = scalar_lea.vmem %s722_s19, 1024  ;;  %p5319_p4 = scmp.lt.s32.totalorder %s722_s19, %s722_s19 }
 0x140   : > { %p5312_p5 = scmp.ne.s32.totalorder %s722_s19, %s5311_s18  ;;  %p5320_p10 = scmp.lt.s32.totalorder %s5311_s18, %s5311_s18 }
 0x142   : > { %p5314_p7 = pnand %p5312_p5, %p5951_p8  ;;  %p5321_p11 = por %p5320_p10, %p5319_p4 }
 0x144   : > { %p5315_p9 = pneg %p5314_p7 }
 0x146   : > { %p5322_p12 = pnand %p5321_p11, %p5315_p9 }
 0x148   : > { %5325 = shalt.err (!%p5322_p12)
}
 0x149   : > { %s6922_s20 = smov 4   ;;  %s6923_s1 = smov 64  }
 0x14a   : > { %4709 = dma.hbm_to_vmem [thread:$0]  (!%p5935_p6), %s6921_s7, 1024, %s722_s19, [#allocation9], %s6923_s1, %s6923_s1, %s6922_s20  }
 0x14b   : > { %s6924_s28 = sld [smem:[#allocation54_spill]] }
 0x151   : > { %s5326_s29 = scalar_lea.hbm %s6924_s28, 1024 }
 0x152   : > { %p5327_p13 = scmp.ne.s32.totalorder %s6924_s28, %s5326_s29  ;;  %p5333_p3 = scmp.lt.u32.totalorder %s5326_s29, %s6924_s28 }
 0x154   : > { %p5329_p0 = pnand %p5327_p13, %p5951_p8 }
 0x156   : > { %p5330_p1 = pneg %p5329_p0 }
 0x158   : > { %p5335_p2 = pnand %p5333_p3, %p5330_p1 }
 0x15a   : > { %5338 = shalt.err (!%p5335_p2)
}
 0x15b   : > { %s5339_s6 = scalar_lea.vmem %s746_s4, 1024  ;;  %p5347_p4 = scmp.lt.s32.totalorder %s746_s4, %s746_s4 }
 0x15c   : > { %p5340_p5 = scmp.ne.s32.totalorder %s746_s4, %s5339_s6  ;;  %p5348_p10 = scmp.lt.s32.totalorder %s5339_s6, %s5339_s6 }
 0x15e   : > { %p5342_p7 = pnand %p5340_p5, %p5951_p8  ;;  %p5349_p11 = por %p5348_p10, %p5347_p4 }
 0x160   : > { %p5343_p9 = pneg %p5342_p7 }
 0x162   : > { %p5350_p12 = pnand %p5349_p11, %p5343_p9 }
 0x164   : > { %5353 = shalt.err (!%p5350_p12)
}
 0x165   : > { %4715 = dma.hbm_to_vmem [thread:$0]  (!%p5935_p6), %s6924_s28, 1024, %s746_s4, [#allocation12], %s6923_s1, %s6923_s1, %s6922_s20  }
 0x166   : > { %s5735_s21 = smov [#allocation16]   ;;  %s5736_s26 = smov [#allocation19]  }
 0x167   : > { %s769_s25 = sshll.u32 %s5735_s21, 4  ;;  %s794_s29 = sshll.u32 %s5736_s26, 4  ;;  %s770_s25 = int_to_ptr.vmem [resolvable:$true] %s769_s25  ;;  %s795_s29 = int_to_ptr.vmem [resolvable:$true] %s794_s29 }
 0x168   : > { %s6925_s18 = sld [smem:[#allocation56_spill]] }
 0x16e   : > { %s5354_s6 = scalar_lea.hbm %s6925_s18, 1024 }
 0x16f   : > { %p5355_p13 = scmp.ne.s32.totalorder %s6925_s18, %s5354_s6  ;;  %p5361_p3 = scmp.lt.u32.totalorder %s5354_s6, %s6925_s18 }
 0x171   : > { %p5357_p0 = pnand %p5355_p13, %p5951_p8 }
 0x173   : > { %p5358_p1 = pneg %p5357_p0 }
 0x175   : > { %p5363_p2 = pnand %p5361_p3, %p5358_p1 }
 0x177   : > { %5366 = shalt.err (!%p5363_p2)
}
 0x178   : > { %s5367_s4 = scalar_lea.vmem %s770_s25, 1024  ;;  %p5375_p4 = scmp.lt.s32.totalorder %s770_s25, %s770_s25 }
 0x179   : > { %p5368_p5 = scmp.ne.s32.totalorder %s770_s25, %s5367_s4  ;;  %p5376_p10 = scmp.lt.s32.totalorder %s5367_s4, %s5367_s4 }
 0x17b   : > { %p5370_p7 = pnand %p5368_p5, %p5951_p8  ;;  %p5377_p11 = por %p5376_p10, %p5375_p4 }
 0x17d   : > { %p5371_p9 = pneg %p5370_p7 }
 0x17f   : > { %p5378_p12 = pnand %p5377_p11, %p5371_p9 }
 0x181   : > { %5381 = shalt.err (!%p5378_p12)
}
 0x182   : > { %4721 = dma.hbm_to_vmem [thread:$0]  (!%p5935_p6), %s6925_s18, 1024, %s770_s25, [#allocation15], %s6923_s1, %s6923_s1, %s6922_s20  }
 0x183   : > { %s6926_s21 = sld [smem:[#allocation58_spill]] }
 0x189   : > { %s5382_s26 = scalar_lea.hbm %s6926_s21, 16 }
 0x18a   : > { %p5383_p13 = scmp.ne.s32.totalorder %s6926_s21, %s5382_s26  ;;  %p5389_p3 = scmp.lt.u32.totalorder %s5382_s26, %s6926_s21 }
 0x18c   : > { %p5385_p0 = pnand %p5383_p13, %p5951_p8 }
 0x18e   : > { %p5386_p1 = pneg %p5385_p0 }
 0x190   : > { %p5391_p2 = pnand %p5389_p3, %p5386_p1 }
 0x192   : > { %5394 = shalt.err (!%p5391_p2)
}
 0x193   : > { %s5395_s4 = scalar_lea.vmem %s795_s29, 16  ;;  %s5402_s25 = scalar_lea.vmem %s795_s29, 32 }
 0x194   : > { %p5396_p5 = scmp.ne.s32.totalorder %s795_s29, %s5395_s4  ;;  %p5403_p4 = scmp.lt.s32.totalorder %s795_s29, %s795_s29 }
 0x195   : > { %p5404_p10 = scmp.lt.s32.totalorder %s5402_s25, %s5395_s4 }
 0x196   : > { %p5398_p7 = pnand %p5396_p5, %p5951_p8 }
 0x197   : > { %p5405_p11 = por %p5404_p10, %p5403_p4 }
 0x198   : > { %p5399_p9 = pneg %p5398_p7 }
 0x19a   : > { %p5406_p12 = pnand %p5405_p11, %p5399_p9 }
 0x19c   : > { %5409 = shalt.err (!%p5406_p12)
}
 0x19d   : > { %4727 = dma.hbm_to_vmem [thread:$0]  (!%p5935_p6), %s6926_s21, 16, %s795_s29, [#allocation18]  }
 0x19e   : > { %s5737_s7 = smov [#allocation22]   ;;  %s5738_s26 = smov [#allocation25]  }
 0x19f   : > { %s815_s19 = sshll.u32 %s5737_s7, 4  ;;  %s839_s23 = sshll.u32 %s5738_s26, 4  ;;  %s816_s19 = int_to_ptr.vmem [resolvable:$true] %s815_s19  ;;  %s840_s23 = int_to_ptr.vmem [resolvable:$true] %s839_s23 }
 0x1a0   : > { %s6927_s12 = sld [smem:[#allocation60_spill]] }
 0x1a6   : > { %s5410_s17 = scalar_lea.hbm %s6927_s12, 1024 }
 0x1a7   : > { %p5411_p13 = scmp.ne.s32.totalorder %s6927_s12, %s5410_s17  ;;  %p5417_p3 = scmp.lt.u32.totalorder %s5410_s17, %s6927_s12 }
 0x1a9   : > { %p5413_p0 = pnand %p5411_p13, %p5951_p8 }
 0x1ab   : > { %p5414_p1 = pneg %p5413_p0 }
 0x1ad   : > { %p5419_p2 = pnand %p5417_p3, %p5414_p1 }
 0x1af   : > { %5422 = shalt.err (!%p5419_p2)
}
 0x1b0   : > { %s5423_s29 = scalar_lea.vmem %s816_s19, 1024  ;;  %p5431_p4 = scmp.lt.s32.totalorder %s816_s19, %s816_s19 }
 0x1b1   : > { %p5424_p5 = scmp.ne.s32.totalorder %s816_s19, %s5423_s29  ;;  %p5432_p10 = scmp.lt.s32.totalorder %s5423_s29, %s5423_s29 }
 0x1b3   : > { %p5426_p7 = pnand %p5424_p5, %p5951_p8  ;;  %p5433_p11 = por %p5432_p10, %p5431_p4 }
 0x1b5   : > { %p5427_p9 = pneg %p5426_p7 }
 0x1b7   : > { %p5434_p12 = pnand %p5433_p11, %p5427_p9 }
 0x1b9   : > { %5437 = shalt.err (!%p5434_p12)
}
 0x1ba   : > { %4733 = dma.hbm_to_vmem [thread:$0]  (!%p5935_p6), %s6927_s12, 1024, %s816_s19, [#allocation21], %s6923_s1, %s6923_s1, %s6922_s20  }
 0x1bb   : > { %s6928_s14 = sld [smem:[#allocation62_spill]] }
 0x1c1   : > { %s5438_s26 = scalar_lea.hbm %s6928_s14, 1024 }
 0x1c2   : > { %p5439_p13 = scmp.ne.s32.totalorder %s6928_s14, %s5438_s26  ;;  %p5445_p3 = scmp.lt.u32.totalorder %s5438_s26, %s6928_s14 }
 0x1c4   : > { %p5441_p0 = pnand %p5439_p13, %p5951_p8 }
 0x1c6   : > { %p5442_p1 = pneg %p5441_p0 }
 0x1c8   : > { %p5447_p2 = pnand %p5445_p3, %p5442_p1 }
 0x1ca   : > { %5450 = shalt.err (!%p5447_p2)
}
 0x1cb   : > { %s5451_s13 = scalar_lea.vmem %s840_s23, 1024  ;;  %p5459_p4 = scmp.lt.s32.totalorder %s840_s23, %s840_s23 }
 0x1cc   : > { %p5452_p5 = scmp.ne.s32.totalorder %s840_s23, %s5451_s13  ;;  %p5460_p10 = scmp.lt.s32.totalorder %s5451_s13, %s5451_s13 }
 0x1ce   : > { %p5454_p7 = pnand %p5452_p5, %p5951_p8  ;;  %p5461_p11 = por %p5460_p10, %p5459_p4 }
 0x1d0   : > { %p5455_p9 = pneg %p5454_p7 }
 0x1d2   : > { %p5462_p12 = pnand %p5461_p11, %p5455_p9 }
 0x1d4   : > { %5465 = shalt.err (!%p5462_p12)
}
 0x1d5   : > { %4739 = dma.hbm_to_vmem [thread:$0]  (!%p5935_p6), %s6928_s14, 1024, %s840_s23, [#allocation24], %s6923_s1, %s6923_s1, %s6922_s20  }
 0x1d6   : > { %s5739_s18 = smov [#allocation28]   ;;  %s5740_s15 = smov [#allocation31]  }
 0x1d7   : > { %s863_s17 = sshll.u32 %s5739_s18, 4  ;;  %s899_s7 = sshll.u32 %s5740_s15, 4  ;;  %s864_s17 = int_to_ptr.vmem [resolvable:$true] %s863_s17  ;;  %s900_s7 = int_to_ptr.vmem [resolvable:$true] %s899_s7 }
 0x1d8   : > { %s6929_s16 = sld [smem:[#allocation64_spill]] }
 0x1de   : > { %s5466_s6 = scalar_lea.hbm %s6929_s16, 1024 }
 0x1df   : > { %p5467_p13 = scmp.ne.s32.totalorder %s6929_s16, %s5466_s6  ;;  %p5473_p3 = scmp.lt.u32.totalorder %s5466_s6, %s6929_s16 }
 0x1e1   : > { %p5469_p0 = pnand %p5467_p13, %p5951_p8 }
 0x1e3   : > { %p5470_p1 = pneg %p5469_p0 }
 0x1e5   : > { %p5475_p2 = pnand %p5473_p3, %p5470_p1 }
 0x1e7   : > { %5478 = shalt.err (!%p5475_p2)
}
 0x1e8   : > { %s5479_s23 = scalar_lea.vmem %s864_s17, 1024  ;;  %p5487_p4 = scmp.lt.s32.totalorder %s864_s17, %s864_s17 }
 0x1e9   : > { %p5480_p5 = scmp.ne.s32.totalorder %s864_s17, %s5479_s23  ;;  %p5488_p10 = scmp.lt.s32.totalorder %s5479_s23, %s5479_s23 }
 0x1eb   : > { %p5482_p7 = pnand %p5480_p5, %p5951_p8  ;;  %p5489_p11 = por %p5488_p10, %p5487_p4 }
 0x1ed   : > { %p5483_p9 = pneg %p5482_p7 }
 0x1ef   : > { %p5490_p12 = pnand %p5489_p11, %p5483_p9 }
 0x1f1   : > { %5493 = shalt.err (!%p5490_p12)
}
 0x1f2   : > { %4745 = dma.hbm_to_vmem [thread:$0]  (!%p5935_p6), %s6929_s16, 1024, %s864_s17, [#allocation27], %s6923_s1, %s6923_s1, %s6922_s20  }
 0x1f3   : > { %s6930_s22 = sld [smem:[#allocation70_spill]] }
 0x1f9   : > { %s5494_s3 = scalar_lea.hbm %s6930_s22, 4096 }
 0x1fa   : > { %p5495_p13 = scmp.ne.s32.totalorder %s6930_s22, %s5494_s3  ;;  %p5501_p3 = scmp.lt.u32.totalorder %s5494_s3, %s6930_s22 }
 0x1fc   : > { %p5497_p0 = pnand %p5495_p13, %p5951_p8 }
 0x1fe   : > { %p5498_p1 = pneg %p5497_p0 }
 0x200   : > { %p5503_p2 = pnand %p5501_p3, %p5498_p1 }
 0x202   : > { %5506 = shalt.err (!%p5503_p2)
}
 0x203   : > { %s5507_s19 = scalar_lea.vmem %s900_s7, 4096  ;;  %p5515_p4 = scmp.lt.s32.totalorder %s900_s7, %s900_s7 }
 0x204   : > { %p5508_p5 = scmp.ne.s32.totalorder %s900_s7, %s5507_s19  ;;  %p5516_p10 = scmp.lt.s32.totalorder %s5507_s19, %s5507_s19 }
 0x206   : > { %p5510_p7 = pnand %p5508_p5, %p5951_p8  ;;  %p5517_p11 = por %p5516_p10, %p5515_p4 }
 0x208   : > { %p5511_p9 = pneg %p5510_p7 }
 0x20a   : > { %p5518_p12 = pnand %p5517_p11, %p5511_p9 }
 0x20c   : > { %5521 = shalt.err (!%p5518_p12)
}
 0x20d   : > { %s5741_s17 = smov 256   ;;  %s5742_s23 = smov 16  }
 0x20e   : > { %4751 = dma.hbm_to_vmem [thread:$0]  (!%p5935_p6), %s6930_s22, 4096, %s900_s7, [#allocation30], %s5741_s17, %s5741_s17, %s5742_s23  }
 0x20f   : > { %s5743_s15 = smov [#allocation32]   ;;  %s6931_s24 = sld [smem:[#allocation72_spill]] }
 0x210   : > { %s915_s26 = sshll.u32 %s5743_s15, 4  ;;  %s916_s26 = int_to_ptr.vmem [resolvable:$true] %s915_s26 }
 0x215   : > { %s5522_s4 = scalar_lea.hbm %s6931_s24, 4096 }
 0x216   : > { %p5523_p13 = scmp.ne.s32.totalorder %s6931_s24, %s5522_s4  ;;  %p5529_p3 = scmp.lt.u32.totalorder %s5522_s4, %s6931_s24 }
 0x218   : > { %p5525_p0 = pnand %p5523_p13, %p5951_p8 }
 0x21a   : > { %p5526_p1 = pneg %p5525_p0 }
 0x21c   : > { %p5531_p2 = pnand %p5529_p3, %p5526_p1 }
 0x21e   : > { %5534 = shalt.err (!%p5531_p2)
}
 0x21f   : > { %s5535_s7 = scalar_lea.vmem %s916_s26, 4096  ;;  %p5543_p4 = scmp.lt.s32.totalorder %s916_s26, %s916_s26 }
 0x220   : > { %p5536_p5 = scmp.ne.s32.totalorder %s916_s26, %s5535_s7  ;;  %p5544_p10 = scmp.lt.s32.totalorder %s5535_s7, %s5535_s7 }
 0x222   : > { %p5538_p7 = pnand %p5536_p5, %p5951_p8  ;;  %p5545_p11 = por %p5544_p10, %p5543_p4 }
 0x224   : > { %p5539_p9 = pneg %p5538_p7 }
 0x226   : > { %p5546_p12 = pnand %p5545_p11, %p5539_p9 }
 0x228   : > { %5549 = shalt.err (!%p5546_p12)
}
 0x229   : > { %4754 = dma.hbm_to_vmem [thread:$0]  (!%p5935_p6), %s6931_s24, 4096, %s916_s26, [#allocation33], %s6923_s1, %s6923_s1, %s6922_s20  }
 0x22a   : > { %s4008_s2 = sadd.s32 4294967294, %s5720_s30   ;;  %s6316_s11 = sadd.s32 1, %s5720_s30  }
 0x22b   : > { %s60_s23 = ssub.s32 %s5720_s30, %s6316_s11  ;;  %s63_s29 = sadd.s32 1, %s5716_s9 }
 0x22c   : > { %p61_p8 = scmp.eq.s32.totalorder %s60_s23, 0  ;;  %p70_p13 = scmp.ne.s32.totalorder %s5716_s9, %s5712_s5 }
 0x22d   : > { %p71_p0 = scmp.eq.s32.totalorder %s5720_s30, 0  ;;  %p76_p1 = scmp.ne.s32.totalorder %s5712_s5, %s5708_s8 }
 0x22e   : > { %s6327_s18 = scalar_select %p61_p8, %s5716_s9, %s63_s29  }
 0x22f   : > { %p6329_p3 = por %p71_p0, %p70_p13  ;;  %p6933_p2 = scmp.eq.s32.totalorder %s5919_s10, 0 }
 0x230   : > { %p672_p5 = scmp.eq.s32.totalorder %s5919_s10, 1  ;;  %p678_p7 = scmp.eq.s32.totalorder %s4008_s2, 1 }
 0x231   : > { %p6335_p6 = por %p6933_p2, %p76_p1  ;;  %p4784_p9 = scmp.lt.s32.totalorder %s5720_s30, 2 }
 0x232   : > { %s938_s1 = sand.u32 1, %s5716_s9   ;;  %p6342_p4 = por %p672_p5, %p70_p13 }
 0x233   : > { %s6934_s20 = scalar_select %p6335_p6, 1, 0 }
 0x234   : > { %s6935_s26 = scalar_select %p6342_p4, 1, 0 }
 0x235   : > { %p6346_p10 = por %p678_p7, %p76_p1  ;;  %s6350_s6 = sshll.u32 %s938_s1, 3 }
 0x236   : > { %s4030_s4 = sshll.u32 %s5720_s30, 7  ;;  %s6937_s19 = sld [smem:[#allocation48_spill]] }
 0x237   : > { %s6936_s3 = scalar_select %p6346_p10, 1, 0 }
 0x238   : > { %s942_s12 = scalar_lea.vmem [#allocation2], %s6350_s6  ;;  %p6363_p11 = pnand %p4784_p9, %p6329_p3 }
 0x239   : > { %s949_s17 = sshll.u32 %s942_s12, 4  ;;  %s6939_s14 = sld [smem:[#allocation49_spill]]  ;;  %s6359_s17 = int_to_ptr.vmem [resolvable:$true] %s949_s17 }
 0x23a   : > { %s956_s13 = sand.u32 1, %s5720_s30   ;;  %s939_s16 = scalar_lea.sflag [#allocation3], %s938_s1 }
 0x23b   : > { %p5552_p8 = pneg %p6363_p11 }
 0x23c   : > { %s6356_s7 = scalar_lea.hbm %s6937_s19, %s4030_s4  ;;  %s5555_s22 = scalar_lea.hbm %s6937_s19, 256 }
 0x23d   : > { %s5550_s21 = scalar_lea.hbm %s6356_s7, 128  ;;  %p5556_p1 = scmp.lt.u32.totalorder %s6356_s7, %s6937_s19 }
 0x23e   : > { %p5551_p12 = scmp.ne.s32.totalorder %s6356_s7, %s5550_s21  ;;  %p5557_p3 = scmp.lt.u32.totalorder %s5555_s22, %s5550_s21 }
 0x23f   : > { %s6370_s25 = scalar_lea.hbm %s6939_s14, %s4030_s4  ;;  %p5559_p5 = scmp.lt.u32.totalorder %s5550_s21, %s6356_s7 }
 0x240   : > { %p5553_p13 = pnand %p5552_p8, %p5551_p12  ;;  %p5558_p2 = por %p5557_p3, %p5556_p1 }
 0x242   : > { %p5554_p0 = pneg %p5553_p13  ;;  %p5560_p7 = por %p5559_p5, %p5558_p2 }
 0x244   : > { %p5561_p9 = pnand %p5560_p7, %p5554_p0 }
 0x246   : > { %5564 = shalt.err (!%p5561_p9)
}
 0x247   : > { %s5565_s1 = scalar_lea.vmem %s6359_s17, 128  ;;  %s5744_s4 = smov [#allocation2]  }
 0x248   : > { %p5566_p12 = scmp.ne.s32.totalorder %s6359_s17, %s5565_s1  ;;  %s5570_s29 = sshll.u32 %s5744_s4, 4  ;;  %s5571_s29 = int_to_ptr.vmem [resolvable:$false] %s5570_s29 }
 0x249   : > { %s5572_s24 = scalar_lea.vmem %s5571_s29, 256  ;;  %p5573_p4 = scmp.lt.s32.totalorder %s6359_s17, %s5571_s29 }
 0x24a   : > { %p5568_p13 = pnand %p5566_p12, %p5552_p8  ;;  %p5574_p1 = scmp.lt.s32.totalorder %s5572_s24, %s5565_s1 }
 0x24c   : > { %p5569_p10 = pneg %p5568_p13  ;;  %p5575_p3 = por %p5574_p1, %p5573_p4 }
 0x24e   : > { %p5576_p2 = pnand %p5575_p3, %p5569_p10 }
 0x250   : > { %5579 = shalt.err (!%p5576_p2)
}
 0x251   : > { %4758 = dma.hbm_to_vmem [thread:$0]  (!%p6363_p11), %s6356_s7, 128, %s6359_s17, %s939_s16  }
 0x252   : > { %s960_s22 = scalar_lea.vmem [#allocation5], %s6350_s6  ;;  %s957_s15 = scalar_lea.sflag [#allocation6], %s956_s13 }
 0x253   : > { %s967_s21 = sshll.u32 %s960_s22, 4  ;;  %s5580_s12 = scalar_lea.hbm %s6370_s25, 128  ;;  %s968_s21 = int_to_ptr.vmem [resolvable:$true] %s967_s21 }
 0x254   : > { %p5581_p4 = scmp.ne.s32.totalorder %s6370_s25, %s5580_s12  ;;  %s5585_s4 = scalar_lea.hbm %s6939_s14, 256 }
 0x255   : > { %p5586_p5 = scmp.lt.u32.totalorder %s6370_s25, %s6939_s14  ;;  %p5587_p7 = scmp.lt.u32.totalorder %s5585_s4, %s5580_s12 }
 0x256   : > { %p5583_p10 = pnand %p5581_p4, %p5552_p8  ;;  %p5589_p12 = scmp.lt.u32.totalorder %s5580_s12, %s6370_s25 }
 0x257   : > { %p5588_p9 = por %p5587_p7, %p5586_p5 }
 0x258   : > { %p5584_p0 = pneg %p5583_p10 }
 0x259   : > { %p5590_p13 = por %p5589_p12, %p5588_p9 }
 0x25b   : > { %p5591_p1 = pnand %p5590_p13, %p5584_p0 }
 0x25d   : > { %5594 = shalt.err (!%p5591_p1)
}
 0x25e   : > { %s5595_s16 = scalar_lea.vmem %s968_s21, 128  ;;  %s5745_s6 = smov [#allocation5]  }
 0x25f   : > { %p5596_p3 = scmp.ne.s32.totalorder %s968_s21, %s5595_s16  ;;  %s5600_s7 = sshll.u32 %s5745_s6, 4  ;;  %s5601_s7 = int_to_ptr.vmem [resolvable:$false] %s5600_s7 }
 0x260   : > { %s5602_s17 = scalar_lea.vmem %s5601_s7, 256  ;;  %p5603_p10 = scmp.lt.s32.totalorder %s968_s21, %s5601_s7 }
 0x261   : > { %p5598_p2 = pnand %p5596_p3, %p5552_p8  ;;  %p5604_p6 = scmp.lt.s32.totalorder %s5602_s17, %s5595_s16 }
 0x263   : > { %p5599_p4 = pneg %p5598_p2  ;;  %p5605_p5 = por %p5604_p6, %p5603_p10 }
 0x265   : > { %p5606_p7 = pnand %p5605_p5, %p5599_p4 }
 0x267   : > { %5609 = shalt.err (!%p5606_p7)
}
 0x268   : > { %4761 = dma.hbm_to_vmem [thread:$0]  (!%p6363_p11), %s6370_s25, 128, %s968_s21, %s957_s15  }
 0x269   : > { %p6940_p0 = scmp.ne.s32.totalorder %s6909_s0, 0 }
 0x26a   : > { %s6423_s13 = sand.u32 (!%p6940_p0), 1, %s5712_s5   ;;  %p6941_p6 = scmp.ne.s32.totalorder (!%p6940_p0), %s6934_s20, 0 }
 0x26b   : > { %976 = sbr.rel (%p6940_p0) target bundleno = 4936 (0x1348), region = 132  ;;  %s6426_s22 = sshll.u32 (!%p6940_p0), %s6423_s13, 3 }
 0x26c   : > { %s979_s12 = scalar_lea.sflag (!%p6940_p0), [#allocation3], %s6423_s13  ;;  %s982_s23 = scalar_lea.vmem (!%p6940_p0), [#allocation2], %s6426_s22 }
 0x272   : > { %5655 = dma.done.wait (%p6941_p6), %s979_s12, 128  }
 0x273   : > { %5657 = vsyncadd (%p6941_p6), %s979_s12, 4294967168  ;;  %s987_s0 = sand.u32 1, %s5919_s10   ;;  %s991_s25 = scalar_lea.vmem [#allocation5], %s6426_s22 }
 0x274   : > { %s988_s2 = scalar_lea.sflag [#allocation6], %s987_s0 }
 0x275   : > { %5659 = dma.done.wait (%p6941_p6), %s988_s2, 128  }
 0x276   : > { %5661 = vsyncadd (%p6941_p6), %s988_s2, 4294967168  ;;  %p6942_p11 = scmp.eq.s32.totalorder %s5919_s10, 0 }
 0x278   : > { %5663 = dma.done.wait (%p6942_p11), [#allocation6], 1024   ;;  %p6943_p8 = pmov %p6942_p11 }
 0x27a   : > { %5665 = vsyncadd (%p6943_p8), [#allocation6], 4294966272  ;;  %p6944_p9 = pmov %p6943_p8 }
 0x27b   : > { %p6945_p12 = pmov %p6943_p8 }
 0x27c   : > { %5667 = dma.done.wait (%p6944_p9), [#allocation9], 1040  }
 0x27d   : > { %5669 = vsyncadd (%p6945_p12), [#allocation9], 4294966256  ;;  %p6946_p13 = pmov %p6943_p8 }
 0x27e   : > { %p6947_p1 = pmov %p6943_p8 }
 0x27f   : > { %5671 = dma.done.wait (%p6946_p13), [#allocation12], 1040  }
 0x280   : > { %5673 = vsyncadd (%p6947_p1), [#allocation12], 4294966256  ;;  %p6948_p3 = pmov %p6947_p1 }
 0x281   : > { %p6949_p2 = pmov %p6947_p1 }
 0x282   : > { %5675 = dma.done.wait (%p6948_p3), [#allocation15], 1040  }
 0x283   : > { %5677 = vsyncadd (%p6949_p2), [#allocation15], 4294966256  ;;  %p6950_p4 = pmov %p6947_p1 }
 0x284   : > { %p6951_p10 = pmov %p6947_p1 }
 0x285   : > { %5679 = dma.done.wait (%p6950_p4), [#allocation18], 32  }
 0x286   : > { %5681 = vsyncadd (%p6951_p10), [#allocation18], 4294967264  ;;  %p6952_p5 = pmov %p6947_p1 }
 0x287   : > { %p6953_p7 = pmov %p6947_p1 }
 0x288   : > { %5683 = dma.done.wait (%p6952_p5), [#allocation21], 1040  }
 0x289   : > { %5685 = vsyncadd (%p6953_p7), [#allocation21], 4294966256  ;;  %p6954_p0 = pmov %p6947_p1 }
 0x28b   : > { %5687 = dma.done.wait (%p6954_p0), [#allocation24], 1040   ;;  %p6955_p6 = pmov %p6954_p0 }
 0x28c   : > { %p6956_p11 = pmov %p6954_p0 }
 0x28d   : > { %5689 = vsyncadd (%p6955_p6), [#allocation24], 4294966256 }
 0x28e   : > { %5691 = dma.done.wait (%p6956_p11), [#allocation27], 1040   ;;  %p6957_p8 = pmov %p6954_p0 }
 0x28f   : > { %p6958_p9 = pmov %p6954_p0 }
 0x290   : > { %5693 = vsyncadd (%p6957_p8), [#allocation27], 4294966256 }
 0x291   : > { %5695 = dma.done.wait (%p6958_p9), [#allocation30], 4112   ;;  %p6959_p12 = pmov %p6954_p0 }
 0x292   : > { %p6960_p13 = pmov %p6954_p0 }
 0x293   : > { %5697 = vsyncadd (%p6959_p12), [#allocation30], 4294963184 }
 0x294   : > { %5699 = dma.done.wait (%p6960_p13), [#allocation33], 4096   ;;  %p6961_p1 = pmov %p6954_p0 }
 0x295   : > { %v5746_v0 = vmov 0.0   ;;  %vm5747_vm0 = vmmov 0   ;;  %v4864_v1 = vld [vmem:[#allocation10] sm:$0xff]   ;;  %v4866_v3 = vld [vmem:[#allocation10 + $0x8] sm:$0xff]   ;;  %v4868_v5 = vld [vmem:[#allocation10 + $0x10] sm:$0xff]   ;;  %vm1527_vm1 = vcmask 261120   ;;  %v1144_v58 = vlaneseq }
 0x296   : > { %5701 = vsyncadd (%p6961_p1), [#allocation33], 4294963200  ;;  %4386 = vmatprep.subr.bf16.mxu1 %v5746_v0  ;;  %4366 = vmatprep.subr.bf16.mxu0 %v5746_v0  ;;  %v4865_v2 = vld [vmem:[#allocation7] sm:$0xff]   ;;  %v4867_v4 = vld [vmem:[#allocation7 + $0x8] sm:$0xff]   ;;  %s5748_s20 = smov 64   ;;  %s5749_s21 = smov 96  }
 0x297   : > { %4402 = vmatprep.mubr.msk.bf16.mxu1 %vm5747_vm0, %v5746_v0  ;;  %4382 = vmatprep.mubr.msk.bf16.mxu0 %vm5747_vm0, %v5746_v0  ;;  %v4869_v6 = vld [vmem:[#allocation7 + $0x10] sm:$0xff]   ;;  %v4870_v7 = vld [vmem:[#allocation10 + $0x18] sm:$0xff]   ;;  %v4872_v9 = vld [vmem:[#allocation10 + $0x20] sm:$0xff]   ;;  %s5750_s15 = smov 32   ;;  %v6553_v59 = vshrl.u32 %v1144_v58, 7  ;;  %v1147_v60 = vand.u32 127, %v1144_v58 }
 0x298   : > { %4387 = vmatpush3.bf16.msra.mxu1 %v4864_v1  ;;  %4367 = vmatpush3.bf16.msra.mxu0 %v4865_v2  ;;  %v4871_v8 = vld [vmem:[#allocation7 + $0x18] sm:$0xff]   ;;  %v4873_v10 = vld [vmem:[#allocation7 + $0x20] sm:$0xff]   ;;  %v4874_v11 = vld [vmem:[#allocation10 + $0x28] sm:$0xff]   ;;  %vm1712_vm3 = vcmask 64512   ;;  %vm1764_vm4 = vcmask 1043456   ;;  %vm1959_vm5 = vcmask 523264  }
 0x299   : > { %4388 = vmatprep.subr.bf16.mxu1 %v5746_v0  ;;  %4368 = vmatprep.subr.bf16.mxu0 %v5746_v0  ;;  %v4875_v12 = vld [vmem:[#allocation7 + $0x28] sm:$0xff]   ;;  %v4876_v13 = vld [vmem:[#allocation10 + $0x30] sm:$0xff]   ;;  %v4878_v15 = vld [vmem:[#allocation10 + $0x38] sm:$0xff]   ;;  %vm1148_vm2 = vcmp.gt.s32.totalorder %v1147_v60, %v6553_v59  ;;  %vm1961_vm6 = vcmask 785408   ;;  %s6962_s29 = sld [smem:[#allocation66_spill]]  ;;  %s6963_s6 = sld [smem:[#allocation67_spill]] }
 0x29a   : > { %v4877_v14 = vld [vmem:[#allocation7 + $0x30] sm:$0xff]   ;;  %v6500_v16 = vld [vmem:[%s982_s23] sm:$0xff]  ;;  %v4879_v17 = vld [vmem:[#allocation7 + $0x38] sm:$0xff]   ;;  %v1149_v61 = vsel %vm1148_vm2, -1e+30, %v5746_v0  ;;  %s6964_s17 = sld [smem:[#allocation68_spill]] }
 0x29b   : > { %v6506_v18 = vpack.c.bf16 %v6500_v16, %v6500_v16  ;;  %v4064_v19 = vld [vmem:[#allocation11] ss:$0 sm:$0xff]  ;;  %v4055_v20 = vld [vmem:[#allocation8] ss:$0 sm:$0xff]  ;;  %v4880_v35 = vld [vmem:[#allocation13] sm:$0xff]   ;;  %s6965_s0 = sld [smem:[#allocation69_spill]] }
 0x29c   : > { %4389 = vmatpush3.bf16.msra.mxu1 %v4866_v3  ;;  %4369 = vmatpush3.bf16.msra.mxu0 %v4867_v4  ;;  %v4881_v36 = vld [vmem:[#allocation13 + $0x8] sm:$0xff]   ;;  %v4882_v37 = vld [vmem:[#allocation13 + $0x10] sm:$0xff]   ;;  %v4883_v38 = vld [vmem:[#allocation13 + $0x18] sm:$0xff]   ;;  %s6966_s1 = sld [smem:[#allocation71_spill]]  ;;  %s6967_s16 = sld [smem:[#allocation73_spill]] }
 0x29d   : > { %4390 = vmatprep.subr.bf16.mxu1 %v5746_v0  ;;  %4370 = vmatprep.subr.bf16.mxu0 %v5746_v0  ;;  %v4884_v39 = vld [vmem:[#allocation13 + $0x20] sm:$0xff]   ;;  %v4885_v40 = vld [vmem:[#allocation13 + $0x28] sm:$0xff]   ;;  %v4886_v44 = vld [vmem:[#allocation13 + $0x30] sm:$0xff]   ;;  %s4215_s12 = sshll.u32 %s5919_s10, 7  ;;  %s1140_s23 = scalar_lea.vmem [#allocation34], %s6426_s22 }
 0x29e   : > { %v4887_v49 = vld [vmem:[#allocation13 + $0x38] sm:$0xff]   ;;  %s3731_s24 = scalar_lea.sflag [#allocation4], %s6423_s13  ;;  %p6971_p2 = scmp.ne.s32.totalorder %s6935_s26, 0 }
 0x29f   : > { %s5752_s10 = smov [#allocation34]  }
 0x2a0   : > { %4391 = vmatpush3.bf16.msra.mxu1 %v4868_v5  ;;  %4371 = vmatpush3.bf16.msra.mxu0 %v4869_v6  ;;  %s5614_s22 = sshll.u32 %s5752_s10, 4  ;;  %s5615_s22 = int_to_ptr.vmem [resolvable:$false] %s5614_s22 }
 0x2a1   : > { %4392 = vmatprep.subr.bf16.mxu1 %v5746_v0  ;;  %4372 = vmatprep.subr.bf16.mxu0 %v5746_v0 }
 0x2a4   : > { %4393 = vmatpush3.bf16.msra.mxu1 %v4870_v7  ;;  %4373 = vmatpush3.bf16.msra.mxu0 %v4871_v8  ;;  %v4073_v8 = vld [vmem:[#allocation14] ss:$0 sm:$0xff] }
 0x2a5   : > { %4394 = vmatprep.subr.bf16.mxu1 %v5746_v0  ;;  %4374 = vmatprep.subr.bf16.mxu0 %v5746_v0 }
 0x2a8   : > { %4395 = vmatpush3.bf16.msra.mxu1 %v4872_v9  ;;  %4375 = vmatpush3.bf16.msra.mxu0 %v4873_v10 }
 0x2a9   : > { %4396 = vmatprep.subr.bf16.mxu1 %v5746_v0  ;;  %4376 = vmatprep.subr.bf16.mxu0 %v5746_v0 }
 0x2ac   : > { %4397 = vmatpush3.bf16.msra.mxu1 %v4874_v11  ;;  %4377 = vmatpush3.bf16.msra.mxu0 %v4875_v12 }
 0x2ad   : > { %4398 = vmatprep.subr.bf16.mxu1 %v5746_v0  ;;  %4378 = vmatprep.subr.bf16.mxu0 %v5746_v0 }
 0x2b0   : > { %4399 = vmatpush3.bf16.msra.mxu1 %v4876_v13  ;;  %4379 = vmatpush3.bf16.msra.mxu0 %v4877_v14 }
 0x2b1   : > { %4400 = vmatprep.subr.bf16.mxu1 %v5746_v0  ;;  %4380 = vmatprep.subr.bf16.mxu0 %v5746_v0 }
 0x2b4   : > { %4401 = vmatpush3.bf16.msra.mxu1 %v4878_v15  ;;  %4381 = vmatpush3.bf16.msra.mxu0 %v4879_v17 }
 0x2b5   : > { %4426 = vmatprep.subr.bf16.mxu1 %v5746_v0  ;;  %4406 = vmatprep.subr.bf16.mxu0 %v5746_v0 }
 0x2b7   : > { %4403 = vmatmul.mubr.bf16.vlgmr.msra.gmra.mrb[0].mxu1 %v6506_v18  ;;  %4383 = vmatmul.mubr.bf16.vlgmr.msra.gmra.mrb[0].mxu0 %v6506_v18 }
 0x2b8   : > { %4428 = vmatprep.mubr.msk.bf16.mxu1 %vm5747_vm0, %v5746_v0  ;;  %4422 = vmatprep.mubr.msk.bf16.mxu0 %vm5747_vm0, %v5746_v0 }
 0x2b9   : > { %4407 = vmatpush3.bf16.msra.mxu0 %v4880_v35 }
 0x2ba   : > { %4408 = vmatprep.subr.bf16.mxu0 %v5746_v0 }
 0x2bd   : > { %4409 = vmatpush3.bf16.msra.mxu0 %v4881_v36 }
 0x2be   : > { %4410 = vmatprep.subr.bf16.mxu0 %v5746_v0 }
 0x2c1   : > { %4411 = vmatpush3.bf16.msra.mxu0 %v4882_v37 }
 0x2c2   : > { %4412 = vmatprep.subr.bf16.mxu0 %v5746_v0 }
 0x2c5   : > { %4413 = vmatpush3.bf16.msra.mxu0 %v4883_v38 }
 0x2c6   : > { %4414 = vmatprep.subr.bf16.mxu0 %v5746_v0 }
 0x2c9   : > { %4415 = vmatpush3.bf16.msra.mxu0 %v4884_v39 }
 0x2ca   : > { %4416 = vmatprep.subr.bf16.mxu0 %v5746_v0 }
 0x2cd   : > { %4417 = vmatpush3.bf16.msra.mxu0 %v4885_v40 }
 0x2ce   : > { %4418 = vmatprep.subr.bf16.mxu0 %v5746_v0 }
 0x2d1   : > { %4419 = vmatpush3.bf16.msra.mxu0 %v4886_v44 }
 0x2d2   : > { %4420 = vmatprep.subr.bf16.mxu0 %v5746_v0 }
 0x2d5   : > { %4421 = vmatpush3.bf16.msra.mxu0 %v4887_v49 }
 0x2d6   : > { %4474 = vmatprep.subr.bf16.mxu0 %v5746_v0 }
 0x2d8   : > { %4423 = vmatmul.mubr.bf16.vlgmr.msra.gmra.mrb[4].mxu0 %v6506_v18 }
 0x2d9   : > { %4490 = vmatprep.mubr.msk.bf16.mxu0 %vm5747_vm0, %v5746_v0 }
 0x38a   : > { %v1367_v21 = vpop.f32.mrb[0].mxu1  ;;  %v1256_v24 = vpop.f32.mrb[0].mxu0 }
 0x38b   : > { %v1368_v22 = vadd.f32 %v4064_v19, %v1367_v21  ;;  %v4404_v23 = vpop.f32.mrb[1].mxu1  ;;  %v1257_v25 = vadd.f32 %v4055_v20, %v1256_v24  ;;  %v4384_v27 = vpop.f32.mrb[1].mxu0 }
 0x38c   : > { %v1370_v26 = vpop.f32.mrb[2].mxu1  ;;  %v1259_v29 = vpop.f32.mrb[2].mxu0 }
 0x38d   : > { %1503 = vrot.lane.b32.xlu1 %v1368_v22, %s5748_s20  ;;  %1500 = vrot.lane.b32.xlu0 %v1368_v22, %s5749_s21  ;;  %v4405_v28 = vpop.f32.mrb[3].mxu1  ;;  %v1509_v30 = vpack.c.bf16 %v1368_v22, %v1368_v22  ;;  %v1484_v31 = vmul.f32 0.17677669, %v1257_v25  ;;  %v4385_v32 = vpop.f32.mrb[3].mxu0 }
 0x38f   : > { %v1532_v33 = vsel %vm1527_vm1, %v1509_v30, 0  ;;  %v1495_v34 = vpack.c.bf16 %v1484_v31, %v1484_v31 }
 0x390   : > { %4427 = vmatpush3.bf16.xpose.msra.mxu1 %v1532_v33 }
 0x391   : > { %1489 = vrot.lane.b32.xlu1 %v1484_v31, %s5748_s20  ;;  %1486 = vrot.lane.b32.xlu0 %v1484_v31, %s5749_s21 }
 0x392   : > { %4432 = vmatprep.subr.bf16.mxu1 %v5746_v0 }
 0x395   : > { %1492 = vrot.lane.b32.xlu1 %v1484_v31, %s5750_s15  ;;  %1506 = vrot.lane.b32.xlu0 %v1368_v22, %s5750_s15 }
 0x397   : > { %4429 = vmatmul.mubr.msk.bf16.vlgmr.msra.gmra.mrb[4].mxu1 %vm1527_vm1, %v1495_v34 }
 0x398   : > { %4434 = vmatprep.mubr.msk.bf16.mxu1 %vm5747_vm0, %v5746_v0 }
 0x3ab   : > { %v1478_v12 = vpop.f32.mrb[4].mxu0 }
 0x3ac   : > { %v1479_v13 = vadd.f32 %v4073_v8, %v1478_v12  ;;  %v4424_v14 = vpop.f32.mrb[5].mxu0 }
 0x3ad   : > { %v1481_v15 = vpop.f32.mrb[6].mxu0 }
 0x3ae   : > { %v4425_v17 = vpop.f32.mrb[7].mxu0  ;;  %v1523_v18 = vpack.c.bf16 %v1479_v13, %v1479_v13 }
 0x3b0   : > { %v1766_v20 = vsel %vm1764_vm4, %v1523_v18, 0 }
 0x3ff   : > { %v1501_v41 = vpop.permute.xlu0 %1500  ;;  %v1504_v45 = vpop.permute.xlu1 %1503 }
 0x400   : > { %v1510_v42 = vpack.c.bf16 %v1501_v41, %v1501_v41  ;;  %v1511_v47 = vpack.c.bf16 %v1504_v45, %v1504_v45 }
 0x402   : > { %v1578_v43 = vsel %vm1527_vm1, %v1510_v42, 0  ;;  %v1624_v50 = vsel %vm1527_vm1, %v1511_v47, 0 }
 0x403   : > { %4433 = vmatpush3.bf16.xpose.msra.mxu1 %v1578_v43  ;;  %v1487_v46 = vpop.permute.xlu0 %1486  ;;  %v1490_v53 = vpop.permute.xlu1 %1489 }
 0x404   : > { %4438 = vmatprep.subr.bf16.mxu1 %v5746_v0  ;;  %v1496_v48 = vpack.c.bf16 %v1487_v46, %v1487_v46  ;;  %v1497_v54 = vpack.c.bf16 %v1490_v53, %v1490_v53 }
 0x407   : > { %v1507_v51 = vpop.permute.xlu0 %1506  ;;  %v1493_v56 = vpop.permute.xlu1 %1492 }
 0x408   : > { %v1512_v52 = vpack.c.bf16 %v1507_v51, %v1507_v51  ;;  %v1498_v57 = vpack.c.bf16 %v1493_v56, %v1493_v56 }
 0x40a   : > { %4435 = vmatmul.mubr.msk.bf16.vlgmr.msra.gmra.mrb[8].mxu1 %vm1527_vm1, %v1496_v48  ;;  %v1670_v55 = vsel %vm1527_vm1, %v1512_v52, 0 }
 0x40b   : > { %4439 = vmatpush3.bf16.xpose.msra.mxu1 %v1624_v50  ;;  %4440 = vmatprep.mubr.msk.bf16.mxu1 %vm5747_vm0, %v5746_v0 }
 0x40c   : > { %4444 = vmatprep.subr.bf16.mxu1 %v5746_v0 }
 0x412   : > { %4441 = vmatmul.mubr.msk.bf16.vlgmr.msra.gmra.mrb[12].mxu1 %vm1527_vm1, %v1497_v54 }
 0x413   : > { %4445 = vmatpush3.bf16.xpose.msra.mxu1 %v1670_v55  ;;  %4446 = vmatprep.mubr.msk.bf16.mxu1 %vm5747_vm0, %v5746_v0 }
 0x414   : > { %4450 = vmatprep.subr.bf16.mxu1 %v5746_v0 }
 0x41a   : > { %4447 = vmatmul.mubr.msk.bf16.vlgmr.msra.gmra.mrb[16].mxu1 %vm1527_vm1, %v1498_v57 }
 0x41b   : > { %4452 = vmatprep.mubr.msk.bf16.mxu1 %vm5747_vm0, %v5746_v0  ;;  %4451 = vmatpush3.bf16.msra.mxu1 %v1766_v20  ;;  %v4888_v20 = vld [vmem:[#allocation16] sm:$0xff]  }
 0x41c   : > { %4456 = vmatprep.subr.bf16.mxu1 %v5746_v0  ;;  %4475 = vmatpush3.bf16.msra.mxu0 %v4888_v20  ;;  %v4100_v20 = vld [vmem:[#allocation20] ss:$0 sm:$0xff] }
 0x41d   : > { %4476 = vmatprep.subr.bf16.mxu0 %v5746_v0 }
 0x46a   : > { %v1568_v62 = vpop.f32.mrb[4].mxu1 }
 0x46b   : > { %v1569_v63 = vadd.f32 %v1568_v62, %v1149_v61  ;;  %v4430_v1 = vpop.f32.mrb[5].mxu1 }
 0x46c   : > { %v1571_v2 = vpop.f32.mrb[6].mxu1 }
 0x46d   : > { %v4431_v3 = vpop.f32.mrb[7].mxu1  ;;  %v1713_v4 = vsel %vm1712_vm3, %v1569_v63, -inf }
 0x46e   : > { %1714 = vmax.xlane.f32.xlu0 %v1713_v4 }
 0x4dd   : > { %v1614_v5 = vpop.f32.mrb[8].mxu1 }
 0x4de   : > { %v1615_v6 = vadd.f32 %v1614_v5, %v1149_v61  ;;  %v4436_v7 = vpop.f32.mrb[9].mxu1 }
 0x4df   : > { %v1617_v9 = vpop.f32.mrb[10].mxu1 }
 0x4e0   : > { %v4437_v10 = vpop.f32.mrb[11].mxu1  ;;  %v1716_v11 = vsel %vm1712_vm3, %v1615_v6, -inf }
 0x4e1   : > { %1717 = vmax.xlane.f32.xlu1 %v1716_v11 }
 0x4e5   : > { %v1660_v19 = vpop.f32.mrb[12].mxu1 }
 0x4e6   : > { %v1661_v21 = vadd.f32 %v1660_v19, %v1149_v61  ;;  %v4442_v22 = vpop.f32.mrb[13].mxu1 }
 0x4e7   : > { %v1663_v23 = vpop.f32.mrb[14].mxu1  ;;  %v4890_v22 = vld [vmem:[#allocation16 + $0x10] sm:$0xff]  }
 0x4e8   : > { %v4443_v24 = vpop.f32.mrb[15].mxu1  ;;  %v1719_v25 = vsel %vm1712_vm3, %v1661_v21, -inf  ;;  %v4891_v23 = vld [vmem:[#allocation16 + $0x18] sm:$0xff]  }
 0x4e9   : > { %1720 = vmax.xlane.f32.xlu0 %v1719_v25  ;;  %v4892_v24 = vld [vmem:[#allocation16 + $0x20] sm:$0xff]   ;;  %v4893_v25 = vld [vmem:[#allocation16 + $0x28] sm:$0xff]  }
 0x4ed   : > { %v1706_v26 = vpop.f32.mrb[16].mxu1 }
 0x4ee   : > { %v1707_v27 = vadd.f32 %v1706_v26, %v1149_v61  ;;  %v4448_v28 = vpop.f32.mrb[17].mxu1  ;;  %v4894_v26 = vld [vmem:[#allocation16 + $0x30] sm:$0xff]  }
 0x4ef   : > { %v1709_v29 = vpop.f32.mrb[18].mxu1 }
 0x4f0   : > { %v4449_v30 = vpop.f32.mrb[19].mxu1  ;;  %v1722_v31 = vsel %vm1712_vm3, %v1707_v27, -inf }
 0x4f1   : > { %1723 = vmax.xlane.f32.xlu0 %v1722_v31  ;;  %v4895_v31 = vld [vmem:[#allocation16 + $0x38] sm:$0xff]  }
 0x4fb   : > { %v1715_v32 = vpop.xlane.xlu0 %1714 }
 0x4fc   : > { %v1725_v33 = vsub.f32 %v1569_v63, %v1715_v32 }
 0x4fe   : > { %v1729_v34 = vmul.f32 1.442695, %v1725_v33 }
 0x500   : > { %5008 = vpow2.f32 %v1729_v34 }
 0x50a   : > { %v5009_v35 = vpop.eup %5008 }
 0x50b   : > { %v1737_v36 = vsel %vm1712_vm3, %v5009_v35, 0.0 }
 0x50c   : > { %1738 = vadd.xlane.f32.xlu1 %v1737_v36 }
 0x51d   : > { %1514 = vrot.lane.b32.xlu1 %v1479_v13, %s5749_s21 }
 0x56e   : > { %v1718_v37 = vpop.xlane.xlu1 %1717 }
 0x56f   : > { %v1726_v38 = vsub.f32 %v1615_v6, %v1718_v37 }
 0x571   : > { %v1731_v39 = vmul.f32 1.442695, %v1726_v38 }
 0x573   : > { %5010 = vpow2.f32 %v1731_v39 }
 0x576   : > { %v1721_v40 = vpop.xlane.xlu0 %1720 }
 0x577   : > { %v1727_v41 = vsub.f32 %v1661_v21, %v1721_v40  ;;  %v4889_v21 = vld [vmem:[#allocation16 + $0x8] sm:$0xff]  }
 0x578   : > { %4477 = vmatpush3.bf16.msra.mxu0 %v4889_v21 }
 0x579   : > { %v1733_v42 = vmul.f32 1.442695, %v1727_v41  ;;  %4478 = vmatprep.subr.bf16.mxu0 %v5746_v0 }
 0x57b   : > { %5012 = vpow2.f32 %v1733_v42 }
 0x57c   : > { %4479 = vmatpush3.bf16.msra.mxu0 %v4890_v22 }
 0x57d   : > { %v5011_v43 = vpop.eup %5010  ;;  %4480 = vmatprep.subr.bf16.mxu0 %v5746_v0 }
 0x57e   : > { %v1724_v44 = vpop.xlane.xlu0 %1723  ;;  %v1740_v45 = vsel %vm1712_vm3, %v5011_v43, 0.0 }
 0x57f   : > { %v1728_v46 = vsub.f32 %v1707_v27, %v1724_v44  ;;  %1741 = vadd.xlane.f32.xlu0 %v1740_v45 }
 0x580   : > { %4481 = vmatpush3.bf16.msra.mxu0 %v4891_v23 }
 0x581   : > { %v1735_v47 = vmul.f32 1.442695, %v1728_v46  ;;  %4482 = vmatprep.subr.bf16.mxu0 %v5746_v0 }
 0x583   : > { %5014 = vpow2.f32 %v1735_v47  ;;  %v4090_v47 = vld [vmem:[#allocation17] ss:$0 sm:$0xff] }
 0x584   : > { %4483 = vmatpush3.bf16.msra.mxu0 %v4892_v24  ;;  %v4110_v24 = vld [vmem:[#allocation26] ss:$0 sm:$0xff] }
 0x585   : > { %v5013_v48 = vpop.eup %5012  ;;  %4484 = vmatprep.subr.bf16.mxu0 %v5746_v0 }
 0x586   : > { %v1743_v49 = vsel %vm1712_vm3, %v5013_v48, 0.0 }
 0x587   : > { %1744 = vadd.xlane.f32.xlu1 %v1743_v49 }
 0x588   : > { %4485 = vmatpush3.bf16.msra.mxu0 %v4893_v25 }
 0x589   : > { %4486 = vmatprep.subr.bf16.mxu0 %v5746_v0 }
 0x58c   : > { %4487 = vmatpush3.bf16.msra.mxu0 %v4894_v26 }
 0x58d   : > { %v5015_v50 = vpop.eup %5014  ;;  %4488 = vmatprep.subr.bf16.mxu0 %v5746_v0 }
 0x58e   : > { %v1746_v51 = vsel %vm1712_vm3, %v5015_v50, 0.0 }
 0x58f   : > { %1747 = vadd.xlane.f32.xlu0 %v1746_v51 }
 0x590   : > { %4489 = vmatpush3.bf16.msra.mxu0 %v4895_v31 }
 0x591   : > { %4514 = vmatprep.subr.bf16.mxu0 %v5746_v0 }
 0x598   : > { %1520 = vrot.lane.b32.xlu1 %v1479_v13, %s5750_s15 }
 0x599   : > { %v1739_v52 = vpop.xlane.xlu1 %1738 }
 0x59a   : > { %5016 = vrcp.f32 %v1739_v52 }
 0x59d   : > { %v1515_v53 = vpop.permute.xlu1 %1514 }
 0x59e   : > { %v1524_v54 = vpack.c.bf16 %v1515_v53, %v1515_v53 }
 0x5a0   : > { %v1812_v58 = vsel %vm1764_vm4, %v1524_v54, 0  ;;  %v4896_v54 = vld [vmem:[#allocation25] sm:$0xff]  }
 0x5a4   : > { %v5017_v55 = vpop.eup %5016 }
 0x5a5   : > { %v1753_v56 = vmul.f32 %v5017_v55, %v5009_v35  ;;  %1517 = vrot.lane.b32.xlu0 %v1479_v13, %s5748_s20  ;;  %v4898_v55 = vld [vmem:[#allocation22] sm:$0xff]  }
 0x5a7   : > { %v1757_v57 = vpack.c.bf16 %v1753_v56, %v1753_v56  ;;  %v4897_v56 = vld [vmem:[#allocation25 + $0x8] sm:$0xff]  }
 0x5a9   : > { %4453 = vmatmul.mubr.msk.bf16.vlgmr.msra.gmra.mrb[20].mxu1 %vm1712_vm3, %v1757_v57  ;;  %v4900_v57 = vld [vmem:[#allocation22 + $0x8] sm:$0xff]  }
 0x5aa   : > { %4457 = vmatpush3.bf16.msra.mxu1 %v1812_v58  ;;  %4458 = vmatprep.mubr.msk.bf16.mxu1 %vm5747_vm0, %v5746_v0  ;;  %v4899_v58 = vld [vmem:[#allocation25 + $0x10] sm:$0xff]  }
 0x5ab   : > { %4462 = vmatprep.subr.bf16.mxu1 %v5746_v0 }
 0x60c   : > { %v1742_v60 = vpop.xlane.xlu0 %1741 }
 0x60d   : > { %5018 = vrcp.f32 %v1742_v60 }
 0x614   : > { %v1745_v61 = vpop.xlane.xlu1 %1744 }
 0x615   : > { %5020 = vrcp.f32 %v1745_v61 }
 0x617   : > { %v5019_v62 = vpop.eup %5018 }
 0x618   : > { %v1754_v63 = vmul.f32 %v5019_v62, %v5011_v43  ;;  %v1521_v4 = vpop.permute.xlu1 %1520 }
 0x619   : > { %v1526_v8 = vpack.c.bf16 %v1521_v4, %v1521_v4  ;;  %v4904_v4 = vld [vmem:[#allocation22 + $0x18] sm:$0xff]  }
 0x61a   : > { %v1758_v1 = vpack.c.bf16 %v1754_v63, %v1754_v63 }
 0x61b   : > { %v1904_v12 = vsel %vm1764_vm4, %v1526_v8, 0  ;;  %v4908_v8 = vld [vmem:[#allocation22 + $0x28] sm:$0xff]  }
 0x61c   : > { %v1748_v2 = vpop.xlane.xlu0 %1747  ;;  %4459 = vmatmul.mubr.msk.bf16.vlgmr.msra.gmra.mrb[24].mxu1 %vm1712_vm3, %v1758_v1  ;;  %v4903_v1 = vld [vmem:[#allocation25 + $0x20] sm:$0xff]  }
 0x61d   : > { %5022 = vrcp.f32 %v1748_v2  ;;  %4464 = vmatprep.mubr.msk.bf16.mxu1 %vm5747_vm0, %v5746_v0  ;;  %v4902_v2 = vld [vmem:[#allocation22 + $0x10] sm:$0xff]  }
 0x61f   : > { %v5021_v3 = vpop.eup %5020 }
 0x620   : > { %v1518_v5 = vpop.permute.xlu0 %1517  ;;  %v1755_v6 = vmul.f32 %v5021_v3, %v5013_v48  ;;  %v4905_v3 = vld [vmem:[#allocation25 + $0x28] sm:$0xff]  }
 0x621   : > { %v1525_v7 = vpack.c.bf16 %v1518_v5, %v1518_v5  ;;  %v4907_v5 = vld [vmem:[#allocation25 + $0x30] sm:$0xff]  }
 0x622   : > { %v1759_v10 = vpack.c.bf16 %v1755_v6, %v1755_v6  ;;  %v4906_v6 = vld [vmem:[#allocation22 + $0x20] sm:$0xff]  }
 0x623   : > { %v1858_v9 = vsel %vm1764_vm4, %v1525_v7, 0  ;;  %v4909_v7 = vld [vmem:[#allocation25 + $0x38] sm:$0xff]  }
 0x624   : > { %4463 = vmatpush3.bf16.msra.mxu1 %v1858_v9  ;;  %v1143_v9 = vld [vmem:[%s991_s25] sm:$0xff] }
 0x625   : > { %4468 = vmatprep.subr.bf16.mxu1 %v5746_v0 }
 0x627   : > { %v5023_v11 = vpop.eup %5022  ;;  %4465 = vmatmul.mubr.msk.bf16.vlgmr.msra.gmra.mrb[28].mxu1 %vm1712_vm3, %v1759_v10  ;;  %v2105_v10 = vpack.c.bf16 %v1143_v9, %v1143_v9 }
 0x628   : > { %4469 = vmatpush3.bf16.msra.mxu1 %v1904_v12  ;;  %4470 = vmatprep.mubr.msk.bf16.mxu1 %vm5747_vm0, %v5746_v0  ;;  %v1756_v13 = vmul.f32 %v5023_v11, %v5015_v50  ;;  %v4910_v11 = vld [vmem:[#allocation22 + $0x30] sm:$0xff]   ;;  %v4911_v12 = vld [vmem:[#allocation22 + $0x38] sm:$0xff]  }
 0x629   : > { %4494 = vmatprep.subr.bf16.mxu1 %v5746_v0 }
 0x62a   : > { %v1760_v14 = vpack.c.bf16 %v1756_v13, %v1756_v13 }
 0x62f   : > { %4471 = vmatmul.mubr.msk.bf16.vlgmr.msra.gmra.mrb[32].mxu1 %vm1712_vm3, %v1760_v14 }
 0x630   : > { %4510 = vmatprep.mubr.msk.bf16.mxu1 %vm5747_vm0, %v5746_v0  ;;  %4495 = vmatpush3.bf16.msra.mxu1 %v4898_v55 }
 0x631   : > { %4496 = vmatprep.subr.bf16.mxu1 %v5746_v0 }
 0x634   : > { %4497 = vmatpush3.bf16.msra.mxu1 %v4900_v57 }
 0x635   : > { %4498 = vmatprep.subr.bf16.mxu1 %v5746_v0 }
 0x638   : > { %4499 = vmatpush3.bf16.msra.mxu1 %v4902_v2 }
 0x639   : > { %4500 = vmatprep.subr.bf16.mxu1 %v5746_v0 }
 0x63c   : > { %4501 = vmatpush3.bf16.msra.mxu1 %v4904_v4  ;;  %v4119_v4 = vld [vmem:[#allocation29] ss:$0 sm:$0xff] }
 0x63d   : > { %4502 = vmatprep.subr.bf16.mxu1 %v5746_v0 }
 0x640   : > { %4503 = vmatpush3.bf16.msra.mxu1 %v4906_v6 }
 0x641   : > { %4504 = vmatprep.subr.bf16.mxu1 %v5746_v0 }
 0x644   : > { %4505 = vmatpush3.bf16.msra.mxu1 %v4908_v8 }
 0x645   : > { %4506 = vmatprep.subr.bf16.mxu1 %v5746_v0 }
 0x648   : > { %4507 = vmatpush3.bf16.msra.mxu1 %v4910_v11 }
 0x649   : > { %4508 = vmatprep.subr.bf16.mxu1 %v5746_v0 }
 0x64c   : > { %4509 = vmatpush3.bf16.msra.mxu1 %v4911_v12 }
 0x64d   : > { %4534 = vmatprep.subr.bf16.mxu1 %v5746_v0 }
 0x67c   : > { %v1802_v15 = vpop.f32.mrb[20].mxu1 }
 0x67d   : > { %v4454_v17 = vpop.f32.mrb[21].mxu1 }
 0x67e   : > { %v1805_v18 = vpop.f32.mrb[22].mxu1 }
 0x67f   : > { %v4455_v19 = vpop.f32.mrb[23].mxu1  ;;  %v4099_v18 = vld [vmem:[#allocation19] ss:$0 sm:$0xff] }
 0x6ef   : > { %v1848_v27 = vpop.f32.mrb[24].mxu1 }
 0x6f0   : > { %1947 = vrot.lane.b32.xlu1 %v1848_v27, %s5750_s15  ;;  %v4460_v28 = vpop.f32.mrb[25].mxu1 }
 0x6f1   : > { %v1851_v29 = vpop.f32.mrb[26].mxu1 }
 0x6f2   : > { %v4461_v30 = vpop.f32.mrb[27].mxu1 }
 0x6fa   : > { %v1894_v32 = vpop.f32.mrb[28].mxu1 }
 0x6fb   : > { %1951 = vrot.lane.b32.xlu0 %v1894_v32, %s5748_s20  ;;  %v4466_v33 = vpop.f32.mrb[29].mxu1  ;;  %v4912_v32 = vld [vmem:[#allocation28] sm:$0xff]  }
 0x6fc   : > { %v1897_v34 = vpop.f32.mrb[30].mxu1  ;;  %v4913_v33 = vld [vmem:[#allocation28 + $0x8] sm:$0xff]  }
 0x6fd   : > { %v4467_v35 = vpop.f32.mrb[31].mxu1  ;;  %v4914_v34 = vld [vmem:[#allocation28 + $0x10] sm:$0xff]  }
 0x6fe   : > { %v4915_v35 = vld [vmem:[#allocation28 + $0x18] sm:$0xff]  }
 0x702   : > { %v1940_v36 = vpop.f32.mrb[32].mxu1 }
 0x703   : > { %1955 = vrot.lane.b32.xlu1 %v1940_v36, %s5749_s21  ;;  %v4472_v37 = vpop.f32.mrb[33].mxu1  ;;  %v4916_v36 = vld [vmem:[#allocation28 + $0x20] sm:$0xff]  }
 0x704   : > { %v1943_v38 = vpop.f32.mrb[34].mxu1  ;;  %v4917_v37 = vld [vmem:[#allocation28 + $0x28] sm:$0xff]  }
 0x705   : > { %v4473_v39 = vpop.f32.mrb[35].mxu1  ;;  %v4918_v38 = vld [vmem:[#allocation28 + $0x30] sm:$0xff]  }
 0x706   : > { %v4919_v39 = vld [vmem:[#allocation28 + $0x38] sm:$0xff]  }
 0x762   : > { %v1948_v40 = vpop.permute.xlu1 %1947 }
 0x763   : > { %v1958_v42 = vsel %vm1527_vm1, %v1802_v15, %v1948_v40 }
 0x76d   : > { %v1952_v41 = vpop.permute.xlu0 %1951 }
 0x76e   : > { %v1960_v43 = vsel %vm1959_vm5, %v1958_v42, %v1952_v41 }
 0x775   : > { %v1956_v44 = vpop.permute.xlu1 %1955 }
 0x776   : > { %v1962_v45 = vsel %vm1961_vm6, %v1960_v43, %v1956_v44  ;;  %v4101_v43 = vld [vmem:[#allocation23] ss:$0 sm:$0xff] }
 0x777   : > { %v1963_v46 = vpack.c.bf16 %v1962_v45, %v1962_v45 }
 0x779   : > { %4491 = vmatmul.mubr.bf16.vlgmr.msra.gmra.mrb[8].mxu0 %v1963_v46 }
 0x77a   : > { %4530 = vmatprep.mubr.msk.bf16.mxu0 %vm5747_vm0, %v5746_v0  ;;  %4515 = vmatpush3.bf16.msra.mxu0 %v4896_v54 }
 0x77b   : > { %4516 = vmatprep.subr.bf16.mxu0 %v5746_v0 }
 0x77e   : > { %4517 = vmatpush3.bf16.msra.mxu0 %v4897_v56 }
 0x77f   : > { %4518 = vmatprep.subr.bf16.mxu0 %v5746_v0 }
 0x782   : > { %4519 = vmatpush3.bf16.msra.mxu0 %v4899_v58 }
 0x783   : > { %4520 = vmatprep.subr.bf16.mxu0 %v5746_v0 }
 0x84c   : > { %v2069_v48 = vpop.f32.mrb[8].mxu0 }
 0x84d   : > { %v2070_v49 = vadd.f32 %v4090_v47, %v2069_v48  ;;  %v4492_v50 = vpop.f32.mrb[9].mxu0 }
 0x84e   : > { %v2072_v51 = vpop.f32.mrb[10].mxu0 }
 0x84f   : > { %v4493_v52 = vpop.f32.mrb[11].mxu0  ;;  %v2075_v53 = vadd.f32 %v2070_v49, %v6500_v16  ;;  %v4901_v16 = vld [vmem:[#allocation25 + $0x18] sm:$0xff]  }
 0x850   : > { %4521 = vmatpush3.bf16.msra.mxu0 %v4901_v16 }
 0x851   : > { %2076 = vadd.xlane.f32.xlu0 %v2075_v53  ;;  %4522 = vmatprep.subr.bf16.mxu0 %v5746_v0 }
 0x854   : > { %4523 = vmatpush3.bf16.msra.mxu0 %v4903_v1 }
 0x855   : > { %4524 = vmatprep.subr.bf16.mxu0 %v5746_v0 }
 0x858   : > { %4525 = vmatpush3.bf16.msra.mxu0 %v4905_v3 }
 0x859   : > { %4526 = vmatprep.subr.bf16.mxu0 %v5746_v0 }
 0x85c   : > { %4527 = vmatpush3.bf16.msra.mxu0 %v4907_v5 }
 0x85d   : > { %4528 = vmatprep.subr.bf16.mxu0 %v5746_v0 }
 0x860   : > { %4529 = vmatpush3.bf16.msra.mxu0 %v4909_v7 }
 0x861   : > { %4554 = vmatprep.subr.bf16.mxu0 %v5746_v0 }
 0x863   : > { %4531 = vmatmul.mubr.bf16.vlgmr.msra.gmra.mrb[12].mxu0 %v2105_v10 }
 0x864   : > { %4556 = vmatprep.mubr.msk.bf16.mxu0 %vm5747_vm0, %v5746_v0 }
 0x8de   : > { %v2077_v60 = vpop.xlane.xlu0 %2076 }
 0x8df   : > { %v2079_v61 = vmul.f32 0.0078125, %v2077_v60 }
 0x8e1   : > { %v2080_v62 = vsub.f32 %v2075_v53, %v2079_v61 }
 0x8e3   : > { %v2081_v63 = vmul.f32 %v2080_v62, %v2080_v62 }
 0x8e5   : > { %2082 = vadd.xlane.f32.xlu1 %v2081_v63 }
 0x936   : > { %v2322_v25 = vpop.f32.mrb[12].mxu0 }
 0x937   : > { %v2323_v26 = vadd.f32 %v4110_v24, %v2322_v25  ;;  %v4532_v27 = vpop.f32.mrb[13].mxu0 }
 0x938   : > { %v2325_v28 = vpop.f32.mrb[14].mxu0 }
 0x939   : > { %2455 = vrot.lane.b32.xlu0 %v2323_v26, %s5749_s21  ;;  %2458 = vrot.lane.b32.xlu1 %v2323_v26, %s5748_s20  ;;  %v4533_v29 = vpop.f32.mrb[15].mxu0  ;;  %v2464_v30 = vpack.c.bf16 %v2323_v26, %v2323_v26 }
 0x93b   : > { %v2486_v31 = vsel %vm1527_vm1, %v2464_v30, 0 }
 0x93c   : > { %4555 = vmatpush3.bf16.xpose.msra.mxu0 %v2486_v31 }
 0x93d   : > { %2461 = vrot.lane.b32.xlu1 %v2323_v26, %s5750_s15  ;;  %4566 = vmatprep.subr.bf16.mxu0 %v5746_v0 }
 0x972   : > { %v2083_v13 = vpop.xlane.xlu1 %2082 }
 0x973   : > { %v2084_v14 = vmul.f32 0.0078125, %v2083_v13 }
 0x975   : > { %v2085_v15 = vadd.f32 1e-05, %v2084_v14 }
 0x977   : > { %5024 = vrsqrt.f32 %v2085_v15 }
 0x981   : > { %v5025_v17 = vpop.eup %5024 }
 0x982   : > { %v2087_v19 = vmul.f32 %v5025_v17, %v2080_v62 }
 0x984   : > { %v2095_v21 = vmul.f32 %v4099_v18, %v2087_v19 }
 0x986   : > { %v6625_v22 = vadd.f32 %v4100_v20, %v2095_v21 }
 0x988   : > { %v2104_v23 = vpack.c.bf16 %v6625_v22, %v6625_v22 }
 0x98a   : > { %4511 = vmatmul.mubr.bf16.vlgmr.msra.gmra.mrb[36].mxu1 %v2104_v23 }
 0x98b   : > { %4550 = vmatprep.mubr.msk.bf16.mxu1 %vm5747_vm0, %v5746_v0  ;;  %4535 = vmatpush3.bf16.msra.mxu1 %v4912_v32 }
 0x98c   : > { %4536 = vmatprep.subr.bf16.mxu1 %v5746_v0 }
 0x98f   : > { %4537 = vmatpush3.bf16.msra.mxu1 %v4913_v33 }
 0x990   : > { %4538 = vmatprep.subr.bf16.mxu1 %v5746_v0 }
 0x993   : > { %4539 = vmatpush3.bf16.msra.mxu1 %v4914_v34 }
 0x994   : > { %4540 = vmatprep.subr.bf16.mxu1 %v5746_v0 }
 0x997   : > { %4541 = vmatpush3.bf16.msra.mxu1 %v4915_v35 }
 0x998   : > { %4542 = vmatprep.subr.bf16.mxu1 %v5746_v0 }
 0x99b   : > { %4543 = vmatpush3.bf16.msra.mxu1 %v4916_v36 }
 0x99c   : > { %4544 = vmatprep.subr.bf16.mxu1 %v5746_v0 }
 0x99f   : > { %4545 = vmatpush3.bf16.msra.mxu1 %v4917_v37 }
 0x9a0   : > { %4546 = vmatprep.subr.bf16.mxu1 %v5746_v0 }
 0x9a3   : > { %4547 = vmatpush3.bf16.msra.mxu1 %v4918_v38 }
 0x9a4   : > { %4548 = vmatprep.subr.bf16.mxu1 %v5746_v0 }
 0x9a7   : > { %4549 = vmatpush3.bf16.msra.mxu1 %v4919_v39 }
 0x9a8   : > { %4560 = vmatprep.subr.bf16.mxu1 %v5746_v0 }
 0x9aa   : > { %4551 = vmatmul.mubr.bf16.vlgmr.msra.gmra.mrb[40].mxu1 %v2105_v10 }
 0x9ab   : > { %4562 = vmatprep.mubr.msk.bf16.mxu1 %vm5747_vm0, %v5746_v0  ;;  %v2456_v40 = vpop.permute.xlu0 %2455  ;;  %v2459_v45 = vpop.permute.xlu1 %2458 }
 0x9ac   : > { %v2465_v41 = vpack.c.bf16 %v2456_v40, %v2456_v40  ;;  %v2466_v48 = vpack.c.bf16 %v2459_v45, %v2459_v45 }
 0x9ae   : > { %v2532_v42 = vsel %vm1527_vm1, %v2465_v41, 0  ;;  %v2578_v53 = vsel %vm1527_vm1, %v2466_v48, 0 }
 0x9af   : > { %v2462_v54 = vpop.permute.xlu1 %2461 }
 0x9b0   : > { %4561 = vmatpush3.bf16.xpose.msra.mxu1 %v2532_v42  ;;  %v2467_v55 = vpack.c.bf16 %v2462_v54, %v2462_v54 }
 0x9b1   : > { %4572 = vmatprep.subr.bf16.mxu1 %v5746_v0 }
 0x9b2   : > { %v2624_v58 = vsel %vm1527_vm1, %v2467_v55, 0 }
 0xa5d   : > { %v2211_v44 = vpop.f32.mrb[36].mxu1 }
 0xa5e   : > { %v2212_v46 = vadd.f32 %v4101_v43, %v2211_v44  ;;  %v4512_v47 = vpop.f32.mrb[37].mxu1 }
 0xa5f   : > { %v2214_v49 = vpop.f32.mrb[38].mxu1 }
 0xa60   : > { %v2439_v50 = vmul.f32 0.17677669, %v2212_v46  ;;  %v4513_v51 = vpop.f32.mrb[39].mxu1 }
 0xa62   : > { %v2450_v52 = vpack.c.bf16 %v2439_v50, %v2439_v50  ;;  %2447 = vrot.lane.b32.xlu1 %v2439_v50, %s5750_s15  ;;  %2441 = vrot.lane.b32.xlu0 %v2439_v50, %s5749_s21 }
 0xa64   : > { %4557 = vmatmul.mubr.msk.bf16.vlgmr.msra.gmra.mrb[16].mxu0 %vm1527_vm1, %v2450_v52 }
 0xa65   : > { %4567 = vmatpush3.bf16.xpose.msra.mxu0 %v2578_v53  ;;  %4568 = vmatprep.mubr.msk.bf16.mxu0 %vm5747_vm0, %v5746_v0 }
 0xa66   : > { %2444 = vrot.lane.b32.xlu0 %v2439_v50, %s5748_s20  ;;  %4578 = vmatprep.subr.bf16.mxu0 %v5746_v0 }
 0xa7d   : > { %v2433_v62 = vpop.f32.mrb[40].mxu1 }
 0xa7e   : > { %v4552_v63 = vpop.f32.mrb[41].mxu1  ;;  %v6667_v5 = vadd.f32 %v4119_v4, %v2433_v62 }
 0xa7f   : > { %v2436_v1 = vpop.f32.mrb[42].mxu1 }
 0xa80   : > { %v4553_v3 = vpop.f32.mrb[43].mxu1  ;;  %v2478_v6 = vpack.c.bf16 %v6667_v5, %v6667_v5 }
 0xa82   : > { %v2718_v7 = vsel %vm1764_vm4, %v2478_v6, 0 }
 0xad4   : > { %v2442_v56 = vpop.permute.xlu0 %2441  ;;  %v2448_v61 = vpop.permute.xlu1 %2447 }
 0xad5   : > { %v2451_v57 = vpack.c.bf16 %v2442_v56, %v2442_v56  ;;  %v2453_v2 = vpack.c.bf16 %v2448_v61, %v2448_v61 }
 0xad7   : > { %4563 = vmatmul.mubr.msk.bf16.vlgmr.msra.gmra.mrb[44].mxu1 %vm1527_vm1, %v2451_v57 }
 0xad8   : > { %4573 = vmatpush3.bf16.xpose.msra.mxu1 %v2624_v58  ;;  %v2445_v16 = vpop.permute.xlu0 %2444  ;;  %4574 = vmatprep.mubr.msk.bf16.mxu1 %vm5747_vm0, %v5746_v0 }
 0xad9   : > { %v2452_v60 = vpack.c.bf16 %v2445_v16, %v2445_v16  ;;  %4584 = vmatprep.subr.bf16.mxu1 %v5746_v0 }
 0xadb   : > { %4569 = vmatmul.mubr.msk.bf16.vlgmr.msra.gmra.mrb[20].mxu0 %vm1527_vm1, %v2452_v60 }
 0xadc   : > { %4580 = vmatprep.mubr.msk.bf16.mxu0 %vm5747_vm0, %v5746_v0  ;;  %4579 = vmatpush3.bf16.msra.mxu0 %v2718_v7 }
 0xadd   : > { %4590 = vmatprep.subr.bf16.mxu0 %v5746_v0 }
 0xadf   : > { %4575 = vmatmul.mubr.msk.bf16.vlgmr.msra.gmra.mrb[48].mxu1 %vm1527_vm1, %v2453_v2 }
 0xae0   : > { %4586 = vmatprep.mubr.msk.bf16.mxu1 %vm5747_vm0, %v5746_v0 }
 0xb37   : > { %v2522_v8 = vpop.f32.mrb[16].mxu0 }
 0xb38   : > { %v4558_v9 = vpop.f32.mrb[17].mxu0  ;;  %v2666_v10 = vsel %vm1712_vm3, %v2522_v8, -inf }
 0xb39   : > { %2667 = vmax.xlane.f32.xlu0 %v2666_v10  ;;  %v2525_v11 = vpop.f32.mrb[18].mxu0 }
 0xb3a   : > { %v4559_v12 = vpop.f32.mrb[19].mxu0 }
 0xb3b   : > { %v4920_v12 = vld [vmem:[%s6962_s29] sm:$0xff]  }
 0xbaa   : > { %v2568_v13 = vpop.f32.mrb[44].mxu1 }
 0xbab   : > { %v4564_v14 = vpop.f32.mrb[45].mxu1  ;;  %v2669_v15 = vsel %vm1712_vm3, %v2568_v13, -inf }
 0xbac   : > { %2670 = vmax.xlane.f32.xlu1 %v2669_v15  ;;  %v2571_v17 = vpop.f32.mrb[46].mxu1  ;;  %v4922_v14 = vld [vmem:[%s6962_s29 + $0x10] sm:$0xff]   ;;  %v4923_v15 = vld [vmem:[%s6962_s29 + $0x18] sm:$0xff]  }
 0xbad   : > { %v4565_v18 = vpop.f32.mrb[47].mxu1 }
 0xbae   : > { %v2614_v19 = vpop.f32.mrb[20].mxu0 }
 0xbaf   : > { %v4570_v20 = vpop.f32.mrb[21].mxu0  ;;  %v2672_v21 = vsel %vm1712_vm3, %v2614_v19, -inf }
 0xbb0   : > { %2673 = vmax.xlane.f32.xlu0 %v2672_v21  ;;  %v2617_v23 = vpop.f32.mrb[22].mxu0  ;;  %v4924_v20 = vld [vmem:[%s6962_s29 + $0x20] sm:$0xff]  }
 0xbb1   : > { %v4571_v24 = vpop.f32.mrb[23].mxu0  ;;  %v4925_v23 = vld [vmem:[%s6962_s29 + $0x28] sm:$0xff]  }
 0xbb2   : > { %v2660_v25 = vpop.f32.mrb[48].mxu1  ;;  %v4926_v24 = vld [vmem:[%s6962_s29 + $0x30] sm:$0xff]  }
 0xbb3   : > { %v4576_v26 = vpop.f32.mrb[49].mxu1  ;;  %v2675_v27 = vsel %vm1712_vm3, %v2660_v25, -inf }
 0xbb4   : > { %v2663_v28 = vpop.f32.mrb[50].mxu1  ;;  %2676 = vmax.xlane.f32.xlu0 %v2675_v27 }
 0xbb5   : > { %v4577_v29 = vpop.f32.mrb[51].mxu1 }
 0xbbd   : > { %2469 = vrot.lane.b32.xlu1 %v6667_v5, %s5749_s21 }
 0xbc6   : > { %v2668_v30 = vpop.xlane.xlu0 %2667 }
 0xbc7   : > { %v2678_v31 = vsub.f32 %v2522_v8, %v2668_v30 }
 0xbc9   : > { %v2682_v32 = vmul.f32 1.442695, %v2678_v31 }
 0xbcb   : > { %5026 = vpow2.f32 %v2682_v32 }
 0xbd5   : > { %v5027_v33 = vpop.eup %5026 }
 0xbd6   : > { %v2690_v34 = vsel %vm1712_vm3, %v5027_v33, 0.0 }
 0xbe1   : > { %2691 = vadd.xlane.f32.xlu1 %v2690_v34 }
 0xc39   : > { %v2671_v35 = vpop.xlane.xlu1 %2670 }
 0xc3a   : > { %v2679_v36 = vsub.f32 %v2568_v13, %v2671_v35  ;;  %v4921_v13 = vld [vmem:[%s6962_s29 + $0x8] sm:$0xff]  }
 0xc3c   : > { %v2684_v37 = vmul.f32 1.442695, %v2679_v36 }
 0xc3d   : > { %v2470_v38 = vpop.permute.xlu1 %2469  ;;  %v2674_v39 = vpop.xlane.xlu0 %2673 }
 0xc3e   : > { %5028 = vpow2.f32 %v2684_v37  ;;  %v2479_v40 = vpack.c.bf16 %v2470_v38, %v2470_v38  ;;  %v2680_v41 = vsub.f32 %v2614_v19, %v2674_v39 }
 0xc40   : > { %v2764_v42 = vsel %vm1764_vm4, %v2479_v40, 0  ;;  %v2686_v43 = vmul.f32 1.442695, %v2680_v41 }
 0xc41   : > { %4585 = vmatpush3.bf16.msra.mxu1 %v2764_v42  ;;  %v2677_v44 = vpop.xlane.xlu0 %2676 }
 0xc42   : > { %5030 = vpow2.f32 %v2686_v43  ;;  %v2681_v45 = vsub.f32 %v2660_v25, %v2677_v44  ;;  %4596 = vmatprep.subr.bf16.mxu1 %v5746_v0  ;;  %v4927_v25 = vld [vmem:[%s6962_s29 + $0x38] sm:$0xff]   ;;  %v4136_v44 = vld [vmem:[%s6963_s6] ss:$0 sm:$0xff]  ;;  %s6968_s6 = sld [smem:[#allocation74_spill]] }
 0xc44   : > { %v2688_v46 = vmul.f32 1.442695, %v2681_v45 }
 0xc46   : > { %5032 = vpow2.f32 %v2688_v46 }
 0xc48   : > { %v5029_v47 = vpop.eup %5028 }
 0xc49   : > { %v2693_v48 = vsel %vm1712_vm3, %v5029_v47, 0.0 }
 0xc4a   : > { %2694 = vadd.xlane.f32.xlu0 %v2693_v48 }
 0xc4c   : > { %v5031_v49 = vpop.eup %5030 }
 0xc4d   : > { %v2696_v50 = vsel %vm1712_vm3, %v5031_v49, 0.0 }
 0xc4e   : > { %2697 = vadd.xlane.f32.xlu1 %v2696_v50 }
 0xc50   : > { %v5033_v51 = vpop.eup %5032 }
 0xc51   : > { %v2699_v52 = vsel %vm1712_vm3, %v5033_v51, 0.0 }
 0xc52   : > { %2700 = vadd.xlane.f32.xlu0 %v2699_v52  ;;  %v4930_v52 = vld [vmem:[#allocation31 + $0x4] ss:$16 sps:$4 sm:$0xff]  }
 0xc5f   : > { %2475 = vrot.lane.b32.xlu1 %v6667_v5, %s5750_s15 }
 0xc68   : > { %2472 = vrot.lane.b32.xlu0 %v6667_v5, %s5748_s20 }
 0xc6e   : > { %v2692_v53 = vpop.xlane.xlu1 %2691 }
 0xc6f   : > { %5034 = vrcp.f32 %v2692_v53  ;;  %v4931_v53 = vld [vmem:[#allocation31 + $0x8] ss:$16 sps:$4 sm:$0xff]  }
 0xc79   : > { %v5035_v54 = vpop.eup %5034 }
 0xc7a   : > { %v2706_v55 = vmul.f32 %v5035_v54, %v5027_v33  ;;  %v4933_v54 = vld [vmem:[#allocation31 + $0xc] ss:$16 sps:$4 sm:$0xff]  }
 0xc7c   : > { %v2710_v56 = vpack.c.bf16 %v2706_v55, %v2706_v55  ;;  %v4936_v55 = vld [vmem:[#allocation31 + $0x24] ss:$16 sps:$4 sm:$0xff]  }
 0xc7e   : > { %4581 = vmatmul.mubr.msk.bf16.vlgmr.msra.gmra.mrb[24].mxu0 %vm1712_vm3, %v2710_v56  ;;  %v4939_v56 = vld [vmem:[#allocation31 + $0x2c] ss:$16 sps:$4 sm:$0xff]  }
 0xc7f   : > { %4592 = vmatprep.mubr.msk.bf16.mxu0 %vm5747_vm0, %v5746_v0 }
 0xcd7   : > { %v2695_v57 = vpop.xlane.xlu0 %2694 }
 0xcd8   : > { %5036 = vrcp.f32 %v2695_v57  ;;  %v4934_v57 = vld [vmem:[#allocation31 + $0x20] ss:$16 sps:$4 sm:$0xff]  }
 0xcdb   : > { %v2698_v58 = vpop.xlane.xlu1 %2697 }
 0xcdc   : > { %5038 = vrcp.f32 %v2698_v58  ;;  %v4937_v58 = vld [vmem:[#allocation31 + $0x28] ss:$16 sps:$4 sm:$0xff]  }
 0xcdf   : > { %v2701_v16 = vpop.xlane.xlu0 %2700  ;;  %v2476_v60 = vpop.permute.xlu1 %2475 }
 0xce0   : > { %5040 = vrcp.f32 %v2701_v16  ;;  %v2481_v63 = vpack.c.bf16 %v2476_v60, %v2476_v60  ;;  %v4942_v16 = vld [vmem:[#allocation31 + $0x44] ss:$16 sps:$4 sm:$0xff]   ;;  %v4945_v60 = vld [vmem:[#allocation31 + $0x4c] ss:$16 sps:$4 sm:$0xff]  }
 0xce2   : > { %v5037_v61 = vpop.eup %5036  ;;  %v2856_v7 = vsel %vm1764_vm4, %v2481_v63, 0 }
 0xce3   : > { %v2707_v62 = vmul.f32 %v5037_v61, %v5029_v47  ;;  %v2473_v1 = vpop.permute.xlu0 %2472  ;;  %v4940_v61 = vld [vmem:[#allocation31 + $0x40] ss:$16 sps:$4 sm:$0xff]  }
 0xce4   : > { %v2480_v2 = vpack.c.bf16 %v2473_v1, %v2473_v1 }
 0xce5   : > { %v2711_v3 = vpack.c.bf16 %v2707_v62, %v2707_v62 }
 0xce6   : > { %v5039_v4 = vpop.eup %5038  ;;  %v2810_v5 = vsel %vm1764_vm4, %v2480_v2, 0 }
 0xce7   : > { %v2708_v6 = vmul.f32 %v5039_v4, %v5031_v49  ;;  %4587 = vmatmul.mubr.msk.bf16.vlgmr.msra.gmra.mrb[52].mxu1 %vm1712_vm3, %v2711_v3  ;;  %4591 = vmatpush3.bf16.msra.mxu0 %v2810_v5  ;;  %v4948_v3 = vld [vmem:[#allocation31 + $0x64] ss:$16 sps:$4 sm:$0xff]   ;;  %v4951_v4 = vld [vmem:[#allocation31 + $0x6c] ss:$16 sps:$4 sm:$0xff]   ;;  %v4946_v5 = vld [vmem:[#allocation31 + $0x60] ss:$16 sps:$4 sm:$0xff]  }
 0xce8   : > { %4597 = vmatpush3.bf16.msra.mxu1 %v2856_v7  ;;  %4598 = vmatprep.mubr.msk.bf16.mxu1 %vm5747_vm0, %v5746_v0  ;;  %v4954_v7 = vld [vmem:[#allocation31 + $0x84] ss:$16 sps:$4 sm:$0xff]  }
 0xce9   : > { %v2712_v8 = vpack.c.bf16 %v2708_v6, %v2708_v6  ;;  %4602 = vmatprep.subr.bf16.mxu0 %v5746_v0  ;;  %3268 = vmatprep.subr.bf16.mxu1 %v4930_v52  ;;  %v4949_v6 = vld [vmem:[#allocation31 + $0x68] ss:$16 sps:$4 sm:$0xff]   ;;  %v4993_v52 = vld [vmem:[#allocation32 + $0xe0] sm:$0xff]  }
 0xcea   : > { %v5041_v9 = vpop.eup %5040 }
 0xceb   : > { %v2709_v10 = vmul.f32 %v5041_v9, %v5033_v51  ;;  %4593 = vmatmul.mubr.msk.bf16.vlgmr.msra.gmra.mrb[28].mxu0 %vm1712_vm3, %v2712_v8  ;;  %v4928_v51 = vld [vmem:[#allocation31] ss:$16 sps:$4 sm:$0xff]   ;;  %v4957_v8 = vld [vmem:[#allocation31 + $0x8c] ss:$16 sps:$4 sm:$0xff]  }
 0xcec   : > { %4618 = vmatprep.mubr.msk.bf16.mxu0 %vm5747_vm0, %v5746_v0  ;;  %4603 = vmatpush3.bf16.msra.mxu0 %v4920_v12  ;;  %v4952_v9 = vld [vmem:[#allocation31 + $0x80] ss:$16 sps:$4 sm:$0xff]   ;;  %v4963_v12 = vld [vmem:[#allocation31 + $0xac] ss:$16 sps:$4 sm:$0xff]  }
 0xced   : > { %v2713_v11 = vpack.c.bf16 %v2709_v10, %v2709_v10  ;;  %4604 = vmatprep.subr.bf16.mxu0 %v5746_v0  ;;  %v4955_v10 = vld [vmem:[#allocation31 + $0x88] ss:$16 sps:$4 sm:$0xff]  }
 0xcef   : > { %4599 = vmatmul.mubr.msk.bf16.vlgmr.msra.gmra.mrb[56].mxu1 %vm1712_vm3, %v2713_v11  ;;  %v4960_v11 = vld [vmem:[#allocation31 + $0xa4] ss:$16 sps:$4 sm:$0xff]  }
 0xcf0   : > { %4605 = vmatpush3.bf16.msra.mxu0 %v4921_v13  ;;  %3269 = vmatpush1.bf16.msra.mxu1 %v4928_v51  ;;  %v4958_v13 = vld [vmem:[#allocation31 + $0xa0] ss:$16 sps:$4 sm:$0xff]  }
 0xcf1   : > { %4606 = vmatprep.subr.bf16.mxu0 %v5746_v0  ;;  %3270 = vmatprep.subr.bf16.mxu1 %v4936_v55  ;;  %v4992_v51 = vld [vmem:[#allocation32 + $0x60] sm:$0xff]   ;;  %v4996_v55 = vld [vmem:[#allocation32 + $0x68] sm:$0xff]  }
 0xcf4   : > { %4607 = vmatpush3.bf16.msra.mxu0 %v4922_v14  ;;  %3271 = vmatpush1.bf16.msra.mxu1 %v4934_v57  ;;  %v4961_v14 = vld [vmem:[#allocation31 + $0xa8] ss:$16 sps:$4 sm:$0xff]  }
 0xcf5   : > { %4608 = vmatprep.subr.bf16.mxu0 %v5746_v0  ;;  %3272 = vmatprep.subr.bf16.mxu1 %v4942_v16  ;;  %v4998_v57 = vld [vmem:[#allocation32 + $0x28] sm:$0xff]   ;;  %v5000_v16 = vld [vmem:[#allocation32 + $0x70] sm:$0xff]  }
 0xcf8   : > { %4609 = vmatpush3.bf16.msra.mxu0 %v4923_v15  ;;  %3273 = vmatpush1.bf16.msra.mxu1 %v4940_v61  ;;  %v4966_v15 = vld [vmem:[#allocation31 + $0xc4] ss:$16 sps:$4 sm:$0xff]  }
 0xcf9   : > { %4610 = vmatprep.subr.bf16.mxu0 %v5746_v0  ;;  %3274 = vmatprep.subr.bf16.mxu1 %v4948_v3  ;;  %v5002_v61 = vld [vmem:[#allocation32 + $0x30] sm:$0xff]   ;;  %v3090_v3 = vsub.s32 0, %v6553_v59 }
 0xcfc   : > { %4611 = vmatpush3.bf16.msra.mxu0 %v4924_v20  ;;  %3275 = vmatpush1.bf16.msra.mxu1 %v4946_v5  ;;  %v4972_v20 = vld [vmem:[#allocation31 + $0xe4] ss:$16 sps:$4 sm:$0xff]   ;;  %v3086_v5 = vld [vmem:[%s6966_s1] sm:$0xf]  ;;  %s6970_s1 = sld [smem:[#allocation76_spill]] }
 0xcfd   : > { %4612 = vmatprep.subr.bf16.mxu0 %v5746_v0  ;;  %3276 = vmatprep.subr.bf16.mxu1 %v4954_v7  ;;  %v3102_v7 = vsub.s32 3, %v6553_v59 }
 0xd00   : > { %4613 = vmatpush3.bf16.msra.mxu0 %v4925_v23  ;;  %3277 = vmatpush1.bf16.msra.mxu1 %v4952_v9  ;;  %v4970_v23 = vld [vmem:[#allocation31 + $0xe0] ss:$16 sps:$4 sm:$0xff]  }
 0xd01   : > { %4614 = vmatprep.subr.bf16.mxu0 %v5746_v0  ;;  %3278 = vmatprep.subr.bf16.mxu1 %v4960_v11  ;;  %v3103_v11 = vrot.slane %v3086_v5, %v3102_v7 }
 0xd02   : > { %s6775_s4 = scalar_lea.hbm %s6970_s1, %s4215_s12 }
 0xd04   : > { %4615 = vmatpush3.bf16.msra.mxu0 %v4926_v24  ;;  %3279 = vmatpush1.bf16.msra.mxu1 %v4958_v13  ;;  %v4973_v24 = vld [vmem:[#allocation31 + $0xe8] ss:$16 sps:$4 sm:$0xff]  }
 0xd05   : > { %4616 = vmatprep.subr.bf16.mxu0 %v5746_v0  ;;  %3280 = vmatprep.subr.bf16.mxu1 %v4966_v15 }
 0xd08   : > { %4617 = vmatpush3.bf16.msra.mxu0 %v4927_v25  ;;  %v5751_v25 = vmov 0  }
 0xd09   : > { %3309 = vmatprep.subr.bf16.mxu0 %v4933_v54  ;;  %3300 = vmatprep.mubr.bf16.mxu1 %v5751_v25  ;;  %v4995_v54 = vld [vmem:[#allocation32 + $0xa0] sm:$0xff]  }
 0xd51   : > { %v2754_v17 = vpop.f32.mrb[24].mxu0 }
 0xd52   : > { %v4582_v18 = vpop.f32.mrb[25].mxu0 }
 0xd53   : > { %v2757_v19 = vpop.f32.mrb[26].mxu0  ;;  %v4964_v18 = vld [vmem:[#allocation31 + $0xc0] ss:$16 sps:$4 sm:$0xff]  }
 0xd54   : > { %v4583_v21 = vpop.f32.mrb[27].mxu0  ;;  %v4967_v19 = vld [vmem:[#allocation31 + $0xc8] ss:$16 sps:$4 sm:$0xff]   ;;  %3281 = vmatpush1.bf16.msra.mxu1 %v4964_v18 }
 0xd55   : > { %v4975_v21 = vld [vmem:[#allocation31 + $0xec] ss:$16 sps:$4 sm:$0xff]   ;;  %3282 = vmatprep.subr.bf16.mxu1 %v4972_v20 }
 0xd58   : > { %3283 = vmatpush1.bf16.msra.mxu1 %v4970_v23 }
 0xdba   : > { %v2800_v26 = vpop.f32.mrb[52].mxu1 }
 0xdbb   : > { %2899 = vrot.lane.b32.xlu1 %v2800_v26, %s5750_s15  ;;  %v4588_v27 = vpop.f32.mrb[53].mxu1  ;;  %v4976_v26 = vld [vmem:[#allocation32 + $0x40] sm:$0xff]  }
 0xdbc   : > { %v2803_v28 = vpop.f32.mrb[54].mxu1  ;;  %v4977_v27 = vld [vmem:[#allocation32 + $0xc0] sm:$0xff]   ;;  %4322 = vmatprep.subr.bf16.mxu1 %v4976_v26 }
 0xdbd   : > { %v4589_v29 = vpop.f32.mrb[55].mxu1 }
 0xdbe   : > { %v2846_v30 = vpop.f32.mrb[28].mxu0 }
 0xdbf   : > { %2903 = vrot.lane.b32.xlu0 %v2846_v30, %s5748_s20  ;;  %v4594_v31 = vpop.f32.mrb[29].mxu0  ;;  %s5616_s20 = scalar_lea.vmem %s5615_s22, 256 }
 0xdc0   : > { %v2849_v32 = vpop.f32.mrb[30].mxu0 }
 0xdc1   : > { %v4595_v33 = vpop.f32.mrb[31].mxu0  ;;  %v4145_v32 = vld [vmem:[%s6964_s17] ss:$0 sm:$0xff]  ;;  %s6969_s17 = sld [smem:[#allocation75_spill]] }
 0xdc2   : > { %v2892_v34 = vpop.f32.mrb[56].mxu1 }
 0xdc3   : > { %2907 = vrot.lane.b32.xlu1 %v2892_v34, %s5749_s21  ;;  %v4600_v0 = vpop.f32.mrb[57].mxu1  ;;  %v4146_v34 = vld [vmem:[%s6965_s0] ss:$0 sm:$0xff]  ;;  %s3744_s0 = sshll.u32 %s1140_s23, 4  ;;  %s6777_s0 = int_to_ptr.vmem [resolvable:$true] %s3744_s0 }
 0xdc4   : > { %v2895_v35 = vpop.f32.mrb[58].mxu1  ;;  %p5617_p5 = scmp.lt.s32.totalorder %s6777_s0, %s5615_s22 }
 0xdc5   : > { %v4601_v36 = vpop.f32.mrb[59].mxu1 }
 0xdc6   : > { %v4978_v36 = vld [vmem:[#allocation32] sm:$0xff]  }
 0xe2d   : > { %v2900_v37 = vpop.permute.xlu1 %2899 }
 0xe2e   : > { %v2910_v39 = vsel %vm1527_vm1, %v2754_v17, %v2900_v37  ;;  %v4969_v17 = vld [vmem:[#allocation31 + $0xcc] ss:$16 sps:$4 sm:$0xff]   ;;  %v4979_v37 = vld [vmem:[#allocation32 + $0x80] sm:$0xff]  }
 0xe31   : > { %v2904_v38 = vpop.permute.xlu0 %2903 }
 0xe32   : > { %v2911_v40 = vsel %vm1959_vm5, %v2910_v39, %v2904_v38  ;;  %v4980_v39 = vld [vmem:[#allocation32 + $0x48] sm:$0xff]  }
 0xe35   : > { %v2908_v41 = vpop.permute.xlu1 %2907 }
 0xe36   : > { %v2912_v42 = vsel %vm1961_vm6, %v2911_v40, %v2908_v41  ;;  %v4981_v40 = vld [vmem:[#allocation32 + $0xc8] sm:$0xff]  }
 0xe37   : > { %v2913_v43 = vpack.c.bf16 %v2912_v42, %v2912_v42  ;;  %v4982_v41 = vld [vmem:[#allocation32 + $0x8] sm:$0xff]  }
 0xe38   : > { %v4983_v42 = vld [vmem:[#allocation32 + $0x88] sm:$0xff]  }
 0xe39   : > { %4619 = vmatmul.mubr.bf16.vlgmr.msra.gmra.mrb[32].mxu0 %v2913_v43  ;;  %v4984_v43 = vld [vmem:[#allocation32 + $0x50] sm:$0xff]  }
 0xe3a   : > { %3310 = vmatpush1.bf16.msra.mxu0 %v4931_v53  ;;  %3341 = vmatprep.mubr.bf16.mxu0 %v5751_v25  ;;  %v4994_v53 = vld [vmem:[#allocation32 + $0x20] sm:$0xff]  }
 0xe3b   : > { %3311 = vmatprep.subr.bf16.mxu0 %v4939_v56  ;;  %v4997_v56 = vld [vmem:[#allocation32 + $0xe8] sm:$0xff]  }
 0xe3e   : > { %3312 = vmatpush1.bf16.msra.mxu0 %v4937_v58  ;;  %v4999_v58 = vld [vmem:[#allocation32 + $0xa8] sm:$0xff]  }
 0xe3f   : > { %3313 = vmatprep.subr.bf16.mxu0 %v4945_v60  ;;  %v5001_v60 = vld [vmem:[#allocation32 + $0xf0] sm:$0xff]  }
 0xf0c   : > { %v3019_v45 = vpop.f32.mrb[32].mxu0 }
 0xf0d   : > { %v3020_v46 = vadd.f32 %v4136_v44, %v3019_v45  ;;  %v4620_v47 = vpop.f32.mrb[33].mxu0  ;;  %v4985_v44 = vld [vmem:[#allocation32 + $0xd0] sm:$0xff]  }
 0xf0e   : > { %v3022_v48 = vpop.f32.mrb[34].mxu0  ;;  %v4986_v45 = vld [vmem:[#allocation32 + $0x10] sm:$0xff]   ;;  %v4988_v47 = vld [vmem:[#allocation32 + $0x58] sm:$0xff]  }
 0xf0f   : > { %v4621_v49 = vpop.f32.mrb[35].mxu0  ;;  %v3025_v50 = vadd.f32 %v3020_v46, %v6625_v22  ;;  %v4943_v22 = vld [vmem:[#allocation31 + $0x48] ss:$16 sps:$4 sm:$0xff]   ;;  %v4987_v46 = vld [vmem:[#allocation32 + $0x90] sm:$0xff]  }
 0xf10   : > { %3314 = vmatpush1.bf16.msra.mxu0 %v4943_v22  ;;  %v4989_v48 = vld [vmem:[#allocation32 + $0xd8] sm:$0xff]   ;;  %v5003_v22 = vld [vmem:[#allocation32 + $0xb0] sm:$0xff]  }
 0xf11   : > { %3026 = vadd.xlane.f32.xlu0 %v3025_v50  ;;  %3315 = vmatprep.subr.bf16.mxu0 %v4951_v4  ;;  %v4990_v49 = vld [vmem:[#allocation32 + $0x18] sm:$0xff]   ;;  %v3098_v4 = vsub.s32 2, %v6553_v59 }
 0xf13   : > { %v3099_v9 = vrot.slane %v3086_v5, %v3098_v4 }
 0xf14   : > { %3316 = vmatpush1.bf16.msra.mxu0 %v4949_v6  ;;  %v3094_v6 = vsub.s32 1, %v6553_v59 }
 0xf15   : > { %3317 = vmatprep.subr.bf16.mxu0 %v4957_v8  ;;  %v3091_v8 = vrot.slane %v3086_v5, %v3090_v3 }
 0xf18   : > { %3318 = vmatpush1.bf16.msra.mxu0 %v4955_v10  ;;  %v3095_v10 = vrot.slane %v3086_v5, %v3094_v6 }
 0xf19   : > { %3319 = vmatprep.subr.bf16.mxu0 %v4963_v12 }
 0xf1c   : > { %3320 = vmatpush1.bf16.msra.mxu0 %v4961_v14 }
 0xf1d   : > { %3321 = vmatprep.subr.bf16.mxu0 %v4969_v17 }
 0xf20   : > { %3322 = vmatpush1.bf16.msra.mxu0 %v4967_v19 }
 0xf21   : > { %3323 = vmatprep.subr.bf16.mxu0 %v4975_v21 }
 0xf24   : > { %3324 = vmatpush1.bf16.msra.mxu0 %v4973_v24 }
 0xf25   : > { %4344 = vmatprep.subr.bf16.mxu0 %v4977_v27 }
 0xf9e   : > { %v3027_v62 = vpop.xlane.xlu0 %3026 }
 0xf9f   : > { %v3028_v63 = vmul.f32 0.0078125, %v3027_v62  ;;  %v5004_v62 = vld [vmem:[#allocation32 + $0x78] sm:$0xff]  }
 0xfa1   : > { %v3029_v1 = vsub.f32 %v3025_v50, %v3028_v63  ;;  %v4991_v50 = vld [vmem:[#allocation32 + $0x98] sm:$0xff]  }
 0xfa2   : > { %v5005_v63 = vld [vmem:[#allocation32 + $0xf8] sm:$0xff]  }
 0xfa3   : > { %v3030_v2 = vmul.f32 %v3029_v1, %v3029_v1 }
 0xfa5   : > { %3031 = vadd.xlane.f32.xlu1 %v3030_v2  ;;  %v5007_v2 = vld [vmem:[#allocation32 + $0xb8] sm:$0xff]  }
0x1032   : > { %v3032_v28 = vpop.xlane.xlu1 %3031 }
0x1033   : > { %v3033_v29 = vmul.f32 0.0078125, %v3032_v28 }
0x1035   : > { %v3034_v30 = vadd.f32 1e-05, %v3033_v29 }
0x1037   : > { %5042 = vrsqrt.f32 %v3034_v30 }
0x1041   : > { %v5043_v31 = vpop.eup %5042 }
0x1042   : > { %v3036_v33 = vmul.f32 %v5043_v31, %v3029_v1  ;;  %v5006_v1 = vld [vmem:[#allocation32 + $0x38] sm:$0xff]  }
0x1044   : > { %v3044_v0 = vmul.f32 %v4145_v32, %v3036_v33 }
0x1046   : > { %v6749_v35 = vadd.f32 %v4146_v34, %v3044_v0  ;;  %v4179_v0 = vld [vmem:[%s6967_s16] ss:$0 sm:$0xff]  ;;  %s5610_s16 = scalar_lea.vmem %s6777_s0, 128 }
0x1047   : > { %p5611_p3 = scmp.ne.s32.totalorder %s6777_s0, %s5610_s16  ;;  %p5618_p7 = scmp.lt.s32.totalorder %s5616_s20, %s5610_s16 }
0x1048   : > { %v3053_v38 = vpack.c.bf16 %v6749_v35, %v6749_v35 }
0x1049   : > { %p5612_p4 = pnand %p5611_p3, %p6971_p2  ;;  %p5619_p0 = por %p5618_p7, %p5617_p5 }
0x104a   : > { %3301 = vmatmul.mubr.bf16.vlgmr.msra.gmra.mrb[60].mxu1 %v3053_v38  ;;  %3342 = vmatmul.mubr.bf16.vlgmr.msra.gmra.mrb[36].mxu0 %v3053_v38 }
0x104b   : > { %4323 = vmatpush3.bf16.msra.mxu1 %v4978_v36  ;;  %4345 = vmatpush3.bf16.msra.mxu0 %v4979_v37  ;;  %p5613_p10 = pneg %p5612_p4 }
0x104c   : > { %4324 = vmatprep.subr.bf16.mxu1 %v4980_v39  ;;  %4346 = vmatprep.subr.bf16.mxu0 %v4981_v40 }
0x104d   : > { %p5620_p6 = pnand %p5619_p0, %p5613_p10 }
0x104f   : > { %4325 = vmatpush3.bf16.msra.mxu1 %v4982_v41  ;;  %4347 = vmatpush3.bf16.msra.mxu0 %v4983_v42 }
0x1050   : > { %4326 = vmatprep.subr.bf16.mxu1 %v4984_v43  ;;  %4348 = vmatprep.subr.bf16.mxu0 %v4985_v44 }
0x1053   : > { %4327 = vmatpush3.bf16.msra.mxu1 %v4986_v45  ;;  %4349 = vmatpush3.bf16.msra.mxu0 %v4987_v46 }
0x1054   : > { %4328 = vmatprep.subr.bf16.mxu1 %v4988_v47  ;;  %4350 = vmatprep.subr.bf16.mxu0 %v4989_v48 }
0x1057   : > { %4329 = vmatpush3.bf16.msra.mxu1 %v4990_v49  ;;  %4351 = vmatpush3.bf16.msra.mxu0 %v4991_v50 }
0x1058   : > { %4330 = vmatprep.subr.bf16.mxu1 %v4992_v51  ;;  %4352 = vmatprep.subr.bf16.mxu0 %v4993_v52 }
0x105b   : > { %4331 = vmatpush3.bf16.msra.mxu1 %v4994_v53  ;;  %4353 = vmatpush3.bf16.msra.mxu0 %v4995_v54 }
0x105c   : > { %4332 = vmatprep.subr.bf16.mxu1 %v4996_v55  ;;  %4354 = vmatprep.subr.bf16.mxu0 %v4997_v56  ;;  %v4212_v55 = vld [vmem:[%s6968_s6] ss:$0 sm:$0xff] }
0x105f   : > { %4333 = vmatpush3.bf16.msra.mxu1 %v4998_v57  ;;  %4355 = vmatpush3.bf16.msra.mxu0 %v4999_v58 }
0x1060   : > { %4334 = vmatprep.subr.bf16.mxu1 %v5000_v16  ;;  %4356 = vmatprep.subr.bf16.mxu0 %v5001_v60 }
0x1063   : > { %4335 = vmatpush3.bf16.msra.mxu1 %v5002_v61  ;;  %4357 = vmatpush3.bf16.msra.mxu0 %v5003_v22 }
0x1064   : > { %4336 = vmatprep.subr.bf16.mxu1 %v5004_v62  ;;  %4358 = vmatprep.subr.bf16.mxu0 %v5005_v63 }
0x1067   : > { %4337 = vmatpush3.bf16.msra.mxu1 %v5006_v1  ;;  %4359 = vmatpush3.bf16.msra.mxu0 %v5007_v2 }
0x111d   : > { %v3302_v12 = vpop.f32.mrb[60].mxu1  ;;  %v3343_v13 = vpop.f32.mrb[36].mxu0 }
0x111e   : > { %v3303_v14 = vadd.f32 %v3302_v12, %v3091_v8  ;;  %v3344_v15 = vadd.f32 %v3343_v13, %v3099_v9  ;;  %v3304_v17 = vpop.f32.mrb[61].mxu1  ;;  %v3345_v18 = vpop.f32.mrb[37].mxu0 }
0x111f   : > { %v3305_v19 = vadd.f32 %v3304_v17, %v3095_v10  ;;  %v3346_v20 = vadd.f32 %v3345_v18, %v3103_v11  ;;  %v3306_v21 = vpop.f32.mrb[62].mxu1  ;;  %v3347_v23 = vpop.f32.mrb[38].mxu0 }
0x1120   : > { %v3350_v24 = vmax.f32 %v3303_v14, 0.0  ;;  %v3352_v25 = vmax.f32 %v3344_v15, 0.0  ;;  %v3307_v26 = vpop.f32.mrb[63].mxu1  ;;  %v3348_v27 = vpop.f32.mrb[39].mxu0 }
0x1121   : > { %v3351_v28 = vmax.f32 %v3305_v19, 0.0  ;;  %v3353_v59 = vmax.f32 %v3346_v20, 0.0 }
0x1122   : > { %v3354_v31 = vpack.c.bf16 %v3350_v24, %v3350_v24  ;;  %v3356_v32 = vpack.c.bf16 %v3352_v25, %v3352_v25 }
0x1123   : > { %v3355_v29 = vpack.c.bf16 %v3351_v28, %v3351_v28  ;;  %v3357_v30 = vpack.c.bf16 %v3353_v59, %v3353_v59 }
0x1125   : > { %3653 = vmatprep.mubr.bf16.mxu1 %v3355_v29  ;;  %3693 = vmatprep.mubr.bf16.mxu0 %v3357_v30 }
0x1126   : > { %3654 = vmatmul.mubr.bf16.vlgmr.msra.gmra.mrb[64].mxu1 %v3354_v31  ;;  %3694 = vmatmul.mubr.bf16.vlgmr.msra.gmra.mrb[40].mxu0 %v3356_v32 }
0x11f9   : > { %v4338_v33 = vpop.f32.mrb[64].mxu1  ;;  %v4360_v34 = vpop.f32.mrb[40].mxu0 }
0x11fa   : > { %v4339_v36 = vpop.f32.mrb[65].mxu1  ;;  %v4361_v37 = vpop.f32.mrb[41].mxu0 }
0x11fb   : > { %v4340_v38 = vadd.f32 %v4339_v36, %v4338_v33  ;;  %v4362_v39 = vadd.f32 %v4361_v37, %v4360_v34  ;;  %v4341_v40 = vpop.f32.mrb[66].mxu1  ;;  %v4363_v41 = vpop.f32.mrb[42].mxu0 }
0x11fc   : > { %v4342_v42 = vpop.f32.mrb[67].mxu1  ;;  %v4364_v43 = vpop.f32.mrb[43].mxu0 }
0x11fd   : > { %v3656_v44 = vadd.f32 %v4340_v38, %v4179_v0 }
0x11ff   : > { %v3696_v45 = vadd.f32 %v4362_v39, %v3656_v44 }
0x1201   : > { %v3701_v46 = vadd.f32 %v3696_v45, %v6749_v35  ;;  %v4213_v35 = vld [vmem:[%s6969_s17] ss:$0 sm:$0xff] }
0x1203   : > { %3702 = vadd.xlane.f32.xlu0 %v3701_v46 }
0x1290   : > { %v3703_v47 = vpop.xlane.xlu0 %3702 }
0x1291   : > { %v3704_v48 = vmul.f32 0.0078125, %v3703_v47 }
0x1293   : > { %v3705_v49 = vsub.f32 %v3701_v46, %v3704_v48 }
0x1295   : > { %v3706_v50 = vmul.f32 %v3705_v49, %v3705_v49 }
0x1297   : > { %3707 = vadd.xlane.f32.xlu0 %v3706_v50 }
0x1324   : > { %v3708_v51 = vpop.xlane.xlu0 %3707 }
0x1325   : > { %v3709_v52 = vmul.f32 0.0078125, %v3708_v51 }
0x1327   : > { %v3710_v53 = vadd.f32 1e-05, %v3709_v52 }
0x1329   : > { %5044 = vrsqrt.f32 %v3710_v53 }
0x1333   : > { %v5045_v54 = vpop.eup %5044 }
0x1334   : > { %v3712_v56 = vmul.f32 %v5045_v54, %v3705_v49 }
0x1336   : > { %v3720_v57 = vmul.f32 %v4212_v55, %v3712_v56 }
0x1338   : > { %v3728_v58 = vadd.f32 %v4213_v35, %v3720_v57 }
0x133a   : > { %3729 = vst [vmem:[%s1140_s23] sm:$0xff] %v3728_v58 }
0x133b   : > { %5623 = shalt.err (!%p5620_p6)
}
0x133c   : > { %s5624_s13 = scalar_lea.hbm %s6775_s4, 128  ;;  %s5628_s21 = scalar_lea.hbm %s6970_s1, 256 }
0x133d   : > { %p5625_p11 = scmp.ne.s32.totalorder %s6775_s4, %s5624_s13  ;;  %p5629_p12 = scmp.lt.u32.totalorder %s6775_s4, %s6970_s1 }
0x133e   : > { %p5630_p13 = scmp.lt.u32.totalorder %s5628_s21, %s5624_s13  ;;  %p5632_p3 = scmp.lt.u32.totalorder %s5624_s13, %s6775_s4 }
0x133f   : > { %p5626_p8 = pnand %p5625_p11, %p6971_p2 }
0x1340   : > { %p5631_p1 = por %p5630_p13, %p5629_p12 }
0x1341   : > { %p5627_p9 = pneg %p5626_p8 }
0x1342   : > { %p5633_p4 = por %p5632_p3, %p5631_p1 }
0x1344   : > { %p5634_p10 = pnand %p5633_p4, %p5627_p9 }
0x1346   : > { %5637 = shalt.err (!%p5634_p10)
}
0x1347   : > { %4698 = dma.vmem_to_hbm [thread:$0]  (%p6971_p2), %s6777_s0, 128, %s6775_s4, %s3731_s24  }
0x1348 PF: > { %s3756_s12 = sand.u32 1, %s5708_s8   ;;  %p6972_p5 = scmp.ne.s32.totalorder %s6936_s3, 0 }
0x1349   : > { %p6973_p7 = scmp.ge.s32.totalorder %s5720_s30, 2  ;;  %s3757_s23 = scalar_lea.sflag [#allocation4], %s3756_s12 }
0x134b   : > { %p4763_p0 = pnand %p6973_p7, %p6972_p5 }
0x134d   : > { %5703 = dma.done.wait (!%p4763_p0), %s3757_s23, 128  }
0x134e   : > { %5705 = vsyncadd (!%p4763_p0), %s3757_s23, 4294967168  ;;  %p53_p6 = scmp.ge.s32.totalorder %s6316_s11, 4   ;;  %s6974_s8 = smov %s5712_s5 }
0x134f   : > { %s6975_s5 = smov %s5716_s9  ;;  %s6976_s9 = smov %s6327_s18 }
0x1350   : > { %s6977_s30 = smov %s6316_s11  ;;  %55 = sbr.rel (!%p53_p6) target bundleno = 46 (0x2e), region = 262 }
0x1357   :  { %3762 = vsyncpa [#allocation3], 1 }
0x1358   :  { %3764 = vsyncpa [#allocation3 + $0x1], 1 }
0x1359   :  { %3765 = vsyncpa [#allocation6], 1 }
0x135a   :  { %3767 = vsyncpa [#allocation6 + $0x1], 1 }
0x135b   :  { %3768 = vsyncpa [#allocation9], 1 }
0x135c   :  { %3769 = vsyncpa [#allocation12], 1 }
0x135d   :  { %3770 = vsyncpa [#allocation15], 1 }
0x135e   :  { %3771 = vsyncpa [#allocation18], 1 }
0x135f   :  { %3772 = vsyncpa [#allocation21], 1 }
0x1360   :  { %3773 = vsyncpa [#allocation24], 1 }
0x1361   :  { %3774 = vsyncpa [#allocation27], 1 }
0x1362   :  { %3775 = vsyncpa [#allocation30], 1 }
0x1363   :  { %3776 = vsyncpa [#allocation33], 1 }
0x1364   :  { %3777 = vsyncpa [#allocation4], 1 }
0x1365   :  { %3779 = vsyncpa [#allocation4 + $0x1], 1 }

</bundles_post_ra>
